<compile_context>
chip_gen: v6e
topology: v6e:2x2x1
jax: 0.10.0
libtpu: 0.0.40
codegen_flags: <defaults>
</compile_context>

<pallas_src>
import math
import numpy as np

import jax
import jax.numpy as jnp
from jax import lax
from jax.experimental import pallas as pl
from jax.experimental.pallas import tpu as pltpu

# ----- module constants (from transformer.py) -----
D_MODEL = 24
SEQ_LEN = 90
UNIT_PCR = 0.001
FEATURE_NUM = 5                       # source has None; pick a small value (== K)
NUM_HEADS = 4                         # must divide D_MODEL
NUM_LAYERS = 2
D_FF = 4 * D_MODEL
D_K = D_MODEL // NUM_HEADS
OUT_CLASSES = 2 * int(0.1 / UNIT_PCR) + 1     # 201
OUT_PAD = 256                         # lane-dense padded output width (>= 201)
EPS = 1e-5                            # torch.nn.LayerNorm default
_SCALE = 1.0 / math.sqrt(float(D_K))


# ---------------------------------------------------------------------------
# Kernels
# ---------------------------------------------------------------------------
def _layer_norm(x, gamma, beta):
    mu = jnp.mean(x, axis=-1, keepdims=True)
    var = jnp.mean((x - mu) ** 2, axis=-1, keepdims=True)
    return (x - mu) * lax.rsqrt(var + EPS) * gamma + beta


def encoder_kernel(x_ref, pe_w_ref, pe_ref,
                   wq_ref, wk_ref, bq_ref, vo_ref,
                   w1_ref, b1_ref, w2_ref, vec_ref,
                   o_ref):
    """Per-sample forward: pos-embed + NUM_LAYERS encoder layers.

    Weight layouts (all resident in VMEM, constant index maps):
      wq_ref, wk_ref : (L, H, D, D_K)  bf16   (1/sqrt(d_k) folded into wq)
      bq_ref         : (L, H, 1, D_K)  f32    (scaled Q bias; K bias dropped)
      vo_ref         : (L, H, D, D)    bf16   (Wv_head @ Wo_rows_head merged)
      w1_ref         : (L, D, D_FF)    bf16
      b1_ref         : (L, 1, D_FF)    f32
      w2_ref         : (L, D_FF, D)    bf16
      vec_ref        : (L, 6, 1, D)    f32    [b_attn, g1, be1, b2, g2, be2]
    """
    f32 = jnp.float32
    bf16 = jnp.bfloat16

    # ---- position embedding: x(S,F) @ W(F,D) + (pe + bias) ----  (tiny, f32)
    h = (jnp.dot(x_ref[...], pe_w_ref[...], preferred_element_type=f32)
         + pe_ref[...])                                              # (S, D)

    for l in range(NUM_LAYERS):
        b_attn = vec_ref[l, 0]
        g1, be1 = vec_ref[l, 1], vec_ref[l, 2]
        b2, g2, be2 = vec_ref[l, 3], vec_ref[l, 4], vec_ref[l, 5]

        h_bf = h.astype(bf16)                                        # matmul LHS

        # ---- multi-head attention (head-major weights, no slicing) ----
        attn = jnp.zeros((SEQ_LEN, D_MODEL), f32)
        for hd in range(NUM_HEADS):
            # scaled Q (scale folded into weights/bias), K without bias
            q = (jnp.dot(h_bf, wq_ref[l, hd], preferred_element_type=f32)
                 + bq_ref[l, hd])                                    # (S, dk)
            k = jnp.dot(h_bf, wk_ref[l, hd], preferred_element_type=f32)
            # merged V @ Wo projection for this head
            u = jnp.dot(h_bf, vo_ref[l, hd], preferred_element_type=f32)  # (S, D)

            # scores: contract the d_k axis of both (transposed-RHS dot)
            s = lax.dot_general(q, k, (((1,), (1,)), ((), ())),
                                preferred_element_type=f32)          # (S, S)
            m = jnp.max(s, axis=-1, keepdims=True)
            p = jnp.exp(s - m)
            denom = jnp.sum(p, axis=-1, keepdims=True)

            pv = jnp.dot(p.astype(bf16), u.astype(bf16),
                         preferred_element_type=f32)                 # (S, D)
            # normalise AFTER the matmul (on (S,D), not (S,S)); EUP reciprocal
            attn = attn + pv * pl.reciprocal(denom, approx=True)
        attn = attn + b_attn                                         # bo + bv@Wo

        # ---- residual + LayerNorm 1 (dropout == identity) ----
        h1 = _layer_norm(h + attn, g1, be1)

        # ---- feed-forward: Linear(D,4D) -> ReLU -> Linear(4D,D) ----
        h1_bf = h1.astype(bf16)
        ff = jnp.maximum(
            jnp.dot(h1_bf, w1_ref[l], preferred_element_type=f32) + b1_ref[l],
            0.0)
        ff = jnp.dot(ff.astype(bf16), w2_ref[l], preferred_element_type=f32) + b2

        # ---- residual + LayerNorm 2 ----
        h = _layer_norm(h1 + ff, g2, be2)

    o_ref[...] = h.astype(o_ref.dtype)


def output_kernel(x_ref, w_ref, b_ref, o_ref):
    # x_ref: (B, S*D) bf16, w_ref: (S*D, OUT_PAD) bf16, b_ref: (1, OUT_PAD) f32
    o_ref[...] = (jnp.dot(x_ref[...], w_ref[...],
                          preferred_element_type=jnp.float32) + b_ref[...])


# ---------------------------------------------------------------------------
# Wrappers (pallas_call plumbing)
# ---------------------------------------------------------------------------
def _const_spec(a):
    nd = a.ndim
    return pl.BlockSpec(a.shape, lambda b, _nd=nd: (0,) * _nd)


def encode(x, kp):
    """Fused pos-embed + all encoder layers: one pallas_call, grid=(B,)."""
    B, S, F = x.shape
    weights = (kp['pe_w'], kp['pe'], kp['wq'], kp['wk'], kp['bq'], kp['vo'],
               kp['w1'], kp['b1'], kp['w2'], kp['vec'])
    in_specs = [pl.BlockSpec((None, S, F), lambda b: (b, 0, 0))]
    in_specs += [_const_spec(w) for w in weights]
    return pl.pallas_call(
        encoder_kernel,
        out_shape=jax.ShapeDtypeStruct((B, S, D_MODEL), jnp.bfloat16),
        grid=(B,),
        in_specs=in_specs,
        out_specs=pl.BlockSpec((None, S, D_MODEL), lambda b: (b, 0, 0)),
        compiler_params=pltpu.CompilerParams(
            dimension_semantics=("parallel",)),
    )(x, *weights)


def final_projection(h_flat, w_pad, b_pad):
    B, M = h_flat.shape
    N = w_pad.shape[1]
    return pl.pallas_call(
        output_kernel,
        out_shape=jax.ShapeDtypeStruct((B, N), jnp.float32),
        grid=(1,),
        in_specs=[pl.BlockSpec((B, M), lambda i: (0, 0)),
                  pl.BlockSpec((M, N), lambda i: (0, 0)),
                  pl.BlockSpec((1, N), lambda i: (0, 0))],
        out_specs=pl.BlockSpec((B, N), lambda i: (0, 0)),
    )(h_flat, w_pad, b_pad)


def transformer_forward(x, kp):
    h = encode(x, kp)                           # (B, S, D) bf16
    B = h.shape[0]
    h_flat = h.reshape(B, SEQ_LEN * D_MODEL)    # contiguous -> free bitcast
    out = final_projection(h_flat, kp['out_w'], kp['out_b'])
    return out[:, :OUT_CLASSES]                 # drop the lane padding


# ---------------------------------------------------------------------------
# Deterministic parameter init & positional encoding
# ---------------------------------------------------------------------------
def _round_bf16(w):
    # Keep f32 dtype but snap matmul weights to bf16-representable values so
    # the f32 reference and the bf16 kernel path share the same weights.
    return w.astype(jnp.bfloat16).astype(jnp.float32)


def init_linear(key, fan_in, fan_out):
    kw, kb = jax.random.split(key)
    bound = 1.0 / math.sqrt(fan_in)
    w = jax.random.uniform(kw, (fan_in, fan_out), jnp.float32, -bound, bound)
    b = jax.random.uniform(kb, (1, fan_out), jnp.float32, -bound, bound)
    return _round_bf16(w), b


def make_positional_encoding():
    position = np.arange(SEQ_LEN, dtype=np.float32)[:, None]
    div_term = np.exp(np.arange(0, D_MODEL, 2, dtype=np.float32)
                      * (-math.log(1000.0) / D_MODEL))
    pe = np.zeros((SEQ_LEN, D_MODEL), dtype=np.float32)
    pe[:, 0::2] = np.sin(position * div_term)
    pe[:, 1::2] = np.cos(position * div_term)
    return jnp.asarray(pe)


def init_params(key):
    keys = jax.random.split(key, 2 + NUM_LAYERS)
    pe = make_positional_encoding()
    pe_w, pe_b = init_linear(keys[0], FEATURE_NUM, D_MODEL)

    raw = {name: [] for name in
           ['wq', 'bq', 'wk', 'bk', 'wv', 'bv', 'wo', 'bo',
            'w1', 'b1', 'w2', 'b2', 'g1', 'be1', 'g2', 'be2']}
    k_wq, k_wk, k_bq, k_vo, k_vec = [], [], [], [], []
    k_w1, k_b1, k_w2 = [], [], []

    for l in range(NUM_LAYERS):
        lk = jax.random.split(keys[1 + l], 6)
        wq, bq = init_linear(lk[0], D_MODEL, D_MODEL)
        wk, bk = init_linear(lk[1], D_MODEL, D_MODEL)
        wv, bv = init_linear(lk[2], D_MODEL, D_MODEL)
        wo, bo = init_linear(lk[3], D_MODEL, D_MODEL)
        w1, b1 = init_linear(lk[4], D_MODEL, D_FF)
        w2, b2 = init_linear(lk[5], D_FF, D_MODEL)
        g1 = jnp.ones((1, D_MODEL), jnp.float32)
        be1 = jnp.zeros((1, D_MODEL), jnp.float32)
        g2 = jnp.ones((1, D_MODEL), jnp.float32)
        be2 = jnp.zeros((1, D_MODEL), jnp.float32)

        for name, v in [('wq', wq), ('bq', bq), ('wk', wk), ('bk', bk),
                        ('wv', wv), ('bv', bv), ('wo', wo), ('bo', bo),
                        ('w1', w1), ('b1', b1), ('w2', w2), ('b2', b2),
                        ('g1', g1), ('be1', be1), ('g2', g2), ('be2', be2)]:
            raw[name].append(v)

        # --- kernel-transformed, head-major weights ---
        wq_h, wk_h, bq_h, vo_h = [], [], [], []
        for hd in range(NUM_HEADS):
            sl = slice(hd * D_K, (hd + 1) * D_K)
            wq_h.append(wq[:, sl] * _SCALE)          # scale folded into Q
            bq_h.append(bq[:, sl] * _SCALE)          # (1, D_K)
            wk_h.append(wk[:, sl])                   # K bias dropped (softmax inv.)
            vo_h.append(wv[:, sl] @ wo[sl, :])       # merged V @ Wo (D, D)
        k_wq.append(jnp.stack(wq_h))                 # (H, D, D_K)
        k_wk.append(jnp.stack(wk_h))
        k_bq.append(jnp.stack(bq_h))                 # (H, 1, D_K)
        k_vo.append(jnp.stack(vo_h))                 # (H, D, D)
        b_attn = bv @ wo + bo                        # (1, D): bv passes softmax
        k_vec.append(jnp.stack([b_attn, g1, be1, b2, g2, be2]))   # (6, 1, D)
        k_w1.append(w1); k_b1.append(b1); k_w2.append(w2)

    out_w, out_b = init_linear(keys[1 + NUM_LAYERS],
                               SEQ_LEN * D_MODEL, OUT_CLASSES)
    pad = OUT_PAD - OUT_CLASSES

    kparams = {
        'pe_w': pe_w,                                       # f32 (tiny matmul)
        'pe': pe + pe_b,                                    # bias folded into pe
        'wq': jnp.stack(k_wq).astype(jnp.bfloat16),         # (L,H,D,DK)
        'wk': jnp.stack(k_wk).astype(jnp.bfloat16),
        'bq': jnp.stack(k_bq),                              # (L,H,1,DK) f32
        'vo': jnp.stack(k_vo).astype(jnp.bfloat16),         # (L,H,D,D)
        'w1': jnp.stack(k_w1).astype(jnp.bfloat16),         # (L,D,DFF)
        'b1': jnp.stack(k_b1),                              # (L,1,DFF) f32
        'w2': jnp.stack(k_w2).astype(jnp.bfloat16),         # (L,DFF,D)
        'vec': jnp.stack(k_vec),                            # (L,6,1,D) f32
        'out_w': jnp.pad(out_w, ((0, 0), (0, pad))).astype(jnp.bfloat16),
        'out_b': jnp.pad(out_b, ((0, 0), (0, pad))),        # f32
    }
    rparams = {'pe': pe, 'pe_w': pe_w, 'pe_b': pe_b,
               'out_w': out_w, 'out_b': out_b}
    for name, vals in raw.items():
        rparams[name] = jnp.stack(vals)
    return kparams, rparams


# ---------------------------------------------------------------------------
# Pure-JAX reference (mirrors the torch module math, f32 'highest' precision)
# ---------------------------------------------------------------------------
def reference_forward(x, rp):
    def dot(a, b):
        return jnp.dot(a, b, precision='highest',
                       preferred_element_type=jnp.float32)

    def ln(z, g, b):
        mu = jnp.mean(z, -1, keepdims=True)
        var = jnp.mean((z - mu) ** 2, -1, keepdims=True)
        return (z - mu) / jnp.sqrt(var + EPS) * g + b

    h = dot(x, rp['pe_w']) + rp['pe_b'] + rp['pe'][None]
    B, S, D = h.shape

    def split(t):
        return t.reshape(B, S, NUM_HEADS, D_K).transpose(0, 2, 1, 3)

    for l in range(NUM_LAYERS):
        Q = dot(h, rp['wq'][l]) + rp['bq'][l]
        K = dot(h, rp['wk'][l]) + rp['bk'][l]
        V = dot(h, rp['wv'][l]) + rp['bv'][l]
        Qh, Kh, Vh = split(Q), split(K), split(V)
        scores = jnp.einsum('bhsd,bhtd->bhst', Qh, Kh,
                            precision='highest') / math.sqrt(D_K)
        prob = jax.nn.softmax(scores, axis=-1)
        attn = jnp.einsum('bhst,bhtd->bhsd', prob, Vh, precision='highest')
        attn = attn.transpose(0, 2, 1, 3).reshape(B, S, D)
        attn_out = dot(attn, rp['wo'][l]) + rp['bo'][l]

        h1 = ln(h + attn_out, rp['g1'][l], rp['be1'][l])
        ff = jnp.maximum(dot(h1, rp['w1'][l]) + rp['b1'][l], 0.0)
        ff = dot(ff, rp['w2'][l]) + rp['b2'][l]
        h = ln(h1 + ff, rp['g2'][l], rp['be2'][l])

    out = dot(h.reshape(B, -1), rp['out_w']) + rp['out_b']
    return out


# ---------------------------------------------------------------------------
if __name__ == "__main__":
    key = jax.random.PRNGKey(0)
    kx, kp = jax.random.split(key)

    B = 2
    x = jax.random.normal(kx, (B, SEQ_LEN, FEATURE_NUM), jnp.float32)
    kparams, rparams = init_params(kp)

    fwd = jax.jit(transformer_forward)
    out = jax.block_until_ready(fwd(x, kparams))

    assert out.shape == (B, OUT_CLASSES), out.shape
    assert bool(jnp.all(jnp.isfinite(out)))

    ref = reference_forward(x, rparams)
    np.testing.assert_allclose(np.asarray(out), np.asarray(ref),
                               rtol=5e-2, atol=5e-2)

    print("KERNEL_OK")
</pallas_src>

<mosaic_0001>
module attributes {stable_mosaic.version = 11 : i64} {
  func.func @output_kernel(%arg0: i32, %arg1: memref<2x2160xbf16, #tpu.memory_space<vmem>>, %arg2: memref<2160x256xbf16, #tpu.memory_space<vmem>>, %arg3: memref<1x256xf32, #tpu.memory_space<vmem>>, %arg4: memref<2x256xf32, #tpu.memory_space<vmem>>) attributes {dimension_semantics = [#tpu.dimension_semantics<arbitrary>], iteration_bounds = array<i64: 1>, scalar_prefetch = 0 : i64, scratch_operands = 0 : i64, tpu.core_type = #tpu.core_type<tc>, window_params = [{pipeline_mode = #tpu.pipeline_mode<synchronous>, transform_indices = @transform_0, window_bounds = array<i64: 2, 2160>}, {pipeline_mode = #tpu.pipeline_mode<synchronous>, transform_indices = @transform_1, window_bounds = array<i64: 2160, 256>}, {pipeline_mode = #tpu.pipeline_mode<synchronous>, transform_indices = @transform_2, window_bounds = array<i64: 1, 256>}, {pipeline_mode = #tpu.pipeline_mode<synchronous>, transform_indices = @transform_3, window_bounds = array<i64: 2, 256>}]} {
    %c0 = arith.constant 0 : index
    %c0_0 = arith.constant 0 : index
    %0 = vector.load %arg1[%c0, %c0_0] : memref<2x2160xbf16, #tpu.memory_space<vmem>>, vector<2x2160xbf16>
    %c0_1 = arith.constant 0 : index
    %c0_2 = arith.constant 0 : index
    %1 = vector.load %arg2[%c0_1, %c0_2] : memref<2160x256xbf16, #tpu.memory_space<vmem>>, vector<2160x256xbf16>
    %cst = arith.constant dense<0.000000e+00> : vector<2x256xf32>
    %2 = tpu.matmul %0, %1, %cst {dimension_numbers = #tpu.dot_dimension_numbers<[1], [0], [0], [1], [0, 0, 1, 1], [], []>} : vector<2x2160xbf16>, vector<2160x256xbf16>, vector<2x256xf32> -> vector<2x256xf32>
    %c0_3 = arith.constant 0 : index
    %c0_4 = arith.constant 0 : index
    %3 = vector.load %arg3[%c0_3, %c0_4] : memref<1x256xf32, #tpu.memory_space<vmem>>, vector<1x256xf32>
    %4 = vector.broadcast %3 : vector<1x256xf32> to vector<2x256xf32>
    %5 = arith.addf %2, %4 : vector<2x256xf32>
    %c0_5 = arith.constant 0 : index
    %c0_6 = arith.constant 0 : index
    %6 = vector.load %arg4[%c0_5, %c0_6] : memref<2x256xf32, #tpu.memory_space<vmem>>, vector<2x256xf32>
    tpu.vector_store %arg4[%c0_5, %c0_6], %5 {strides = array<i32>} : memref<2x256xf32, #tpu.memory_space<vmem>>, vector<2x256xf32>,
    return
  }
  func.func @transform_0(%arg0: i32) -> (i32, i32) {
    %c0_i32 = arith.constant 0 : i32
    %c0_i32_0 = arith.constant 0 : i32
    %c0_i32_1 = arith.constant 0 : i32
    return %c0_i32, %c0_i32_0 : i32, i32
  }
  func.func @transform_1(%arg0: i32) -> (i32, i32) {
    %c0_i32 = arith.constant 0 : i32
    %c0_i32_0 = arith.constant 0 : i32
    %c0_i32_1 = arith.constant 0 : i32
    return %c0_i32, %c0_i32_0 : i32, i32
  }
  func.func @transform_2(%arg0: i32) -> (i32, i32) {
    %c0_i32 = arith.constant 0 : i32
    %c0_i32_0 = arith.constant 0 : i32
    %c0_i32_1 = arith.constant 0 : i32
    return %c0_i32, %c0_i32_0 : i32, i32
  }
  func.func @transform_3(%arg0: i32) -> (i32, i32) {
    %c0_i32 = arith.constant 0 : i32
    %c0_i32_0 = arith.constant 0 : i32
    %c0_i32_1 = arith.constant 0 : i32
    return %c0_i32, %c0_i32_0 : i32, i32
  }
}

module attributes {stable_mosaic.version = 11 : i64} {
  func.func @encoder_kernel(%arg0: i32, %arg1: memref<1x90x5xf32, #tpu.memory_space<vmem>>, %arg2: memref<5x24xf32, #tpu.memory_space<vmem>>, %arg3: memref<90x24xf32, #tpu.memory_space<vmem>>, %arg4: memref<2x4x24x6xbf16, #tpu.memory_space<vmem>>, %arg5: memref<2x4x24x6xbf16, #tpu.memory_space<vmem>>, %arg6: memref<2x4x1x6xf32, #tpu.memory_space<vmem>>, %arg7: memref<2x4x24x24xbf16, #tpu.memory_space<vmem>>, %arg8: memref<2x24x96xbf16, #tpu.memory_space<vmem>>, %arg9: memref<2x1x96xf32, #tpu.memory_space<vmem>>, %arg10: memref<2x96x24xbf16, #tpu.memory_space<vmem>>, %arg11: memref<2x6x1x24xf32, #tpu.memory_space<vmem>>, %arg12: memref<1x90x24xbf16, #tpu.memory_space<vmem>>) attributes {dimension_semantics = [#tpu.dimension_semantics<parallel>], iteration_bounds = array<i64: 2>, scalar_prefetch = 0 : i64, scratch_operands = 0 : i64, tpu.core_type = #tpu.core_type<tc>, window_params = [{transform_indices = @transform_0, window_bounds = array<i64: 1, 90, 5>}, {pipeline_mode = #tpu.pipeline_mode<synchronous>, transform_indices = @transform_1, window_bounds = array<i64: 5, 24>}, {pipeline_mode = #tpu.pipeline_mode<synchronous>, transform_indices = @transform_2, window_bounds = array<i64: 90, 24>}, {pipeline_mode = #tpu.pipeline_mode<synchronous>, transform_indices = @transform_3, window_bounds = array<i64: 2, 4, 24, 6>}, {pipeline_mode = #tpu.pipeline_mode<synchronous>, transform_indices = @transform_4, window_bounds = array<i64: 2, 4, 24, 6>}, {pipeline_mode = #tpu.pipeline_mode<synchronous>, transform_indices = @transform_5, window_bounds = array<i64: 2, 4, 1, 6>}, {pipeline_mode = #tpu.pipeline_mode<synchronous>, transform_indices = @transform_6, window_bounds = array<i64: 2, 4, 24, 24>}, {pipeline_mode = #tpu.pipeline_mode<synchronous>, transform_indices = @transform_7, window_bounds = array<i64: 2, 24, 96>}, {pipeline_mode = #tpu.pipeline_mode<synchronous>, transform_indices = @transform_8, window_bounds = array<i64: 2, 1, 96>}, {pipeline_mode = #tpu.pipeline_mode<synchronous>, transform_indices = @transform_9, window_bounds = array<i64: 2, 96, 24>}, {pipeline_mode = #tpu.pipeline_mode<synchronous>, transform_indices = @transform_10, window_bounds = array<i64: 2, 6, 1, 24>}, {transform_indices = @transform_11, window_bounds = array<i64: 1, 90, 24>}]} {
    %c0 = arith.constant 0 : index
    %c0_0 = arith.constant 0 : index
    %c0_1 = arith.constant 0 : index
    %0 = vector.load %arg1[%c0, %c0_0, %c0_1] : memref<1x90x5xf32, #tpu.memory_space<vmem>>, vector<1x90x5xf32>
    %1 = vector.shape_cast %0 : vector<1x90x5xf32> to vector<90x5xf32>
    %c0_2 = arith.constant 0 : index
    %c0_3 = arith.constant 0 : index
    %2 = vector.load %arg2[%c0_2, %c0_3] : memref<5x24xf32, #tpu.memory_space<vmem>>, vector<5x24xf32>
    %cst = arith.constant dense<0.000000e+00> : vector<90x24xf32>
    %3 = tpu.matmul %1, %2, %cst {dimension_numbers = #tpu.dot_dimension_numbers<[1], [0], [0], [1], [0, 0, 1, 1], [], []>} : vector<90x5xf32>, vector<5x24xf32>, vector<90x24xf32> -> vector<90x24xf32>
    %c0_4 = arith.constant 0 : index
    %c0_5 = arith.constant 0 : index
    %4 = vector.load %arg3[%c0_4, %c0_5] : memref<90x24xf32, #tpu.memory_space<vmem>>, vector<90x24xf32>
    %5 = arith.addf %3, %4 : vector<90x24xf32>
    %c0_6 = arith.constant 0 : index
    %c0_7 = arith.constant 0 : index
    %c0_8 = arith.constant 0 : index
    %c0_9 = arith.constant 0 : index
    %6 = vector.load %arg11[%c0_6, %c0_7, %c0_8, %c0_9] : memref<2x6x1x24xf32, #tpu.memory_space<vmem>>, vector<1x1x1x24xf32>
    %7 = vector.shape_cast %6 : vector<1x1x1x24xf32> to vector<1x24xf32>
    %c0_10 = arith.constant 0 : index
    %c1 = arith.constant 1 : index
    %c0_11 = arith.constant 0 : index
    %c0_12 = arith.constant 0 : index
    %8 = vector.load %arg11[%c0_10, %c1, %c0_11, %c0_12] : memref<2x6x1x24xf32, #tpu.memory_space<vmem>>, vector<1x1x1x24xf32>
    %9 = vector.shape_cast %8 : vector<1x1x1x24xf32> to vector<1x24xf32>
    %c0_13 = arith.constant 0 : index
    %c2 = arith.constant 2 : index
    %c0_14 = arith.constant 0 : index
    %c0_15 = arith.constant 0 : index
    %10 = vector.load %arg11[%c0_13, %c2, %c0_14, %c0_15] : memref<2x6x1x24xf32, #tpu.memory_space<vmem>>, vector<1x1x1x24xf32>
    %11 = vector.shape_cast %10 : vector<1x1x1x24xf32> to vector<1x24xf32>
    %c0_16 = arith.constant 0 : index
    %c3 = arith.constant 3 : index
    %c0_17 = arith.constant 0 : index
    %c0_18 = arith.constant 0 : index
    %12 = vector.load %arg11[%c0_16, %c3, %c0_17, %c0_18] : memref<2x6x1x24xf32, #tpu.memory_space<vmem>>, vector<1x1x1x24xf32>
    %13 = vector.shape_cast %12 : vector<1x1x1x24xf32> to vector<1x24xf32>
    %c0_19 = arith.constant 0 : index
    %c4 = arith.constant 4 : index
    %c0_20 = arith.constant 0 : index
    %c0_21 = arith.constant 0 : index
    %14 = vector.load %arg11[%c0_19, %c4, %c0_20, %c0_21] : memref<2x6x1x24xf32, #tpu.memory_space<vmem>>, vector<1x1x1x24xf32>
    %15 = vector.shape_cast %14 : vector<1x1x1x24xf32> to vector<1x24xf32>
    %c0_22 = arith.constant 0 : index
    %c5 = arith.constant 5 : index
    %c0_23 = arith.constant 0 : index
    %c0_24 = arith.constant 0 : index
    %16 = vector.load %arg11[%c0_22, %c5, %c0_23, %c0_24] : memref<2x6x1x24xf32, #tpu.memory_space<vmem>>, vector<1x1x1x24xf32>
    %17 = vector.shape_cast %16 : vector<1x1x1x24xf32> to vector<1x24xf32>
    %18 = arith.truncf %5 : vector<90x24xf32> to vector<90x24xbf16>
    %cst_25 = arith.constant 0.000000e+00 : f32
    %19 = vector.broadcast %cst_25 : f32 to vector<90x24xf32>
    %c0_26 = arith.constant 0 : index
    %c0_27 = arith.constant 0 : index
    %c0_28 = arith.constant 0 : index
    %c0_29 = arith.constant 0 : index
    %20 = vector.load %arg4[%c0_26, %c0_27, %c0_28, %c0_29] : memref<2x4x24x6xbf16, #tpu.memory_space<vmem>>, vector<1x1x24x6xbf16>
    %21 = vector.shape_cast %20 : vector<1x1x24x6xbf16> to vector<24x6xbf16>
    %cst_30 = arith.constant dense<0.000000e+00> : vector<90x6xf32>
    %22 = tpu.matmul %18, %21, %cst_30 {dimension_numbers = #tpu.dot_dimension_numbers<[1], [0], [0], [1], [0, 0, 1, 1], [], []>} : vector<90x24xbf16>, vector<24x6xbf16>, vector<90x6xf32> -> vector<90x6xf32>
    %c0_31 = arith.constant 0 : index
    %c0_32 = arith.constant 0 : index
    %c0_33 = arith.constant 0 : index
    %c0_34 = arith.constant 0 : index
    %23 = vector.load %arg6[%c0_31, %c0_32, %c0_33, %c0_34] : memref<2x4x1x6xf32, #tpu.memory_space<vmem>>, vector<1x1x1x6xf32>
    %24 = vector.shape_cast %23 : vector<1x1x1x6xf32> to vector<1x6xf32>
    %25 = vector.broadcast %24 : vector<1x6xf32> to vector<90x6xf32>
    %26 = arith.addf %22, %25 : vector<90x6xf32>
    %c0_35 = arith.constant 0 : index
    %c0_36 = arith.constant 0 : index
    %c0_37 = arith.constant 0 : index
    %c0_38 = arith.constant 0 : index
    %27 = vector.load %arg5[%c0_35, %c0_36, %c0_37, %c0_38] : memref<2x4x24x6xbf16, #tpu.memory_space<vmem>>, vector<1x1x24x6xbf16>
    %28 = vector.shape_cast %27 : vector<1x1x24x6xbf16> to vector<24x6xbf16>
    %cst_39 = arith.constant dense<0.000000e+00> : vector<90x6xf32>
    %29 = tpu.matmul %18, %28, %cst_39 {dimension_numbers = #tpu.dot_dimension_numbers<[1], [0], [0], [1], [0, 0, 1, 1], [], []>} : vector<90x24xbf16>, vector<24x6xbf16>, vector<90x6xf32> -> vector<90x6xf32>
    %c0_40 = arith.constant 0 : index
    %c0_41 = arith.constant 0 : index
    %c0_42 = arith.constant 0 : index
    %c0_43 = arith.constant 0 : index
    %30 = vector.load %arg7[%c0_40, %c0_41, %c0_42, %c0_43] : memref<2x4x24x24xbf16, #tpu.memory_space<vmem>>, vector<1x1x24x24xbf16>
    %31 = vector.shape_cast %30 : vector<1x1x24x24xbf16> to vector<24x24xbf16>
    %cst_44 = arith.constant dense<0.000000e+00> : vector<90x24xf32>
    %32 = tpu.matmul %18, %31, %cst_44 {dimension_numbers = #tpu.dot_dimension_numbers<[1], [0], [0], [1], [0, 0, 1, 1], [], []>} : vector<90x24xbf16>, vector<24x24xbf16>, vector<90x24xf32> -> vector<90x24xf32>
    %cst_45 = arith.constant dense<0.000000e+00> : vector<90x90xf32>
    %33 = tpu.matmul %26, %29, %cst_45 {dimension_numbers = #tpu.dot_dimension_numbers<[1], [1], [0], [0], [0, 0, 1, 0], [], []>} : vector<90x6xf32>, vector<90x6xf32>, vector<90x90xf32> -> vector<90x90xf32>
    %cst_46 = arith.constant dense<0xFF800000> : vector<90xf32>
    %34 = vector.multi_reduction <maximumf>, %33, %cst_46 [1] : vector<90x90xf32> to vector<90xf32>
    %35 = vector.shape_cast %34 : vector<90xf32> to vector<90x1xf32>
    %36 = vector.broadcast %35 : vector<90x1xf32> to vector<90x90xf32>
    %37 = arith.subf %33, %36 : vector<90x90xf32>
    %38 = math.exp %37 : vector<90x90xf32>
    %cst_47 = arith.constant dense<0.000000e+00> : vector<90xf32>
    %39 = vector.multi_reduction <add>, %38, %cst_47 [1] : vector<90x90xf32> to vector<90xf32>
    %40 = vector.shape_cast %39 : vector<90xf32> to vector<90x1xf32>
    %41 = arith.truncf %38 : vector<90x90xf32> to vector<90x90xbf16>
    %42 = arith.truncf %32 : vector<90x24xf32> to vector<90x24xbf16>
    %cst_48 = arith.constant dense<0.000000e+00> : vector<90x24xf32>
    %43 = tpu.matmul %41, %42, %cst_48 {dimension_numbers = #tpu.dot_dimension_numbers<[1], [0], [0], [1], [0, 0, 1, 1], [], []>} : vector<90x90xbf16>, vector<90x24xbf16>, vector<90x24xf32> -> vector<90x24xf32>
    %44 = tpu.reciprocal %40 {approx = true} : vector<90x1xf32> -> vector<90x1xf32>
    %45 = vector.broadcast %44 : vector<90x1xf32> to vector<90x24xf32>
    %46 = arith.mulf %43, %45 : vector<90x24xf32>
    %47 = arith.addf %19, %46 : vector<90x24xf32>
    %c0_49 = arith.constant 0 : index
    %c1_50 = arith.constant 1 : index
    %c0_51 = arith.constant 0 : index
    %c0_52 = arith.constant 0 : index
    %48 = vector.load %arg4[%c0_49, %c1_50, %c0_51, %c0_52] : memref<2x4x24x6xbf16, #tpu.memory_space<vmem>>, vector<1x1x24x6xbf16>
    %49 = vector.shape_cast %48 : vector<1x1x24x6xbf16> to vector<24x6xbf16>
    %cst_53 = arith.constant dense<0.000000e+00> : vector<90x6xf32>
    %50 = tpu.matmul %18, %49, %cst_53 {dimension_numbers = #tpu.dot_dimension_numbers<[1], [0], [0], [1], [0, 0, 1, 1], [], []>} : vector<90x24xbf16>, vector<24x6xbf16>, vector<90x6xf32> -> vector<90x6xf32>
    %c0_54 = arith.constant 0 : index
    %c1_55 = arith.constant 1 : index
    %c0_56 = arith.constant 0 : index
    %c0_57 = arith.constant 0 : index
    %51 = vector.load %arg6[%c0_54, %c1_55, %c0_56, %c0_57] : memref<2x4x1x6xf32, #tpu.memory_space<vmem>>, vector<1x1x1x6xf32>
    %52 = vector.shape_cast %51 : vector<1x1x1x6xf32> to vector<1x6xf32>
    %53 = vector.broadcast %52 : vector<1x6xf32> to vector<90x6xf32>
    %54 = arith.addf %50, %53 : vector<90x6xf32>
    %c0_58 = arith.constant 0 : index
    %c1_59 = arith.constant 1 : index
    %c0_60 = arith.constant 0 : index
    %c0_61 = arith.constant 0 : index
    %55 = vector.load %arg5[%c0_58, %c1_59, %c0_60, %c0_61] : memref<2x4x24x6xbf16, #tpu.memory_space<vmem>>, vector<1x1x24x6xbf16>
    %56 = vector.shape_cast %55 : vector<1x1x24x6xbf16> to vector<24x6xbf16>
    %cst_62 = arith.constant dense<0.000000e+00> : vector<90x6xf32>
    %57 = tpu.matmul %18, %56, %cst_62 {dimension_numbers = #tpu.dot_dimension_numbers<[1], [0], [0], [1], [0, 0, 1, 1], [], []>} : vector<90x24xbf16>, vector<24x6xbf16>, vector<90x6xf32> -> vector<90x6xf32>
    %c0_63 = arith.constant 0 : index
    %c1_64 = arith.constant 1 : index
    %c0_65 = arith.constant 0 : index
    %c0_66 = arith.constant 0 : index
    %58 = vector.load %arg7[%c0_63, %c1_64, %c0_65, %c0_66] : memref<2x4x24x24xbf16, #tpu.memory_space<vmem>>, vector<1x1x24x24xbf16>
    %59 = vector.shape_cast %58 : vector<1x1x24x24xbf16> to vector<24x24xbf16>
    %cst_67 = arith.constant dense<0.000000e+00> : vector<90x24xf32>
    %60 = tpu.matmul %18, %59, %cst_67 {dimension_numbers = #tpu.dot_dimension_numbers<[1], [0], [0], [1], [0, 0, 1, 1], [], []>} : vector<90x24xbf16>, vector<24x24xbf16>, vector<90x24xf32> -> vector<90x24xf32>
    %cst_68 = arith.constant dense<0.000000e+00> : vector<90x90xf32>
    %61 = tpu.matmul %54, %57, %cst_68 {dimension_numbers = #tpu.dot_dimension_numbers<[1], [1], [0], [0], [0, 0, 1, 0], [], []>} : vector<90x6xf32>, vector<90x6xf32>, vector<90x90xf32> -> vector<90x90xf32>
    %cst_69 = arith.constant dense<0xFF800000> : vector<90xf32>
    %62 = vector.multi_reduction <maximumf>, %61, %cst_69 [1] : vector<90x90xf32> to vector<90xf32>
    %63 = vector.shape_cast %62 : vector<90xf32> to vector<90x1xf32>
    %64 = vector.broadcast %63 : vector<90x1xf32> to vector<90x90xf32>
    %65 = arith.subf %61, %64 : vector<90x90xf32>
    %66 = math.exp %65 : vector<90x90xf32>
    %cst_70 = arith.constant dense<0.000000e+00> : vector<90xf32>
    %67 = vector.multi_reduction <add>, %66, %cst_70 [1] : vector<90x90xf32> to vector<90xf32>
    %68 = vector.shape_cast %67 : vector<90xf32> to vector<90x1xf32>
    %69 = arith.truncf %66 : vector<90x90xf32> to vector<90x90xbf16>
    %70 = arith.truncf %60 : vector<90x24xf32> to vector<90x24xbf16>
    %cst_71 = arith.constant dense<0.000000e+00> : vector<90x24xf32>
    %71 = tpu.matmul %69, %70, %cst_71 {dimension_numbers = #tpu.dot_dimension_numbers<[1], [0], [0], [1], [0, 0, 1, 1], [], []>} : vector<90x90xbf16>, vector<90x24xbf16>, vector<90x24xf32> -> vector<90x24xf32>
    %72 = tpu.reciprocal %68 {approx = true} : vector<90x1xf32> -> vector<90x1xf32>
    %73 = vector.broadcast %72 : vector<90x1xf32> to vector<90x24xf32>
    %74 = arith.mulf %71, %73 : vector<90x24xf32>
    %75 = arith.addf %47, %74 : vector<90x24xf32>
    %c0_72 = arith.constant 0 : index
    %c2_73 = arith.constant 2 : index
    %c0_74 = arith.constant 0 : index
    %c0_75 = arith.constant 0 : index
    %76 = vector.load %arg4[%c0_72, %c2_73, %c0_74, %c0_75] : memref<2x4x24x6xbf16, #tpu.memory_space<vmem>>, vector<1x1x24x6xbf16>
    %77 = vector.shape_cast %76 : vector<1x1x24x6xbf16> to vector<24x6xbf16>
    %cst_76 = arith.constant dense<0.000000e+00> : vector<90x6xf32>
    %78 = tpu.matmul %18, %77, %cst_76 {dimension_numbers = #tpu.dot_dimension_numbers<[1], [0], [0], [1], [0, 0, 1, 1], [], []>} : vector<90x24xbf16>, vector<24x6xbf16>, vector<90x6xf32> -> vector<90x6xf32>
    %c0_77 = arith.constant 0 : index
    %c2_78 = arith.constant 2 : index
    %c0_79 = arith.constant 0 : index
    %c0_80 = arith.constant 0 : index
    %79 = vector.load %arg6[%c0_77, %c2_78, %c0_79, %c0_80] : memref<2x4x1x6xf32, #tpu.memory_space<vmem>>, vector<1x1x1x6xf32>
    %80 = vector.shape_cast %79 : vector<1x1x1x6xf32> to vector<1x6xf32>
    %81 = vector.broadcast %80 : vector<1x6xf32> to vector<90x6xf32>
    %82 = arith.addf %78, %81 : vector<90x6xf32>
    %c0_81 = arith.constant 0 : index
    %c2_82 = arith.constant 2 : index
    %c0_83 = arith.constant 0 : index
    %c0_84 = arith.constant 0 : index
    %83 = vector.load %arg5[%c0_81, %c2_82, %c0_83, %c0_84] : memref<2x4x24x6xbf16, #tpu.memory_space<vmem>>, vector<1x1x24x6xbf16>
    %84 = vector.shape_cast %83 : vector<1x1x24x6xbf16> to vector<24x6xbf16>
    %cst_85 = arith.constant dense<0.000000e+00> : vector<90x6xf32>
    %85 = tpu.matmul %18, %84, %cst_85 {dimension_numbers = #tpu.dot_dimension_numbers<[1], [0], [0], [1], [0, 0, 1, 1], [], []>} : vector<90x24xbf16>, vector<24x6xbf16>, vector<90x6xf32> -> vector<90x6xf32>
    %c0_86 = arith.constant 0 : index
    %c2_87 = arith.constant 2 : index
    %c0_88 = arith.constant 0 : index
    %c0_89 = arith.constant 0 : index
    %86 = vector.load %arg7[%c0_86, %c2_87, %c0_88, %c0_89] : memref<2x4x24x24xbf16, #tpu.memory_space<vmem>>, vector<1x1x24x24xbf16>
    %87 = vector.shape_cast %86 : vector<1x1x24x24xbf16> to vector<24x24xbf16>
    %cst_90 = arith.constant dense<0.000000e+00> : vector<90x24xf32>
    %88 = tpu.matmul %18, %87, %cst_90 {dimension_numbers = #tpu.dot_dimension_numbers<[1], [0], [0], [1], [0, 0, 1, 1], [], []>} : vector<90x24xbf16>, vector<24x24xbf16>, vector<90x24xf32> -> vector<90x24xf32>
    %cst_91 = arith.constant dense<0.000000e+00> : vector<90x90xf32>
    %89 = tpu.matmul %82, %85, %cst_91 {dimension_numbers = #tpu.dot_dimension_numbers<[1], [1], [0], [0], [0, 0, 1, 0], [], []>} : vector<90x6xf32>, vector<90x6xf32>, vector<90x90xf32> -> vector<90x90xf32>
    %cst_92 = arith.constant dense<0xFF800000> : vector<90xf32>
    %90 = vector.multi_reduction <maximumf>, %89, %cst_92 [1] : vector<90x90xf32> to vector<90xf32>
    %91 = vector.shape_cast %90 : vector<90xf32> to vector<90x1xf32>
    %92 = vector.broadcast %91 : vector<90x1xf32> to vector<90x90xf32>
    %93 = arith.subf %89, %92 : vector<90x90xf32>
    %94 = math.exp %93 : vector<90x90xf32>
    %cst_93 = arith.constant dense<0.000000e+00> : vector<90xf32>
    %95 = vector.multi_reduction <add>, %94, %cst_93 [1] : vector<90x90xf32> to vector<90xf32>
    %96 = vector.shape_cast %95 : vector<90xf32> to vector<90x1xf32>
    %97 = arith.truncf %94 : vector<90x90xf32> to vector<90x90xbf16>
    %98 = arith.truncf %88 : vector<90x24xf32> to vector<90x24xbf16>
    %cst_94 = arith.constant dense<0.000000e+00> : vector<90x24xf32>
    %99 = tpu.matmul %97, %98, %cst_94 {dimension_numbers = #tpu.dot_dimension_numbers<[1], [0], [0], [1], [0, 0, 1, 1], [], []>} : vector<90x90xbf16>, vector<90x24xbf16>, vector<90x24xf32> -> vector<90x24xf32>
    %100 = tpu.reciprocal %96 {approx = true} : vector<90x1xf32> -> vector<90x1xf32>
    %101 = vector.broadcast %100 : vector<90x1xf32> to vector<90x24xf32>
    %102 = arith.mulf %99, %101 : vector<90x24xf32>
    %103 = arith.addf %75, %102 : vector<90x24xf32>
    %c0_95 = arith.constant 0 : index
    %c3_96 = arith.constant 3 : index
    %c0_97 = arith.constant 0 : index
    %c0_98 = arith.constant 0 : index
    %104 = vector.load %arg4[%c0_95, %c3_96, %c0_97, %c0_98] : memref<2x4x24x6xbf16, #tpu.memory_space<vmem>>, vector<1x1x24x6xbf16>
    %105 = vector.shape_cast %104 : vector<1x1x24x6xbf16> to vector<24x6xbf16>
    %cst_99 = arith.constant dense<0.000000e+00> : vector<90x6xf32>
    %106 = tpu.matmul %18, %105, %cst_99 {dimension_numbers = #tpu.dot_dimension_numbers<[1], [0], [0], [1], [0, 0, 1, 1], [], []>} : vector<90x24xbf16>, vector<24x6xbf16>, vector<90x6xf32> -> vector<90x6xf32>
    %c0_100 = arith.constant 0 : index
    %c3_101 = arith.constant 3 : index
    %c0_102 = arith.constant 0 : index
    %c0_103 = arith.constant 0 : index
    %107 = vector.load %arg6[%c0_100, %c3_101, %c0_102, %c0_103] : memref<2x4x1x6xf32, #tpu.memory_space<vmem>>, vector<1x1x1x6xf32>
    %108 = vector.shape_cast %107 : vector<1x1x1x6xf32> to vector<1x6xf32>
    %109 = vector.broadcast %108 : vector<1x6xf32> to vector<90x6xf32>
    %110 = arith.addf %106, %109 : vector<90x6xf32>
    %c0_104 = arith.constant 0 : index
    %c3_105 = arith.constant 3 : index
    %c0_106 = arith.constant 0 : index
    %c0_107 = arith.constant 0 : index
    %111 = vector.load %arg5[%c0_104, %c3_105, %c0_106, %c0_107] : memref<2x4x24x6xbf16, #tpu.memory_space<vmem>>, vector<1x1x24x6xbf16>
    %112 = vector.shape_cast %111 : vector<1x1x24x6xbf16> to vector<24x6xbf16>
    %cst_108 = arith.constant dense<0.000000e+00> : vector<90x6xf32>
    %113 = tpu.matmul %18, %112, %cst_108 {dimension_numbers = #tpu.dot_dimension_numbers<[1], [0], [0], [1], [0, 0, 1, 1], [], []>} : vector<90x24xbf16>, vector<24x6xbf16>, vector<90x6xf32> -> vector<90x6xf32>
    %c0_109 = arith.constant 0 : index
    %c3_110 = arith.constant 3 : index
    %c0_111 = arith.constant 0 : index
    %c0_112 = arith.constant 0 : index
    %114 = vector.load %arg7[%c0_109, %c3_110, %c0_111, %c0_112] : memref<2x4x24x24xbf16, #tpu.memory_space<vmem>>, vector<1x1x24x24xbf16>
    %115 = vector.shape_cast %114 : vector<1x1x24x24xbf16> to vector<24x24xbf16>
    %cst_113 = arith.constant dense<0.000000e+00> : vector<90x24xf32>
    %116 = tpu.matmul %18, %115, %cst_113 {dimension_numbers = #tpu.dot_dimension_numbers<[1], [0], [0], [1], [0, 0, 1, 1], [], []>} : vector<90x24xbf16>, vector<24x24xbf16>, vector<90x24xf32> -> vector<90x24xf32>
    %cst_114 = arith.constant dense<0.000000e+00> : vector<90x90xf32>
    %117 = tpu.matmul %110, %113, %cst_114 {dimension_numbers = #tpu.dot_dimension_numbers<[1], [1], [0], [0], [0, 0, 1, 0], [], []>} : vector<90x6xf32>, vector<90x6xf32>, vector<90x90xf32> -> vector<90x90xf32>
    %cst_115 = arith.constant dense<0xFF800000> : vector<90xf32>
    %118 = vector.multi_reduction <maximumf>, %117, %cst_115 [1] : vector<90x90xf32> to vector<90xf32>
    %119 = vector.shape_cast %118 : vector<90xf32> to vector<90x1xf32>
    %120 = vector.broadcast %119 : vector<90x1xf32> to vector<90x90xf32>
    %121 = arith.subf %117, %120 : vector<90x90xf32>
    %122 = math.exp %121 : vector<90x90xf32>
    %cst_116 = arith.constant dense<0.000000e+00> : vector<90xf32>
    %123 = vector.multi_reduction <add>, %122, %cst_116 [1] : vector<90x90xf32> to vector<90xf32>
    %124 = vector.shape_cast %123 : vector<90xf32> to vector<90x1xf32>
    %125 = arith.truncf %122 : vector<90x90xf32> to vector<90x90xbf16>
    %126 = arith.truncf %116 : vector<90x24xf32> to vector<90x24xbf16>
    %cst_117 = arith.constant dense<0.000000e+00> : vector<90x24xf32>
    %127 = tpu.matmul %125, %126, %cst_117 {dimension_numbers = #tpu.dot_dimension_numbers<[1], [0], [0], [1], [0, 0, 1, 1], [], []>} : vector<90x90xbf16>, vector<90x24xbf16>, vector<90x24xf32> -> vector<90x24xf32>
    %128 = tpu.reciprocal %124 {approx = true} : vector<90x1xf32> -> vector<90x1xf32>
    %129 = vector.broadcast %128 : vector<90x1xf32> to vector<90x24xf32>
    %130 = arith.mulf %127, %129 : vector<90x24xf32>
    %131 = arith.addf %103, %130 : vector<90x24xf32>
    %132 = vector.broadcast %7 : vector<1x24xf32> to vector<90x24xf32>
    %133 = arith.addf %131, %132 : vector<90x24xf32>
    %134 = arith.addf %5, %133 : vector<90x24xf32>
    %cst_118 = arith.constant dense<0.000000e+00> : vector<90xf32>
    %135 = vector.multi_reduction <add>, %134, %cst_118 [1] : vector<90x24xf32> to vector<90xf32>
    %136 = vector.shape_cast %135 : vector<90xf32> to vector<90x1xf32>
    %cst_119 = arith.constant 2.400000e+01 : f32
    %137 = vector.broadcast %cst_119 : f32 to vector<90x1xf32>
    %138 = arith.divf %136, %137 : vector<90x1xf32>
    %139 = vector.broadcast %138 : vector<90x1xf32> to vector<90x24xf32>
    %140 = arith.subf %134, %139 : vector<90x24xf32>
    %141 = arith.mulf %140, %140 : vector<90x24xf32>
    %cst_120 = arith.constant dense<0.000000e+00> : vector<90xf32>
    %142 = vector.multi_reduction <add>, %141, %cst_120 [1] : vector<90x24xf32> to vector<90xf32>
    %143 = vector.shape_cast %142 : vector<90xf32> to vector<90x1xf32>
    %cst_121 = arith.constant 2.400000e+01 : f32
    %144 = vector.broadcast %cst_121 : f32 to vector<90x1xf32>
    %145 = arith.divf %143, %144 : vector<90x1xf32>
    %146 = vector.broadcast %138 : vector<90x1xf32> to vector<90x24xf32>
    %147 = arith.subf %134, %146 : vector<90x24xf32>
    %cst_122 = arith.constant 9.99999974E-6 : f32
    %148 = vector.broadcast %cst_122 : f32 to vector<90x1xf32>
    %149 = arith.addf %145, %148 : vector<90x1xf32>
    %150 = math.rsqrt %149 : vector<90x1xf32>
    %151 = vector.broadcast %150 : vector<90x1xf32> to vector<90x24xf32>
    %152 = arith.mulf %147, %151 : vector<90x24xf32>
    %153 = vector.broadcast %9 : vector<1x24xf32> to vector<90x24xf32>
    %154 = arith.mulf %152, %153 : vector<90x24xf32>
    %155 = vector.broadcast %11 : vector<1x24xf32> to vector<90x24xf32>
    %156 = arith.addf %154, %155 : vector<90x24xf32>
    %157 = arith.truncf %156 : vector<90x24xf32> to vector<90x24xbf16>
    %c0_123 = arith.constant 0 : index
    %c0_124 = arith.constant 0 : index
    %c0_125 = arith.constant 0 : index
    %158 = vector.load %arg8[%c0_123, %c0_124, %c0_125] : memref<2x24x96xbf16, #tpu.memory_space<vmem>>, vector<1x24x96xbf16>
    %159 = vector.shape_cast %158 : vector<1x24x96xbf16> to vector<24x96xbf16>
    %cst_126 = arith.constant dense<0.000000e+00> : vector<90x96xf32>
    %160 = tpu.matmul %157, %159, %cst_126 {dimension_numbers = #tpu.dot_dimension_numbers<[1], [0], [0], [1], [0, 0, 1, 1], [], []>} : vector<90x24xbf16>, vector<24x96xbf16>, vector<90x96xf32> -> vector<90x96xf32>
    %c0_127 = arith.constant 0 : index
    %c0_128 = arith.constant 0 : index
    %c0_129 = arith.constant 0 : index
    %161 = vector.load %arg9[%c0_127, %c0_128, %c0_129] : memref<2x1x96xf32, #tpu.memory_space<vmem>>, vector<1x1x96xf32>
    %162 = vector.shape_cast %161 : vector<1x1x96xf32> to vector<1x96xf32>
    %163 = vector.broadcast %162 : vector<1x96xf32> to vector<90x96xf32>
    %164 = arith.addf %160, %163 : vector<90x96xf32>
    %cst_130 = arith.constant 0.000000e+00 : f32
    %165 = vector.broadcast %cst_130 : f32 to vector<90x96xf32>
    %166 = arith.maximumf %164, %165 : vector<90x96xf32>
    %167 = arith.truncf %166 : vector<90x96xf32> to vector<90x96xbf16>
    %c0_131 = arith.constant 0 : index
    %c0_132 = arith.constant 0 : index
    %c0_133 = arith.constant 0 : index
    %168 = vector.load %arg10[%c0_131, %c0_132, %c0_133] : memref<2x96x24xbf16, #tpu.memory_space<vmem>>, vector<1x96x24xbf16>
    %169 = vector.shape_cast %168 : vector<1x96x24xbf16> to vector<96x24xbf16>
    %cst_134 = arith.constant dense<0.000000e+00> : vector<90x24xf32>
    %170 = tpu.matmul %167, %169, %cst_134 {dimension_numbers = #tpu.dot_dimension_numbers<[1], [0], [0], [1], [0, 0, 1, 1], [], []>} : vector<90x96xbf16>, vector<96x24xbf16>, vector<90x24xf32> -> vector<90x24xf32>
    %171 = vector.broadcast %13 : vector<1x24xf32> to vector<90x24xf32>
    %172 = arith.addf %170, %171 : vector<90x24xf32>
    %173 = arith.addf %156, %172 : vector<90x24xf32>
    %cst_135 = arith.constant dense<0.000000e+00> : vector<90xf32>
    %174 = vector.multi_reduction <add>, %173, %cst_135 [1] : vector<90x24xf32> to vector<90xf32>
    %175 = vector.shape_cast %174 : vector<90xf32> to vector<90x1xf32>
    %cst_136 = arith.constant 2.400000e+01 : f32
    %176 = vector.broadcast %cst_136 : f32 to vector<90x1xf32>
    %177 = arith.divf %175, %176 : vector<90x1xf32>
    %178 = vector.broadcast %177 : vector<90x1xf32> to vector<90x24xf32>
    %179 = arith.subf %173, %178 : vector<90x24xf32>
    %180 = arith.mulf %179, %179 : vector<90x24xf32>
    %cst_137 = arith.constant dense<0.000000e+00> : vector<90xf32>
    %181 = vector.multi_reduction <add>, %180, %cst_137 [1] : vector<90x24xf32> to vector<90xf32>
    %182 = vector.shape_cast %181 : vector<90xf32> to vector<90x1xf32>
    %cst_138 = arith.constant 2.400000e+01 : f32
    %183 = vector.broadcast %cst_138 : f32 to vector<90x1xf32>
    %184 = arith.divf %182, %183 : vector<90x1xf32>
    %185 = vector.broadcast %177 : vector<90x1xf32> to vector<90x24xf32>
    %186 = arith.subf %173, %185 : vector<90x24xf32>
    %cst_139 = arith.constant 9.99999974E-6 : f32
    %187 = vector.broadcast %cst_139 : f32 to vector<90x1xf32>
    %188 = arith.addf %184, %187 : vector<90x1xf32>
    %189 = math.rsqrt %188 : vector<90x1xf32>
    %190 = vector.broadcast %189 : vector<90x1xf32> to vector<90x24xf32>
    %191 = arith.mulf %186, %190 : vector<90x24xf32>
    %192 = vector.broadcast %15 : vector<1x24xf32> to vector<90x24xf32>
    %193 = arith.mulf %191, %192 : vector<90x24xf32>
    %194 = vector.broadcast %17 : vector<1x24xf32> to vector<90x24xf32>
    %195 = arith.addf %193, %194 : vector<90x24xf32>
    %c1_140 = arith.constant 1 : index
    %c0_141 = arith.constant 0 : index
    %c0_142 = arith.constant 0 : index
    %c0_143 = arith.constant 0 : index
    %196 = vector.load %arg11[%c1_140, %c0_141, %c0_142, %c0_143] : memref<2x6x1x24xf32, #tpu.memory_space<vmem>>, vector<1x1x1x24xf32>
    %197 = vector.shape_cast %196 : vector<1x1x1x24xf32> to vector<1x24xf32>
    %c1_144 = arith.constant 1 : index
    %c1_145 = arith.constant 1 : index
    %c0_146 = arith.constant 0 : index
    %c0_147 = arith.constant 0 : index
    %198 = vector.load %arg11[%c1_144, %c1_145, %c0_146, %c0_147] : memref<2x6x1x24xf32, #tpu.memory_space<vmem>>, vector<1x1x1x24xf32>
    %199 = vector.shape_cast %198 : vector<1x1x1x24xf32> to vector<1x24xf32>
    %c1_148 = arith.constant 1 : index
    %c2_149 = arith.constant 2 : index
    %c0_150 = arith.constant 0 : index
    %c0_151 = arith.constant 0 : index
    %200 = vector.load %arg11[%c1_148, %c2_149, %c0_150, %c0_151] : memref<2x6x1x24xf32, #tpu.memory_space<vmem>>, vector<1x1x1x24xf32>
    %201 = vector.shape_cast %200 : vector<1x1x1x24xf32> to vector<1x24xf32>
    %c1_152 = arith.constant 1 : index
    %c3_153 = arith.constant 3 : index
    %c0_154 = arith.constant 0 : index
    %c0_155 = arith.constant 0 : index
    %202 = vector.load %arg11[%c1_152, %c3_153, %c0_154, %c0_155] : memref<2x6x1x24xf32, #tpu.memory_space<vmem>>, vector<1x1x1x24xf32>
    %203 = vector.shape_cast %202 : vector<1x1x1x24xf32> to vector<1x24xf32>
    %c1_156 = arith.constant 1 : index
    %c4_157 = arith.constant 4 : index
    %c0_158 = arith.constant 0 : index
    %c0_159 = arith.constant 0 : index
    %204 = vector.load %arg11[%c1_156, %c4_157, %c0_158, %c0_159] : memref<2x6x1x24xf32, #tpu.memory_space<vmem>>, vector<1x1x1x24xf32>
    %205 = vector.shape_cast %204 : vector<1x1x1x24xf32> to vector<1x24xf32>
    %c1_160 = arith.constant 1 : index
    %c5_161 = arith.constant 5 : index
    %c0_162 = arith.constant 0 : index
    %c0_163 = arith.constant 0 : index
    %206 = vector.load %arg11[%c1_160, %c5_161, %c0_162, %c0_163] : memref<2x6x1x24xf32, #tpu.memory_space<vmem>>, vector<1x1x1x24xf32>
    %207 = vector.shape_cast %206 : vector<1x1x1x24xf32> to vector<1x24xf32>
    %208 = arith.truncf %195 : vector<90x24xf32> to vector<90x24xbf16>
    %cst_164 = arith.constant 0.000000e+00 : f32
    %209 = vector.broadcast %cst_164 : f32 to vector<90x24xf32>
    %c1_165 = arith.constant 1 : index
    %c0_166 = arith.constant 0 : index
    %c0_167 = arith.constant 0 : index
    %c0_168 = arith.constant 0 : index
    %210 = vector.load %arg4[%c1_165, %c0_166, %c0_167, %c0_168] : memref<2x4x24x6xbf16, #tpu.memory_space<vmem>>, vector<1x1x24x6xbf16>
    %211 = vector.shape_cast %210 : vector<1x1x24x6xbf16> to vector<24x6xbf16>
    %cst_169 = arith.constant dense<0.000000e+00> : vector<90x6xf32>
    %212 = tpu.matmul %208, %211, %cst_169 {dimension_numbers = #tpu.dot_dimension_numbers<[1], [0], [0], [1], [0, 0, 1, 1], [], []>} : vector<90x24xbf16>, vector<24x6xbf16>, vector<90x6xf32> -> vector<90x6xf32>
    %c1_170 = arith.constant 1 : index
    %c0_171 = arith.constant 0 : index
    %c0_172 = arith.constant 0 : index
    %c0_173 = arith.constant 0 : index
    %213 = vector.load %arg6[%c1_170, %c0_171, %c0_172, %c0_173] : memref<2x4x1x6xf32, #tpu.memory_space<vmem>>, vector<1x1x1x6xf32>
    %214 = vector.shape_cast %213 : vector<1x1x1x6xf32> to vector<1x6xf32>
    %215 = vector.broadcast %214 : vector<1x6xf32> to vector<90x6xf32>
    %216 = arith.addf %212, %215 : vector<90x6xf32>
    %c1_174 = arith.constant 1 : index
    %c0_175 = arith.constant 0 : index
    %c0_176 = arith.constant 0 : index
    %c0_177 = arith.constant 0 : index
    %217 = vector.load %arg5[%c1_174, %c0_175, %c0_176, %c0_177] : memref<2x4x24x6xbf16, #tpu.memory_space<vmem>>, vector<1x1x24x6xbf16>
    %218 = vector.shape_cast %217 : vector<1x1x24x6xbf16> to vector<24x6xbf16>
    %cst_178 = arith.constant dense<0.000000e+00> : vector<90x6xf32>
    %219 = tpu.matmul %208, %218, %cst_178 {dimension_numbers = #tpu.dot_dimension_numbers<[1], [0], [0], [1], [0, 0, 1, 1], [], []>} : vector<90x24xbf16>, vector<24x6xbf16>, vector<90x6xf32> -> vector<90x6xf32>
    %c1_179 = arith.constant 1 : index
    %c0_180 = arith.constant 0 : index
    %c0_181 = arith.constant 0 : index
    %c0_182 = arith.constant 0 : index
    %220 = vector.load %arg7[%c1_179, %c0_180, %c0_181, %c0_182] : memref<2x4x24x24xbf16, #tpu.memory_space<vmem>>, vector<1x1x24x24xbf16>
    %221 = vector.shape_cast %220 : vector<1x1x24x24xbf16> to vector<24x24xbf16>
    %cst_183 = arith.constant dense<0.000000e+00> : vector<90x24xf32>
    %222 = tpu.matmul %208, %221, %cst_183 {dimension_numbers = #tpu.dot_dimension_numbers<[1], [0], [0], [1], [0, 0, 1, 1], [], []>} : vector<90x24xbf16>, vector<24x24xbf16>, vector<90x24xf32> -> vector<90x24xf32>
    %cst_184 = arith.constant dense<0.000000e+00> : vector<90x90xf32>
    %223 = tpu.matmul %216, %219, %cst_184 {dimension_numbers = #tpu.dot_dimension_numbers<[1], [1], [0], [0], [0, 0, 1, 0], [], []>} : vector<90x6xf32>, vector<90x6xf32>, vector<90x90xf32> -> vector<90x90xf32>
    %cst_185 = arith.constant dense<0xFF800000> : vector<90xf32>
    %224 = vector.multi_reduction <maximumf>, %223, %cst_185 [1] : vector<90x90xf32> to vector<90xf32>
    %225 = vector.shape_cast %224 : vector<90xf32> to vector<90x1xf32>
    %226 = vector.broadcast %225 : vector<90x1xf32> to vector<90x90xf32>
    %227 = arith.subf %223, %226 : vector<90x90xf32>
    %228 = math.exp %227 : vector<90x90xf32>
    %cst_186 = arith.constant dense<0.000000e+00> : vector<90xf32>
    %229 = vector.multi_reduction <add>, %228, %cst_186 [1] : vector<90x90xf32> to vector<90xf32>
    %230 = vector.shape_cast %229 : vector<90xf32> to vector<90x1xf32>
    %231 = arith.truncf %228 : vector<90x90xf32> to vector<90x90xbf16>
    %232 = arith.truncf %222 : vector<90x24xf32> to vector<90x24xbf16>
    %cst_187 = arith.constant dense<0.000000e+00> : vector<90x24xf32>
    %233 = tpu.matmul %231, %232, %cst_187 {dimension_numbers = #tpu.dot_dimension_numbers<[1], [0], [0], [1], [0, 0, 1, 1], [], []>} : vector<90x90xbf16>, vector<90x24xbf16>, vector<90x24xf32> -> vector<90x24xf32>
    %234 = tpu.reciprocal %230 {approx = true} : vector<90x1xf32> -> vector<90x1xf32>
    %235 = vector.broadcast %234 : vector<90x1xf32> to vector<90x24xf32>
    %236 = arith.mulf %233, %235 : vector<90x24xf32>
    %237 = arith.addf %209, %236 : vector<90x24xf32>
    %c1_188 = arith.constant 1 : index
    %c1_189 = arith.constant 1 : index
    %c0_190 = arith.constant 0 : index
    %c0_191 = arith.constant 0 : index
    %238 = vector.load %arg4[%c1_188, %c1_189, %c0_190, %c0_191] : memref<2x4x24x6xbf16, #tpu.memory_space<vmem>>, vector<1x1x24x6xbf16>
    %239 = vector.shape_cast %238 : vector<1x1x24x6xbf16> to vector<24x6xbf16>
    %cst_192 = arith.constant dense<0.000000e+00> : vector<90x6xf32>
    %240 = tpu.matmul %208, %239, %cst_192 {dimension_numbers = #tpu.dot_dimension_numbers<[1], [0], [0], [1], [0, 0, 1, 1], [], []>} : vector<90x24xbf16>, vector<24x6xbf16>, vector<90x6xf32> -> vector<90x6xf32>
    %c1_193 = arith.constant 1 : index
    %c1_194 = arith.constant 1 : index
    %c0_195 = arith.constant 0 : index
    %c0_196 = arith.constant 0 : index
    %241 = vector.load %arg6[%c1_193, %c1_194, %c0_195, %c0_196] : memref<2x4x1x6xf32, #tpu.memory_space<vmem>>, vector<1x1x1x6xf32>
    %242 = vector.shape_cast %241 : vector<1x1x1x6xf32> to vector<1x6xf32>
    %243 = vector.broadcast %242 : vector<1x6xf32> to vector<90x6xf32>
    %244 = arith.addf %240, %243 : vector<90x6xf32>
    %c1_197 = arith.constant 1 : index
    %c1_198 = arith.constant 1 : index
    %c0_199 = arith.constant 0 : index
    %c0_200 = arith.constant 0 : index
    %245 = vector.load %arg5[%c1_197, %c1_198, %c0_199, %c0_200] : memref<2x4x24x6xbf16, #tpu.memory_space<vmem>>, vector<1x1x24x6xbf16>
    %246 = vector.shape_cast %245 : vector<1x1x24x6xbf16> to vector<24x6xbf16>
    %cst_201 = arith.constant dense<0.000000e+00> : vector<90x6xf32>
    %247 = tpu.matmul %208, %246, %cst_201 {dimension_numbers = #tpu.dot_dimension_numbers<[1], [0], [0], [1], [0, 0, 1, 1], [], []>} : vector<90x24xbf16>, vector<24x6xbf16>, vector<90x6xf32> -> vector<90x6xf32>
    %c1_202 = arith.constant 1 : index
    %c1_203 = arith.constant 1 : index
    %c0_204 = arith.constant 0 : index
    %c0_205 = arith.constant 0 : index
    %248 = vector.load %arg7[%c1_202, %c1_203, %c0_204, %c0_205] : memref<2x4x24x24xbf16, #tpu.memory_space<vmem>>, vector<1x1x24x24xbf16>
    %249 = vector.shape_cast %248 : vector<1x1x24x24xbf16> to vector<24x24xbf16>
    %cst_206 = arith.constant dense<0.000000e+00> : vector<90x24xf32>
    %250 = tpu.matmul %208, %249, %cst_206 {dimension_numbers = #tpu.dot_dimension_numbers<[1], [0], [0], [1], [0, 0, 1, 1], [], []>} : vector<90x24xbf16>, vector<24x24xbf16>, vector<90x24xf32> -> vector<90x24xf32>
    %cst_207 = arith.constant dense<0.000000e+00> : vector<90x90xf32>
    %251 = tpu.matmul %244, %247, %cst_207 {dimension_numbers = #tpu.dot_dimension_numbers<[1], [1], [0], [0], [0, 0, 1, 0], [], []>} : vector<90x6xf32>, vector<90x6xf32>, vector<90x90xf32> -> vector<90x90xf32>
    %cst_208 = arith.constant dense<0xFF800000> : vector<90xf32>
    %252 = vector.multi_reduction <maximumf>, %251, %cst_208 [1] : vector<90x90xf32> to vector<90xf32>
    %253 = vector.shape_cast %252 : vector<90xf32> to vector<90x1xf32>
    %254 = vector.broadcast %253 : vector<90x1xf32> to vector<90x90xf32>
    %255 = arith.subf %251, %254 : vector<90x90xf32>
    %256 = math.exp %255 : vector<90x90xf32>
    %cst_209 = arith.constant dense<0.000000e+00> : vector<90xf32>
    %257 = vector.multi_reduction <add>, %256, %cst_209 [1] : vector<90x90xf32> to vector<90xf32>
    %258 = vector.shape_cast %257 : vector<90xf32> to vector<90x1xf32>
    %259 = arith.truncf %256 : vector<90x90xf32> to vector<90x90xbf16>
    %260 = arith.truncf %250 : vector<90x24xf32> to vector<90x24xbf16>
    %cst_210 = arith.constant dense<0.000000e+00> : vector<90x24xf32>
    %261 = tpu.matmul %259, %260, %cst_210 {dimension_numbers = #tpu.dot_dimension_numbers<[1], [0], [0], [1], [0, 0, 1, 1], [], []>} : vector<90x90xbf16>, vector<90x24xbf16>, vector<90x24xf32> -> vector<90x24xf32>
    %262 = tpu.reciprocal %258 {approx = true} : vector<90x1xf32> -> vector<90x1xf32>
    %263 = vector.broadcast %262 : vector<90x1xf32> to vector<90x24xf32>
    %264 = arith.mulf %261, %263 : vector<90x24xf32>
    %265 = arith.addf %237, %264 : vector<90x24xf32>
    %c1_211 = arith.constant 1 : index
    %c2_212 = arith.constant 2 : index
    %c0_213 = arith.constant 0 : index
    %c0_214 = arith.constant 0 : index
    %266 = vector.load %arg4[%c1_211, %c2_212, %c0_213, %c0_214] : memref<2x4x24x6xbf16, #tpu.memory_space<vmem>>, vector<1x1x24x6xbf16>
    %267 = vector.shape_cast %266 : vector<1x1x24x6xbf16> to vector<24x6xbf16>
    %cst_215 = arith.constant dense<0.000000e+00> : vector<90x6xf32>
    %268 = tpu.matmul %208, %267, %cst_215 {dimension_numbers = #tpu.dot_dimension_numbers<[1], [0], [0], [1], [0, 0, 1, 1], [], []>} : vector<90x24xbf16>, vector<24x6xbf16>, vector<90x6xf32> -> vector<90x6xf32>
    %c1_216 = arith.constant 1 : index
    %c2_217 = arith.constant 2 : index
    %c0_218 = arith.constant 0 : index
    %c0_219 = arith.constant 0 : index
    %269 = vector.load %arg6[%c1_216, %c2_217, %c0_218, %c0_219] : memref<2x4x1x6xf32, #tpu.memory_space<vmem>>, vector<1x1x1x6xf32>
    %270 = vector.shape_cast %269 : vector<1x1x1x6xf32> to vector<1x6xf32>
    %271 = vector.broadcast %270 : vector<1x6xf32> to vector<90x6xf32>
    %272 = arith.addf %268, %271 : vector<90x6xf32>
    %c1_220 = arith.constant 1 : index
    %c2_221 = arith.constant 2 : index
    %c0_222 = arith.constant 0 : index
    %c0_223 = arith.constant 0 : index
    %273 = vector.load %arg5[%c1_220, %c2_221, %c0_222, %c0_223] : memref<2x4x24x6xbf16, #tpu.memory_space<vmem>>, vector<1x1x24x6xbf16>
    %274 = vector.shape_cast %273 : vector<1x1x24x6xbf16> to vector<24x6xbf16>
    %cst_224 = arith.constant dense<0.000000e+00> : vector<90x6xf32>
    %275 = tpu.matmul %208, %274, %cst_224 {dimension_numbers = #tpu.dot_dimension_numbers<[1], [0], [0], [1], [0, 0, 1, 1], [], []>} : vector<90x24xbf16>, vector<24x6xbf16>, vector<90x6xf32> -> vector<90x6xf32>
    %c1_225 = arith.constant 1 : index
    %c2_226 = arith.constant 2 : index
    %c0_227 = arith.constant 0 : index
    %c0_228 = arith.constant 0 : index
    %276 = vector.load %arg7[%c1_225, %c2_226, %c0_227, %c0_228] : memref<2x4x24x24xbf16, #tpu.memory_space<vmem>>, vector<1x1x24x24xbf16>
    %277 = vector.shape_cast %276 : vector<1x1x24x24xbf16> to vector<24x24xbf16>
    %cst_229 = arith.constant dense<0.000000e+00> : vector<90x24xf32>
    %278 = tpu.matmul %208, %277, %cst_229 {dimension_numbers = #tpu.dot_dimension_numbers<[1], [0], [0], [1], [0, 0, 1, 1], [], []>} : vector<90x24xbf16>, vector<24x24xbf16>, vector<90x24xf32> -> vector<90x24xf32>
    %cst_230 = arith.constant dense<0.000000e+00> : vector<90x90xf32>
    %279 = tpu.matmul %272, %275, %cst_230 {dimension_numbers = #tpu.dot_dimension_numbers<[1], [1], [0], [0], [0, 0, 1, 0], [], []>} : vector<90x6xf32>, vector<90x6xf32>, vector<90x90xf32> -> vector<90x90xf32>
    %cst_231 = arith.constant dense<0xFF800000> : vector<90xf32>
    %280 = vector.multi_reduction <maximumf>, %279, %cst_231 [1] : vector<90x90xf32> to vector<90xf32>
    %281 = vector.shape_cast %280 : vector<90xf32> to vector<90x1xf32>
    %282 = vector.broadcast %281 : vector<90x1xf32> to vector<90x90xf32>
    %283 = arith.subf %279, %282 : vector<90x90xf32>
    %284 = math.exp %283 : vector<90x90xf32>
    %cst_232 = arith.constant dense<0.000000e+00> : vector<90xf32>
    %285 = vector.multi_reduction <add>, %284, %cst_232 [1] : vector<90x90xf32> to vector<90xf32>
    %286 = vector.shape_cast %285 : vector<90xf32> to vector<90x1xf32>
    %287 = arith.truncf %284 : vector<90x90xf32> to vector<90x90xbf16>
    %288 = arith.truncf %278 : vector<90x24xf32> to vector<90x24xbf16>
    %cst_233 = arith.constant dense<0.000000e+00> : vector<90x24xf32>
    %289 = tpu.matmul %287, %288, %cst_233 {dimension_numbers = #tpu.dot_dimension_numbers<[1], [0], [0], [1], [0, 0, 1, 1], [], []>} : vector<90x90xbf16>, vector<90x24xbf16>, vector<90x24xf32> -> vector<90x24xf32>
    %290 = tpu.reciprocal %286 {approx = true} : vector<90x1xf32> -> vector<90x1xf32>
    %291 = vector.broadcast %290 : vector<90x1xf32> to vector<90x24xf32>
    %292 = arith.mulf %289, %291 : vector<90x24xf32>
    %293 = arith.addf %265, %292 : vector<90x24xf32>
    %c1_234 = arith.constant 1 : index
    %c3_235 = arith.constant 3 : index
    %c0_236 = arith.constant 0 : index
    %c0_237 = arith.constant 0 : index
    %294 = vector.load %arg4[%c1_234, %c3_235, %c0_236, %c0_237] : memref<2x4x24x6xbf16, #tpu.memory_space<vmem>>, vector<1x1x24x6xbf16>
    %295 = vector.shape_cast %294 : vector<1x1x24x6xbf16> to vector<24x6xbf16>
    %cst_238 = arith.constant dense<0.000000e+00> : vector<90x6xf32>
    %296 = tpu.matmul %208, %295, %cst_238 {dimension_numbers = #tpu.dot_dimension_numbers<[1], [0], [0], [1], [0, 0, 1, 1], [], []>} : vector<90x24xbf16>, vector<24x6xbf16>, vector<90x6xf32> -> vector<90x6xf32>
    %c1_239 = arith.constant 1 : index
    %c3_240 = arith.constant 3 : index
    %c0_241 = arith.constant 0 : index
    %c0_242 = arith.constant 0 : index
    %297 = vector.load %arg6[%c1_239, %c3_240, %c0_241, %c0_242] : memref<2x4x1x6xf32, #tpu.memory_space<vmem>>, vector<1x1x1x6xf32>
    %298 = vector.shape_cast %297 : vector<1x1x1x6xf32> to vector<1x6xf32>
    %299 = vector.broadcast %298 : vector<1x6xf32> to vector<90x6xf32>
    %300 = arith.addf %296, %299 : vector<90x6xf32>
    %c1_243 = arith.constant 1 : index
    %c3_244 = arith.constant 3 : index
    %c0_245 = arith.constant 0 : index
    %c0_246 = arith.constant 0 : index
    %301 = vector.load %arg5[%c1_243, %c3_244, %c0_245, %c0_246] : memref<2x4x24x6xbf16, #tpu.memory_space<vmem>>, vector<1x1x24x6xbf16>
    %302 = vector.shape_cast %301 : vector<1x1x24x6xbf16> to vector<24x6xbf16>
    %cst_247 = arith.constant dense<0.000000e+00> : vector<90x6xf32>
    %303 = tpu.matmul %208, %302, %cst_247 {dimension_numbers = #tpu.dot_dimension_numbers<[1], [0], [0], [1], [0, 0, 1, 1], [], []>} : vector<90x24xbf16>, vector<24x6xbf16>, vector<90x6xf32> -> vector<90x6xf32>
    %c1_248 = arith.constant 1 : index
    %c3_249 = arith.constant 3 : index
    %c0_250 = arith.constant 0 : index
    %c0_251 = arith.constant 0 : index
    %304 = vector.load %arg7[%c1_248, %c3_249, %c0_250, %c0_251] : memref<2x4x24x24xbf16, #tpu.memory_space<vmem>>, vector<1x1x24x24xbf16>
    %305 = vector.shape_cast %304 : vector<1x1x24x24xbf16> to vector<24x24xbf16>
    %cst_252 = arith.constant dense<0.000000e+00> : vector<90x24xf32>
    %306 = tpu.matmul %208, %305, %cst_252 {dimension_numbers = #tpu.dot_dimension_numbers<[1], [0], [0], [1], [0, 0, 1, 1], [], []>} : vector<90x24xbf16>, vector<24x24xbf16>, vector<90x24xf32> -> vector<90x24xf32>
    %cst_253 = arith.constant dense<0.000000e+00> : vector<90x90xf32>
    %307 = tpu.matmul %300, %303, %cst_253 {dimension_numbers = #tpu.dot_dimension_numbers<[1], [1], [0], [0], [0, 0, 1, 0], [], []>} : vector<90x6xf32>, vector<90x6xf32>, vector<90x90xf32> -> vector<90x90xf32>
    %cst_254 = arith.constant dense<0xFF800000> : vector<90xf32>
    %308 = vector.multi_reduction <maximumf>, %307, %cst_254 [1] : vector<90x90xf32> to vector<90xf32>
    %309 = vector.shape_cast %308 : vector<90xf32> to vector<90x1xf32>
    %310 = vector.broadcast %309 : vector<90x1xf32> to vector<90x90xf32>
    %311 = arith.subf %307, %310 : vector<90x90xf32>
    %312 = math.exp %311 : vector<90x90xf32>
    %cst_255 = arith.constant dense<0.000000e+00> : vector<90xf32>
    %313 = vector.multi_reduction <add>, %312, %cst_255 [1] : vector<90x90xf32> to vector<90xf32>
    %314 = vector.shape_cast %313 : vector<90xf32> to vector<90x1xf32>
    %315 = arith.truncf %312 : vector<90x90xf32> to vector<90x90xbf16>
    %316 = arith.truncf %306 : vector<90x24xf32> to vector<90x24xbf16>
    %cst_256 = arith.constant dense<0.000000e+00> : vector<90x24xf32>
    %317 = tpu.matmul %315, %316, %cst_256 {dimension_numbers = #tpu.dot_dimension_numbers<[1], [0], [0], [1], [0, 0, 1, 1], [], []>} : vector<90x90xbf16>, vector<90x24xbf16>, vector<90x24xf32> -> vector<90x24xf32>
    %318 = tpu.reciprocal %314 {approx = true} : vector<90x1xf32> -> vector<90x1xf32>
    %319 = vector.broadcast %318 : vector<90x1xf32> to vector<90x24xf32>
    %320 = arith.mulf %317, %319 : vector<90x24xf32>
    %321 = arith.addf %293, %320 : vector<90x24xf32>
    %322 = vector.broadcast %197 : vector<1x24xf32> to vector<90x24xf32>
    %323 = arith.addf %321, %322 : vector<90x24xf32>
    %324 = arith.addf %195, %323 : vector<90x24xf32>
    %cst_257 = arith.constant dense<0.000000e+00> : vector<90xf32>
    %325 = vector.multi_reduction <add>, %324, %cst_257 [1] : vector<90x24xf32> to vector<90xf32>
    %326 = vector.shape_cast %325 : vector<90xf32> to vector<90x1xf32>
    %cst_258 = arith.constant 2.400000e+01 : f32
    %327 = vector.broadcast %cst_258 : f32 to vector<90x1xf32>
    %328 = arith.divf %326, %327 : vector<90x1xf32>
    %329 = vector.broadcast %328 : vector<90x1xf32> to vector<90x24xf32>
    %330 = arith.subf %324, %329 : vector<90x24xf32>
    %331 = arith.mulf %330, %330 : vector<90x24xf32>
    %cst_259 = arith.constant dense<0.000000e+00> : vector<90xf32>
    %332 = vector.multi_reduction <add>, %331, %cst_259 [1] : vector<90x24xf32> to vector<90xf32>
    %333 = vector.shape_cast %332 : vector<90xf32> to vector<90x1xf32>
    %cst_260 = arith.constant 2.400000e+01 : f32
    %334 = vector.broadcast %cst_260 : f32 to vector<90x1xf32>
    %335 = arith.divf %333, %334 : vector<90x1xf32>
    %336 = vector.broadcast %328 : vector<90x1xf32> to vector<90x24xf32>
    %337 = arith.subf %324, %336 : vector<90x24xf32>
    %cst_261 = arith.constant 9.99999974E-6 : f32
    %338 = vector.broadcast %cst_261 : f32 to vector<90x1xf32>
    %339 = arith.addf %335, %338 : vector<90x1xf32>
    %340 = math.rsqrt %339 : vector<90x1xf32>
    %341 = vector.broadcast %340 : vector<90x1xf32> to vector<90x24xf32>
    %342 = arith.mulf %337, %341 : vector<90x24xf32>
    %343 = vector.broadcast %199 : vector<1x24xf32> to vector<90x24xf32>
    %344 = arith.mulf %342, %343 : vector<90x24xf32>
    %345 = vector.broadcast %201 : vector<1x24xf32> to vector<90x24xf32>
    %346 = arith.addf %344, %345 : vector<90x24xf32>
    %347 = arith.truncf %346 : vector<90x24xf32> to vector<90x24xbf16>
    %c1_262 = arith.constant 1 : index
    %c0_263 = arith.constant 0 : index
    %c0_264 = arith.constant 0 : index
    %348 = vector.load %arg8[%c1_262, %c0_263, %c0_264] : memref<2x24x96xbf16, #tpu.memory_space<vmem>>, vector<1x24x96xbf16>
    %349 = vector.shape_cast %348 : vector<1x24x96xbf16> to vector<24x96xbf16>
    %cst_265 = arith.constant dense<0.000000e+00> : vector<90x96xf32>
    %350 = tpu.matmul %347, %349, %cst_265 {dimension_numbers = #tpu.dot_dimension_numbers<[1], [0], [0], [1], [0, 0, 1, 1], [], []>} : vector<90x24xbf16>, vector<24x96xbf16>, vector<90x96xf32> -> vector<90x96xf32>
    %c1_266 = arith.constant 1 : index
    %c0_267 = arith.constant 0 : index
    %c0_268 = arith.constant 0 : index
    %351 = vector.load %arg9[%c1_266, %c0_267, %c0_268] : memref<2x1x96xf32, #tpu.memory_space<vmem>>, vector<1x1x96xf32>
    %352 = vector.shape_cast %351 : vector<1x1x96xf32> to vector<1x96xf32>
    %353 = vector.broadcast %352 : vector<1x96xf32> to vector<90x96xf32>
    %354 = arith.addf %350, %353 : vector<90x96xf32>
    %cst_269 = arith.constant 0.000000e+00 : f32
    %355 = vector.broadcast %cst_269 : f32 to vector<90x96xf32>
    %356 = arith.maximumf %354, %355 : vector<90x96xf32>
    %357 = arith.truncf %356 : vector<90x96xf32> to vector<90x96xbf16>
    %c1_270 = arith.constant 1 : index
    %c0_271 = arith.constant 0 : index
    %c0_272 = arith.constant 0 : index
    %358 = vector.load %arg10[%c1_270, %c0_271, %c0_272] : memref<2x96x24xbf16, #tpu.memory_space<vmem>>, vector<1x96x24xbf16>
    %359 = vector.shape_cast %358 : vector<1x96x24xbf16> to vector<96x24xbf16>
    %cst_273 = arith.constant dense<0.000000e+00> : vector<90x24xf32>
    %360 = tpu.matmul %357, %359, %cst_273 {dimension_numbers = #tpu.dot_dimension_numbers<[1], [0], [0], [1], [0, 0, 1, 1], [], []>} : vector<90x96xbf16>, vector<96x24xbf16>, vector<90x24xf32> -> vector<90x24xf32>
    %361 = vector.broadcast %203 : vector<1x24xf32> to vector<90x24xf32>
    %362 = arith.addf %360, %361 : vector<90x24xf32>
    %363 = arith.addf %346, %362 : vector<90x24xf32>
    %cst_274 = arith.constant dense<0.000000e+00> : vector<90xf32>
    %364 = vector.multi_reduction <add>, %363, %cst_274 [1] : vector<90x24xf32> to vector<90xf32>
    %365 = vector.shape_cast %364 : vector<90xf32> to vector<90x1xf32>
    %cst_275 = arith.constant 2.400000e+01 : f32
    %366 = vector.broadcast %cst_275 : f32 to vector<90x1xf32>
    %367 = arith.divf %365, %366 : vector<90x1xf32>
    %368 = vector.broadcast %367 : vector<90x1xf32> to vector<90x24xf32>
    %369 = arith.subf %363, %368 : vector<90x24xf32>
    %370 = arith.mulf %369, %369 : vector<90x24xf32>
    %cst_276 = arith.constant dense<0.000000e+00> : vector<90xf32>
    %371 = vector.multi_reduction <add>, %370, %cst_276 [1] : vector<90x24xf32> to vector<90xf32>
    %372 = vector.shape_cast %371 : vector<90xf32> to vector<90x1xf32>
    %cst_277 = arith.constant 2.400000e+01 : f32
    %373 = vector.broadcast %cst_277 : f32 to vector<90x1xf32>
    %374 = arith.divf %372, %373 : vector<90x1xf32>
    %375 = vector.broadcast %367 : vector<90x1xf32> to vector<90x24xf32>
    %376 = arith.subf %363, %375 : vector<90x24xf32>
    %cst_278 = arith.constant 9.99999974E-6 : f32
    %377 = vector.broadcast %cst_278 : f32 to vector<90x1xf32>
    %378 = arith.addf %374, %377 : vector<90x1xf32>
    %379 = math.rsqrt %378 : vector<90x1xf32>
    %380 = vector.broadcast %379 : vector<90x1xf32> to vector<90x24xf32>
    %381 = arith.mulf %376, %380 : vector<90x24xf32>
    %382 = vector.broadcast %205 : vector<1x24xf32> to vector<90x24xf32>
    %383 = arith.mulf %381, %382 : vector<90x24xf32>
    %384 = vector.broadcast %207 : vector<1x24xf32> to vector<90x24xf32>
    %385 = arith.addf %383, %384 : vector<90x24xf32>
    %386 = arith.truncf %385 : vector<90x24xf32> to vector<90x24xbf16>
    %c0_279 = arith.constant 0 : index
    %c0_280 = arith.constant 0 : index
    %c0_281 = arith.constant 0 : index
    %387 = vector.load %arg12[%c0_279, %c0_280, %c0_281] : memref<1x90x24xbf16, #tpu.memory_space<vmem>>, vector<1x90x24xbf16>
    %388 = vector.shape_cast %387 : vector<1x90x24xbf16> to vector<90x24xbf16>
    %389 = vector.shape_cast %386 : vector<90x24xbf16> to vector<1x90x24xbf16>
    tpu.vector_store %arg12[%c0_279, %c0_280, %c0_281], %389 {strides = array<i32>} : memref<1x90x24xbf16, #tpu.memory_space<vmem>>, vector<1x90x24xbf16>,
    return
  }
  func.func @transform_0(%arg0: i32) -> (i32, i32, i32) {
    %c0_i32 = arith.constant 0 : i32
    %c0_i32_0 = arith.constant 0 : i32
    %c0_i32_1 = arith.constant 0 : i32
    return %arg0, %c0_i32, %c0_i32_0 : i32, i32, i32
  }
  func.func @transform_1(%arg0: i32) -> (i32, i32) {
    %c0_i32 = arith.constant 0 : i32
    %c0_i32_0 = arith.constant 0 : i32
    %c0_i32_1 = arith.constant 0 : i32
    return %c0_i32, %c0_i32_0 : i32, i32
  }
  func.func @transform_2(%arg0: i32) -> (i32, i32) {
    %c0_i32 = arith.constant 0 : i32
    %c0_i32_0 = arith.constant 0 : i32
    %c0_i32_1 = arith.constant 0 : i32
    return %c0_i32, %c0_i32_0 : i32, i32
  }
  func.func @transform_3(%arg0: i32) -> (i32, i32, i32, i32) {
    %c0_i32 = arith.constant 0 : i32
    %c0_i32_0 = arith.constant 0 : i32
    %c0_i32_1 = arith.constant 0 : i32
    %c0_i32_2 = arith.constant 0 : i32
    %c0_i32_3 = arith.constant 0 : i32
    return %c0_i32, %c0_i32_0, %c0_i32_1, %c0_i32_2 : i32, i32, i32, i32
  }
  func.func @transform_4(%arg0: i32) -> (i32, i32, i32, i32) {
    %c0_i32 = arith.constant 0 : i32
    %c0_i32_0 = arith.constant 0 : i32
    %c0_i32_1 = arith.constant 0 : i32
    %c0_i32_2 = arith.constant 0 : i32
    %c0_i32_3 = arith.constant 0 : i32
    return %c0_i32, %c0_i32_0, %c0_i32_1, %c0_i32_2 : i32, i32, i32, i32
  }
  func.func @transform_5(%arg0: i32) -> (i32, i32, i32, i32) {
    %c0_i32 = arith.constant 0 : i32
    %c0_i32_0 = arith.constant 0 : i32
    %c0_i32_1 = arith.constant 0 : i32
    %c0_i32_2 = arith.constant 0 : i32
    %c0_i32_3 = arith.constant 0 : i32
    return %c0_i32, %c0_i32_0, %c0_i32_1, %c0_i32_2 : i32, i32, i32, i32
  }
  func.func @transform_6(%arg0: i32) -> (i32, i32, i32, i32) {
    %c0_i32 = arith.constant 0 : i32
    %c0_i32_0 = arith.constant 0 : i32
    %c0_i32_1 = arith.constant 0 : i32
    %c0_i32_2 = arith.constant 0 : i32
    %c0_i32_3 = arith.constant 0 : i32
    return %c0_i32, %c0_i32_0, %c0_i32_1, %c0_i32_2 : i32, i32, i32, i32
  }
  func.func @transform_7(%arg0: i32) -> (i32, i32, i32) {
    %c0_i32 = arith.constant 0 : i32
    %c0_i32_0 = arith.constant 0 : i32
    %c0_i32_1 = arith.constant 0 : i32
    %c0_i32_2 = arith.constant 0 : i32
    return %c0_i32, %c0_i32_0, %c0_i32_1 : i32, i32, i32
  }
  func.func @transform_8(%arg0: i32) -> (i32, i32, i32) {
    %c0_i32 = arith.constant 0 : i32
    %c0_i32_0 = arith.constant 0 : i32
    %c0_i32_1 = arith.constant 0 : i32
    %c0_i32_2 = arith.constant 0 : i32
    return %c0_i32, %c0_i32_0, %c0_i32_1 : i32, i32, i32
  }
  func.func @transform_9(%arg0: i32) -> (i32, i32, i32) {
    %c0_i32 = arith.constant 0 : i32
    %c0_i32_0 = arith.constant 0 : i32
    %c0_i32_1 = arith.constant 0 : i32
    %c0_i32_2 = arith.constant 0 : i32
    return %c0_i32, %c0_i32_0, %c0_i32_1 : i32, i32, i32
  }
  func.func @transform_10(%arg0: i32) -> (i32, i32, i32, i32) {
    %c0_i32 = arith.constant 0 : i32
    %c0_i32_0 = arith.constant 0 : i32
    %c0_i32_1 = arith.constant 0 : i32
    %c0_i32_2 = arith.constant 0 : i32
    %c0_i32_3 = arith.constant 0 : i32
    return %c0_i32, %c0_i32_0, %c0_i32_1, %c0_i32_2 : i32, i32, i32, i32
  }
  func.func @transform_11(%arg0: i32) -> (i32, i32, i32) {
    %c0_i32 = arith.constant 0 : i32
    %c0_i32_0 = arith.constant 0 : i32
    %c0_i32_1 = arith.constant 0 : i32
    return %arg0, %c0_i32, %c0_i32_0 : i32, i32, i32
  }
}

</mosaic_0001>

<bundles_post_ra>
// kernel: transformer_forward.3
= control target key start
LH: loop header
LB: loop body
LE: loop exit
PB: predicated region body
PF: predicated region fallthrough
CT: control target
= control target key end

     0   :  { %8 = vsyncpa [#allocation3], 0  ;;  %s3047_s0 = inlined_call_operand.vmem [shape: bf16[2,2160], index: 0, kind: input, shape index: {}]   ;;  %s3048_s1 = inlined_call_operand.hbm [shape: bf16[2160,256], index: 1, kind: input, shape index: {}]   ;;  %s3049_s2 = inlined_call_operand.hbm [shape: f32[1,256], index: 2, kind: input, shape index: {}]   ;;  %s3050_s3 = inlined_call_operand.hbm [shape: f32[2,256], index: 3, kind: output, shape index: {}]  }
   0x1   :  { %9 = vsyncpa [#allocation6], 0 }
   0x2   :  { %10 = vsyncpa [#allocation4], 0  ;;  %s2962_s12 = smov [#allocation2]  }
   0x3   :  { %s18_s13 = sshll.u32 %s2962_s12, 4  ;;  %s19_s13 = int_to_ptr.vmem [resolvable:$true] %s18_s13 }
   0x4   :  { %s2904_s14 = scalar_lea.vmem %s19_s13, 34560  ;;  %p2909_p1 = scmp.lt.s32.totalorder %s19_s13, %s19_s13 }
   0x5   :  { %p2905_p0 = scmp.ne.s32.totalorder %s19_s13, %s2904_s14  ;;  %p2910_p2 = scmp.lt.s32.totalorder %s2904_s14, %s2904_s14 }
   0x7   :  { %p2911_p3 = por %p2910_p2, %p2909_p1 }
   0x9   :  { %p2912_p4 = pnand %p2911_p3, %p2905_p0 }
   0xb   :  { %2915 = shalt.err (!%p2912_p4)
}
   0xc   :  { %s2963_s15 = smov 128   ;;  %s2964_s16 = smov 8  }
   0xd   :  { %24 = dma.hbm_to_vmem [thread:$0]  %s3048_s1, 34560, %s19_s13, [#allocation3], %s2963_s15, %s2963_s15, %s2964_s16  }
   0xe   :  { %s2965_s19 = smov [#allocation5]  }
   0xf   :  { %s31_s20 = sshll.u32 %s2965_s19, 4  ;;  %s32_s20 = int_to_ptr.vmem [resolvable:$true] %s31_s20 }
  0x10   :  { %s2924_s21 = scalar_lea.vmem %s32_s20, 32  ;;  %p2929_p6 = scmp.lt.s32.totalorder %s32_s20, %s32_s20 }
  0x11   :  { %p2925_p5 = scmp.ne.s32.totalorder %s32_s20, %s2924_s21  ;;  %p2930_p7 = scmp.lt.s32.totalorder %s2924_s21, %s2924_s21 }
  0x13   :  { %p2931_p8 = por %p2930_p7, %p2929_p6 }
  0x15   :  { %p2932_p9 = pnand %p2931_p8, %p2925_p5 }
  0x17   :  { %2935 = shalt.err (!%p2932_p9)
}
  0x18   :  { %34 = dma.hbm_to_vmem [thread:$0]  %s3049_s2, 32, %s32_s20, [#allocation6]  }
  0x19   :  { %2956 = dma.done.wait [#allocation3], 34560  }
  0x1a   :  { %2957 = vsyncadd [#allocation3], 4294932736 }
  0x1b   :  { %2958 = dma.done.wait [#allocation6], 32  }
  0x1c   :  { %2959 = vsyncadd [#allocation6], 4294967264  ;;  %v2489_v0 = vld [vmem:[#allocation2 + $0x74] ss:$8 sps:$4 sm:$0xff]   ;;  %v2491_v1 = vld [vmem:[#allocation2 + $0x70] ss:$8 sps:$4 sm:$0xff]   ;;  %v317_v35 = vlaneseq }
  0x1d   :  { %1812 = vmatprep.subr.bf16.mxu0 %v2489_v0  ;;  %v2492_v2 = vld [vmem:[#allocation2 + $0x174] ss:$8 sps:$4 sm:$0xff]   ;;  %v2494_v3 = vld [vmem:[#allocation2 + $0x170] ss:$8 sps:$4 sm:$0xff]   ;;  %v2495_v4 = vld [vmem:[#allocation2 + $0x64] ss:$8 sps:$4 sm:$0xff]  }
  0x1e   :  { %1813 = vmatpush1.bf16.msra.mxu0 %v2491_v1  ;;  %v2497_v5 = vld [vmem:[#allocation2 + $0x60] ss:$8 sps:$4 sm:$0xff]   ;;  %1853 = vmatprep.subr.bf16.mxu1 %v2492_v2  ;;  %v2498_v6 = vld [vmem:[#allocation2 + $0x164] ss:$8 sps:$4 sm:$0xff]   ;;  %v2501_v8 = vld [vmem:[#allocation2 + $0x54] ss:$8 sps:$4 sm:$0xff]  }
  0x1f   :  { %1854 = vmatpush1.bf16.msra.mxu1 %v2494_v3  ;;  %1814 = vmatprep.subr.bf16.mxu0 %v2495_v4  ;;  %v2500_v7 = vld [vmem:[#allocation2 + $0x160] ss:$8 sps:$4 sm:$0xff]   ;;  %v2503_v9 = vld [vmem:[#allocation2 + $0x50] ss:$8 sps:$4 sm:$0xff]   ;;  %v2504_v10 = vld [vmem:[#allocation2 + $0x154] ss:$8 sps:$4 sm:$0xff]  }
  0x20   :  { %1855 = vmatprep.subr.bf16.mxu1 %v2498_v6  ;;  %v2507_v11 = vld [vmem:[#allocation2 + $0x44] ss:$8 sps:$4 sm:$0xff]   ;;  %v2506_v12 = vld [vmem:[#allocation2 + $0x150] ss:$8 sps:$4 sm:$0xff]   ;;  %v2509_v14 = vld [vmem:[#allocation2 + $0x40] ss:$8 sps:$4 sm:$0xff]  }
  0x21   :  { %v2510_v13 = vld [vmem:[#allocation2 + $0x144] ss:$8 sps:$4 sm:$0xff]   ;;  %v2513_v15 = vld [vmem:[#allocation2 + $0x34] ss:$8 sps:$4 sm:$0xff]   ;;  %v2512_v16 = vld [vmem:[#allocation2 + $0x140] ss:$8 sps:$4 sm:$0xff]  }
  0x22   :  { %1815 = vmatpush1.bf16.msra.mxu0 %v2497_v5  ;;  %v2516_v17 = vld [vmem:[#allocation2 + $0x134] ss:$8 sps:$4 sm:$0xff]   ;;  %v2515_v18 = vld [vmem:[#allocation2 + $0x30] ss:$8 sps:$4 sm:$0xff]   ;;  %v2519_v19 = vld [vmem:[#allocation2 + $0x24] ss:$8 sps:$4 sm:$0xff]  }
  0x23   :  { %1816 = vmatprep.subr.bf16.mxu0 %v2501_v8  ;;  %1856 = vmatpush1.bf16.msra.mxu1 %v2500_v7  ;;  %v2518_v20 = vld [vmem:[#allocation2 + $0x130] ss:$8 sps:$4 sm:$0xff]   ;;  %v2522_v21 = vld [vmem:[#allocation2 + $0x124] ss:$8 sps:$4 sm:$0xff]   ;;  %v2521_v22 = vld [vmem:[#allocation2 + $0x20] ss:$8 sps:$4 sm:$0xff]  }
  0x24   :  { %1857 = vmatprep.subr.bf16.mxu1 %v2504_v10  ;;  %v2525_v23 = vld [vmem:[#allocation2 + $0x14] ss:$8 sps:$4 sm:$0xff]   ;;  %v2524_v24 = vld [vmem:[#allocation2 + $0x120] ss:$8 sps:$4 sm:$0xff]   ;;  %v2527_v26 = vld [vmem:[#allocation2 + $0x10] ss:$8 sps:$4 sm:$0xff]  }
  0x25   :  { %v2528_v25 = vld [vmem:[#allocation2 + $0x114] ss:$8 sps:$4 sm:$0xff]   ;;  %v2531_v27 = vld [vmem:[#allocation2 + $0x4] ss:$8 sps:$4 sm:$0xff]   ;;  %v2530_v28 = vld [vmem:[#allocation2 + $0x110] ss:$8 sps:$4 sm:$0xff]  }
  0x26   :  { %1817 = vmatpush1.bf16.msra.mxu0 %v2503_v9  ;;  %v2534_v29 = vld [vmem:[#allocation2 + $0x104] ss:$8 sps:$4 sm:$0xff]   ;;  %v2533_v30 = vld [vmem:[#allocation2] ss:$8 sps:$4 sm:$0xff]   ;;  %v2537_v31 = vld [vmem:[#allocation2 + $0xf4] ss:$8 sps:$4 sm:$0xff]  }
  0x27   :  { %1818 = vmatprep.subr.bf16.mxu0 %v2507_v11  ;;  %1858 = vmatpush1.bf16.msra.mxu1 %v2506_v12  ;;  %v2536_v32 = vld [vmem:[#allocation2 + $0x100] ss:$8 sps:$4 sm:$0xff]   ;;  %v2540_v33 = vld [vmem:[#allocation2 + $0x1f4] ss:$8 sps:$4 sm:$0xff]   ;;  %v2539_v34 = vld [vmem:[#allocation2 + $0xf0] ss:$8 sps:$4 sm:$0xff]  }
  0x28   :  { %1859 = vmatprep.subr.bf16.mxu1 %v2510_v13  ;;  %v2966_v36 = vmov 1966171168   ;;  %v2543_v38 = vld [vmem:[#allocation2 + $0xe4] ss:$8 sps:$4 sm:$0xff]   ;;  %v2542_v39 = vld [vmem:[#allocation2 + $0x1f0] ss:$8 sps:$4 sm:$0xff]  }
  0x29   :  { %v332_v37 = vunpack.c.l.s4 %v2966_v36  ;;  %v2546_v40 = vld [vmem:[#allocation2 + $0x1e4] ss:$8 sps:$4 sm:$0xff]   ;;  %v2545_v41 = vld [vmem:[#allocation2 + $0xe0] ss:$8 sps:$4 sm:$0xff]   ;;  %v2995_v42 = vshrl.u32 %v317_v35, 7  ;;  %vm1808_vm0 = vcmask 916480  }
  0x2a   :  { %1819 = vmatpush1.bf16.msra.mxu0 %v2509_v14  ;;  %v2549_v44 = vld [vmem:[#allocation2 + $0xd4] ss:$8 sps:$4 sm:$0xff]   ;;  %v2548_v45 = vld [vmem:[#allocation2 + $0x1e0] ss:$8 sps:$4 sm:$0xff]   ;;  %v2551_v47 = vld [vmem:[#allocation2 + $0xd0] ss:$8 sps:$4 sm:$0xff]  }
  0x2b   :  { %1820 = vmatprep.subr.bf16.mxu0 %v2513_v15  ;;  %1860 = vmatpush1.bf16.msra.mxu1 %v2512_v16  ;;  %v333_v43 = vunpack.c.0.s8 %v332_v37  ;;  %v2552_v46 = vld [vmem:[#allocation2 + $0x1d4] ss:$8 sps:$4 sm:$0xff]   ;;  %v2555_v49 = vld [vmem:[#allocation2 + $0xc4] ss:$8 sps:$4 sm:$0xff]   ;;  %v2554_v50 = vld [vmem:[#allocation2 + $0x1d0] ss:$8 sps:$4 sm:$0xff]  }
  0x2c   :  { %1861 = vmatprep.subr.bf16.mxu1 %v2516_v17  ;;  %v2558_v51 = vld [vmem:[#allocation2 + $0x1c4] ss:$8 sps:$4 sm:$0xff]   ;;  %v2557_v53 = vld [vmem:[#allocation2 + $0xc0] ss:$8 sps:$4 sm:$0xff]   ;;  %v2561_v55 = vld [vmem:[#allocation2 + $0xb4] ss:$8 sps:$4 sm:$0xff]  }
  0x2d   :  { %v2998_v48 = vsub.s32 %v333_v43, %v2995_v42  ;;  %v42_v52 = vld [vmem:[%s3047_s0] sm:$0xff]  ;;  %v2564_v58 = vld [vmem:[#allocation2 + $0x1b4] ss:$8 sps:$4 sm:$0xff]   ;;  %v2563_v59 = vld [vmem:[#allocation2 + $0xb0] ss:$8 sps:$4 sm:$0xff]  }
  0x2e   :  { %1821 = vmatpush1.bf16.msra.mxu0 %v2515_v18  ;;  %v2560_v56 = vld [vmem:[#allocation2 + $0x1c0] ss:$8 sps:$4 sm:$0xff]   ;;  %v2567_v61 = vld [vmem:[#allocation2 + $0xa4] ss:$8 sps:$4 sm:$0xff]   ;;  %v2566_v62 = vld [vmem:[#allocation2 + $0x1b0] ss:$8 sps:$4 sm:$0xff]   ;;  %v330_v63 = vcombine.high %v42_v52, %v42_v52 }
  0x2f   :  { %1822 = vmatprep.subr.bf16.mxu0 %v2519_v19  ;;  %1862 = vmatpush1.bf16.msra.mxu1 %v2518_v20  ;;  %v337_v54 = vrot.slane %v42_v52, %v2998_v48  ;;  %v2570_v1 = vld [vmem:[#allocation2 + $0x1a4] ss:$8 sps:$4 sm:$0xff]   ;;  %v2569_v2 = vld [vmem:[#allocation2 + $0xa0] ss:$8 sps:$4 sm:$0xff]   ;;  %v2573_v3 = vld [vmem:[#allocation2 + $0x94] ss:$8 sps:$4 sm:$0xff]  }
  0x30   :  { %1863 = vmatprep.subr.bf16.mxu1 %v2522_v21  ;;  %v2572_v4 = vld [vmem:[#allocation2 + $0x1a0] ss:$8 sps:$4 sm:$0xff]   ;;  %v3006_v5 = vrot.slane %v330_v63, %v2998_v48  ;;  %v2576_v6 = vld [vmem:[#allocation2 + $0x194] ss:$8 sps:$4 sm:$0xff]   ;;  %v2575_v7 = vld [vmem:[#allocation2 + $0x90] ss:$8 sps:$4 sm:$0xff]  }
  0x31   :  { %v345_v57 = vcombine.high %v337_v54, %v337_v54  ;;  %v2579_v8 = vld [vmem:[#allocation2 + $0x84] ss:$8 sps:$4 sm:$0xff]   ;;  %v2578_v9 = vld [vmem:[#allocation2 + $0x190] ss:$8 sps:$4 sm:$0xff]   ;;  %v2581_v12 = vld [vmem:[#allocation2 + $0x80] ss:$8 sps:$4 sm:$0xff]   ;;  %v353_v13 = vrot.slane %v337_v54, %v2998_v48 }
  0x32   :  { %1823 = vmatpush1.bf16.msra.mxu0 %v2521_v22  ;;  %v346_v10 = vcombine.high %v3006_v5, %v3006_v5  ;;  %v2582_v11 = vld [vmem:[#allocation2 + $0x184] ss:$8 sps:$4 sm:$0xff]   ;;  %v2588_v14 = vld [vmem:[#allocation2 + $0x274] ss:$8 sps:$4 sm:$0xff]   ;;  %v2585_v15 = vld [vmem:[#allocation2 + $0x180] ss:$8 sps:$4 sm:$0xff]  }
  0x33   :  { %1824 = vmatprep.subr.bf16.mxu0 %v2525_v23  ;;  %1864 = vmatpush1.bf16.msra.mxu1 %v2524_v24  ;;  %v367_v60 = vrot.slane %v345_v57, %v2998_v48  ;;  %v2591_v17 = vld [vmem:[#allocation2 + $0x374] ss:$8 sps:$4 sm:$0xff]   ;;  %v2586_v18 = vld [vmem:[#allocation2 + $0x270] ss:$8 sps:$4 sm:$0xff]   ;;  %v375_v19 = vcombine.high %v353_v13, %v353_v13  ;;  %v2594_v20 = vld [vmem:[#allocation2 + $0x264] ss:$8 sps:$4 sm:$0xff]  }
  0x34   :  { %1865 = vmatprep.subr.bf16.mxu1 %v2528_v25  ;;  %v374_v16 = vrot.slane %v346_v10, %v2998_v48  ;;  %v2589_v21 = vld [vmem:[#allocation2 + $0x370] ss:$8 sps:$4 sm:$0xff]   ;;  %v2597_v23 = vld [vmem:[#allocation2 + $0x364] ss:$8 sps:$4 sm:$0xff]   ;;  %v2592_v24 = vld [vmem:[#allocation2 + $0x260] ss:$8 sps:$4 sm:$0xff]  }
  0x35   :  { %1844 = vmatprep.mubr.bf16.mxu0 %v367_v60  ;;  %v377_v0 = vcombine.high %v367_v60, %v367_v60  ;;  %v2600_v25 = vld [vmem:[#allocation2 + $0x254] ss:$8 sps:$4 sm:$0xff]   ;;  %v2610_v36 = vld [vmem:[#allocation2 + $0x230] ss:$8 sps:$4 sm:$0xff]   ;;  %v2618_v37 = vld [vmem:[#allocation2 + $0x224] ss:$8 sps:$4 sm:$0xff]  }
  0x36   :  { %1825 = vmatpush1.bf16.msra.mxu0 %v2527_v26  ;;  %v378_v22 = vcombine.high %v374_v16, %v374_v16  ;;  %v2595_v26 = vld [vmem:[#allocation2 + $0x360] ss:$8 sps:$4 sm:$0xff]   ;;  %v2615_v35 = vld [vmem:[#allocation2 + $0x334] ss:$8 sps:$4 sm:$0xff]   ;;  %v2634_v54 = vld [vmem:[#allocation2 + $0x2f0] ss:$8 sps:$4 sm:$0xff]  }
  0x37   :  { %1826 = vmatprep.subr.bf16.mxu0 %v2531_v27  ;;  %1866 = vmatpush1.bf16.msra.mxu1 %v2530_v28  ;;  %v2603_v27 = vld [vmem:[#allocation2 + $0x354] ss:$8 sps:$4 sm:$0xff]   ;;  %v2598_v28 = vld [vmem:[#allocation2 + $0x250] ss:$8 sps:$4 sm:$0xff]   ;;  %v2619_v43 = vld [vmem:[#allocation2 + $0x320] ss:$8 sps:$4 sm:$0xff]  }
  0x38   :  { %1867 = vmatprep.subr.bf16.mxu1 %v2534_v29  ;;  %1885 = vmatprep.mubr.bf16.mxu1 %v377_v0  ;;  %v2606_v29 = vld [vmem:[#allocation2 + $0x244] ss:$8 sps:$4 sm:$0xff]   ;;  %v2631_v52 = vld [vmem:[#allocation2 + $0x300] ss:$8 sps:$4 sm:$0xff]   ;;  %v2649_v0 = vld [vmem:[#allocation2 + $0x3d0] ss:$8 sps:$4 sm:$0xff]  }
  0x39   :  { %v2645_v57 = vld [vmem:[#allocation2 + $0x3e4] ss:$8 sps:$4 sm:$0xff]   ;;  %v2643_v60 = vld [vmem:[#allocation2 + $0x3e0] ss:$8 sps:$4 sm:$0xff]  }
  0x3a   :  { %1827 = vmatpush1.bf16.msra.mxu0 %v2533_v30  ;;  %v2601_v30 = vld [vmem:[#allocation2 + $0x350] ss:$8 sps:$4 sm:$0xff]   ;;  %v2654_v63 = vld [vmem:[#allocation2 + $0x2c4] ss:$8 sps:$4 sm:$0xff]  }
  0x3b   :  { %1828 = vmatprep.subr.bf16.mxu0 %v2537_v31  ;;  %1868 = vmatpush1.bf16.msra.mxu1 %v2536_v32  ;;  %v2609_v31 = vld [vmem:[#allocation2 + $0x344] ss:$8 sps:$4 sm:$0xff]   ;;  %v2604_v32 = vld [vmem:[#allocation2 + $0x240] ss:$8 sps:$4 sm:$0xff]  }
  0x3c   :  { %1869 = vmatprep.subr.bf16.mxu1 %v2540_v33  ;;  %v2612_v33 = vld [vmem:[#allocation2 + $0x234] ss:$8 sps:$4 sm:$0xff]   ;;  %v2669_v10 = vld [vmem:[#allocation2 + $0x3a4] ss:$8 sps:$4 sm:$0xff]  }
  0x3e   :  { %1829 = vmatpush2.bf16.msra.mxu0 %v2539_v34  ;;  %v2607_v34 = vld [vmem:[#allocation2 + $0x340] ss:$8 sps:$4 sm:$0xff]  }
  0x3f   :  { %1830 = vmatprep.subr.bf16.mxu0 %v2543_v38  ;;  %1870 = vmatpush2.bf16.msra.mxu1 %v2542_v39  ;;  %v2613_v38 = vld [vmem:[#allocation2 + $0x330] ss:$8 sps:$4 sm:$0xff]   ;;  %v2621_v39 = vld [vmem:[#allocation2 + $0x324] ss:$8 sps:$4 sm:$0xff]  }
  0x40   :  { %1871 = vmatprep.subr.bf16.mxu1 %v2546_v40  ;;  %v2616_v40 = vld [vmem:[#allocation2 + $0x220] ss:$8 sps:$4 sm:$0xff]  }
  0x42   :  { %1831 = vmatpush2.bf16.msra.mxu0 %v2545_v41  ;;  %v2624_v41 = vld [vmem:[#allocation2 + $0x214] ss:$8 sps:$4 sm:$0xff]  }
  0x43   :  { %1832 = vmatprep.subr.bf16.mxu0 %v2549_v44  ;;  %1872 = vmatpush2.bf16.msra.mxu1 %v2548_v45  ;;  %v2627_v44 = vld [vmem:[#allocation2 + $0x314] ss:$8 sps:$4 sm:$0xff]   ;;  %v2622_v45 = vld [vmem:[#allocation2 + $0x210] ss:$8 sps:$4 sm:$0xff]  }
  0x44   :  { %1873 = vmatprep.subr.bf16.mxu1 %v2552_v46  ;;  %v2630_v46 = vld [vmem:[#allocation2 + $0x204] ss:$8 sps:$4 sm:$0xff]  }
  0x46   :  { %1833 = vmatpush2.bf16.msra.mxu0 %v2551_v47  ;;  %v2625_v47 = vld [vmem:[#allocation2 + $0x310] ss:$8 sps:$4 sm:$0xff]  }
  0x47   :  { %1834 = vmatprep.subr.bf16.mxu0 %v2555_v49  ;;  %1874 = vmatpush2.bf16.msra.mxu1 %v2554_v50  ;;  %v2633_v49 = vld [vmem:[#allocation2 + $0x304] ss:$8 sps:$4 sm:$0xff]   ;;  %v2628_v50 = vld [vmem:[#allocation2 + $0x200] ss:$8 sps:$4 sm:$0xff]  }
  0x48   :  { %1875 = vmatprep.subr.bf16.mxu1 %v2558_v51  ;;  %v2636_v51 = vld [vmem:[#allocation2 + $0x2f4] ss:$8 sps:$4 sm:$0xff]  }
  0x4a   :  { %1835 = vmatpush2.bf16.msra.mxu0 %v2557_v53  ;;  %v2639_v53 = vld [vmem:[#allocation2 + $0x3f4] ss:$8 sps:$4 sm:$0xff]  }
  0x4b   :  { %1836 = vmatprep.subr.bf16.mxu0 %v2561_v55  ;;  %1876 = vmatpush2.bf16.msra.mxu1 %v2560_v56  ;;  %v2642_v55 = vld [vmem:[#allocation2 + $0x2e4] ss:$8 sps:$4 sm:$0xff]   ;;  %v2637_v56 = vld [vmem:[#allocation2 + $0x3f0] ss:$8 sps:$4 sm:$0xff]  }
  0x4c   :  { %1877 = vmatprep.subr.bf16.mxu1 %v2564_v58  ;;  %v2640_v58 = vld [vmem:[#allocation2 + $0x2e0] ss:$8 sps:$4 sm:$0xff]  }
  0x4e   :  { %1837 = vmatpush2.bf16.msra.mxu0 %v2563_v59  ;;  %v2648_v59 = vld [vmem:[#allocation2 + $0x2d4] ss:$8 sps:$4 sm:$0xff]  }
  0x4f   :  { %1838 = vmatprep.subr.bf16.mxu0 %v2567_v61  ;;  %1878 = vmatpush2.bf16.msra.mxu1 %v2566_v62  ;;  %v2651_v61 = vld [vmem:[#allocation2 + $0x3d4] ss:$8 sps:$4 sm:$0xff]   ;;  %v2646_v62 = vld [vmem:[#allocation2 + $0x2d0] ss:$8 sps:$4 sm:$0xff]  }
  0x50   :  { %1879 = vmatprep.subr.bf16.mxu1 %v2570_v1  ;;  %v2657_v1 = vld [vmem:[#allocation2 + $0x3c4] ss:$8 sps:$4 sm:$0xff]  }
  0x52   :  { %1839 = vmatpush2.bf16.msra.mxu0 %v2569_v2  ;;  %v2652_v2 = vld [vmem:[#allocation2 + $0x2c0] ss:$8 sps:$4 sm:$0xff]  }
  0x53   :  { %1840 = vmatprep.subr.bf16.mxu0 %v2573_v3  ;;  %1880 = vmatpush2.bf16.msra.mxu1 %v2572_v4  ;;  %v2660_v3 = vld [vmem:[#allocation2 + $0x2b4] ss:$8 sps:$4 sm:$0xff]   ;;  %v2655_v4 = vld [vmem:[#allocation2 + $0x3c0] ss:$8 sps:$4 sm:$0xff]  }
  0x54   :  { %1881 = vmatprep.subr.bf16.mxu1 %v2576_v6  ;;  %v2663_v6 = vld [vmem:[#allocation2 + $0x3b4] ss:$8 sps:$4 sm:$0xff]  }
  0x56   :  { %1841 = vmatpush2.bf16.msra.mxu0 %v2575_v7  ;;  %v2658_v7 = vld [vmem:[#allocation2 + $0x2b0] ss:$8 sps:$4 sm:$0xff]  }
  0x57   :  { %1842 = vmatprep.subr.bf16.mxu0 %v2579_v8  ;;  %1882 = vmatpush2.bf16.msra.mxu1 %v2578_v9  ;;  %v2666_v8 = vld [vmem:[#allocation2 + $0x2a4] ss:$8 sps:$4 sm:$0xff]   ;;  %v2661_v9 = vld [vmem:[#allocation2 + $0x3b0] ss:$8 sps:$4 sm:$0xff]  }
  0x58   :  { %1883 = vmatprep.subr.bf16.mxu1 %v2582_v11  ;;  %v2664_v11 = vld [vmem:[#allocation2 + $0x2a0] ss:$8 sps:$4 sm:$0xff]  }
  0x5a   :  { %1843 = vmatpush2.bf16.msra.mxu0 %v2581_v12  ;;  %v2672_v12 = vld [vmem:[#allocation2 + $0x294] ss:$8 sps:$4 sm:$0xff]  }
  0x5b   :  { %1894 = vmatprep.subr.bf16.mxu0 %v2588_v14  ;;  %1884 = vmatpush2.bf16.msra.mxu1 %v2585_v15  ;;  %v2675_v14 = vld [vmem:[#allocation2 + $0x394] ss:$8 sps:$4 sm:$0xff]   ;;  %v2670_v15 = vld [vmem:[#allocation2 + $0x290] ss:$8 sps:$4 sm:$0xff]  }
  0x5c   :  { %1935 = vmatprep.subr.bf16.mxu1 %v2591_v17  ;;  %v2673_v17 = vld [vmem:[#allocation2 + $0x390] ss:$8 sps:$4 sm:$0xff]  }
  0x5d   :  { %1845 = vmatmul.mubr.bf16.vlgmr.msra.gmra.mxu0 %v353_v13  ;;  %v2667_v13 = vld [vmem:[#allocation2 + $0x3a0] ss:$8 sps:$4 sm:$0xff]  }
  0x5e   :  { %1895 = vmatpush1.bf16.msra.mxu0 %v2586_v18  ;;  %1926 = vmatprep.mubr.bf16.mxu0 %v374_v16  ;;  %v2678_v16 = vld [vmem:[#allocation2 + $0x284] ss:$8 sps:$4 sm:$0xff]  }
  0x5f   :  { %1886 = vmatmul.mubr.bf16.vlgmr.msra.gmra.mxu1 %v375_v19  ;;  %1896 = vmatprep.subr.bf16.mxu0 %v2594_v20  ;;  %v2681_v18 = vld [vmem:[#allocation2 + $0x384] ss:$8 sps:$4 sm:$0xff]   ;;  %v2676_v19 = vld [vmem:[#allocation2 + $0x280] ss:$8 sps:$4 sm:$0xff]   ;;  %v360_v20 = vrot.slane %v3006_v5, %v2998_v48 }
  0x60   :  { %1936 = vmatpush1.bf16.msra.mxu1 %v2589_v21  ;;  %1967 = vmatprep.mubr.bf16.mxu1 %v378_v22  ;;  %v2684_v21 = vld [vmem:[#allocation2 + $0x474] ss:$8 sps:$4 sm:$0xff]   ;;  %v2679_v22 = vld [vmem:[#allocation2 + $0x380] ss:$8 sps:$4 sm:$0xff]  }
  0x61   :  { %1937 = vmatprep.subr.bf16.mxu1 %v2597_v23  ;;  %v2687_v23 = vld [vmem:[#allocation2 + $0x574] ss:$8 sps:$4 sm:$0xff]  }
  0x62   :  { %1897 = vmatpush1.bf16.msra.mxu0 %v2592_v24  ;;  %v2682_v24 = vld [vmem:[#allocation2 + $0x470] ss:$8 sps:$4 sm:$0xff]  }
  0x63   :  { %1898 = vmatprep.subr.bf16.mxu0 %v2600_v25  ;;  %v376_v25 = vcombine.high %v360_v20, %v360_v20 }
  0x64   :  { %1938 = vmatpush1.bf16.msra.mxu1 %v2595_v26  ;;  %v2690_v26 = vld [vmem:[#allocation2 + $0x464] ss:$8 sps:$4 sm:$0xff]  }
  0x65   :  { %1939 = vmatprep.subr.bf16.mxu1 %v2603_v27  ;;  %v3017_v27 = vld [vmem:[%s3047_s0 + $0x8] sm:$0xff] }
  0x66   :  { %1899 = vmatpush1.bf16.msra.mxu0 %v2598_v28  ;;  %v2685_v28 = vld [vmem:[#allocation2 + $0x570] ss:$8 sps:$4 sm:$0xff]   ;;  %v3021_v5 = vrot.slane %v3017_v27, %v2998_v48 }
  0x67   :  { %1900 = vmatprep.subr.bf16.mxu0 %v2606_v29  ;;  %v2693_v29 = vld [vmem:[#allocation2 + $0x564] ss:$8 sps:$4 sm:$0xff]  }
  0x68   :  { %1940 = vmatpush1.bf16.msra.mxu1 %v2601_v30  ;;  %v2688_v30 = vld [vmem:[#allocation2 + $0x460] ss:$8 sps:$4 sm:$0xff]  }
  0x69   :  { %1941 = vmatprep.subr.bf16.mxu1 %v2609_v31  ;;  %v394_v31 = vcombine.high %v3021_v5, %v3021_v5 }
  0x6a   :  { %1901 = vmatpush1.bf16.msra.mxu0 %v2604_v32  ;;  %v2696_v32 = vld [vmem:[#allocation2 + $0x454] ss:$8 sps:$4 sm:$0xff]  }
  0x6b   :  { %1902 = vmatprep.subr.bf16.mxu0 %v2612_v33  ;;  %v2691_v33 = vld [vmem:[#allocation2 + $0x560] ss:$8 sps:$4 sm:$0xff]  }
  0x6c   :  { %1942 = vmatpush1.bf16.msra.mxu1 %v2607_v34  ;;  %v416_v34 = vrot.slane %v394_v31, %v2998_v48  ;;  %v2772_v31 = vld [vmem:[#allocation2 + $0x480] ss:$8 sps:$4 sm:$0xff]  }
  0x6d   :  { %1943 = vmatprep.subr.bf16.mxu1 %v2615_v35  ;;  %v2699_v35 = vld [vmem:[#allocation2 + $0x554] ss:$8 sps:$4 sm:$0xff]  }
  0x6e   :  { %1903 = vmatpush1.bf16.msra.mxu0 %v2610_v36  ;;  %v2694_v36 = vld [vmem:[#allocation2 + $0x450] ss:$8 sps:$4 sm:$0xff]  }
  0x6f   :  { %1904 = vmatprep.subr.bf16.mxu0 %v2618_v37  ;;  %v426_v37 = vcombine.high %v416_v34, %v416_v34 }
  0x70   :  { %1944 = vmatpush1.bf16.msra.mxu1 %v2613_v38  ;;  %v2702_v38 = vld [vmem:[#allocation2 + $0x444] ss:$8 sps:$4 sm:$0xff]  }
  0x71   :  { %1945 = vmatprep.subr.bf16.mxu1 %v2621_v39  ;;  %v2697_v39 = vld [vmem:[#allocation2 + $0x550] ss:$8 sps:$4 sm:$0xff]  }
  0x72   :  { %1905 = vmatpush1.bf16.msra.mxu0 %v2616_v40  ;;  %v2705_v40 = vld [vmem:[#allocation2 + $0x544] ss:$8 sps:$4 sm:$0xff]  }
  0x73   :  { %1906 = vmatprep.subr.bf16.mxu0 %v2624_v41  ;;  %v2700_v41 = vld [vmem:[#allocation2 + $0x440] ss:$8 sps:$4 sm:$0xff]  }
  0x74   :  { %1946 = vmatpush1.bf16.msra.mxu1 %v2619_v43  ;;  %v2708_v43 = vld [vmem:[#allocation2 + $0x434] ss:$8 sps:$4 sm:$0xff]  }
  0x75   :  { %1947 = vmatprep.subr.bf16.mxu1 %v2627_v44  ;;  %v2703_v44 = vld [vmem:[#allocation2 + $0x540] ss:$8 sps:$4 sm:$0xff]  }
  0x76   :  { %1907 = vmatpush1.bf16.msra.mxu0 %v2622_v45  ;;  %v2711_v45 = vld [vmem:[#allocation2 + $0x534] ss:$8 sps:$4 sm:$0xff]  }
  0x77   :  { %1908 = vmatprep.subr.bf16.mxu0 %v2630_v46  ;;  %v2706_v46 = vld [vmem:[#allocation2 + $0x430] ss:$8 sps:$4 sm:$0xff]  }
  0x78   :  { %1948 = vmatpush1.bf16.msra.mxu1 %v2625_v47  ;;  %v2714_v47 = vld [vmem:[#allocation2 + $0x424] ss:$8 sps:$4 sm:$0xff]  }
  0x79   :  { %1949 = vmatprep.subr.bf16.mxu1 %v2633_v49  ;;  %v2709_v49 = vld [vmem:[#allocation2 + $0x530] ss:$8 sps:$4 sm:$0xff]  }
  0x7a   :  { %1909 = vmatpush1.bf16.msra.mxu0 %v2628_v50  ;;  %v2717_v50 = vld [vmem:[#allocation2 + $0x524] ss:$8 sps:$4 sm:$0xff]  }
  0x7b   :  { %1910 = vmatprep.subr.bf16.mxu0 %v2636_v51  ;;  %v2712_v51 = vld [vmem:[#allocation2 + $0x420] ss:$8 sps:$4 sm:$0xff]  }
  0x7c   :  { %1950 = vmatpush1.bf16.msra.mxu1 %v2631_v52  ;;  %v2720_v52 = vld [vmem:[#allocation2 + $0x414] ss:$8 sps:$4 sm:$0xff]  }
  0x7d   :  { %1951 = vmatprep.subr.bf16.mxu1 %v2639_v53  ;;  %v2715_v53 = vld [vmem:[#allocation2 + $0x520] ss:$8 sps:$4 sm:$0xff]  }
  0x7e   :  { %1911 = vmatpush2.bf16.msra.mxu0 %v2634_v54  ;;  %v2723_v54 = vld [vmem:[#allocation2 + $0x514] ss:$8 sps:$4 sm:$0xff]  }
  0x7f   :  { %1912 = vmatprep.subr.bf16.mxu0 %v2642_v55  ;;  %v2718_v55 = vld [vmem:[#allocation2 + $0x410] ss:$8 sps:$4 sm:$0xff]  }
  0x80   :  { %1952 = vmatpush2.bf16.msra.mxu1 %v2637_v56  ;;  %v2726_v56 = vld [vmem:[#allocation2 + $0x404] ss:$8 sps:$4 sm:$0xff]  }
  0x81   :  { %1953 = vmatprep.subr.bf16.mxu1 %v2645_v57  ;;  %v2721_v57 = vld [vmem:[#allocation2 + $0x510] ss:$8 sps:$4 sm:$0xff]  }
  0x82   :  { %1913 = vmatpush2.bf16.msra.mxu0 %v2640_v58  ;;  %v2729_v58 = vld [vmem:[#allocation2 + $0x504] ss:$8 sps:$4 sm:$0xff]  }
  0x83   :  { %1914 = vmatprep.subr.bf16.mxu0 %v2648_v59  ;;  %v2724_v59 = vld [vmem:[#allocation2 + $0x400] ss:$8 sps:$4 sm:$0xff]  }
  0x84   :  { %1954 = vmatpush2.bf16.msra.mxu1 %v2643_v60  ;;  %v2732_v60 = vld [vmem:[#allocation2 + $0x4f4] ss:$8 sps:$4 sm:$0xff]  }
  0x85   :  { %1955 = vmatprep.subr.bf16.mxu1 %v2651_v61  ;;  %v2727_v61 = vld [vmem:[#allocation2 + $0x500] ss:$8 sps:$4 sm:$0xff]  }
  0x86   :  { %1915 = vmatpush2.bf16.msra.mxu0 %v2646_v62  ;;  %v2735_v62 = vld [vmem:[#allocation2 + $0x5f4] ss:$8 sps:$4 sm:$0xff]  }
  0x87   :  { %1916 = vmatprep.subr.bf16.mxu0 %v2654_v63  ;;  %v2730_v63 = vld [vmem:[#allocation2 + $0x4f0] ss:$8 sps:$4 sm:$0xff]  }
  0x88   :  { %1956 = vmatpush2.bf16.msra.mxu1 %v2649_v0  ;;  %v2738_v0 = vld [vmem:[#allocation2 + $0x4e4] ss:$8 sps:$4 sm:$0xff]  }
  0x89   :  { %1957 = vmatprep.subr.bf16.mxu1 %v2657_v1  ;;  %v2733_v1 = vld [vmem:[#allocation2 + $0x5f0] ss:$8 sps:$4 sm:$0xff]  }
  0x8a   :  { %1917 = vmatpush2.bf16.msra.mxu0 %v2652_v2  ;;  %v2741_v2 = vld [vmem:[#allocation2 + $0x5e4] ss:$8 sps:$4 sm:$0xff]  }
  0x8b   :  { %1918 = vmatprep.subr.bf16.mxu0 %v2660_v3  ;;  %v2736_v3 = vld [vmem:[#allocation2 + $0x4e0] ss:$8 sps:$4 sm:$0xff]  }
  0x8c   :  { %1958 = vmatpush2.bf16.msra.mxu1 %v2655_v4  ;;  %v2744_v4 = vld [vmem:[#allocation2 + $0x4d4] ss:$8 sps:$4 sm:$0xff]  }
  0x8d   :  { %1959 = vmatprep.subr.bf16.mxu1 %v2663_v6  ;;  %v2739_v6 = vld [vmem:[#allocation2 + $0x5e0] ss:$8 sps:$4 sm:$0xff]  }
  0x8e   :  { %1919 = vmatpush2.bf16.msra.mxu0 %v2658_v7  ;;  %v2747_v7 = vld [vmem:[#allocation2 + $0x5d4] ss:$8 sps:$4 sm:$0xff]  }
  0x8f   :  { %1920 = vmatprep.subr.bf16.mxu0 %v2666_v8  ;;  %v2742_v8 = vld [vmem:[#allocation2 + $0x4d0] ss:$8 sps:$4 sm:$0xff]  }
  0x90   :  { %1960 = vmatpush2.bf16.msra.mxu1 %v2661_v9  ;;  %v2750_v9 = vld [vmem:[#allocation2 + $0x4c4] ss:$8 sps:$4 sm:$0xff]  }
  0x91   :  { %1961 = vmatprep.subr.bf16.mxu1 %v2669_v10  ;;  %v2745_v10 = vld [vmem:[#allocation2 + $0x5d0] ss:$8 sps:$4 sm:$0xff]  }
  0x92   :  { %1921 = vmatpush2.bf16.msra.mxu0 %v2664_v11  ;;  %v2753_v11 = vld [vmem:[#allocation2 + $0x5c4] ss:$8 sps:$4 sm:$0xff]  }
  0x93   :  { %1922 = vmatprep.subr.bf16.mxu0 %v2672_v12  ;;  %v2748_v12 = vld [vmem:[#allocation2 + $0x4c0] ss:$8 sps:$4 sm:$0xff]  }
  0x94   :  { %1962 = vmatpush2.bf16.msra.mxu1 %v2667_v13  ;;  %v2756_v13 = vld [vmem:[#allocation2 + $0x4b4] ss:$8 sps:$4 sm:$0xff]  }
  0x95   :  { %1963 = vmatprep.subr.bf16.mxu1 %v2675_v14  ;;  %v2751_v14 = vld [vmem:[#allocation2 + $0x5c0] ss:$8 sps:$4 sm:$0xff]  }
  0x96   :  { %1923 = vmatpush2.bf16.msra.mxu0 %v2670_v15  ;;  %v2759_v15 = vld [vmem:[#allocation2 + $0x5b4] ss:$8 sps:$4 sm:$0xff]  }
  0x97   :  { %1924 = vmatprep.subr.bf16.mxu0 %v2678_v16  ;;  %v2754_v16 = vld [vmem:[#allocation2 + $0x4b0] ss:$8 sps:$4 sm:$0xff]  }
  0x98   :  { %1964 = vmatpush2.bf16.msra.mxu1 %v2673_v17  ;;  %v2762_v17 = vld [vmem:[#allocation2 + $0x4a4] ss:$8 sps:$4 sm:$0xff]  }
  0x99   :  { %1965 = vmatprep.subr.bf16.mxu1 %v2681_v18  ;;  %v2757_v18 = vld [vmem:[#allocation2 + $0x5b0] ss:$8 sps:$4 sm:$0xff]  }
  0x9a   :  { %1925 = vmatpush2.bf16.msra.mxu0 %v2676_v19  ;;  %v379_v19 = vcombine.high %v3017_v27, %v3017_v27 }
  0x9b   :  { %1976 = vmatprep.subr.bf16.mxu0 %v2684_v21  ;;  %v2760_v21 = vld [vmem:[#allocation2 + $0x4a0] ss:$8 sps:$4 sm:$0xff]  }
  0x9c   :  { %1966 = vmatpush2.bf16.msra.mxu1 %v2679_v22  ;;  %v2768_v22 = vld [vmem:[#allocation2 + $0x494] ss:$8 sps:$4 sm:$0xff]  }
  0x9d   :  { %1927 = vmatmul.mubr.bf16.vlgmr.msra.gmra.mxu0 %v360_v20  ;;  %2017 = vmatprep.subr.bf16.mxu1 %v2687_v23  ;;  %v2765_v20 = vld [vmem:[#allocation2 + $0x5a4] ss:$8 sps:$4 sm:$0xff]   ;;  %v2763_v23 = vld [vmem:[#allocation2 + $0x5a0] ss:$8 sps:$4 sm:$0xff]  }
  0x9e   :  { %1977 = vmatpush1.bf16.msra.mxu0 %v2682_v24  ;;  %2008 = vmatprep.mubr.bf16.mxu0 %v416_v34  ;;  %v3029_v24 = vrot.slane %v379_v19, %v2998_v48  ;;  %v2775_v34 = vld [vmem:[#allocation2 + $0x580] ss:$8 sps:$4 sm:$0xff]   ;;  %v2841_v19 = vld [vmem:[#allocation2 + $0x7d0] ss:$8 sps:$4 sm:$0xff]  }
  0x9f   :  { %1968 = vmatmul.mubr.bf16.vlgmr.msra.gmra.mxu1 %v376_v25  ;;  %1978 = vmatprep.subr.bf16.mxu0 %v2690_v26  ;;  %v2771_v25 = vld [vmem:[#allocation2 + $0x594] ss:$8 sps:$4 sm:$0xff]   ;;  %v2766_v26 = vld [vmem:[#allocation2 + $0x490] ss:$8 sps:$4 sm:$0xff]  }
  0xa0   :  { %2018 = vmatpush1.bf16.msra.mxu1 %v2685_v28  ;;  %2049 = vmatprep.mubr.bf16.mxu1 %v426_v37  ;;  %v2774_v28 = vld [vmem:[#allocation2 + $0x484] ss:$8 sps:$4 sm:$0xff]   ;;  %v395_v27 = vcombine.high %v3029_v24, %v3029_v24  ;;  %v2778_v37 = vld [vmem:[#allocation2 + $0x670] ss:$8 sps:$4 sm:$0xff]  }
  0xa1   :  { %2019 = vmatprep.subr.bf16.mxu1 %v2693_v29  ;;  %v2769_v29 = vld [vmem:[#allocation2 + $0x590] ss:$8 sps:$4 sm:$0xff]  }
  0xa2   :  { %1979 = vmatpush1.bf16.msra.mxu0 %v2688_v30  ;;  %v2777_v30 = vld [vmem:[#allocation2 + $0x584] ss:$8 sps:$4 sm:$0xff]  }
  0xa3   :  { %1980 = vmatprep.subr.bf16.mxu0 %v2696_v32  ;;  %v402_v32 = vrot.slane %v3021_v5, %v2998_v48  ;;  %v2784_v5 = vld [vmem:[#allocation2 + $0x660] ss:$8 sps:$4 sm:$0xff]  }
  0xa4   :  { %2020 = vmatpush1.bf16.msra.mxu1 %v2691_v33  ;;  %v2780_v33 = vld [vmem:[#allocation2 + $0x674] ss:$8 sps:$4 sm:$0xff]  }
  0xa5   :  { %2021 = vmatprep.subr.bf16.mxu1 %v2699_v35  ;;  %v423_v35 = vrot.slane %v395_v27, %v2998_v48  ;;  %v2861_v27 = vld [vmem:[#allocation2 + $0x7a4] ss:$8 sps:$4 sm:$0xff]  }
  0xa6   :  { %1981 = vmatpush1.bf16.msra.mxu0 %v2694_v36  ;;  %v2783_v36 = vld [vmem:[#allocation2 + $0x774] ss:$8 sps:$4 sm:$0xff]  }
  0xa7   :  { %1982 = vmatprep.subr.bf16.mxu0 %v2702_v38  ;;  %v424_v38 = vcombine.high %v402_v32, %v402_v32 }
  0xa8   :  { %2022 = vmatpush1.bf16.msra.mxu1 %v2697_v39  ;;  %v2786_v39 = vld [vmem:[#allocation2 + $0x664] ss:$8 sps:$4 sm:$0xff]  }
  0xa9   :  { %2023 = vmatprep.subr.bf16.mxu1 %v2705_v40  ;;  %v2781_v40 = vld [vmem:[#allocation2 + $0x770] ss:$8 sps:$4 sm:$0xff]  }
  0xaa   :  { %1983 = vmatpush1.bf16.msra.mxu0 %v2700_v41  ;;  %v427_v41 = vcombine.high %v423_v35, %v423_v35 }
  0xab   :  { %1984 = vmatprep.subr.bf16.mxu0 %v2708_v43  ;;  %v2789_v43 = vld [vmem:[#allocation2 + $0x764] ss:$8 sps:$4 sm:$0xff]  }
  0xac   :  { %2024 = vmatpush1.bf16.msra.mxu1 %v2703_v44  ;;  %v2792_v44 = vld [vmem:[#allocation2 + $0x654] ss:$8 sps:$4 sm:$0xff]  }
  0xad   :  { %2025 = vmatprep.subr.bf16.mxu1 %v2711_v45  ;;  %v2787_v45 = vld [vmem:[#allocation2 + $0x760] ss:$8 sps:$4 sm:$0xff]  }
  0xae   :  { %1985 = vmatpush1.bf16.msra.mxu0 %v2706_v46  ;;  %v2795_v46 = vld [vmem:[#allocation2 + $0x754] ss:$8 sps:$4 sm:$0xff]  }
  0xaf   :  { %1986 = vmatprep.subr.bf16.mxu0 %v2714_v47  ;;  %v2790_v47 = vld [vmem:[#allocation2 + $0x650] ss:$8 sps:$4 sm:$0xff]  }
  0xb0   :  { %2026 = vmatpush1.bf16.msra.mxu1 %v2709_v49  ;;  %v2798_v49 = vld [vmem:[#allocation2 + $0x644] ss:$8 sps:$4 sm:$0xff]  }
  0xb1   :  { %2027 = vmatprep.subr.bf16.mxu1 %v2717_v50  ;;  %v2793_v50 = vld [vmem:[#allocation2 + $0x750] ss:$8 sps:$4 sm:$0xff]  }
  0xb2   :  { %1987 = vmatpush1.bf16.msra.mxu0 %v2712_v51  ;;  %v2801_v51 = vld [vmem:[#allocation2 + $0x744] ss:$8 sps:$4 sm:$0xff]  }
  0xb3   :  { %1988 = vmatprep.subr.bf16.mxu0 %v2720_v52  ;;  %v2796_v52 = vld [vmem:[#allocation2 + $0x640] ss:$8 sps:$4 sm:$0xff]  }
  0xb4   :  { %2028 = vmatpush1.bf16.msra.mxu1 %v2715_v53  ;;  %v2804_v53 = vld [vmem:[#allocation2 + $0x634] ss:$8 sps:$4 sm:$0xff]  }
  0xb5   :  { %2029 = vmatprep.subr.bf16.mxu1 %v2723_v54  ;;  %v2799_v54 = vld [vmem:[#allocation2 + $0x740] ss:$8 sps:$4 sm:$0xff]  }
  0xb6   :  { %1989 = vmatpush1.bf16.msra.mxu0 %v2718_v55  ;;  %v2807_v55 = vld [vmem:[#allocation2 + $0x734] ss:$8 sps:$4 sm:$0xff]  }
  0xb7   :  { %1990 = vmatprep.subr.bf16.mxu0 %v2726_v56  ;;  %v2802_v56 = vld [vmem:[#allocation2 + $0x630] ss:$8 sps:$4 sm:$0xff]  }
  0xb8   :  { %2030 = vmatpush1.bf16.msra.mxu1 %v2721_v57  ;;  %v2810_v57 = vld [vmem:[#allocation2 + $0x624] ss:$8 sps:$4 sm:$0xff]  }
  0xb9   :  { %2031 = vmatprep.subr.bf16.mxu1 %v2729_v58  ;;  %v2805_v58 = vld [vmem:[#allocation2 + $0x730] ss:$8 sps:$4 sm:$0xff]  }
  0xba   :  { %1991 = vmatpush1.bf16.msra.mxu0 %v2724_v59  ;;  %v2813_v59 = vld [vmem:[#allocation2 + $0x724] ss:$8 sps:$4 sm:$0xff]  }
  0xbb   :  { %1992 = vmatprep.subr.bf16.mxu0 %v2732_v60  ;;  %v2808_v60 = vld [vmem:[#allocation2 + $0x620] ss:$8 sps:$4 sm:$0xff]  }
  0xbc   :  { %2032 = vmatpush1.bf16.msra.mxu1 %v2727_v61  ;;  %v2816_v61 = vld [vmem:[#allocation2 + $0x614] ss:$8 sps:$4 sm:$0xff]  }
  0xbd   :  { %2033 = vmatprep.subr.bf16.mxu1 %v2735_v62  ;;  %v2811_v62 = vld [vmem:[#allocation2 + $0x720] ss:$8 sps:$4 sm:$0xff]  }
  0xbe   :  { %1993 = vmatpush2.bf16.msra.mxu0 %v2730_v63  ;;  %v2819_v63 = vld [vmem:[#allocation2 + $0x714] ss:$8 sps:$4 sm:$0xff]  }
  0xbf   :  { %1994 = vmatprep.subr.bf16.mxu0 %v2738_v0  ;;  %v2814_v0 = vld [vmem:[#allocation2 + $0x610] ss:$8 sps:$4 sm:$0xff]  }
  0xc0   :  { %2034 = vmatpush2.bf16.msra.mxu1 %v2733_v1  ;;  %v2822_v1 = vld [vmem:[#allocation2 + $0x604] ss:$8 sps:$4 sm:$0xff]  }
  0xc1   :  { %2035 = vmatprep.subr.bf16.mxu1 %v2741_v2  ;;  %v2817_v2 = vld [vmem:[#allocation2 + $0x710] ss:$8 sps:$4 sm:$0xff]  }
  0xc2   :  { %1995 = vmatpush2.bf16.msra.mxu0 %v2736_v3  ;;  %v2825_v3 = vld [vmem:[#allocation2 + $0x704] ss:$8 sps:$4 sm:$0xff]  }
  0xc3   :  { %1996 = vmatprep.subr.bf16.mxu0 %v2744_v4  ;;  %v2820_v4 = vld [vmem:[#allocation2 + $0x600] ss:$8 sps:$4 sm:$0xff]  }
  0xc4   :  { %2036 = vmatpush2.bf16.msra.mxu1 %v2739_v6  ;;  %v2828_v6 = vld [vmem:[#allocation2 + $0x6f4] ss:$8 sps:$4 sm:$0xff]  }
  0xc5   :  { %2037 = vmatprep.subr.bf16.mxu1 %v2747_v7  ;;  %v2823_v7 = vld [vmem:[#allocation2 + $0x700] ss:$8 sps:$4 sm:$0xff]  }
  0xc6   :  { %1997 = vmatpush2.bf16.msra.mxu0 %v2742_v8  ;;  %v2831_v8 = vld [vmem:[#allocation2 + $0x7f4] ss:$8 sps:$4 sm:$0xff]  }
  0xc7   :  { %1998 = vmatprep.subr.bf16.mxu0 %v2750_v9  ;;  %v2826_v9 = vld [vmem:[#allocation2 + $0x6f0] ss:$8 sps:$4 sm:$0xff]  }
  0xc8   :  { %2038 = vmatpush2.bf16.msra.mxu1 %v2745_v10  ;;  %v2834_v10 = vld [vmem:[#allocation2 + $0x6e4] ss:$8 sps:$4 sm:$0xff]  }
  0xc9   :  { %2039 = vmatprep.subr.bf16.mxu1 %v2753_v11  ;;  %v2829_v11 = vld [vmem:[#allocation2 + $0x7f0] ss:$8 sps:$4 sm:$0xff]  }
  0xca   :  { %1999 = vmatpush2.bf16.msra.mxu0 %v2748_v12  ;;  %v2837_v12 = vld [vmem:[#allocation2 + $0x7e4] ss:$8 sps:$4 sm:$0xff]  }
  0xcb   :  { %2000 = vmatprep.subr.bf16.mxu0 %v2756_v13  ;;  %v2832_v13 = vld [vmem:[#allocation2 + $0x6e0] ss:$8 sps:$4 sm:$0xff]  }
  0xcc   :  { %2040 = vmatpush2.bf16.msra.mxu1 %v2751_v14  ;;  %v2840_v14 = vld [vmem:[#allocation2 + $0x6d4] ss:$8 sps:$4 sm:$0xff]  }
  0xcd   :  { %2041 = vmatprep.subr.bf16.mxu1 %v2759_v15  ;;  %v2835_v15 = vld [vmem:[#allocation2 + $0x7e0] ss:$8 sps:$4 sm:$0xff]  }
  0xce   :  { %2001 = vmatpush2.bf16.msra.mxu0 %v2754_v16  ;;  %v2843_v16 = vld [vmem:[#allocation2 + $0x7d4] ss:$8 sps:$4 sm:$0xff]  }
  0xcf   :  { %2002 = vmatprep.subr.bf16.mxu0 %v2762_v17  ;;  %v2838_v17 = vld [vmem:[#allocation2 + $0x6d0] ss:$8 sps:$4 sm:$0xff]  }
  0xd0   :  { %2042 = vmatpush2.bf16.msra.mxu1 %v2757_v18  ;;  %v2846_v18 = vld [vmem:[#allocation2 + $0x6c4] ss:$8 sps:$4 sm:$0xff]  }
  0xd1   :  { %2043 = vmatprep.subr.bf16.mxu1 %v2765_v20  ;;  %v2849_v20 = vld [vmem:[#allocation2 + $0x7c4] ss:$8 sps:$4 sm:$0xff]  }
  0xd2   :  { %2003 = vmatpush2.bf16.msra.mxu0 %v2760_v21  ;;  %v2844_v21 = vld [vmem:[#allocation2 + $0x6c0] ss:$8 sps:$4 sm:$0xff]  }
  0xd3   :  { %2004 = vmatprep.subr.bf16.mxu0 %v2768_v22  ;;  %v2852_v22 = vld [vmem:[#allocation2 + $0x6b4] ss:$8 sps:$4 sm:$0xff]  }
  0xd4   :  { %2044 = vmatpush2.bf16.msra.mxu1 %v2763_v23  ;;  %v2847_v23 = vld [vmem:[#allocation2 + $0x7c0] ss:$8 sps:$4 sm:$0xff]  }
  0xd5   :  { %2045 = vmatprep.subr.bf16.mxu1 %v2771_v25  ;;  %v2855_v25 = vld [vmem:[#allocation2 + $0x7b4] ss:$8 sps:$4 sm:$0xff]  }
  0xd6   :  { %2005 = vmatpush2.bf16.msra.mxu0 %v2766_v26  ;;  %v2850_v26 = vld [vmem:[#allocation2 + $0x6b0] ss:$8 sps:$4 sm:$0xff]  }
  0xd7   :  { %2006 = vmatprep.subr.bf16.mxu0 %v2774_v28  ;;  %v2858_v28 = vld [vmem:[#allocation2 + $0x6a4] ss:$8 sps:$4 sm:$0xff]  }
  0xd8   :  { %2046 = vmatpush2.bf16.msra.mxu1 %v2769_v29  ;;  %v2853_v29 = vld [vmem:[#allocation2 + $0x7b0] ss:$8 sps:$4 sm:$0xff]  }
  0xd9   :  { %2047 = vmatprep.subr.bf16.mxu1 %v2777_v30  ;;  %v2856_v30 = vld [vmem:[#allocation2 + $0x6a0] ss:$8 sps:$4 sm:$0xff]  }
  0xda   :  { %2007 = vmatpush2.bf16.msra.mxu0 %v2772_v31  ;;  %v2864_v31 = vld [vmem:[#allocation2 + $0x694] ss:$8 sps:$4 sm:$0xff]  }
  0xdb   :  { %2058 = vmatprep.subr.bf16.mxu0 %v2780_v33  ;;  %v2867_v33 = vld [vmem:[#allocation2 + $0x794] ss:$8 sps:$4 sm:$0xff]  }
  0xdc   :  { %2048 = vmatpush2.bf16.msra.mxu1 %v2775_v34  ;;  %v2862_v34 = vld [vmem:[#allocation2 + $0x690] ss:$8 sps:$4 sm:$0xff]  }
  0xdd   :  { %2009 = vmatmul.mubr.bf16.vlgmr.msra.gmra.mxu0 %v402_v32  ;;  %2099 = vmatprep.subr.bf16.mxu1 %v2783_v36  ;;  %v2859_v32 = vld [vmem:[#allocation2 + $0x7a0] ss:$8 sps:$4 sm:$0xff]   ;;  %v2865_v36 = vld [vmem:[#allocation2 + $0x790] ss:$8 sps:$4 sm:$0xff]  }
  0xde   :  { %2059 = vmatpush1.bf16.msra.mxu0 %v2778_v37  ;;  %2090 = vmatprep.mubr.bf16.mxu0 %v423_v35  ;;  %v2870_v35 = vld [vmem:[#allocation2 + $0x684] ss:$8 sps:$4 sm:$0xff]  }
  0xdf   :  { %2050 = vmatmul.mubr.bf16.vlgmr.msra.gmra.mxu1 %v424_v38  ;;  %2060 = vmatprep.subr.bf16.mxu0 %v2786_v39  ;;  %v2873_v37 = vld [vmem:[#allocation2 + $0x784] ss:$8 sps:$4 sm:$0xff]   ;;  %v2868_v38 = vld [vmem:[#allocation2 + $0x680] ss:$8 sps:$4 sm:$0xff]   ;;  %v319_v39 = vsub.s32 0, %v2995_v42 }
  0xe0   :  { %2100 = vmatpush1.bf16.msra.mxu1 %v2781_v40  ;;  %2131 = vmatprep.mubr.bf16.mxu1 %v427_v41  ;;  %v315_v40 = vld [vmem:[#allocation5] sm:$0x3]  ;;  %v409_v41 = vrot.slane %v3029_v24, %v2998_v48  ;;  %v2967_v24 = vmov 0  }
  0xe1   :  { %2101 = vmatprep.subr.bf16.mxu1 %v2789_v43  ;;  %v2877_v43 = vld [vmem:[#allocation2 + $0x864] ss:$8 sps:$4 sm:$0xff]  }
  0xe2   :  { %2061 = vmatpush1.bf16.msra.mxu0 %v2784_v5  ;;  %v2871_v5 = vld [vmem:[#allocation2 + $0x780] ss:$8 sps:$4 sm:$0xff]  }
  0xe3   :  { %2062 = vmatprep.subr.bf16.mxu0 %v2792_v44  ;;  %v323_v44 = vsub.s32 1, %v2995_v42  ;;  %v2883_v42 = vld [vmem:[#allocation2 + $0x844] ss:$8 sps:$4 sm:$0xff]  }
  0xe4   :  { %2102 = vmatpush1.bf16.msra.mxu1 %v2787_v45  ;;  %v320_v45 = vrot.slane %v315_v40, %v319_v39 }
  0xe5   :  { %2103 = vmatprep.subr.bf16.mxu1 %v2795_v46  ;;  %v2875_v46 = vld [vmem:[#allocation2 + $0x860] ss:$8 sps:$4 sm:$0xff]  }
  0xe6   :  { %2063 = vmatpush1.bf16.msra.mxu0 %v2790_v47  ;;  %v425_v47 = vcombine.high %v409_v41, %v409_v41 }
  0xe7   :  { %2064 = vmatprep.subr.bf16.mxu0 %v2798_v49  ;;  %v2880_v49 = vld [vmem:[#allocation2 + $0x854] ss:$8 sps:$4 sm:$0xff]  }
  0xe8   :  { %2104 = vmatpush1.bf16.msra.mxu1 %v2793_v50  ;;  %v324_v50 = vrot.slane %v315_v40, %v323_v44 }
  0xe9   :  { %2105 = vmatprep.subr.bf16.mxu1 %v2801_v51 }
  0xea   :  { %2065 = vmatpush1.bf16.msra.mxu0 %v2796_v52 }
  0xeb   :  { %2066 = vmatprep.subr.bf16.mxu0 %v2804_v53  ;;  %v2878_v53 = vld [vmem:[#allocation2 + $0x850] ss:$8 sps:$4 sm:$0xff]  }
  0xec   :  { %2106 = vmatpush1.bf16.msra.mxu1 %v2799_v54 }
  0xed   :  { %2107 = vmatprep.subr.bf16.mxu1 %v2807_v55 }
  0xee   :  { %2067 = vmatpush1.bf16.msra.mxu0 %v2802_v56 }
  0xef   :  { %2068 = vmatprep.subr.bf16.mxu0 %v2810_v57 }
  0xf0   :  { %2108 = vmatpush1.bf16.msra.mxu1 %v2805_v58 }
  0xf1   :  { %2109 = vmatprep.subr.bf16.mxu1 %v2813_v59 }
  0xf2   :  { %2069 = vmatpush1.bf16.msra.mxu0 %v2808_v60 }
  0xf3   :  { %2070 = vmatprep.subr.bf16.mxu0 %v2816_v61  ;;  %v2881_v61 = vld [vmem:[#allocation2 + $0x840] ss:$8 sps:$4 sm:$0xff]  }
  0xf4   :  { %2110 = vmatpush1.bf16.msra.mxu1 %v2811_v62 }
  0xf5   :  { %2111 = vmatprep.subr.bf16.mxu1 %v2819_v63  ;;  %v2886_v63 = vld [vmem:[#allocation2 + $0x834] ss:$8 sps:$4 sm:$0xff]  }
  0xf6   :  { %2071 = vmatpush1.bf16.msra.mxu0 %v2814_v0 }
  0xf7   :  { %2072 = vmatprep.subr.bf16.mxu0 %v2822_v1 }
  0xf8   :  { %2112 = vmatpush1.bf16.msra.mxu1 %v2817_v2  ;;  %v2884_v2 = vld [vmem:[#allocation2 + $0x830] ss:$8 sps:$4 sm:$0xff]  }
  0xf9   :  { %2113 = vmatprep.subr.bf16.mxu1 %v2825_v3  ;;  %v2889_v3 = vld [vmem:[#allocation2 + $0x824] ss:$8 sps:$4 sm:$0xff]  }
  0xfa   :  { %2073 = vmatpush1.bf16.msra.mxu0 %v2820_v4  ;;  %v2887_v4 = vld [vmem:[#allocation2 + $0x820] ss:$8 sps:$4 sm:$0xff]  }
  0xfb   :  { %2074 = vmatprep.subr.bf16.mxu0 %v2828_v6  ;;  %v2892_v6 = vld [vmem:[#allocation2 + $0x814] ss:$8 sps:$4 sm:$0xff]  }
  0xfc   :  { %2114 = vmatpush1.bf16.msra.mxu1 %v2823_v7  ;;  %v2890_v7 = vld [vmem:[#allocation2 + $0x810] ss:$8 sps:$4 sm:$0xff]  }
  0xfd   :  { %2115 = vmatprep.subr.bf16.mxu1 %v2831_v8  ;;  %v2895_v8 = vld [vmem:[#allocation2 + $0x804] ss:$8 sps:$4 sm:$0xff]  }
  0xfe   :  { %2075 = vmatpush2.bf16.msra.mxu0 %v2826_v9  ;;  %v2893_v9 = vld [vmem:[#allocation2 + $0x800] ss:$8 sps:$4 sm:$0xff]  }
  0xff   :  { %2076 = vmatprep.subr.bf16.mxu0 %v2834_v10  ;;  %v2209_v10 = vld.sshfl [vmem:[%s3047_s0 + $0x10] sm:$0x1 pattern:$0x75316420]  ;;  %s2968_s0 = smov [#allocation7]  }
 0x100   :  { %2116 = vmatpush2.bf16.msra.mxu1 %v2829_v11  ;;  %v441_v11 = vrot.slane %v2209_v10, %v2998_v48  ;;  %s2199_s28 = sshll.u32 %s2968_s0, 4  ;;  %s2200_s28 = int_to_ptr.vmem [resolvable:$true] %s2199_s28 }
 0x101   :  { %2117 = vmatprep.subr.bf16.mxu1 %v2837_v12  ;;  %s2936_s29 = scalar_lea.vmem %s2200_s28, 64  ;;  %p2941_p11 = scmp.lt.s32.totalorder %s2200_s28, %s2200_s28 }
 0x102   :  { %2077 = vmatpush2.bf16.msra.mxu0 %v2832_v13  ;;  %p2937_p10 = scmp.ne.s32.totalorder %s2200_s28, %s2936_s29  ;;  %p2942_p12 = scmp.lt.s32.totalorder %s2936_s29, %s2936_s29 }
 0x103   :  { %2078 = vmatprep.subr.bf16.mxu0 %v2840_v14 }
 0x104   :  { %2118 = vmatpush2.bf16.msra.mxu1 %v2835_v15  ;;  %p2943_p13 = por %p2942_p12, %p2941_p11 }
 0x105   :  { %2119 = vmatprep.subr.bf16.mxu1 %v2843_v16 }
 0x106   :  { %2079 = vmatpush2.bf16.msra.mxu0 %v2838_v17  ;;  %p2944_p0 = pnand %p2943_p13, %p2937_p10 }
 0x107   :  { %2080 = vmatprep.subr.bf16.mxu0 %v2846_v18 }
 0x108   :  { %2120 = vmatpush2.bf16.msra.mxu1 %v2841_v19 }
 0x109   :  { %2121 = vmatprep.subr.bf16.mxu1 %v2849_v20 }
 0x10a   :  { %2081 = vmatpush2.bf16.msra.mxu0 %v2844_v21 }
 0x10b   :  { %2082 = vmatprep.subr.bf16.mxu0 %v2852_v22 }
 0x10c   :  { %2122 = vmatpush2.bf16.msra.mxu1 %v2847_v23 }
 0x10d   :  { %2123 = vmatprep.subr.bf16.mxu1 %v2855_v25 }
 0x10e   :  { %2083 = vmatpush2.bf16.msra.mxu0 %v2850_v26 }
 0x10f   :  { %2084 = vmatprep.subr.bf16.mxu0 %v2858_v28 }
 0x110   :  { %2124 = vmatpush2.bf16.msra.mxu1 %v2853_v29 }
 0x111   :  { %2125 = vmatprep.subr.bf16.mxu1 %v2861_v27 }
 0x112   :  { %2085 = vmatpush2.bf16.msra.mxu0 %v2856_v30 }
 0x113   :  { %2086 = vmatprep.subr.bf16.mxu0 %v2864_v31 }
 0x114   :  { %2126 = vmatpush2.bf16.msra.mxu1 %v2859_v32 }
 0x115   :  { %2127 = vmatprep.subr.bf16.mxu1 %v2867_v33 }
 0x116   :  { %2087 = vmatpush2.bf16.msra.mxu0 %v2862_v34 }
 0x117   :  { %2088 = vmatprep.subr.bf16.mxu0 %v2870_v35 }
 0x118   :  { %2128 = vmatpush2.bf16.msra.mxu1 %v2865_v36 }
 0x119   :  { %2129 = vmatprep.subr.bf16.mxu1 %v2873_v37 }
 0x11a   :  { %2089 = vmatpush2.bf16.msra.mxu0 %v2868_v38 }
 0x11b   :  { %2142 = vmatprep.subr.bf16.mxu0 %v2877_v43 }
 0x11c   :  { %2130 = vmatpush2.bf16.msra.mxu1 %v2871_v5 }
 0x11d   :  { %v1846_v51 = vpop.f32.mrf.mxu0  ;;  %2091 = vmatmul.mubr.bf16.vlgmr.msra.gmra.mxu0 %v409_v41 }
 0x11e   :  { %v1847_v52 = vadd.f32 %v1846_v51, %v320_v45  ;;  %2143 = vmatpush1.bf16.msra.mxu0 %v2875_v46  ;;  %2172 = vmatprep.mubr.bf16.mxu0 %v2967_v24 }
 0x11f   :  { %v1848_v54 = vpop.f32.mrf.mxu0  ;;  %v1887_v55 = vpop.f32.mrf.mxu1  ;;  %2132 = vmatmul.mubr.bf16.vlgmr.msra.gmra.mxu1 %v425_v47  ;;  %2144 = vmatprep.subr.bf16.mxu0 %v2880_v49 }
 0x120   :  { %v1849_v56 = vadd.f32 %v1848_v54, %v324_v50  ;;  %v1888_v57 = vadd.f32 %v1887_v55, %v1847_v52 }
 0x121   :  { %v1850_v58 = vpop.f32.mrf.mxu0  ;;  %v1889_v59 = vpop.f32.mrf.mxu1 }
 0x122   :  { %v1890_v60 = vadd.f32 %v1889_v59, %v1849_v56  ;;  %2145 = vmatpush1.bf16.msra.mxu0 %v2878_v53 }
 0x123   :  { %v1851_v62 = vpop.f32.mrf.mxu0  ;;  %2146 = vmatprep.subr.bf16.mxu0 %v2883_v42  ;;  %v1891_v0 = vpop.f32.mrf.mxu1 }
 0x125   :  { %v1892_v1 = vpop.f32.mrf.mxu1 }
 0x126   :  { %2147 = vmatpush1.bf16.msra.mxu0 %v2881_v61 }
 0x127   :  { %2148 = vmatprep.subr.bf16.mxu0 %v2886_v63 }
 0x12a   :  { %2149 = vmatpush1.bf16.msra.mxu0 %v2884_v2 }
 0x12b   :  { %2150 = vmatprep.subr.bf16.mxu0 %v2889_v3 }
 0x12e   :  { %2151 = vmatpush1.bf16.msra.mxu0 %v2887_v4 }
 0x12f   :  { %2152 = vmatprep.subr.bf16.mxu0 %v2892_v6 }
 0x132   :  { %2153 = vmatpush1.bf16.msra.mxu0 %v2890_v7 }
 0x133   :  { %2154 = vmatprep.subr.bf16.mxu0 %v2895_v8 }
 0x136   :  { %2155 = vmatpush1.bf16.msra.mxu0 %v2893_v9 }
 0x139   :  { %2480 = vmatmul.mubr.msk.bf16.vlgmr.msra.gmra.mxu0 %vm1808_vm0, %v441_v11 }
 0x15d   :  { %v1928_v12 = vpop.f32.mrf.mxu0 }
 0x15e   :  { %v1929_v13 = vadd.f32 %v1928_v12, %v1888_v57 }
 0x15f   :  { %v1930_v14 = vpop.f32.mrf.mxu0  ;;  %v1969_v15 = vpop.f32.mrf.mxu1 }
 0x160   :  { %v1931_v16 = vadd.f32 %v1930_v14, %v1890_v60  ;;  %v1970_v17 = vadd.f32 %v1969_v15, %v1929_v13 }
 0x161   :  { %v1932_v18 = vpop.f32.mrf.mxu0  ;;  %v1971_v19 = vpop.f32.mrf.mxu1 }
 0x162   :  { %v1972_v20 = vadd.f32 %v1971_v19, %v1931_v16 }
 0x163   :  { %v1933_v21 = vpop.f32.mrf.mxu0  ;;  %v1973_v22 = vpop.f32.mrf.mxu1 }
 0x165   :  { %v1974_v23 = vpop.f32.mrf.mxu1 }
 0x19d   :  { %v2010_v25 = vpop.f32.mrf.mxu0 }
 0x19e   :  { %v2011_v26 = vadd.f32 %v2010_v25, %v1970_v17 }
 0x19f   :  { %v2012_v28 = vpop.f32.mrf.mxu0  ;;  %v2051_v29 = vpop.f32.mrf.mxu1 }
 0x1a0   :  { %v2013_v48 = vadd.f32 %v2012_v28, %v1972_v20  ;;  %v2052_v27 = vadd.f32 %v2051_v29, %v2011_v26 }
 0x1a1   :  { %v2014_v30 = vpop.f32.mrf.mxu0  ;;  %v2053_v31 = vpop.f32.mrf.mxu1 }
 0x1a2   :  { %v2054_v32 = vadd.f32 %v2053_v31, %v2013_v48 }
 0x1a3   :  { %v2015_v33 = vpop.f32.mrf.mxu0  ;;  %v2055_v34 = vpop.f32.mrf.mxu1 }
 0x1a5   :  { %v2056_v35 = vpop.f32.mrf.mxu1 }
 0x1dd   :  { %v2092_v36 = vpop.f32.mrf.mxu0 }
 0x1de   :  { %v2093_v44 = vadd.f32 %v2092_v36, %v2052_v27 }
 0x1df   :  { %v2094_v37 = vpop.f32.mrf.mxu0  ;;  %v2133_v38 = vpop.f32.mrf.mxu1 }
 0x1e0   :  { %v2095_v45 = vadd.f32 %v2094_v37, %v2054_v32  ;;  %v2134_v47 = vadd.f32 %v2133_v38, %v2093_v44 }
 0x1e1   :  { %v2096_v39 = vpop.f32.mrf.mxu0  ;;  %v2135_v40 = vpop.f32.mrf.mxu1 }
 0x1e2   :  { %v2136_v49 = vadd.f32 %v2135_v40, %v2095_v45 }
 0x1e3   :  { %v2097_v41 = vpop.f32.mrf.mxu0  ;;  %v2137_v43 = vpop.f32.mrf.mxu1 }
 0x1e5   :  { %v2138_v5 = vpop.f32.mrf.mxu1 }
 0x1f9   :  { %v2174_v46 = vpop.f32.mrf.mxu0 }
 0x1fa   :  { %v2175_v51 = vadd.f32 %v2174_v46, %v2134_v47 }
 0x1fb   :  { %v2176_v50 = vpop.f32.mrf.mxu0 }
 0x1fc   :  { %v2177_v52 = vadd.f32 %v2176_v50, %v2136_v49 }
 0x1fd   :  { %v2178_v53 = vpop.f32.mrf.mxu0 }
 0x1fe   :  { %v2183_v24 = vcombine.low %v2175_v51, %v2177_v52 }
 0x1ff   :  { %v2179_v54 = vpop.f32.mrf.mxu0 }
 0x200   :  { %2481 = vst.sshfl [vmem:[#allocation7] sm:$0x33 pattern:$0x76325410] %v2183_v24 }
 0x201   :  { %2947 = shalt.err (!%p2944_p0)
}
 0x202   :  { %2202 = dma.vmem_to_hbm [thread:$0]  %s2200_s28, 64, %s3050_s3, [#allocation4]  }
 0x203   :  { %2960 = dma.done.wait [#allocation4], 64  }
 0x204   :  { %2961 = vsyncadd [#allocation4], 4294967232 }
 0x205   :  { %2206 = vsyncpa [#allocation3], 1 }
 0x206   :  { %2207 = vsyncpa [#allocation6], 1 }
 0x207   :  { %2208 = vsyncpa [#allocation4], 1 }

// kernel: transformer_forward.2
= control target key start
LH: loop header
LB: loop body
LE: loop exit
PB: predicated region body
PF: predicated region fallthrough
CT: control target
= control target key end

     0   :  { %16 = vsyncpa [#allocation3], 0  ;;  %s14615_s0 = inlined_call_operand.vmem [shape: f32[2,90,5], index: 0, kind: input, shape index: {}]   ;;  %s14616_s1 = inlined_call_operand.hbm [shape: f32[5,24], index: 1, kind: input, shape index: {}]   ;;  %s14617_s2 = inlined_call_operand.vmem [shape: f32[90,24], index: 2, kind: input, shape index: {}]   ;;  %s14618_s3 = inlined_call_operand.vmem [shape: bf16[2,4,24,6], index: 3, kind: input, shape index: {}]   ;;  %s14619_s4 = inlined_call_operand.vmem [shape: bf16[2,4,24,6], index: 4, kind: input, shape index: {}]   ;;  %s14620_s5 = inlined_call_operand.hbm [shape: f32[2,4,1,6], index: 5, kind: input, shape index: {}]   ;;  %s14621_s6 = inlined_call_operand.hbm [shape: bf16[2,4,24,24], index: 6, kind: input, shape index: {}]   ;;  %s14622_s7 = inlined_call_operand.hbm [shape: bf16[2,24,96], index: 7, kind: input, shape index: {}]   ;;  %s14623_s8 = inlined_call_operand.hbm [shape: f32[2,1,96], index: 8, kind: input, shape index: {}]   ;;  %s14624_s9 = inlined_call_operand.vmem [shape: bf16[2,96,24], index: 9, kind: input, shape index: {}]   ;;  %s14625_s10 = inlined_call_operand.hbm [shape: f32[2,6,1,24], index: 10, kind: input, shape index: {}]   ;;  %s14626_s11 = inlined_call_operand.vmem [shape: bf16[2,90,24], index: 11, kind: output, shape index: {}]  }
   0x1   :  { %17 = vsyncpa [#allocation5], 0 }
   0x2   :  { %18 = vsyncpa [#allocation8], 0 }
   0x3   :  { %19 = vsyncpa [#allocation11], 0  ;;  %s11456_s17 = smov 0  }
   0x4 LB: > { %s11386_s18 = smov [#allocation4]   ;;  %s11462_s20 = sadd.s32 4294967295, %s11384_s17   ;;  %s11384_s17 = sphi %s11456_s17, %s25_s17  }
   0x5   : > { %s324_s19 = sshll.u32 %s11386_s18, 4  ;;  %p8402_p0 = scmp.ge.s32.totalorder %s11384_s17, 1  ;;  %s325_s19 = int_to_ptr.vmem [resolvable:$true] %s324_s19 }
   0x6   : > { %p292_p1 = scmp.lt.s32.totalorder %s11384_s17, 3  ;;  %p10632_p2 = scmp.eq.s32.totalorder %s11462_s20, 0 }
   0x7   : > { %s11387_s23 = smov [#allocation7]   ;;  %s11388_s25 = smov [#allocation2]  }
   0x8   : > { %p11467_p3 = pnand %p8402_p0, %p292_p1  ;;  %s350_s24 = sshll.u32 %s11387_s23, 4  ;;  %s11479_s24 = int_to_ptr.vmem [resolvable:$true] %s350_s24 }
   0x9   : > { %s305_s26 = sshll.u32 %s11388_s25, 4  ;;  %s11217_s28 = scalar_lea.vmem %s325_s19, 128  ;;  %s11481_s26 = int_to_ptr.vmem [resolvable:$true] %s305_s26 }
   0xa   : > { %p10613_p4 = pneg %p11467_p3  ;;  %p11218_p7 = scmp.ne.s32.totalorder %s325_s19, %s11217_s28 }
   0xb   : > { %p11225_p10 = scmp.lt.s32.totalorder %s325_s19, %s325_s19  ;;  %p11226_p11 = scmp.lt.s32.totalorder %s11217_s28, %s11217_s28 }
   0xc   : > { %p11475_p5 = pnand %p10632_p2, %p10613_p4 }
   0xd   : > { %p11227_p12 = por %p11226_p11, %p11225_p10 }
   0xe   : > { %p11485_p6 = pneg %p11475_p5 }
  0x10   : > { %p11220_p8 = pnand %p11218_p7, %p11485_p6 }
  0x12   : > { %p11221_p9 = pneg %p11220_p8 }
  0x14   : > { %p11228_p13 = pnand %p11227_p12, %p11221_p9 }
  0x16   : > { %11231 = shalt.err (!%p11228_p13)
}
  0x17   : > { %s11389_s29 = smov 16   ;;  %s11390_s30 = smov 1  }
  0x18   : > { %10619 = dma.hbm_to_vmem [thread:$0]  (!%p11475_p5), %s14620_s5, 128, %s325_s19, [#allocation5], %s11389_s29, %s11389_s29, %s11390_s30  }
  0x19   : > { %s11243_s14 = scalar_lea.vmem %s11479_s24, 384  ;;  %p11251_p7 = scmp.lt.s32.totalorder %s11479_s24, %s11479_s24 }
  0x1a   : > { %p11244_p0 = scmp.ne.s32.totalorder %s11479_s24, %s11243_s14  ;;  %p11252_p8 = scmp.lt.s32.totalorder %s11243_s14, %s11243_s14 }
  0x1c   : > { %p11246_p1 = pnand %p11244_p0, %p11485_p6  ;;  %p11253_p9 = por %p11252_p8, %p11251_p7 }
  0x1e   : > { %p11247_p4 = pneg %p11246_p1 }
  0x20   : > { %p11254_p10 = pnand %p11253_p9, %p11247_p4 }
  0x22   : > { %11257 = shalt.err (!%p11254_p10)
}
  0x23   : > { %s11391_s15 = smov 64   ;;  %s11392_s16 = smov 4  }
  0x24   : > { %10625 = dma.hbm_to_vmem [thread:$0]  (!%p11475_p5), %s14622_s7, 384, %s11479_s24, [#allocation8], %s11391_s15, %s11391_s15, %s11392_s16  }
  0x25   : > { %s11269_s23 = scalar_lea.vmem %s11481_s26, 128  ;;  %p11277_p0 = scmp.lt.s32.totalorder %s11481_s26, %s11481_s26 }
  0x26   : > { %p11270_p11 = scmp.ne.s32.totalorder %s11481_s26, %s11269_s23  ;;  %p11278_p1 = scmp.lt.s32.totalorder %s11269_s23, %s11269_s23 }
  0x28   : > { %p11272_p12 = pnand %p11270_p11, %p11485_p6  ;;  %p11279_p4 = por %p11278_p1, %p11277_p0 }
  0x2a   : > { %p11273_p13 = pneg %p11272_p12 }
  0x2c   : > { %p11280_p7 = pnand %p11279_p4, %p11273_p13 }
  0x2e   : > { %11283 = shalt.err (!%p11280_p7)
}
  0x2f   : > { %10616 = dma.hbm_to_vmem [thread:$0]  (!%p11475_p5), %s14616_s1, 128, %s11481_s26, [#allocation3]  }
  0x30   : > { %s11393_s24 = smov [#allocation6]   ;;  %s11394_s13 = smov [#allocation9]  }
  0x31   : > { %s337_s12 = sshll.u32 %s11393_s24, 4  ;;  %s363_s14 = sshll.u32 %s11394_s13, 4  ;;  %s338_s12 = int_to_ptr.vmem [resolvable:$true] %s337_s12  ;;  %s364_s14 = int_to_ptr.vmem [resolvable:$true] %s363_s14 }
  0x32   : > { %s11295_s18 = scalar_lea.vmem %s338_s12, 1536  ;;  %p11303_p11 = scmp.lt.s32.totalorder %s338_s12, %s338_s12 }
  0x33   : > { %p11296_p8 = scmp.ne.s32.totalorder %s338_s12, %s11295_s18  ;;  %p11304_p12 = scmp.lt.s32.totalorder %s11295_s18, %s11295_s18 }
  0x35   : > { %p11298_p9 = pnand %p11296_p8, %p11485_p6  ;;  %p11305_p13 = por %p11304_p12, %p11303_p11 }
  0x37   : > { %p11299_p10 = pneg %p11298_p9 }
  0x39   : > { %p11306_p0 = pnand %p11305_p13, %p11299_p10 }
  0x3b   : > { %11309 = shalt.err (!%p11306_p0)
}
  0x3c   : > { %10622 = dma.hbm_to_vmem [thread:$0]  (!%p11475_p5), %s14621_s6, 1536, %s338_s12, [#allocation5], %s11391_s15, %s11391_s15, %s11392_s16  }
  0x3d   : > { %s11321_s23 = scalar_lea.vmem %s364_s14, 32  ;;  %p11329_p8 = scmp.lt.s32.totalorder %s364_s14, %s364_s14 }
  0x3e   : > { %p11322_p1 = scmp.ne.s32.totalorder %s364_s14, %s11321_s23  ;;  %p11330_p9 = scmp.lt.s32.totalorder %s11321_s23, %s11321_s23 }
  0x40   : > { %p11324_p4 = pnand %p11322_p1, %p11485_p6  ;;  %p11331_p11 = por %p11330_p9, %p11329_p8 }
  0x42   : > { %p11325_p7 = pneg %p11324_p4 }
  0x44   : > { %p11332_p10 = pnand %p11331_p11, %p11325_p7 }
  0x46   : > { %11335 = shalt.err (!%p11332_p10)
}
  0x47   : > { %10628 = dma.hbm_to_vmem [thread:$0]  (!%p11475_p5), %s14623_s8, 32, %s364_s14, [#allocation8], %s11389_s29, %s11389_s29, %s11390_s30  }
  0x48   : > { %s11395_s15 = smov [#allocation10]  }
  0x49   : > { %s379_s16 = sshll.u32 %s11395_s15, 4  ;;  %s380_s16 = int_to_ptr.vmem [resolvable:$true] %s379_s16 }
  0x4a   : > { %s11347_s24 = scalar_lea.vmem %s380_s16, 192  ;;  %p11355_p1 = scmp.lt.s32.totalorder %s380_s16, %s380_s16 }
  0x4b   : > { %p11348_p12 = scmp.ne.s32.totalorder %s380_s16, %s11347_s24  ;;  %p11356_p4 = scmp.lt.s32.totalorder %s11347_s24, %s11347_s24 }
  0x4d   : > { %p11350_p13 = pnand %p11348_p12, %p11485_p6  ;;  %p11357_p7 = por %p11356_p4, %p11355_p1 }
  0x4f   : > { %p11351_p0 = pneg %p11350_p13 }
  0x51   : > { %p11358_p8 = pnand %p11357_p7, %p11351_p0 }
  0x53   : > { %11361 = shalt.err (!%p11358_p8)
}
  0x54   : > { %10631 = dma.hbm_to_vmem [thread:$0]  (!%p11475_p5), %s14625_s10, 192, %s380_s16, [#allocation11], %s11389_s29, %s11389_s29, %s11390_s30  }
  0x55   : > { %403 = sbr.rel (%p11467_p3) target bundleno = 7551 (0x1d7f), region = 64 }
  0x5a   : > { %11367 = dma.done.wait (%p10632_p2), [#allocation3], 128  }
  0x5b   : > { %11369 = vsyncadd (%p10632_p2), [#allocation3], 4294967168 }
  0x5c   : > { %11371 = dma.done.wait (%p10632_p2), [#allocation5], 1664  }
  0x5d   : > { %11373 = vsyncadd (%p10632_p2), [#allocation5], 4294965632 }
  0x5e   : > { %11375 = dma.done.wait (%p10632_p2), [#allocation8], 416  }
  0x5f   : > { %11377 = vsyncadd (%p10632_p2), [#allocation8], 4294966880 }
  0x60   : > { %11379 = dma.done.wait (%p10632_p2), [#allocation11], 192  }
  0x61   : > { %11381 = vsyncadd (%p10632_p2), [#allocation11], 4294967104  ;;  %p463_p3 = scmp.lt.s32.totalorder %s11462_s20, 1  ;;  %vm536_vm0 = vcmask 1044480   ;;  %vm499_vm1 = vcmask 39936   ;;  %vm720_vm2 = vcmask 1043456  }
  0x62   : > { %v486_v0 = vld [vmem:[#allocation2] sm:$0x1f]  ;;  %v10662_v9 = vld [vmem:[%s14619_s4 + $0x8] ss:$0 sps:$4 sm:$0xff]   ;;  %v10666_v19 = vld [vmem:[#allocation6 + $0x8] ss:$0 sps:$4 sm:$0xff]  }
  0x63   : > { %s14811_s20 = smov (!%p463_p3, %s11462_s20), 1  ;;  %9539 = vmatprep.subr.msk.mxu0 %vm536_vm0, %v486_v0  ;;  %10551 = vmatprep.subr.msk.mxu1 %vm536_vm0, %v486_v0  ;;  %v818_v13 = vsel %vm720_vm2, %v10662_v9, 0  ;;  %v10663_v15 = vld [vmem:[%s14618_s3 + $0x8] ss:$0 sps:$4 sm:$0xff]   ;;  %v10664_v17 = vld [vmem:[%s14619_s4] sm:$0xff]   ;;  %v490_v27 = vld [vmem:[%s14617_s2 + $0x18] sm:$0xff] }
  0x64   : > { %s10587_s21 = smul.u32 96, %s14811_s20  ;;  %9540 = vmatpush3.msk.msra.mxu0 %vm536_vm0, %v486_v0  ;;  %10552 = vmatpush3.msk.msra.mxu1 %vm536_vm0, %v486_v0  ;;  %v722_v16 = vsel %vm720_vm2, %v10663_v15, 0  ;;  %v10665_v18 = vld [vmem:[%s14618_s3] sm:$0xff]   ;;  %v488_v20 = vld [vmem:[%s14617_s2 + $0x8] sm:$0xff]  ;;  %v489_v29 = vld [vmem:[%s14617_s2 + $0x10] sm:$0xff]  ;;  %vm701_vm3 = vcmask 195584  }
  0x65   : > { %10554 = vmatprep.subr.msk.bf16.mxu0 %vm720_vm2, %v10662_v9  ;;  %10553 = vmatprep.subr.msk.bf16.mxu1 %vm720_vm2, %v10663_v15  ;;  %v487_v22 = vld [vmem:[%s14617_s2] sm:$0xff]  ;;  %v492_v33 = vld [vmem:[%s14617_s2 + $0x28] sm:$0xff]  ;;  %v914_v44 = vsel %vm720_vm2, %v10666_v19, 0  ;;  %v10667_v45 = vld [vmem:[#allocation6] sm:$0xff]   ;;  %vm997_vm4 = vcmask 48128   ;;  %vm1195_vm5 = vcmask 736256  }
  0x66   : > { %s467_s29 = scalar_lea.vmem %s14615_s0, %s10587_s21  ;;  %v491_v38 = vld [vmem:[%s14617_s2 + $0x20] sm:$0xff]  ;;  %v496_v41 = vld [vmem:[%s14617_s2 + $0x48] sm:$0xff]  ;;  %v494_v46 = vld [vmem:[%s14617_s2 + $0x38] sm:$0xff]  ;;  %vm1229_vm6 = vcmask 730112   ;;  %vm3780_vm7 = vcmask 189440   ;;  %vm4140_vm8 = vcmask 785408  }
  0x67   : > { %v474_v1 = vld [vmem:[%s467_s29] sm:$0xff]  ;;  %v475_v2 = vld [vmem:[%s467_s29 + $0x8] sm:$0xff]  ;;  %v476_v3 = vld [vmem:[%s467_s29 + $0x10] sm:$0xff]  ;;  %s10588_s24 = smul.u32 48, %s14811_s20  ;;  %vm8271_vm9 = vcmask 191488   ;;  %vm8283_vm10 = vcmask 188416  }
  0x68   : > { %9541 = vmatprep.mubr.msk.f32.mxu0 %vm499_vm1, %v474_v1  ;;  %v480_v4 = vld [vmem:[%s467_s29 + $0x30] sm:$0xff]  ;;  %v481_v5 = vld [vmem:[%s467_s29 + $0x38] sm:$0xff]  ;;  %v482_v7 = vld [vmem:[%s467_s29 + $0x40] sm:$0xff] }
  0x69   : > { %9542 = vmatmul.mubr.msk.f32.vlgmr.msra.gmra.mxu0 %vm499_vm1, %v475_v2  ;;  %v477_v6 = vld [vmem:[%s467_s29 + $0x18] sm:$0xff]  ;;  %v478_v8 = vld [vmem:[%s467_s29 + $0x20] sm:$0xff]  ;;  %9550 = vmatprep.mubr.msk.f32.mxu1 %vm499_vm1, %v480_v4  ;;  %v483_v10 = vld [vmem:[%s467_s29 + $0x48] sm:$0xff]  ;;  %s14555_s20 = scalar_lea.vmem %s14626_s11, %s10588_s24 }
  0x6a   : > { %9544 = vmatprep.mubr.msk.f32.mxu0 %vm499_vm1, %v476_v3  ;;  %9551 = vmatmul.mubr.msk.f32.vlgmr.msra.gmra.mxu1 %vm499_vm1, %v481_v5  ;;  %v479_v11 = vld [vmem:[%s467_s29 + $0x28] sm:$0xff]  ;;  %v484_v12 = vld [vmem:[%s467_s29 + $0x50] sm:$0xff]  ;;  %v485_v14 = vld [vmem:[%s467_s29 + $0x58] sm:$0x3] }
  0x6b   : > { %9553 = vmatprep.mubr.msk.f32.mxu1 %vm499_vm1, %v482_v7  ;;  %9576 = vmatpush3.bf16.msra.mxu0 %v818_v13  ;;  %v495_v43 = vld [vmem:[%s14617_s2 + $0x40] sm:$0xff]  ;;  %v493_v48 = vld [vmem:[%s14617_s2 + $0x30] sm:$0xff]  ;;  %v498_v58 = vld [vmem:[%s14617_s2 + $0x58] sm:$0x3] }
  0x6c   : > { %9560 = vmatpush3.bf16.msra.mxu1 %v722_v16  ;;  %9577 = vmatprep.subr.bf16.mxu0 %v10664_v17  ;;  %v497_v60 = vld [vmem:[%s14617_s2 + $0x50] sm:$0xff]  ;;  %v11736_v0 = vld [vmem:[#allocation4] ss:$0 sm:$0xff] }
  0x6d   : > { %9545 = vmatmul.mubr.msk.f32.gmra.mxu0 %vm499_vm1, %v477_v6  ;;  %9561 = vmatprep.subr.bf16.mxu1 %v10665_v18 }
  0x6e   : > { %9547 = vmatprep.mubr.msk.f32.mxu0 %vm499_vm1, %v478_v8  ;;  %9554 = vmatmul.mubr.msk.f32.gmra.mxu1 %vm499_vm1, %v483_v10 }
  0x6f   : > { %9556 = vmatprep.mubr.msk.f32.mxu1 %vm499_vm1, %v484_v12  ;;  %9578 = vmatpush3.bf16.msra.mxu0 %v10664_v17 }
  0x70   : > { %9562 = vmatpush3.bf16.msra.mxu1 %v10665_v18 }
  0x71   : > { %9548 = vmatmul.mubr.msk.f32.gmra.mxu0 %vm499_vm1, %v479_v11  ;;  %10555 = vmatprep.subr.msk.bf16.mxu1 %vm720_vm2, %v10666_v19 }
  0x72   : > { %9557 = vmatmul.mubr.msk.f32.gmra.mxu1 %vm499_vm1, %v485_v14 }
 0x129   : > { %v9543_v21 = vpop.f32.mrf.mxu0 }
 0x12a   : > { %v9552_v24 = vpop.f32.mrf.mxu1  ;;  %v11621_v25 = vadd.f32 %v9543_v21, %v488_v20 }
 0x12b   : > { %v606_v23 = vpop.f32.mrf.mxu0  ;;  %v11678_v52 = vadd.f32 %v9552_v24, %v494_v46 }
 0x12c   : > { %14654 = vst [vmem:[#allocation16_spill] sm:$0xff] %v11621_v25  ;;  %v11623_v26 = vadd.f32 %v606_v23, %v487_v22  ;;  %v636_v30 = vpop.f32.mrf.mxu1 }
 0x12d   : > { %v9546_v28 = vpop.f32.mrf.mxu0  ;;  %14662 = vst [vmem:[#allocation24_spill] sm:$0xff] %v11678_v52  ;;  %v11684_v54 = vadd.f32 %v636_v30, %v493_v48 }
 0x12e   : > { %14655 = vst [vmem:[#allocation17_spill] sm:$0xff] %v11623_v26  ;;  %v11633_v31 = vpack.c.bf16 %v11621_v25, %v11623_v26  ;;  %v9555_v34 = vpop.f32.mrf.mxu1  ;;  %v11638_v35 = vadd.f32 %v9546_v28, %v490_v27 }
 0x12f   : > { %v616_v32 = vpop.f32.mrf.mxu0  ;;  %v11674_v50 = vadd.f32 %v9555_v34, %v496_v41  ;;  %14663 = vst [vmem:[#allocation25_spill] sm:$0xff] %v11684_v54  ;;  %v11696_v57 = vpack.c.bf16 %v11678_v52, %v11684_v54 }
 0x130   : > { %14656 = vst [vmem:[#allocation18_spill] sm:$0xff] %v11638_v35  ;;  %v11640_v36 = vadd.f32 %v616_v32, %v489_v29  ;;  %9563 = vmatprep.mubr.msk.bf16.mxu1 %vm701_vm3, %v11633_v31  ;;  %9579 = vmatprep.mubr.msk.bf16.mxu0 %vm701_vm3, %v11633_v31  ;;  %v646_v42 = vpop.f32.mrf.mxu1 }
 0x131   : > { %v9549_v37 = vpop.f32.mrf.mxu0  ;;  %14660 = vst [vmem:[#allocation22_spill] sm:$0xff] %v11674_v50  ;;  %v11676_v51 = vadd.f32 %v646_v42, %v495_v43 }
 0x132   : > { %14657 = vst [vmem:[#allocation19_spill] sm:$0xff] %v11640_v36  ;;  %v11651_v39 = vpack.c.bf16 %v11638_v35, %v11640_v36  ;;  %v11653_v40 = vadd.f32 %v9549_v37, %v492_v33  ;;  %v9558_v55 = vpop.f32.mrf.mxu1  ;;  %v10681_v36 = vld [vmem:[%s14619_s4 + $0x24] sm:$0xff]  }
 0x133   : > { %v626_v47 = vpop.f32.mrf.mxu0  ;;  %14661 = vst [vmem:[#allocation23_spill] sm:$0xff] %v11676_v51  ;;  %v11692_v56 = vpack.c.bf16 %v11674_v50, %v11676_v51  ;;  %v11712_v61 = vadd.f32 %v9558_v55, %v498_v58 }
 0x134   : > { %14658 = vst [vmem:[#allocation20_spill] sm:$0xff] %v11653_v40  ;;  %v11668_v49 = vadd.f32 %v626_v47, %v491_v38  ;;  %9564 = vmatmul.mubr.msk.bf16.vlgmr.msra.gmra.mxu1 %vm701_vm3, %v11651_v39  ;;  %9580 = vmatmul.mubr.msk.bf16.vlgmr.msra.gmra.mxu0 %vm701_vm3, %v11651_v39  ;;  %v656_v59 = vpop.f32.mrf.mxu1 }
 0x135   : > { %9592 = vmatpush3.bf16.msra.mxu1 %v914_v44  ;;  %14664 = vst [vmem:[#allocation26_spill] sm:$0xff] %v11712_v61  ;;  %v11714_v62 = vadd.f32 %v656_v59, %v497_v60 }
 0x136   : > { %14659 = vst [vmem:[#allocation21_spill] sm:$0xff] %v11668_v49  ;;  %v11682_v53 = vpack.c.bf16 %v11653_v40, %v11668_v49  ;;  %9593 = vmatprep.subr.bf16.mxu1 %v10667_v45 }
 0x137   : > { %14665 = vst [vmem:[#allocation27_spill] sm:$0xff] %v11714_v62  ;;  %v11718_v63 = vpack.c.bf16 %v11712_v61, %v11714_v62  ;;  %v12130_v61 = vld [vmem:[%s14618_s3 + $0x20] ss:$0 sps:$4 sm:$0xff]  }
 0x138   : > { %9567 = vmatprep.mubr.msk.bf16.mxu1 %vm701_vm3, %v11682_v53  ;;  %9583 = vmatprep.mubr.msk.bf16.mxu0 %vm701_vm3, %v11682_v53 }
 0x139   : > { %9594 = vmatpush3.bf16.msra.mxu1 %v10667_v45 }
 0x13c   : > { %9568 = vmatmul.mubr.msk.bf16.gmra.mxu1 %vm701_vm3, %v11696_v57  ;;  %9584 = vmatmul.mubr.msk.bf16.gmra.mxu0 %vm701_vm3, %v11696_v57 }
 0x13d   : > { %9571 = vmatprep.mubr.msk.bf16.mxu1 %vm701_vm3, %v11692_v56  ;;  %9587 = vmatprep.mubr.msk.bf16.mxu0 %vm701_vm3, %v11692_v56 }
 0x144   : > { %9572 = vmatmul.mubr.msk.bf16.gmra.mxu1 %vm701_vm3, %v11718_v63  ;;  %9588 = vmatmul.mubr.msk.bf16.gmra.mxu0 %vm701_vm3, %v11718_v63 }
 0x145   : > { %9595 = vmatprep.mubr.msk.bf16.mxu1 %vm701_vm3, %v11633_v31 }
 0x14c   : > { %9596 = vmatmul.mubr.msk.bf16.vlgmr.msra.gmra.mxu1 %vm701_vm3, %v11651_v39 }
 0x14d   : > { %9599 = vmatprep.mubr.msk.bf16.mxu1 %vm701_vm3, %v11682_v53 }
 0x154   : > { %9600 = vmatmul.mubr.msk.bf16.gmra.mxu1 %vm701_vm3, %v11696_v57 }
 0x155   : > { %9603 = vmatprep.mubr.msk.bf16.mxu1 %vm701_vm3, %v11692_v56 }
 0x15c   : > { %9604 = vmatmul.mubr.msk.bf16.gmra.mxu1 %vm701_vm3, %v11718_v63 }
 0x1f4   : > { %v9565_v1 = vpop.f32.mrf.mxu1  ;;  %v11738_v2 = vpop.f32.mrf.mxu0 }
 0x1f5   : > { %v11741_v3 = vadd.f32 %v9565_v1, %v11736_v0 }
 0x1f6   : > { %v758_v4 = vpop.f32.mrf.mxu1  ;;  %v11743_v5 = vpop.f32.mrf.mxu0 }
 0x1f7   : > { %v759_v6 = vadd.f32 %v11736_v0, %v758_v4 }
 0x1f8   : > { %v9566_v7 = vpop.f32.mrf.mxu1  ;;  %v11746_v8 = vpop.f32.mrf.mxu0 }
 0x1f9   : > { %v11749_v9 = vadd.f32 %v9566_v7, %v11736_v0  ;;  %9631 = vmatprep.mubr.msk.f32.mxu0 %vm997_vm4, %v759_v6 }
 0x1fa   : > { %v11752_v10 = vpop.f32.mrf.mxu1  ;;  %v11754_v11 = vpop.f32.mrf.mxu0 }
 0x1fc   : > { %v9569_v12 = vpop.f32.mrf.mxu1  ;;  %v9585_v13 = vpop.f32.mrf.mxu0 }
 0x1fd   : > { %v11757_v14 = vadd.f32 %v9569_v12, %v11736_v0 }
 0x1fe   : > { %v11759_v15 = vpop.f32.mrf.mxu1  ;;  %v870_v16 = vpop.f32.mrf.mxu0 }
 0x200   : > { %v9570_v17 = vpop.f32.mrf.mxu1  ;;  %v9586_v18 = vpop.f32.mrf.mxu0 }
 0x201   : > { %v11762_v19 = vadd.f32 %v9570_v17, %v11736_v0 }
 0x202   : > { %v11764_v20 = vpop.f32.mrf.mxu1  ;;  %v873_v21 = vpop.f32.mrf.mxu0 }
 0x204   : > { %v9573_v22 = vpop.f32.mrf.mxu1  ;;  %v9589_v23 = vpop.f32.mrf.mxu0 }
 0x205   : > { %v11767_v24 = vadd.f32 %v9573_v22, %v11736_v0 }
 0x206   : > { %v11769_v27 = vpop.f32.mrf.mxu1  ;;  %v886_v28 = vpop.f32.mrf.mxu0 }
 0x208   : > { %v9574_v29 = vpop.f32.mrf.mxu1  ;;  %v9590_v30 = vpop.f32.mrf.mxu0 }
 0x209   : > { %v11772_v32 = vadd.f32 %v9574_v29, %v11736_v0  ;;  %9607 = vmatprep.subr.msk.mxu0 %vm997_vm4, %v9590_v30 }
 0x20a   : > { %v11775_v33 = vpop.f32.mrf.mxu1  ;;  %9608 = vmatpush3.xpose.msk.msra.mxu0 %vm997_vm4, %v9590_v30  ;;  %v889_v37 = vpop.f32.mrf.mxu0 }
 0x20b   : > { %9609 = vmatprep.subr.msk.mxu0 %vm997_vm4, %v9589_v23 }
 0x20c   : > { %v9597_v34 = vpop.f32.mrf.mxu1 }
 0x20e   : > { %v950_v38 = vpop.f32.mrf.mxu1  ;;  %9610 = vmatpush3.xpose.msk.msra.mxu0 %vm997_vm4, %v9589_v23 }
 0x20f   : > { %9611 = vmatprep.subr.msk.mxu0 %vm997_vm4, %v889_v37 }
 0x210   : > { %v9598_v41 = vpop.f32.mrf.mxu1 }
 0x211   : > { %v1312_v7 = vpack.c.bf16 %v9598_v41, %v9597_v34 }
 0x212   : > { %v953_v42 = vpop.f32.mrf.mxu1  ;;  %9612 = vmatpush3.xpose.msk.msra.mxu0 %vm997_vm4, %v889_v37 }
 0x213   : > { %9613 = vmatprep.subr.msk.mxu0 %vm997_vm4, %v886_v28  ;;  %v1311_v12 = vpack.c.bf16 %v953_v42, %v950_v38 }
 0x214   : > { %v9601_v43 = vpop.f32.mrf.mxu1 }
 0x216   : > { %v966_v44 = vpop.f32.mrf.mxu1  ;;  %9614 = vmatpush3.xpose.msk.msra.mxu0 %vm997_vm4, %v886_v28 }
 0x217   : > { %9615 = vmatprep.subr.msk.mxu0 %vm997_vm4, %v9586_v18 }
 0x218   : > { %v9602_v45 = vpop.f32.mrf.mxu1 }
 0x219   : > { %v1314_v4 = vpack.c.bf16 %v9602_v45, %v9601_v43 }
 0x21a   : > { %v969_v46 = vpop.f32.mrf.mxu1  ;;  %9616 = vmatpush3.xpose.msk.msra.mxu0 %vm997_vm4, %v9586_v18 }
 0x21b   : > { %9617 = vmatprep.subr.msk.mxu0 %vm997_vm4, %v9585_v13  ;;  %v1313_v6 = vpack.c.bf16 %v969_v46, %v966_v44 }
 0x21c   : > { %v9605_v47 = vpop.f32.mrf.mxu1 }
 0x21e   : > { %v982_v48 = vpop.f32.mrf.mxu1  ;;  %9618 = vmatpush3.xpose.msk.msra.mxu0 %vm997_vm4, %v9585_v13  ;;  %v10669_v13 = vld [vmem:[%s14619_s4 + $0xc] sm:$0xff]  }
 0x21f   : > { %9619 = vmatprep.subr.msk.mxu0 %vm997_vm4, %v873_v21 }
 0x220   : > { %v9606_v55 = vpop.f32.mrf.mxu1 }
 0x221   : > { %v1316_v58 = vpack.c.bf16 %v9606_v55, %v9605_v47 }
 0x222   : > { %v985_v59 = vpop.f32.mrf.mxu1  ;;  %9620 = vmatpush3.xpose.msk.msra.mxu0 %vm997_vm4, %v873_v21 }
 0x223   : > { %v1336_v60 = vsel %vm536_vm0, %v1316_v58, 0  ;;  %v1315_v1 = vpack.c.bf16 %v985_v59, %v982_v48  ;;  %9621 = vmatprep.subr.msk.mxu0 %vm997_vm4, %v870_v16  ;;  %10556 = vmatprep.subr.msk.bf16.mxu1 %vm536_vm0, %v1316_v58 }
 0x224   : > { %9650 = vmatpush3.bf16.msra.mxu1 %v1336_v60 }
 0x225   : > { %9651 = vmatprep.subr.bf16.mxu1 %v1315_v1 }
 0x226   : > { %9622 = vmatpush3.xpose.msk.msra.mxu0 %vm997_vm4, %v870_v16 }
 0x227   : > { %9623 = vmatprep.subr.msk.mxu0 %vm997_vm4, %v11746_v8 }
 0x228   : > { %9652 = vmatpush3.bf16.msra.mxu1 %v1315_v1  ;;  %v11908_v1 = vld [vmem:[%s14618_s3 + $0x14] ss:$0 sps:$4 sm:$0xff]  }
 0x229   : > { %9653 = vmatprep.subr.bf16.mxu1 %v1314_v4 }
 0x22a   : > { %9624 = vmatpush3.xpose.msk.msra.mxu0 %vm997_vm4, %v11746_v8  ;;  %v10668_v8 = vld [vmem:[%s14619_s4 + $0x14] ss:$0 sps:$4 sm:$0xff]  }
 0x22b   : > { %9625 = vmatprep.subr.msk.mxu0 %vm997_vm4, %v11738_v2 }
 0x22c   : > { %9654 = vmatpush3.bf16.msra.mxu1 %v1314_v4 }
 0x22d   : > { %9655 = vmatprep.subr.bf16.mxu1 %v1313_v6 }
 0x22e   : > { %9626 = vmatpush3.xpose.msk.msra.mxu0 %vm997_vm4, %v11738_v2  ;;  %v762_v2 = vadd.f32 %v11736_v0, %v11752_v10  ;;  %v778_v10 = vadd.f32 %v11736_v0, %v11764_v20 }
 0x22f   : > { %9627 = vmatprep.subr.msk.mxu0 %vm997_vm4, %v11754_v11 }
 0x230   : > { %9656 = vmatpush3.bf16.msra.mxu1 %v1313_v6 }
 0x231   : > { %9657 = vmatprep.subr.bf16.mxu1 %v1312_v7 }
 0x232   : > { %9628 = vmatpush3.xpose.msk.msra.mxu0 %vm997_vm4, %v11754_v11  ;;  %v1574_v11 = vsel %vm720_vm2, %v10668_v8, 0 }
 0x233   : > { %9629 = vmatprep.subr.msk.mxu0 %vm997_vm4, %v11743_v5 }
 0x234   : > { %9658 = vmatpush3.bf16.msra.mxu1 %v1312_v7 }
 0x235   : > { %9659 = vmatprep.subr.bf16.mxu1 %v1311_v12 }
 0x236   : > { %9630 = vmatpush3.xpose.msk.msra.mxu0 %vm997_vm4, %v11743_v5  ;;  %v775_v5 = vadd.f32 %v11736_v0, %v11759_v15 }
 0x237   : > { %10558 = vmatprep.subr.msk.bf16.mxu0 %vm720_vm2, %v10668_v8 }
 0x238   : > { %9660 = vmatpush3.bf16.msra.mxu1 %v1311_v12 }
 0x239   : > { %9632 = vmatmul.mubr.msk.f32.vlgmr.msra.gmra.mxu0 %vm997_vm4, %v762_v2  ;;  %10557 = vmatprep.subr.msk.bf16.mxu1 %vm720_vm2, %v11908_v1 }
 0x23a   : > { %9634 = vmatprep.mubr.msk.f32.mxu0 %vm997_vm4, %v11741_v3  ;;  %9690 = vmatpush3.bf16.msra.mxu0 %v1574_v11  ;;  %v791_v3 = vadd.f32 %v11736_v0, %v11769_v27 }
 0x23b   : > { %9691 = vmatprep.subr.bf16.mxu0 %v10669_v13 }
 0x23d   : > { %9635 = vmatmul.mubr.msk.f32.gmra.mxu0 %vm997_vm4, %v11749_v9  ;;  %v794_v9 = vadd.f32 %v11736_v0, %v11775_v33 }
 0x23e   : > { %9637 = vmatprep.mubr.msk.f32.mxu0 %vm997_vm4, %v775_v5  ;;  %9692 = vmatpush3.bf16.msra.mxu0 %v10669_v13 }
 0x241   : > { %9638 = vmatmul.mubr.msk.f32.gmra.mxu0 %vm997_vm4, %v778_v10 }
 0x242   : > { %9640 = vmatprep.mubr.msk.f32.mxu0 %vm997_vm4, %v11757_v14 }
 0x245   : > { %9641 = vmatmul.mubr.msk.f32.gmra.mxu0 %vm997_vm4, %v11762_v19 }
 0x246   : > { %9643 = vmatprep.mubr.msk.f32.mxu0 %vm997_vm4, %v791_v3 }
 0x249   : > { %9644 = vmatmul.mubr.msk.f32.gmra.mxu0 %vm997_vm4, %v794_v9 }
 0x24a   : > { %9646 = vmatprep.mubr.msk.f32.mxu0 %vm997_vm4, %v11767_v24 }
 0x24d   : > { %9647 = vmatmul.mubr.msk.f32.gmra.mxu0 %vm997_vm4, %v11772_v32 }
 0x24e   : > { %9693 = vmatprep.mubr.msk.bf16.mxu0 %vm701_vm3, %v11633_v31 }
 0x251   : > { %9694 = vmatmul.mubr.msk.bf16.vlgmr.msra.gmra.mxu0 %vm701_vm3, %v11651_v39 }
 0x252   : > { %9697 = vmatprep.mubr.msk.bf16.mxu0 %vm701_vm3, %v11682_v53 }
 0x259   : > { %9698 = vmatmul.mubr.msk.bf16.gmra.mxu0 %vm701_vm3, %v11696_v57 }
 0x25a   : > { %9701 = vmatprep.mubr.msk.bf16.mxu0 %vm701_vm3, %v11692_v56 }
 0x261   : > { %9702 = vmatmul.mubr.msk.bf16.gmra.mxu0 %vm701_vm3, %v11718_v63 }
 0x2f9   : > { %v11857_v0 = vpop.f32.mrf.mxu0 }
 0x2fa   : > { %v1199_v19 = vsel %vm1195_vm5, %v11857_v0, -inf }
 0x2fb   : > { %v11859_v14 = vpop.f32.mrf.mxu0 }
 0x2fc   : > { %v1196_v15 = vsel %vm1195_vm5, %v11859_v14, -inf }
 0x2fd   : > { %1197 = vmax.xlane.f32.xlu0 %v1196_v15  ;;  %v11863_v16 = vpop.f32.mrf.mxu0 }
 0x2fe   : > { %v1205_v17 = vsel %vm1195_vm5, %v11863_v16, -inf }
 0x2ff   : > { %1206 = vmax.xlane.f32.xlu1 %v1205_v17  ;;  %v11867_v18 = vpop.f32.mrf.mxu0 }
 0x300   : > { %v1202_v21 = vsel %vm1195_vm5, %v11867_v18, -inf }
 0x301   : > { %1200 = vmax.xlane.f32.xlu0 %v1199_v19  ;;  %v11871_v20 = vpop.f32.mrf.mxu0 }
 0x302   : > { %v1211_v27 = vsel %vm1195_vm5, %v11871_v20, -inf }
 0x303   : > { %1203 = vmax.xlane.f32.xlu1 %v1202_v21  ;;  %v11875_v22 = vpop.f32.mrf.mxu0 }
 0x304   : > { %v1208_v23 = vsel %vm1195_vm5, %v11875_v22, -inf }
 0x305   : > { %1209 = vmax.xlane.f32.xlu0 %v1208_v23  ;;  %v11879_v24 = vpop.f32.mrf.mxu0 }
 0x306   : > { %v1217_v32 = vsel %vm1195_vm5, %v11879_v24, -inf }
 0x307   : > { %1212 = vmax.xlane.f32.xlu1 %v1211_v27  ;;  %v11883_v28 = vpop.f32.mrf.mxu0 }
 0x308   : > { %v1214_v29 = vsel %vm1195_vm5, %v11883_v28, -inf }
 0x309   : > { %1215 = vmax.xlane.f32.xlu0 %v1214_v29  ;;  %v11887_v30 = vpop.f32.mrf.mxu0 }
 0x30a   : > { %v1223_v38 = vsel %vm1195_vm5, %v11887_v30, -inf }
 0x30b   : > { %1218 = vmax.xlane.f32.xlu1 %v1217_v32  ;;  %v11891_v33 = vpop.f32.mrf.mxu0 }
 0x30c   : > { %v1220_v34 = vsel %vm1195_vm5, %v11891_v33, -inf }
 0x30d   : > { %1221 = vmax.xlane.f32.xlu0 %v1220_v34  ;;  %v11895_v37 = vpop.f32.mrf.mxu0 }
 0x30e   : > { %v1230_v44 = vsel %vm1229_vm6, %v11895_v37, -inf }
 0x30f   : > { %1224 = vmax.xlane.f32.xlu1 %v1223_v38  ;;  %v11899_v41 = vpop.f32.mrf.mxu0 }
 0x310   : > { %v1226_v42 = vsel %vm1195_vm5, %v11899_v41, -inf }
 0x311   : > { %v9695_v43 = vpop.f32.mrf.mxu0  ;;  %1227 = vmax.xlane.f32.xlu0 %v1226_v42 }
 0x313   : > { %1231 = vmax.xlane.f32.xlu1 %v1230_v44  ;;  %v1610_v45 = vpop.f32.mrf.mxu0 }
 0x315   : > { %v9696_v46 = vpop.f32.mrf.mxu0 }
 0x317   : > { %v1613_v47 = vpop.f32.mrf.mxu0 }
 0x319   : > { %v9699_v48 = vpop.f32.mrf.mxu0 }
 0x31b   : > { %v1626_v55 = vpop.f32.mrf.mxu0 }
 0x31d   : > { %v9700_v58 = vpop.f32.mrf.mxu0 }
 0x31f   : > { %v1629_v59 = vpop.f32.mrf.mxu0 }
 0x321   : > { %v9703_v60 = vpop.f32.mrf.mxu0 }
 0x323   : > { %v1642_v4 = vpop.f32.mrf.mxu0 }
 0x325   : > { %v9704_v6 = vpop.f32.mrf.mxu0 }
 0x326   : > { %9721 = vmatprep.subr.msk.mxu0 %vm997_vm4, %v9704_v6 }
 0x327   : > { %9722 = vmatpush3.xpose.msk.msra.mxu0 %vm997_vm4, %v9704_v6  ;;  %v1645_v7 = vpop.f32.mrf.mxu0 }
 0x328   : > { %9723 = vmatprep.subr.msk.mxu0 %vm997_vm4, %v9703_v60 }
 0x32b   : > { %9724 = vmatpush3.xpose.msk.msra.mxu0 %vm997_vm4, %v9703_v60 }
 0x32c   : > { %9725 = vmatprep.subr.msk.mxu0 %vm997_vm4, %v1645_v7 }
 0x32f   : > { %9726 = vmatpush3.xpose.msk.msra.mxu0 %vm997_vm4, %v1645_v7  ;;  %v10671_v7 = vld [vmem:[%s14618_s3 + $0xc] sm:$0xff]  }
 0x330   : > { %9727 = vmatprep.subr.msk.mxu0 %vm997_vm4, %v1642_v4 }
 0x333   : > { %9728 = vmatpush3.xpose.msk.msra.mxu0 %vm997_vm4, %v1642_v4 }
 0x334   : > { %9729 = vmatprep.subr.msk.mxu0 %vm997_vm4, %v9700_v58 }
 0x337   : > { %9730 = vmatpush3.xpose.msk.msra.mxu0 %vm997_vm4, %v9700_v58 }
 0x338   : > { %9731 = vmatprep.subr.msk.mxu0 %vm997_vm4, %v9699_v48 }
 0x33b   : > { %9732 = vmatpush3.xpose.msk.msra.mxu0 %vm997_vm4, %v9699_v48 }
 0x33c   : > { %9733 = vmatprep.subr.msk.mxu0 %vm997_vm4, %v1629_v59 }
 0x33f   : > { %9734 = vmatpush3.xpose.msk.msra.mxu0 %vm997_vm4, %v1629_v59 }
 0x340   : > { %9735 = vmatprep.subr.msk.mxu0 %vm997_vm4, %v1626_v55 }
 0x343   : > { %9736 = vmatpush3.xpose.msk.msra.mxu0 %vm997_vm4, %v1626_v55 }
 0x344   : > { %9737 = vmatprep.subr.msk.mxu0 %vm997_vm4, %v9696_v46 }
 0x347   : > { %9738 = vmatpush3.xpose.msk.msra.mxu0 %vm997_vm4, %v9696_v46 }
 0x348   : > { %9739 = vmatprep.subr.msk.mxu0 %vm997_vm4, %v9695_v43 }
 0x34b   : > { %9740 = vmatpush3.xpose.msk.msra.mxu0 %vm997_vm4, %v9695_v43 }
 0x34c   : > { %9741 = vmatprep.subr.msk.mxu0 %vm997_vm4, %v1613_v47 }
 0x34f   : > { %9742 = vmatpush3.xpose.msk.msra.mxu0 %vm997_vm4, %v1613_v47 }
 0x350   : > { %9743 = vmatprep.subr.msk.mxu0 %vm997_vm4, %v1610_v45 }
 0x353   : > { %9744 = vmatpush3.xpose.msk.msra.mxu0 %vm997_vm4, %v1610_v45 }
 0x386   : > { %v1198_v12 = vpop.xlane.xlu0 %1197 }
 0x387   : > { %v1233_v8 = vsub.f32 %v11859_v14, %v1198_v12 }
 0x388   : > { %v1207_v2 = vpop.xlane.xlu1 %1206 }
 0x389   : > { %v1236_v11 = vsub.f32 %v11863_v16, %v1207_v2  ;;  %v1245_v13 = vmul.f32 1.442695, %v1233_v8  ;;  %v10672_v2 = vld [vmem:[#allocation6 + $0x14] ss:$0 sps:$4 sm:$0xff]  }
 0x38a   : > { %v1201_v5 = vpop.xlane.xlu0 %1200 }
 0x38b   : > { %v1234_v10 = vsub.f32 %v11857_v0, %v1201_v5  ;;  %v1251_v3 = vmul.f32 1.442695, %v1236_v11  ;;  %10726 = vpow2.f32 %v1245_v13 }
 0x38c   : > { %v1204_v9 = vpop.xlane.xlu1 %1203 }
 0x38d   : > { %v1247_v15 = vmul.f32 1.442695, %v1234_v10  ;;  %v1235_v17 = vsub.f32 %v11867_v18, %v1204_v9 }
 0x38e   : > { %v1210_v19 = vpop.xlane.xlu0 %1209 }
 0x38f   : > { %10728 = vpow2.f32 %v1247_v15  ;;  %v1249_v21 = vmul.f32 1.442695, %v1235_v17  ;;  %v1237_v23 = vsub.f32 %v11875_v22, %v1210_v19  ;;  %v1671_v19 = vsel %vm720_vm2, %v10672_v2, 0 }
 0x390   : > { %10730 = vpow2.f32 %v1251_v3  ;;  %v1213_v14 = vpop.xlane.xlu1 %1212 }
 0x391   : > { %10732 = vpow2.f32 %v1249_v21  ;;  %v1253_v27 = vmul.f32 1.442695, %v1237_v23  ;;  %v1238_v16 = vsub.f32 %v11871_v20, %v1213_v14  ;;  %v10673_v21 = vld [vmem:[#allocation6 + $0xc] sm:$0xff]  }
 0x392   : > { %v1216_v29 = vpop.xlane.xlu0 %1215  ;;  %v10674_v23 = vld [vmem:[%s14619_s4 + $0x20] ss:$0 sps:$4 sm:$0xff]  }
 0x393   : > { %v1255_v32 = vmul.f32 1.442695, %v1238_v16  ;;  %v1239_v0 = vsub.f32 %v11883_v28, %v1216_v29  ;;  %10734 = vpow2.f32 %v1253_v27  ;;  %10562 = vmatprep.subr.msk.bf16.mxu0 %vm720_vm2, %v10674_v23 }
 0x394   : > { %v1219_v34 = vpop.xlane.xlu1 %1218 }
 0x395   : > { %10736 = vpow2.f32 %v1255_v32  ;;  %v1257_v18 = vmul.f32 1.442695, %v1239_v0  ;;  %v1240_v38 = vsub.f32 %v11879_v24, %v1219_v34 }
 0x396   : > { %v1222_v42 = vpop.xlane.xlu0 %1221 }
 0x397   : > { %v1259_v43 = vmul.f32 1.442695, %v1240_v38  ;;  %v1241_v22 = vsub.f32 %v11891_v33, %v1222_v42  ;;  %10738 = vpow2.f32 %v1257_v18 }
 0x398   : > { %v1225_v44 = vpop.xlane.xlu1 %1224  ;;  %v11946_v47 = vpop.eup %10726 }
 0x399   : > { %10740 = vpow2.f32 %v1259_v43  ;;  %v1261_v45 = vmul.f32 1.442695, %v1241_v22  ;;  %v1242_v20 = vsub.f32 %v11887_v30, %v1225_v44 }
 0x39a   : > { %v1228_v46 = vpop.xlane.xlu0 %1227 }
 0x39b   : > { %v1263_v28 = vmul.f32 1.442695, %v1242_v20  ;;  %v1243_v48 = vsub.f32 %v11899_v41, %v1228_v46  ;;  %10742 = vpow2.f32 %v1261_v45  ;;  %v1477_v41 = vsel %vm720_vm2, %v11908_v1, 0  ;;  %v8490_v45 = vld [vmem:[#allocation4 + $0x1] ss:$0 sm:$0xff] }
 0x39c   : > { %v11949_v55 = vpop.eup %10728  ;;  %v1232_v24 = vpop.xlane.xlu1 %1231 }
 0x39d   : > { %v11951_v58 = vpop.eup %10730  ;;  %10744 = vpow2.f32 %v1263_v28  ;;  %v1265_v33 = vmul.f32 1.442695, %v1243_v48  ;;  %v1244_v59 = vsub.f32 %v11895_v37, %v1232_v24  ;;  %v1305_v60 = vpack.c.bf16 %v11949_v55, %v11946_v47 }
 0x39e   : > { %v11956_v30 = vpop.eup %10732 }
 0x39f   : > { %v1306_v4 = vpack.c.bf16 %v11951_v58, %v11956_v30  ;;  %v1267_v6 = vmul.f32 1.442695, %v1244_v59  ;;  %9661 = vmatprep.mubr.msk.bf16.mxu1 %vm1195_vm5, %v1305_v60  ;;  %10746 = vpow2.f32 %v1265_v33  ;;  %v2328_v33 = vsel %vm720_vm2, %v10674_v23, 0  ;;  %v10675_v59 = vld [vmem:[%s14619_s4 + $0x18] sm:$0xff]  }
 0x3a0   : > { %v11966_v37 = vpop.eup %10734 }
 0x3a1   : > { %10748 = vpow2.f32 %v1267_v6  ;;  %9662 = vmatmul.mubr.msk.bf16.vlgmr.msra.gmra.mxu1 %vm1195_vm5, %v1306_v4 }
 0x3a2   : > { %v11969_v12 = vpop.eup %10736  ;;  %9674 = vmatpush3.bf16.msra.mxu1 %v1477_v41 }
 0x3a3   : > { %v1307_v8 = vpack.c.bf16 %v11969_v12, %v11966_v37  ;;  %9675 = vmatprep.subr.bf16.mxu1 %v10671_v7 }
 0x3a4   : > { %v11973_v11 = vpop.eup %10738 }
 0x3a5   : > { %9665 = vmatprep.mubr.msk.bf16.mxu1 %vm1195_vm5, %v1307_v8 }
 0x3a6   : > { %v11976_v1 = vpop.eup %10740  ;;  %9676 = vmatpush3.bf16.msra.mxu1 %v10671_v7 }
 0x3a7   : > { %v1308_v13 = vpack.c.bf16 %v11976_v1, %v11973_v11  ;;  %10559 = vmatprep.subr.msk.bf16.mxu1 %vm720_vm2, %v10672_v2 }
 0x3a8   : > { %v11981_v5 = vpop.eup %10742 }
 0x3a9   : > { %9666 = vmatmul.mubr.msk.bf16.gmra.mxu1 %vm1195_vm5, %v1308_v13 }
 0x3aa   : > { %v11984_v10 = vpop.eup %10744 }
 0x3ab   : > { %v1309_v3 = vpack.c.bf16 %v11984_v10, %v11981_v5 }
 0x3ac   : > { %v11988_v9 = vpop.eup %10746 }
 0x3ad   : > { %9669 = vmatprep.mubr.msk.bf16.mxu1 %vm1195_vm5, %v1309_v3 }
 0x3ae   : > { %v11991_v15 = vpop.eup %10748 }
 0x3af   : > { %v1310_v17 = vpack.c.bf16 %v11991_v15, %v11988_v9 }
 0x3b1   : > { %9670 = vmatmul.mubr.msk.bf16.gmra.mxu1 %vm1195_vm5, %v1310_v17 }
 0x3b2   : > { %9677 = vmatprep.mubr.msk.bf16.mxu1 %vm701_vm3, %v11633_v31 }
 0x3b9   : > { %9678 = vmatmul.mubr.msk.bf16.vlgmr.msra.gmra.mxu1 %vm701_vm3, %v11651_v39 }
 0x3ba   : > { %9681 = vmatprep.mubr.msk.bf16.mxu1 %vm701_vm3, %v11682_v53  ;;  %9706 = vmatpush3.bf16.msra.mxu1 %v1671_v19 }
 0x3bb   : > { %9707 = vmatprep.subr.bf16.mxu1 %v10673_v21 }
 0x3be   : > { %9708 = vmatpush3.bf16.msra.mxu1 %v10673_v21 }
 0x3c1   : > { %9682 = vmatmul.mubr.msk.bf16.gmra.mxu1 %vm701_vm3, %v11696_v57 }
 0x3c2   : > { %9685 = vmatprep.mubr.msk.bf16.mxu1 %vm701_vm3, %v11692_v56 }
 0x3c9   : > { %9686 = vmatmul.mubr.msk.bf16.gmra.mxu1 %vm701_vm3, %v11718_v63 }
 0x3ca   : > { %9709 = vmatprep.mubr.msk.bf16.mxu1 %vm701_vm3, %v11633_v31 }
 0x3d1   : > { %9710 = vmatmul.mubr.msk.bf16.vlgmr.msra.gmra.mxu1 %vm701_vm3, %v11651_v39 }
 0x3d2   : > { %9713 = vmatprep.mubr.msk.bf16.mxu1 %vm701_vm3, %v11682_v53 }
 0x3d9   : > { %9714 = vmatmul.mubr.msk.bf16.gmra.mxu1 %vm701_vm3, %v11696_v57 }
 0x3da   : > { %9717 = vmatprep.mubr.msk.bf16.mxu1 %vm701_vm3, %v11692_v56 }
 0x3e1   : > { %9718 = vmatmul.mubr.msk.bf16.gmra.mxu1 %vm701_vm3, %v11718_v63 }
 0x461   : > { %v12025_v14 = vpop.f32.mrf.mxu1 }
 0x463   : > { %v12027_v27 = vpop.f32.mrf.mxu1 }
 0x465   : > { %v12029_v16 = vpop.f32.mrf.mxu1 }
 0x466   : > { %14666 = vst [vmem:[#allocation28_spill] sm:$0xff] %v12029_v16 }
 0x467   : > { %v12031_v29 = vpop.f32.mrf.mxu1 }
 0x469   : > { %v12033_v32 = vpop.f32.mrf.mxu1 }
 0x46a   : > { %14667 = vst [vmem:[#allocation29_spill] sm:$0xff] %v12033_v32 }
 0x46b   : > { %v12035_v0 = vpop.f32.mrf.mxu1 }
 0x46c   : > { %14668 = vst [vmem:[#allocation30_spill] sm:$0xff] %v12035_v0 }
 0x46d   : > { %v12037_v34 = vpop.f32.mrf.mxu1 }
 0x46e   : > { %14669 = vst [vmem:[#allocation31_spill] sm:$0xff] %v12037_v34 }
 0x46f   : > { %v12039_v18 = vpop.f32.mrf.mxu1 }
 0x470   : > { %14670 = vst [vmem:[#allocation32_spill] sm:$0xff] %v12039_v18 }
 0x471   : > { %v12041_v38 = vpop.f32.mrf.mxu1 }
 0x472   : > { %14671 = vst [vmem:[#allocation33_spill] sm:$0xff] %v12041_v38 }
 0x473   : > { %v12043_v42 = vpop.f32.mrf.mxu1 }
 0x474   : > { %14672 = vst [vmem:[#allocation34_spill] sm:$0xff] %v12043_v42 }
 0x475   : > { %v12045_v43 = vpop.f32.mrf.mxu1 }
 0x476   : > { %14673 = vst [vmem:[#allocation35_spill] sm:$0xff] %v12045_v43 }
 0x477   : > { %v12047_v22 = vpop.f32.mrf.mxu1 }
 0x478   : > { %14674 = vst [vmem:[#allocation36_spill] sm:$0xff] %v12047_v22 }
 0x479   : > { %v9679_v44 = vpop.f32.mrf.mxu1 }
 0x47a   : > { %v1522_v60 = vadd.f32 %v9679_v44, %v8490_v45 }
 0x47b   : > { %v1513_v20 = vpop.f32.mrf.mxu1 }
 0x47c   : > { %v1514_v46 = vadd.f32 %v8490_v45, %v1513_v20 }
 0x47d   : > { %v9680_v28 = vpop.f32.mrf.mxu1 }
 0x47e   : > { %9745 = vmatprep.mubr.msk.f32.mxu0 %vm997_vm4, %v1514_v46  ;;  %v1525_v41 = vadd.f32 %v9680_v28, %v8490_v45 }
 0x47f   : > { %v1516_v48 = vpop.f32.mrf.mxu1 }
 0x480   : > { %v1517_v24 = vadd.f32 %v8490_v45, %v1516_v48 }
 0x481   : > { %v9683_v4 = vpop.f32.mrf.mxu1 }
 0x482   : > { %9746 = vmatmul.mubr.msk.f32.vlgmr.msra.gmra.mxu0 %vm997_vm4, %v1517_v24  ;;  %v1538_v3 = vadd.f32 %v9683_v4, %v8490_v45 }
 0x483   : > { %v1529_v6 = vpop.f32.mrf.mxu1  ;;  %9748 = vmatprep.mubr.msk.f32.mxu0 %vm997_vm4, %v1522_v60  ;;  %9804 = vmatpush3.bf16.msra.mxu0 %v2328_v33 }
 0x484   : > { %v1530_v7 = vadd.f32 %v8490_v45, %v1529_v6  ;;  %9805 = vmatprep.subr.bf16.mxu0 %v10675_v59 }
 0x485   : > { %v9684_v8 = vpop.f32.mrf.mxu1 }
 0x486   : > { %9749 = vmatmul.mubr.msk.f32.gmra.mxu0 %vm997_vm4, %v1525_v41  ;;  %v1541_v21 = vadd.f32 %v9684_v8, %v8490_v45 }
 0x487   : > { %v1532_v2 = vpop.f32.mrf.mxu1  ;;  %9751 = vmatprep.mubr.msk.f32.mxu0 %vm997_vm4, %v1530_v7  ;;  %9806 = vmatpush3.bf16.msra.mxu0 %v10675_v59 }
 0x488   : > { %v1533_v13 = vadd.f32 %v8490_v45, %v1532_v2 }
 0x489   : > { %v9687_v17 = vpop.f32.mrf.mxu1 }
 0x48a   : > { %9752 = vmatmul.mubr.msk.f32.gmra.mxu0 %vm997_vm4, %v1533_v13  ;;  %v1554_v28 = vadd.f32 %v9687_v17, %v8490_v45 }
 0x48b   : > { %v1545_v19 = vpop.f32.mrf.mxu1  ;;  %9754 = vmatprep.mubr.msk.f32.mxu0 %vm997_vm4, %v1538_v3 }
 0x48c   : > { %v1546_v23 = vadd.f32 %v8490_v45, %v1545_v19 }
 0x48d   : > { %v9688_v44 = vpop.f32.mrf.mxu1 }
 0x48e   : > { %9755 = vmatmul.mubr.msk.f32.gmra.mxu0 %vm997_vm4, %v1541_v21  ;;  %v1557_v33 = vadd.f32 %v9688_v44, %v8490_v45 }
 0x48f   : > { %v1548_v20 = vpop.f32.mrf.mxu1  ;;  %9757 = vmatprep.mubr.msk.f32.mxu0 %vm997_vm4, %v1546_v23 }
 0x490   : > { %v1549_v46 = vadd.f32 %v8490_v45, %v1548_v20 }
 0x491   : > { %v9711_v48 = vpop.f32.mrf.mxu1 }
 0x492   : > { %9758 = vmatmul.mubr.msk.f32.gmra.mxu0 %vm997_vm4, %v1549_v46 }
 0x493   : > { %v1707_v24 = vpop.f32.mrf.mxu1  ;;  %9760 = vmatprep.mubr.msk.f32.mxu0 %vm997_vm4, %v1554_v28 }
 0x495   : > { %v9712_v59 = vpop.f32.mrf.mxu1 }
 0x496   : > { %9761 = vmatmul.mubr.msk.f32.gmra.mxu0 %vm997_vm4, %v1557_v33  ;;  %v2066_v44 = vpack.c.bf16 %v9712_v59, %v9711_v48 }
 0x497   : > { %v1710_v60 = vpop.f32.mrf.mxu1  ;;  %9807 = vmatprep.mubr.msk.bf16.mxu0 %vm701_vm3, %v11633_v31 }
 0x498   : > { %v2065_v20 = vpack.c.bf16 %v1710_v60, %v1707_v24 }
 0x499   : > { %v9715_v4 = vpop.f32.mrf.mxu1 }
 0x49a   : > { %9808 = vmatmul.mubr.msk.bf16.vlgmr.msra.gmra.mxu0 %vm701_vm3, %v11651_v39 }
 0x49b   : > { %v1723_v6 = vpop.f32.mrf.mxu1  ;;  %9811 = vmatprep.mubr.msk.bf16.mxu0 %vm701_vm3, %v11682_v53 }
 0x49d   : > { %v9716_v41 = vpop.f32.mrf.mxu1 }
 0x49e   : > { %v2068_v21 = vpack.c.bf16 %v9716_v41, %v9715_v4 }
 0x49f   : > { %v1726_v7 = vpop.f32.mrf.mxu1 }
 0x4a0   : > { %v2067_v23 = vpack.c.bf16 %v1726_v7, %v1723_v6 }
 0x4a1   : > { %v9719_v8 = vpop.f32.mrf.mxu1 }
 0x4a2   : > { %9812 = vmatmul.mubr.msk.bf16.gmra.mxu0 %vm701_vm3, %v11696_v57 }
 0x4a3   : > { %v1739_v45 = vpop.f32.mrf.mxu1  ;;  %9815 = vmatprep.mubr.msk.bf16.mxu0 %vm701_vm3, %v11692_v56 }
 0x4a5   : > { %v9720_v2 = vpop.f32.mrf.mxu1 }
 0x4a6   : > { %v2070_v13 = vpack.c.bf16 %v9720_v2, %v9719_v8 }
 0x4a7   : > { %v1742_v3 = vpop.f32.mrf.mxu1 }
 0x4a8   : > { %v2090_v17 = vsel %vm536_vm0, %v2070_v13, 0  ;;  %v2069_v19 = vpack.c.bf16 %v1742_v3, %v1739_v45  ;;  %10560 = vmatprep.subr.msk.bf16.mxu1 %vm536_vm0, %v2070_v13 }
 0x4a9   : > { %9764 = vmatpush3.bf16.msra.mxu1 %v2090_v17 }
 0x4aa   : > { %9765 = vmatprep.subr.bf16.mxu1 %v2069_v19  ;;  %9816 = vmatmul.mubr.msk.bf16.gmra.mxu0 %vm701_vm3, %v11718_v63 }
 0x4ad   : > { %9766 = vmatpush3.bf16.msra.mxu1 %v2069_v19 }
 0x4ae   : > { %9767 = vmatprep.subr.bf16.mxu1 %v2068_v21 }
 0x4b1   : > { %9768 = vmatpush3.bf16.msra.mxu1 %v2068_v21 }
 0x4b2   : > { %9769 = vmatprep.subr.bf16.mxu1 %v2067_v23 }
 0x4b5   : > { %9770 = vmatpush3.bf16.msra.mxu1 %v2067_v23 }
 0x4b6   : > { %9771 = vmatprep.subr.bf16.mxu1 %v2066_v44 }
 0x4b9   : > { %9772 = vmatpush3.bf16.msra.mxu1 %v2066_v44 }
 0x4ba   : > { %9773 = vmatprep.subr.bf16.mxu1 %v2065_v20 }
 0x4bd   : > { %9774 = vmatpush3.bf16.msra.mxu1 %v2065_v20 }
 0x4be   : > { %10561 = vmatprep.subr.msk.bf16.mxu1 %vm720_vm2, %v12130_v61 }
 0x542   : > { %v12079_v46 = vpop.f32.mrf.mxu0 }
 0x543   : > { %v1954_v28 = vsel %vm1195_vm5, %v12079_v46, -inf }
 0x544   : > { %1955 = vmax.xlane.f32.xlu1 %v1954_v28  ;;  %v12083_v33 = vpop.f32.mrf.mxu0 }
 0x545   : > { %v1951_v4 = vsel %vm1195_vm5, %v12083_v33, -inf }
 0x546   : > { %1952 = vmax.xlane.f32.xlu0 %v1951_v4  ;;  %v12087_v6 = vpop.f32.mrf.mxu0 }
 0x547   : > { %v1960_v48 = vsel %vm1195_vm5, %v12087_v6, -inf }
 0x548   : > { %1961 = vmax.xlane.f32.xlu1 %v1960_v48  ;;  %v12091_v24 = vpop.f32.mrf.mxu0 }
 0x549   : > { %v1957_v59 = vsel %vm1195_vm5, %v12091_v24, -inf }
 0x54a   : > { %1958 = vmax.xlane.f32.xlu0 %v1957_v59  ;;  %v12095_v60 = vpop.f32.mrf.mxu0 }
 0x54b   : > { %v1966_v41 = vsel %vm1195_vm5, %v12095_v60, -inf }
 0x54c   : > { %1967 = vmax.xlane.f32.xlu1 %v1966_v41  ;;  %v12099_v7 = vpop.f32.mrf.mxu0 }
 0x54d   : > { %v1963_v8 = vsel %vm1195_vm5, %v12099_v7, -inf }
 0x54e   : > { %1964 = vmax.xlane.f32.xlu0 %v1963_v8  ;;  %v12103_v45 = vpop.f32.mrf.mxu0 }
 0x54f   : > { %v1972_v2 = vsel %vm1195_vm5, %v12103_v45, -inf }
 0x550   : > { %1973 = vmax.xlane.f32.xlu1 %v1972_v2  ;;  %v12107_v13 = vpop.f32.mrf.mxu0 }
 0x551   : > { %v1969_v3 = vsel %vm1195_vm5, %v12107_v13, -inf }
 0x552   : > { %1970 = vmax.xlane.f32.xlu0 %v1969_v3  ;;  %v12111_v17 = vpop.f32.mrf.mxu0 }
 0x553   : > { %v1978_v19 = vsel %vm1195_vm5, %v12111_v17, -inf }
 0x554   : > { %1979 = vmax.xlane.f32.xlu1 %v1978_v19  ;;  %v12115_v21 = vpop.f32.mrf.mxu0 }
 0x555   : > { %v1975_v23 = vsel %vm1195_vm5, %v12115_v21, -inf }
 0x556   : > { %1976 = vmax.xlane.f32.xlu0 %v1975_v23  ;;  %v12119_v44 = vpop.f32.mrf.mxu0 }
 0x557   : > { %v1984_v20 = vsel %vm1229_vm6, %v12119_v44, -inf }
 0x558   : > { %1985 = vmax.xlane.f32.xlu1 %v1984_v20  ;;  %v12123_v28 = vpop.f32.mrf.mxu0 }
 0x559   : > { %v1981_v4 = vsel %vm1195_vm5, %v12123_v28, -inf }
 0x55a   : > { %v9809_v48 = vpop.f32.mrf.mxu0  ;;  %1982 = vmax.xlane.f32.xlu0 %v1981_v4 }
 0x55c   : > { %v2364_v59 = vpop.f32.mrf.mxu0 }
 0x55e   : > { %v9810_v41 = vpop.f32.mrf.mxu0 }
 0x560   : > { %v2367_v8 = vpop.f32.mrf.mxu0 }
 0x562   : > { %v9813_v2 = vpop.f32.mrf.mxu0 }
 0x564   : > { %v2380_v3 = vpop.f32.mrf.mxu0 }
 0x566   : > { %v9814_v19 = vpop.f32.mrf.mxu0 }
 0x568   : > { %v2383_v23 = vpop.f32.mrf.mxu0 }
 0x56a   : > { %v9817_v20 = vpop.f32.mrf.mxu0 }
 0x56c   : > { %v2396_v50 = vpop.f32.mrf.mxu0 }
 0x56e   : > { %v9818_v62 = vpop.f32.mrf.mxu0 }
 0x56f   : > { %9835 = vmatprep.subr.msk.mxu0 %vm997_vm4, %v9818_v62 }
 0x570   : > { %9836 = vmatpush3.xpose.msk.msra.mxu0 %vm997_vm4, %v9818_v62  ;;  %v2399_v4 = vpop.f32.mrf.mxu0 }
 0x571   : > { %9837 = vmatprep.subr.msk.mxu0 %vm997_vm4, %v9817_v20 }
 0x574   : > { %9838 = vmatpush3.xpose.msk.msra.mxu0 %vm997_vm4, %v9817_v20 }
 0x575   : > { %9839 = vmatprep.subr.msk.mxu0 %vm997_vm4, %v2399_v4 }
 0x578   : > { %9840 = vmatpush3.xpose.msk.msra.mxu0 %vm997_vm4, %v2399_v4 }
 0x579   : > { %9841 = vmatprep.subr.msk.mxu0 %vm997_vm4, %v2396_v50 }
 0x57c   : > { %9842 = vmatpush3.xpose.msk.msra.mxu0 %vm997_vm4, %v2396_v50 }
 0x57d   : > { %9843 = vmatprep.subr.msk.mxu0 %vm997_vm4, %v9814_v19 }
 0x580   : > { %9844 = vmatpush3.xpose.msk.msra.mxu0 %vm997_vm4, %v9814_v19 }
 0x581   : > { %9845 = vmatprep.subr.msk.mxu0 %vm997_vm4, %v9813_v2 }
 0x584   : > { %9846 = vmatpush3.xpose.msk.msra.mxu0 %vm997_vm4, %v9813_v2 }
 0x585   : > { %9847 = vmatprep.subr.msk.mxu0 %vm997_vm4, %v2383_v23 }
 0x588   : > { %9848 = vmatpush3.xpose.msk.msra.mxu0 %vm997_vm4, %v2383_v23 }
 0x589   : > { %9849 = vmatprep.subr.msk.mxu0 %vm997_vm4, %v2380_v3 }
 0x58c   : > { %9850 = vmatpush3.xpose.msk.msra.mxu0 %vm997_vm4, %v2380_v3 }
 0x58d   : > { %9851 = vmatprep.subr.msk.mxu0 %vm997_vm4, %v9810_v41 }
 0x590   : > { %9852 = vmatpush3.xpose.msk.msra.mxu0 %vm997_vm4, %v9810_v41 }
 0x591   : > { %9853 = vmatprep.subr.msk.mxu0 %vm997_vm4, %v9809_v48 }
 0x594   : > { %9854 = vmatpush3.xpose.msk.msra.mxu0 %vm997_vm4, %v9809_v48 }
 0x595   : > { %9855 = vmatprep.subr.msk.mxu0 %vm997_vm4, %v2367_v8 }
 0x598   : > { %9856 = vmatpush3.xpose.msk.msra.mxu0 %vm997_vm4, %v2367_v8 }
 0x599   : > { %9857 = vmatprep.subr.msk.mxu0 %vm997_vm4, %v2364_v59 }
 0x59c   : > { %9858 = vmatpush3.xpose.msk.msra.mxu0 %vm997_vm4, %v2364_v59 }
 0x5cd   : > { %v1956_v50 = vpop.xlane.xlu1 %1955 }
 0x5ce   : > { %v1988_v62 = vsub.f32 %v12079_v46, %v1956_v50 }
 0x5cf   : > { %v1953_v2 = vpop.xlane.xlu0 %1952 }
 0x5d0   : > { %v2001_v3 = vmul.f32 1.442695, %v1988_v62  ;;  %v1987_v19 = vsub.f32 %v12083_v33, %v1953_v2 }
 0x5d1   : > { %v1962_v41 = vpop.xlane.xlu1 %1961 }
 0x5d2   : > { %v1999_v23 = vmul.f32 1.442695, %v1987_v19  ;;  %v1990_v20 = vsub.f32 %v12087_v6, %v1962_v41  ;;  %10750 = vpow2.f32 %v2001_v3 }
 0x5d3   : > { %v1959_v48 = vpop.xlane.xlu0 %1958 }
 0x5d4   : > { %10752 = vpow2.f32 %v1999_v23  ;;  %v2005_v4 = vmul.f32 1.442695, %v1990_v20  ;;  %v1989_v8 = vsub.f32 %v12091_v24, %v1959_v48 }
 0x5d5   : > { %v1968_v51 = vpop.xlane.xlu1 %1967 }
 0x5d6   : > { %v2003_v52 = vmul.f32 1.442695, %v1989_v8  ;;  %v1992_v59 = vsub.f32 %v12095_v60, %v1968_v51  ;;  %10754 = vpow2.f32 %v2005_v4 }
 0x5d7   : > { %v1965_v46 = vpop.xlane.xlu0 %1964 }
 0x5d8   : > { %10756 = vpow2.f32 %v2003_v52  ;;  %v2009_v50 = vmul.f32 1.442695, %v1992_v59  ;;  %v1991_v33 = vsub.f32 %v12099_v7, %v1965_v46 }
 0x5d9   : > { %v1974_v62 = vpop.xlane.xlu1 %1973 }
 0x5da   : > { %v2007_v2 = vmul.f32 1.442695, %v1991_v33  ;;  %v1994_v6 = vsub.f32 %v12103_v45, %v1974_v62  ;;  %10758 = vpow2.f32 %v2009_v50 }
 0x5db   : > { %v1971_v3 = vpop.xlane.xlu0 %1970 }
 0x5dc   : > { %10760 = vpow2.f32 %v2007_v2  ;;  %v2013_v19 = vmul.f32 1.442695, %v1994_v6  ;;  %v1993_v24 = vsub.f32 %v12107_v13, %v1971_v3  ;;  %v10677_v2 = vld [vmem:[%s14618_s3 + $0x18] sm:$0xff]  }
 0x5dd   : > { %v1980_v41 = vpop.xlane.xlu1 %1979 }
 0x5de   : > { %v2011_v23 = vmul.f32 1.442695, %v1993_v24  ;;  %v1996_v51 = vsub.f32 %v12111_v17, %v1980_v41  ;;  %10762 = vpow2.f32 %v2013_v19  ;;  %v10678_v19 = vld [vmem:[#allocation6 + $0x20] ss:$0 sps:$4 sm:$0xff]  }
 0x5df   : > { %v1977_v60 = vpop.xlane.xlu0 %1976  ;;  %v12167_v52 = vpop.eup %10750 }
 0x5e0   : > { %10764 = vpow2.f32 %v2011_v23  ;;  %v2017_v7 = vmul.f32 1.442695, %v1996_v51  ;;  %v1995_v20 = vsub.f32 %v12115_v21, %v1977_v60 }
 0x5e1   : > { %v12170_v48 = vpop.eup %10752  ;;  %v1986_v45 = vpop.xlane.xlu1 %1985 }
 0x5e2   : > { %v2015_v4 = vmul.f32 1.442695, %v1995_v20  ;;  %v1998_v8 = vsub.f32 %v12119_v44, %v1986_v45  ;;  %v2059_v13 = vpack.c.bf16 %v12167_v52, %v12170_v48  ;;  %10766 = vpow2.f32 %v2017_v7 }
 0x5e3   : > { %v1983_v59 = vpop.xlane.xlu0 %1982  ;;  %v12175_v17 = vpop.eup %10754  ;;  %v2231_v44 = vsel %vm720_vm2, %v12130_v61, 0 }
 0x5e4   : > { %10768 = vpow2.f32 %v2015_v4  ;;  %v2021_v46 = vmul.f32 1.442695, %v1998_v8  ;;  %v1997_v50 = vsub.f32 %v12123_v28, %v1983_v59  ;;  %9775 = vmatprep.mubr.msk.bf16.mxu1 %vm1195_vm5, %v2059_v13  ;;  %v2425_v4 = vsel %vm720_vm2, %v10678_v19, 0  ;;  %v10679_v8 = vld [vmem:[#allocation6 + $0x18] sm:$0xff]  }
 0x5e5   : > { %v12179_v21 = vpop.eup %10756  ;;  %v10680_v13 = vld [vmem:[%s14619_s4 + $0x2c] ss:$0 sps:$4 sm:$0xff]  }
 0x5e6   : > { %v2060_v33 = vpack.c.bf16 %v12175_v17, %v12179_v21  ;;  %v2019_v62 = vmul.f32 1.442695, %v1997_v50  ;;  %10770 = vpow2.f32 %v2021_v46  ;;  %10566 = vmatprep.subr.msk.bf16.mxu0 %vm720_vm2, %v10680_v13  ;;  %v3082_v43 = vsel %vm720_vm2, %v10680_v13, 0 }
 0x5e7   : > { %v12188_v6 = vpop.eup %10758 }
 0x5e8   : > { %10772 = vpow2.f32 %v2019_v62  ;;  %9776 = vmatmul.mubr.msk.bf16.vlgmr.msra.gmra.mxu1 %vm1195_vm5, %v2060_v33 }
 0x5e9   : > { %v12191_v28 = vpop.eup %10760  ;;  %9788 = vmatpush3.bf16.msra.mxu1 %v2231_v44 }
 0x5ea   : > { %v2061_v3 = vpack.c.bf16 %v12188_v6, %v12191_v28  ;;  %9789 = vmatprep.subr.bf16.mxu1 %v10677_v2 }
 0x5eb   : > { %v12195_v24 = vpop.eup %10762 }
 0x5ec   : > { %9779 = vmatprep.mubr.msk.bf16.mxu1 %vm1195_vm5, %v2061_v3 }
 0x5ed   : > { %v12198_v61 = vpop.eup %10764  ;;  %9790 = vmatpush3.bf16.msra.mxu1 %v10677_v2 }
 0x5ee   : > { %v2062_v41 = vpack.c.bf16 %v12195_v24, %v12198_v61  ;;  %10563 = vmatprep.subr.msk.bf16.mxu1 %vm720_vm2, %v10678_v19 }
 0x5ef   : > { %v12203_v23 = vpop.eup %10766 }
 0x5f0   : > { %9780 = vmatmul.mubr.msk.bf16.gmra.mxu1 %vm1195_vm5, %v2062_v41 }
 0x5f1   : > { %v12206_v51 = vpop.eup %10768 }
 0x5f2   : > { %v2063_v60 = vpack.c.bf16 %v12203_v23, %v12206_v51 }
 0x5f3   : > { %v12210_v7 = vpop.eup %10770 }
 0x5f4   : > { %9783 = vmatprep.mubr.msk.bf16.mxu1 %vm1195_vm5, %v2063_v60 }
 0x5f5   : > { %v12213_v20 = vpop.eup %10772 }
 0x5f6   : > { %v2064_v45 = vpack.c.bf16 %v12210_v7, %v12213_v20 }
 0x5f8   : > { %9784 = vmatmul.mubr.msk.bf16.gmra.mxu1 %vm1195_vm5, %v2064_v45 }
 0x5f9   : > { %9791 = vmatprep.mubr.msk.bf16.mxu1 %vm701_vm3, %v11633_v31 }
 0x600   : > { %9792 = vmatmul.mubr.msk.bf16.vlgmr.msra.gmra.mxu1 %vm701_vm3, %v11651_v39 }
 0x601   : > { %9795 = vmatprep.mubr.msk.bf16.mxu1 %vm701_vm3, %v11682_v53  ;;  %9820 = vmatpush3.bf16.msra.mxu1 %v2425_v4 }
 0x602   : > { %9821 = vmatprep.subr.bf16.mxu1 %v10679_v8 }
 0x605   : > { %9822 = vmatpush3.bf16.msra.mxu1 %v10679_v8  ;;  %v8551_v8 = vld [vmem:[#allocation4 + $0x2] ss:$0 sm:$0xff] }
 0x608   : > { %9796 = vmatmul.mubr.msk.bf16.gmra.mxu1 %vm701_vm3, %v11696_v57 }
 0x609   : > { %9799 = vmatprep.mubr.msk.bf16.mxu1 %vm701_vm3, %v11692_v56 }
 0x610   : > { %9800 = vmatmul.mubr.msk.bf16.gmra.mxu1 %vm701_vm3, %v11718_v63 }
 0x611   : > { %9823 = vmatprep.mubr.msk.bf16.mxu1 %vm701_vm3, %v11633_v31 }
 0x618   : > { %9824 = vmatmul.mubr.msk.bf16.vlgmr.msra.gmra.mxu1 %vm701_vm3, %v11651_v39 }
 0x619   : > { %9827 = vmatprep.mubr.msk.bf16.mxu1 %vm701_vm3, %v11682_v53 }
 0x620   : > { %9828 = vmatmul.mubr.msk.bf16.gmra.mxu1 %vm701_vm3, %v11696_v57 }
 0x621   : > { %9831 = vmatprep.mubr.msk.bf16.mxu1 %vm701_vm3, %v11692_v56 }
 0x628   : > { %9832 = vmatmul.mubr.msk.bf16.gmra.mxu1 %vm701_vm3, %v11718_v63 }
 0x6a8   : > { %v12247_v59 = vpop.f32.mrf.mxu1 }
 0x6aa   : > { %v12249_v46 = vpop.f32.mrf.mxu1 }
 0x6ac   : > { %v12251_v50 = vpop.f32.mrf.mxu1 }
 0x6ae   : > { %v12253_v33 = vpop.f32.mrf.mxu1 }
 0x6b0   : > { %v12255_v62 = vpop.f32.mrf.mxu1 }
 0x6b1   : > { %14675 = vst [vmem:[#allocation37_spill] sm:$0xff] %v12255_v62  ;;  %v12352_v62 = vld [vmem:[%s14618_s3 + $0x2c] ss:$0 sps:$4 sm:$0xff]  }
 0x6b2   : > { %v12257_v44 = vpop.f32.mrf.mxu1 }
 0x6b3   : > { %14676 = vst [vmem:[#allocation38_spill] sm:$0xff] %v12257_v44 }
 0x6b4   : > { %v12259_v2 = vpop.f32.mrf.mxu1 }
 0x6b5   : > { %14677 = vst [vmem:[#allocation39_spill] sm:$0xff] %v12259_v2 }
 0x6b6   : > { %v12261_v3 = vpop.f32.mrf.mxu1 }
 0x6b7   : > { %14678 = vst [vmem:[#allocation40_spill] sm:$0xff] %v12261_v3 }
 0x6b8   : > { %v12263_v19 = vpop.f32.mrf.mxu1 }
 0x6b9   : > { %14679 = vst [vmem:[#allocation41_spill] sm:$0xff] %v12263_v19 }
 0x6ba   : > { %v12265_v41 = vpop.f32.mrf.mxu1 }
 0x6bb   : > { %14680 = vst [vmem:[#allocation42_spill] sm:$0xff] %v12265_v41 }
 0x6bc   : > { %v12267_v60 = vpop.f32.mrf.mxu1 }
 0x6bd   : > { %14681 = vst [vmem:[#allocation43_spill] sm:$0xff] %v12267_v60 }
 0x6be   : > { %v12269_v45 = vpop.f32.mrf.mxu1 }
 0x6bf   : > { %14682 = vst [vmem:[#allocation44_spill] sm:$0xff] %v12269_v45 }
 0x6c0   : > { %v9793_v4 = vpop.f32.mrf.mxu1 }
 0x6c1   : > { %v2276_v38 = vadd.f32 %v9793_v4, %v8551_v8 }
 0x6c2   : > { %v2267_v40 = vpop.f32.mrf.mxu1 }
 0x6c3   : > { %v2268_v54 = vadd.f32 %v8551_v8, %v2267_v40 }
 0x6c4   : > { %v9794_v49 = vpop.f32.mrf.mxu1 }
 0x6c5   : > { %9859 = vmatprep.mubr.msk.f32.mxu0 %vm997_vm4, %v2268_v54  ;;  %v2279_v40 = vadd.f32 %v9794_v49, %v8551_v8 }
 0x6c6   : > { %v2270_v35 = vpop.f32.mrf.mxu1 }
 0x6c7   : > { %v2271_v25 = vadd.f32 %v8551_v8, %v2270_v35 }
 0x6c8   : > { %v9797_v26 = vpop.f32.mrf.mxu1 }
 0x6c9   : > { %9860 = vmatmul.mubr.msk.f32.vlgmr.msra.gmra.mxu0 %vm997_vm4, %v2271_v25  ;;  %v2292_v22 = vadd.f32 %v9797_v26, %v8551_v8 }
 0x6ca   : > { %v2283_v60 = vpop.f32.mrf.mxu1  ;;  %9862 = vmatprep.mubr.msk.f32.mxu0 %vm997_vm4, %v2276_v38  ;;  %9918 = vmatpush3.bf16.msra.mxu0 %v3082_v43 }
 0x6cb   : > { %v2284_v45 = vadd.f32 %v8551_v8, %v2283_v60  ;;  %9919 = vmatprep.subr.bf16.mxu0 %v10681_v36 }
 0x6cc   : > { %v9798_v54 = vpop.f32.mrf.mxu1 }
 0x6cd   : > { %9863 = vmatmul.mubr.msk.f32.gmra.mxu0 %vm997_vm4, %v2279_v40  ;;  %v2295_v38 = vadd.f32 %v9798_v54, %v8551_v8 }
 0x6ce   : > { %v2286_v35 = vpop.f32.mrf.mxu1  ;;  %9865 = vmatprep.mubr.msk.f32.mxu0 %vm997_vm4, %v2284_v45  ;;  %9920 = vmatpush3.bf16.msra.mxu0 %v10681_v36 }
 0x6cf   : > { %v2287_v13 = vadd.f32 %v8551_v8, %v2286_v35 }
 0x6d0   : > { %v9801_v4 = vpop.f32.mrf.mxu1 }
 0x6d1   : > { %9866 = vmatmul.mubr.msk.f32.gmra.mxu0 %vm997_vm4, %v2287_v13  ;;  %v2308_v41 = vadd.f32 %v9801_v4, %v8551_v8 }
 0x6d2   : > { %v2299_v25 = vpop.f32.mrf.mxu1  ;;  %9868 = vmatprep.mubr.msk.f32.mxu0 %vm997_vm4, %v2292_v22 }
 0x6d3   : > { %v2300_v43 = vadd.f32 %v8551_v8, %v2299_v25 }
 0x6d4   : > { %v9802_v49 = vpop.f32.mrf.mxu1 }
 0x6d5   : > { %9869 = vmatmul.mubr.msk.f32.gmra.mxu0 %vm997_vm4, %v2295_v38  ;;  %v2311_v36 = vadd.f32 %v9802_v49, %v8551_v8 }
 0x6d6   : > { %v2302_v60 = vpop.f32.mrf.mxu1  ;;  %9871 = vmatprep.mubr.msk.f32.mxu0 %vm997_vm4, %v2300_v43 }
 0x6d7   : > { %v2303_v40 = vadd.f32 %v8551_v8, %v2302_v60 }
 0x6d8   : > { %v9825_v45 = vpop.f32.mrf.mxu1 }
 0x6d9   : > { %9872 = vmatmul.mubr.msk.f32.gmra.mxu0 %vm997_vm4, %v2303_v40 }
 0x6da   : > { %v2461_v26 = vpop.f32.mrf.mxu1  ;;  %9874 = vmatprep.mubr.msk.f32.mxu0 %vm997_vm4, %v2308_v41 }
 0x6dc   : > { %v9826_v35 = vpop.f32.mrf.mxu1 }
 0x6dd   : > { %9875 = vmatmul.mubr.msk.f32.gmra.mxu0 %vm997_vm4, %v2311_v36  ;;  %v2820_v19 = vpack.c.bf16 %v9826_v35, %v9825_v45 }
 0x6de   : > { %v2464_v22 = vpop.f32.mrf.mxu1  ;;  %9921 = vmatprep.mubr.msk.bf16.mxu0 %vm701_vm3, %v11633_v31 }
 0x6e0   : > { %v9829_v54 = vpop.f32.mrf.mxu1 }
 0x6e1   : > { %9922 = vmatmul.mubr.msk.bf16.vlgmr.msra.gmra.mxu0 %vm701_vm3, %v11651_v39 }
 0x6e2   : > { %v2477_v13 = vpop.f32.mrf.mxu1  ;;  %9925 = vmatprep.mubr.msk.bf16.mxu0 %vm701_vm3, %v11682_v53 }
 0x6e4   : > { %v9830_v4 = vpop.f32.mrf.mxu1 }
 0x6e5   : > { %v2822_v36 = vpack.c.bf16 %v9830_v4, %v9829_v54 }
 0x6e6   : > { %v2480_v25 = vpop.f32.mrf.mxu1 }
 0x6e7   : > { %v2821_v42 = vpack.c.bf16 %v2480_v25, %v2477_v13 }
 0x6e8   : > { %v9833_v38 = vpop.f32.mrf.mxu1 }
 0x6e9   : > { %9926 = vmatmul.mubr.msk.bf16.gmra.mxu0 %vm701_vm3, %v11696_v57 }
 0x6ea   : > { %v2493_v41 = vpop.f32.mrf.mxu1  ;;  %9929 = vmatprep.mubr.msk.bf16.mxu0 %vm701_vm3, %v11692_v56 }
 0x6ec   : > { %v9834_v8 = vpop.f32.mrf.mxu1 }
 0x6ed   : > { %v2824_v43 = vpack.c.bf16 %v9834_v8, %v9833_v38  ;;  %v2819_v38 = vpack.c.bf16 %v2464_v22, %v2461_v26 }
 0x6ee   : > { %v2496_v49 = vpop.f32.mrf.mxu1 }
 0x6ef   : > { %v2844_v60 = vsel %vm536_vm0, %v2824_v43, 0  ;;  %v2823_v40 = vpack.c.bf16 %v2496_v49, %v2493_v41  ;;  %10564 = vmatprep.subr.msk.bf16.mxu1 %vm536_vm0, %v2824_v43 }
 0x6f0   : > { %9878 = vmatpush3.bf16.msra.mxu1 %v2844_v60 }
 0x6f1   : > { %9879 = vmatprep.subr.bf16.mxu1 %v2823_v40  ;;  %9930 = vmatmul.mubr.msk.bf16.gmra.mxu0 %vm701_vm3, %v11718_v63 }
 0x6f4   : > { %9880 = vmatpush3.bf16.msra.mxu1 %v2823_v40 }
 0x6f5   : > { %9881 = vmatprep.subr.bf16.mxu1 %v2822_v36 }
 0x6f8   : > { %9882 = vmatpush3.bf16.msra.mxu1 %v2822_v36 }
 0x6f9   : > { %9883 = vmatprep.subr.bf16.mxu1 %v2821_v42 }
 0x6fc   : > { %9884 = vmatpush3.bf16.msra.mxu1 %v2821_v42 }
 0x6fd   : > { %9885 = vmatprep.subr.bf16.mxu1 %v2820_v19 }
 0x700   : > { %9886 = vmatpush3.bf16.msra.mxu1 %v2820_v19 }
 0x701   : > { %9887 = vmatprep.subr.bf16.mxu1 %v2819_v38 }
 0x704   : > { %9888 = vmatpush3.bf16.msra.mxu1 %v2819_v38 }
 0x705   : > { %10565 = vmatprep.subr.msk.bf16.mxu1 %vm720_vm2, %v12352_v62 }
 0x789   : > { %v12301_v41 = vpop.f32.mrf.mxu0 }
 0x78a   : > { %v2708_v8 = vsel %vm1195_vm5, %v12301_v41, -inf }
 0x78b   : > { %2709 = vmax.xlane.f32.xlu1 %v2708_v8  ;;  %v12305_v43 = vpop.f32.mrf.mxu0 }
 0x78c   : > { %v2705_v54 = vsel %vm1195_vm5, %v12305_v43, -inf }
 0x78d   : > { %2706 = vmax.xlane.f32.xlu0 %v2705_v54  ;;  %v12309_v13 = vpop.f32.mrf.mxu0 }
 0x78e   : > { %v2714_v42 = vsel %vm1195_vm5, %v12309_v13, -inf }
 0x78f   : > { %2715 = vmax.xlane.f32.xlu1 %v2714_v42  ;;  %v12313_v19 = vpop.f32.mrf.mxu0 }
 0x790   : > { %v2711_v45 = vsel %vm1195_vm5, %v12313_v19, -inf }
 0x791   : > { %2712 = vmax.xlane.f32.xlu0 %v2711_v45  ;;  %v12317_v26 = vpop.f32.mrf.mxu0 }
 0x792   : > { %v2720_v35 = vsel %vm1195_vm5, %v12317_v26, -inf }
 0x793   : > { %2721 = vmax.xlane.f32.xlu1 %v2720_v35  ;;  %v12321_v22 = vpop.f32.mrf.mxu0 }
 0x794   : > { %v2717_v4 = vsel %vm1195_vm5, %v12321_v22, -inf }
 0x795   : > { %2718 = vmax.xlane.f32.xlu0 %v2717_v4  ;;  %v12325_v25 = vpop.f32.mrf.mxu0 }
 0x796   : > { %v2726_v49 = vsel %vm1195_vm5, %v12325_v25, -inf }
 0x797   : > { %2727 = vmax.xlane.f32.xlu1 %v2726_v49  ;;  %v12329_v60 = vpop.f32.mrf.mxu0 }
 0x798   : > { %v2723_v40 = vsel %vm1195_vm5, %v12329_v60, -inf }
 0x799   : > { %2724 = vmax.xlane.f32.xlu0 %v2723_v40  ;;  %v12333_v36 = vpop.f32.mrf.mxu0 }
 0x79a   : > { %v2732_v38 = vsel %vm1195_vm5, %v12333_v36, -inf }
 0x79b   : > { %2733 = vmax.xlane.f32.xlu1 %v2732_v38  ;;  %v12337_v8 = vpop.f32.mrf.mxu0 }
 0x79c   : > { %v2729_v54 = vsel %vm1195_vm5, %v12337_v8, -inf }
 0x79d   : > { %2730 = vmax.xlane.f32.xlu0 %v2729_v54  ;;  %v12341_v42 = vpop.f32.mrf.mxu0 }
 0x79e   : > { %v2738_v45 = vsel %vm1229_vm6, %v12341_v42, -inf }
 0x79f   : > { %2739 = vmax.xlane.f32.xlu1 %v2738_v45  ;;  %v12345_v35 = vpop.f32.mrf.mxu0 }
 0x7a0   : > { %v2735_v4 = vsel %vm1195_vm5, %v12345_v35, -inf }
 0x7a1   : > { %v9923_v49 = vpop.f32.mrf.mxu0  ;;  %2736 = vmax.xlane.f32.xlu0 %v2735_v4 }
 0x7a3   : > { %v3118_v40 = vpop.f32.mrf.mxu0 }
 0x7a5   : > { %v9924_v38 = vpop.f32.mrf.mxu0 }
 0x7a7   : > { %v3121_v32 = vpop.f32.mrf.mxu0 }
 0x7a9   : > { %v9927_v34 = vpop.f32.mrf.mxu0 }
 0x7ab   : > { %v3134_v2 = vpop.f32.mrf.mxu0 }
 0x7ad   : > { %v9928_v44 = vpop.f32.mrf.mxu0 }
 0x7af   : > { %v3137_v54 = vpop.f32.mrf.mxu0 }
 0x7b1   : > { %v9931_v45 = vpop.f32.mrf.mxu0 }
 0x7b3   : > { %v3150_v3 = vpop.f32.mrf.mxu0 }
 0x7b5   : > { %v9932_v18 = vpop.f32.mrf.mxu0 }
 0x7b6   : > { %9949 = vmatprep.subr.msk.mxu0 %vm997_vm4, %v9932_v18 }
 0x7b7   : > { %9950 = vmatpush3.xpose.msk.msra.mxu0 %vm997_vm4, %v9932_v18  ;;  %v3153_v4 = vpop.f32.mrf.mxu0 }
 0x7b8   : > { %9951 = vmatprep.subr.msk.mxu0 %vm997_vm4, %v9931_v45 }
 0x7bb   : > { %9952 = vmatpush3.xpose.msk.msra.mxu0 %vm997_vm4, %v9931_v45 }
 0x7bc   : > { %9953 = vmatprep.subr.msk.mxu0 %vm997_vm4, %v3153_v4 }
 0x7bf   : > { %9954 = vmatpush3.xpose.msk.msra.mxu0 %vm997_vm4, %v3153_v4 }
 0x7c0   : > { %9955 = vmatprep.subr.msk.mxu0 %vm997_vm4, %v3150_v3 }
 0x7c3   : > { %9956 = vmatpush3.xpose.msk.msra.mxu0 %vm997_vm4, %v3150_v3 }
 0x7c4   : > { %9957 = vmatprep.subr.msk.mxu0 %vm997_vm4, %v9928_v44 }
 0x7c7   : > { %9958 = vmatpush3.xpose.msk.msra.mxu0 %vm997_vm4, %v9928_v44 }
 0x7c8   : > { %9959 = vmatprep.subr.msk.mxu0 %vm997_vm4, %v9927_v34 }
 0x7cb   : > { %9960 = vmatpush3.xpose.msk.msra.mxu0 %vm997_vm4, %v9927_v34 }
 0x7cc   : > { %9961 = vmatprep.subr.msk.mxu0 %vm997_vm4, %v3137_v54 }
 0x7cf   : > { %9962 = vmatpush3.xpose.msk.msra.mxu0 %vm997_vm4, %v3137_v54 }
 0x7d0   : > { %9963 = vmatprep.subr.msk.mxu0 %vm997_vm4, %v3134_v2 }
 0x7d3   : > { %9964 = vmatpush3.xpose.msk.msra.mxu0 %vm997_vm4, %v3134_v2 }
 0x7d4   : > { %9965 = vmatprep.subr.msk.mxu0 %vm997_vm4, %v9924_v38 }
 0x7d7   : > { %9966 = vmatpush3.xpose.msk.msra.mxu0 %vm997_vm4, %v9924_v38 }
 0x7d8   : > { %9967 = vmatprep.subr.msk.mxu0 %vm997_vm4, %v9923_v49 }
 0x7db   : > { %9968 = vmatpush3.xpose.msk.msra.mxu0 %vm997_vm4, %v9923_v49 }
 0x7dc   : > { %9969 = vmatprep.subr.msk.mxu0 %vm997_vm4, %v3121_v32 }
 0x7df   : > { %9970 = vmatpush3.xpose.msk.msra.mxu0 %vm997_vm4, %v3121_v32 }
 0x7e0   : > { %9971 = vmatprep.subr.msk.mxu0 %vm997_vm4, %v3118_v40 }
 0x7e3   : > { %9972 = vmatpush3.xpose.msk.msra.mxu0 %vm997_vm4, %v3118_v40 }
 0x814   : > { %v2710_v34 = vpop.xlane.xlu1 %2709 }
 0x815   : > { %v2742_v18 = vsub.f32 %v12301_v41, %v2710_v34 }
 0x816   : > { %v2707_v44 = vpop.xlane.xlu0 %2706 }
 0x817   : > { %v2755_v2 = vmul.f32 1.442695, %v2742_v18  ;;  %v2741_v3 = vsub.f32 %v12305_v43, %v2707_v44 }
 0x818   : > { %v2716_v38 = vpop.xlane.xlu1 %2715 }
 0x819   : > { %v2753_v54 = vmul.f32 1.442695, %v2741_v3  ;;  %v2744_v45 = vsub.f32 %v12309_v13, %v2716_v38  ;;  %10774 = vpow2.f32 %v2755_v2 }
 0x81a   : > { %v2713_v49 = vpop.xlane.xlu0 %2712 }
 0x81b   : > { %10776 = vpow2.f32 %v2753_v54  ;;  %v2759_v4 = vmul.f32 1.442695, %v2744_v45  ;;  %v2743_v32 = vsub.f32 %v12313_v19, %v2713_v49 }
 0x81c   : > { %v2722_v0 = vpop.xlane.xlu1 %2721 }
 0x81d   : > { %v2757_v16 = vmul.f32 1.442695, %v2743_v32  ;;  %v2746_v40 = vsub.f32 %v12317_v26, %v2722_v0  ;;  %10778 = vpow2.f32 %v2759_v4 }
 0x81e   : > { %v2719_v41 = vpop.xlane.xlu0 %2718 }
 0x81f   : > { %10780 = vpow2.f32 %v2757_v16  ;;  %v2763_v34 = vmul.f32 1.442695, %v2746_v40  ;;  %v2745_v43 = vsub.f32 %v12321_v22, %v2719_v41 }
 0x820   : > { %v2728_v18 = vpop.xlane.xlu1 %2727 }
 0x821   : > { %v2761_v44 = vmul.f32 1.442695, %v2745_v43  ;;  %v2748_v13 = vsub.f32 %v12325_v25, %v2728_v18  ;;  %10782 = vpow2.f32 %v2763_v34 }
 0x822   : > { %v2725_v2 = vpop.xlane.xlu0 %2724 }
 0x823   : > { %10784 = vpow2.f32 %v2761_v44  ;;  %v2767_v3 = vmul.f32 1.442695, %v2748_v13  ;;  %v2747_v19 = vsub.f32 %v12329_v60, %v2725_v2  ;;  %v10683_v44 = vld [vmem:[%s14618_s3 + $0x24] sm:$0xff]  }
 0x824   : > { %v2734_v38 = vpop.xlane.xlu1 %2733 }
 0x825   : > { %v2765_v54 = vmul.f32 1.442695, %v2747_v19  ;;  %v2750_v0 = vsub.f32 %v12333_v36, %v2734_v38  ;;  %10786 = vpow2.f32 %v2767_v3  ;;  %v10684_v3 = vld [vmem:[#allocation6 + $0x2c] ss:$0 sps:$4 sm:$0xff]  }
 0x826   : > { %v2731_v26 = vpop.xlane.xlu0 %2730  ;;  %v12389_v16 = vpop.eup %10774 }
 0x827   : > { %10788 = vpow2.f32 %v2765_v54  ;;  %v2771_v22 = vmul.f32 1.442695, %v2750_v0  ;;  %v2749_v45 = vsub.f32 %v12337_v8, %v2731_v26 }
 0x828   : > { %v12392_v49 = vpop.eup %10776  ;;  %v2740_v25 = vpop.xlane.xlu1 %2739 }
 0x829   : > { %v2769_v4 = vmul.f32 1.442695, %v2749_v45  ;;  %v2752_v32 = vsub.f32 %v12341_v42, %v2740_v25  ;;  %v2813_v60 = vpack.c.bf16 %v12389_v16, %v12392_v49  ;;  %10790 = vpow2.f32 %v2771_v22 }
 0x82a   : > { %v2737_v40 = vpop.xlane.xlu0 %2736  ;;  %v12397_v36 = vpop.eup %10778  ;;  %v2985_v42 = vsel %vm720_vm2, %v12352_v62, 0 }
 0x82b   : > { %10792 = vpow2.f32 %v2769_v4  ;;  %v2775_v41 = vmul.f32 1.442695, %v2752_v32  ;;  %v2751_v34 = vsub.f32 %v12345_v35, %v2737_v40  ;;  %9889 = vmatprep.mubr.msk.bf16.mxu1 %vm1195_vm5, %v2813_v60  ;;  %v3179_v4 = vsel %vm720_vm2, %v10684_v3, 0  ;;  %v10685_v32 = vld [vmem:[#allocation6 + $0x24] sm:$0xff]  }
 0x82c   : > { %v12401_v8 = vpop.eup %10780 }
 0x82d   : > { %v2814_v43 = vpack.c.bf16 %v12397_v36, %v12401_v8  ;;  %v2773_v18 = vmul.f32 1.442695, %v2751_v34  ;;  %10794 = vpow2.f32 %v2775_v41 }
 0x82e   : > { %v12410_v13 = vpop.eup %10782 }
 0x82f   : > { %10796 = vpow2.f32 %v2773_v18  ;;  %9890 = vmatmul.mubr.msk.bf16.vlgmr.msra.gmra.mxu1 %vm1195_vm5, %v2814_v43 }
 0x830   : > { %v12413_v35 = vpop.eup %10784  ;;  %9902 = vmatpush3.bf16.msra.mxu1 %v2985_v42 }
 0x831   : > { %v2815_v2 = vpack.c.bf16 %v12410_v13, %v12413_v35  ;;  %9903 = vmatprep.subr.bf16.mxu1 %v10683_v44 }
 0x832   : > { %v12417_v19 = vpop.eup %10786 }
 0x833   : > { %9893 = vmatprep.mubr.msk.bf16.mxu1 %vm1195_vm5, %v2815_v2 }
 0x834   : > { %v12420_v62 = vpop.eup %10788  ;;  %9904 = vmatpush3.bf16.msra.mxu1 %v10683_v44  ;;  %v8612_v44 = vld [vmem:[#allocation4 + $0x3] ss:$0 sm:$0xff] }
 0x835   : > { %v2816_v38 = vpack.c.bf16 %v12417_v19, %v12420_v62  ;;  %10567 = vmatprep.subr.msk.bf16.mxu1 %vm720_vm2, %v10684_v3 }
 0x836   : > { %v12425_v54 = vpop.eup %10790 }
 0x837   : > { %9894 = vmatmul.mubr.msk.bf16.gmra.mxu1 %vm1195_vm5, %v2816_v38 }
 0x838   : > { %v12428_v0 = vpop.eup %10792 }
 0x839   : > { %v2817_v26 = vpack.c.bf16 %v12425_v54, %v12428_v0 }
 0x83a   : > { %v12432_v22 = vpop.eup %10794 }
 0x83b   : > { %9897 = vmatprep.mubr.msk.bf16.mxu1 %vm1195_vm5, %v2817_v26 }
 0x83c   : > { %v12435_v45 = vpop.eup %10796 }
 0x83d   : > { %v2818_v25 = vpack.c.bf16 %v12432_v22, %v12435_v45 }
 0x83f   : > { %9898 = vmatmul.mubr.msk.bf16.gmra.mxu1 %vm1195_vm5, %v2818_v25 }
 0x840   : > { %9905 = vmatprep.mubr.msk.bf16.mxu1 %vm701_vm3, %v11633_v31 }
 0x847   : > { %9906 = vmatmul.mubr.msk.bf16.vlgmr.msra.gmra.mxu1 %vm701_vm3, %v11651_v39 }
 0x848   : > { %9909 = vmatprep.mubr.msk.bf16.mxu1 %vm701_vm3, %v11682_v53  ;;  %9934 = vmatpush3.bf16.msra.mxu1 %v3179_v4 }
 0x849   : > { %9935 = vmatprep.subr.bf16.mxu1 %v10685_v32 }
 0x84c   : > { %9936 = vmatpush3.bf16.msra.mxu1 %v10685_v32 }
 0x84f   : > { %9910 = vmatmul.mubr.msk.bf16.gmra.mxu1 %vm701_vm3, %v11696_v57 }
 0x850   : > { %9913 = vmatprep.mubr.msk.bf16.mxu1 %vm701_vm3, %v11692_v56 }
 0x857   : > { %9914 = vmatmul.mubr.msk.bf16.gmra.mxu1 %vm701_vm3, %v11718_v63 }
 0x858   : > { %9937 = vmatprep.mubr.msk.bf16.mxu1 %vm701_vm3, %v11633_v31 }
 0x85f   : > { %9938 = vmatmul.mubr.msk.bf16.vlgmr.msra.gmra.mxu1 %vm701_vm3, %v11651_v39 }
 0x860   : > { %9941 = vmatprep.mubr.msk.bf16.mxu1 %vm701_vm3, %v11682_v53 }
 0x867   : > { %9942 = vmatmul.mubr.msk.bf16.gmra.mxu1 %vm701_vm3, %v11696_v57 }
 0x868   : > { %9945 = vmatprep.mubr.msk.bf16.mxu1 %vm701_vm3, %v11692_v56 }
 0x86f   : > { %9946 = vmatmul.mubr.msk.bf16.gmra.mxu1 %vm701_vm3, %v11718_v63 }
 0x8ef   : > { %v12465_v60 = vpop.f32.mrf.mxu1 }
 0x8f1   : > { %v12467_v40 = vpop.f32.mrf.mxu1 }
 0x8f2   : > { %14683 = vst [vmem:[#allocation45_spill] sm:$0xff] %v12467_v40 }
 0x8f3   : > { %v12469_v31 = vpop.f32.mrf.mxu1 }
 0x8f4   : > { %14684 = vst [vmem:[#allocation46_spill] sm:$0xff] %v12469_v31 }
 0x8f5   : > { %v12471_v41 = vpop.f32.mrf.mxu1 }
 0x8f7   : > { %v12473_v39 = vpop.f32.mrf.mxu1 }
 0x8f8   : > { %14685 = vst [vmem:[#allocation47_spill] sm:$0xff] %v12473_v39 }
 0x8f9   : > { %v12475_v53 = vpop.f32.mrf.mxu1 }
 0x8fa   : > { %14686 = vst [vmem:[#allocation48_spill] sm:$0xff] %v12475_v53 }
 0x8fb   : > { %v12477_v34 = vpop.f32.mrf.mxu1 }
 0x8fc   : > { %14687 = vst [vmem:[#allocation49_spill] sm:$0xff] %v12477_v34 }
 0x8fd   : > { %v12479_v57 = vpop.f32.mrf.mxu1 }
 0x8fe   : > { %14688 = vst [vmem:[#allocation50_spill] sm:$0xff] %v12479_v57 }
 0x8ff   : > { %v12481_v56 = vpop.f32.mrf.mxu1 }
 0x900   : > { %14689 = vst [vmem:[#allocation51_spill] sm:$0xff] %v12481_v56 }
 0x901   : > { %v12483_v43 = vpop.f32.mrf.mxu1 }
 0x902   : > { %14690 = vst [vmem:[#allocation52_spill] sm:$0xff] %v12483_v43 }
 0x903   : > { %v12485_v63 = vpop.f32.mrf.mxu1 }
 0x904   : > { %14691 = vst [vmem:[#allocation53_spill] sm:$0xff] %v12485_v63 }
 0x905   : > { %v12487_v18 = vpop.f32.mrf.mxu1 }
 0x906   : > { %14692 = vst [vmem:[#allocation54_spill] sm:$0xff] %v12487_v18 }
 0x907   : > { %v9907_v42 = vpop.f32.mrf.mxu1 }
 0x908   : > { %v3030_v4 = vadd.f32 %v9907_v42, %v8612_v44 }
 0x909   : > { %v3021_v2 = vpop.f32.mrf.mxu1 }
 0x90a   : > { %v3022_v3 = vadd.f32 %v8612_v44, %v3021_v2 }
 0x90b   : > { %v9908_v38 = vpop.f32.mrf.mxu1 }
 0x90c   : > { %9973 = vmatprep.mubr.msk.f32.mxu0 %vm997_vm4, %v3022_v3  ;;  %v3033_v43 = vadd.f32 %v9908_v38, %v8612_v44 }
 0x90d   : > { %v3024_v26 = vpop.f32.mrf.mxu1 }
 0x90e   : > { %v3025_v25 = vadd.f32 %v8612_v44, %v3024_v26 }
 0x90f   : > { %v9911_v32 = vpop.f32.mrf.mxu1 }
 0x910   : > { %9974 = vmatmul.mubr.msk.f32.vlgmr.msra.gmra.mxu0 %vm997_vm4, %v3025_v25  ;;  %v3046_v53 = vadd.f32 %v9911_v32, %v8612_v44 }
 0x911   : > { %v3037_v56 = vpop.f32.mrf.mxu1  ;;  %9976 = vmatprep.mubr.msk.f32.mxu0 %vm997_vm4, %v3030_v4 }
 0x912   : > { %v3038_v63 = vadd.f32 %v8612_v44, %v3037_v56 }
 0x913   : > { %v9912_v34 = vpop.f32.mrf.mxu1 }
 0x914   : > { %9977 = vmatmul.mubr.msk.f32.gmra.mxu0 %vm997_vm4, %v3033_v43  ;;  %v3049_v26 = vadd.f32 %v9912_v34, %v8612_v44 }
 0x915   : > { %v3040_v18 = vpop.f32.mrf.mxu1  ;;  %9979 = vmatprep.mubr.msk.f32.mxu0 %vm997_vm4, %v3038_v63 }
 0x916   : > { %v3041_v2 = vadd.f32 %v8612_v44, %v3040_v18 }
 0x917   : > { %v9915_v3 = vpop.f32.mrf.mxu1 }
 0x918   : > { %9980 = vmatmul.mubr.msk.f32.gmra.mxu0 %vm997_vm4, %v3041_v2  ;;  %v3062_v38 = vadd.f32 %v9915_v3, %v8612_v44 }
 0x919   : > { %v3053_v42 = vpop.f32.mrf.mxu1  ;;  %9982 = vmatprep.mubr.msk.f32.mxu0 %vm997_vm4, %v3046_v53 }
 0x91a   : > { %v3054_v25 = vadd.f32 %v8612_v44, %v3053_v42 }
 0x91b   : > { %v9916_v39 = vpop.f32.mrf.mxu1 }
 0x91c   : > { %9983 = vmatmul.mubr.msk.f32.gmra.mxu0 %vm997_vm4, %v3049_v26  ;;  %v3065_v18 = vadd.f32 %v9916_v39, %v8612_v44 }
 0x91d   : > { %v3056_v56 = vpop.f32.mrf.mxu1  ;;  %9985 = vmatprep.mubr.msk.f32.mxu0 %vm997_vm4, %v3054_v25 }
 0x91e   : > { %v3057_v43 = vadd.f32 %v8612_v44, %v3056_v56 }
 0x91f   : > { %v9939_v4 = vpop.f32.mrf.mxu1 }
 0x920   : > { %9986 = vmatmul.mubr.msk.f32.gmra.mxu0 %vm997_vm4, %v3057_v43 }
 0x921   : > { %v3215_v63 = vpop.f32.mrf.mxu1  ;;  %9988 = vmatprep.mubr.msk.f32.mxu0 %vm997_vm4, %v3062_v38 }
 0x923   : > { %v9940_v32 = vpop.f32.mrf.mxu1 }
 0x924   : > { %9989 = vmatmul.mubr.msk.f32.gmra.mxu0 %vm997_vm4, %v3065_v18  ;;  %v3574_v38 = vpack.c.bf16 %v9940_v32, %v9939_v4 }
 0x925   : > { %v3218_v53 = vpop.f32.mrf.mxu1 }
 0x926   : > { %v3573_v18 = vpack.c.bf16 %v3218_v53, %v3215_v63 }
 0x927   : > { %v9943_v34 = vpop.f32.mrf.mxu1 }
 0x929   : > { %v3231_v2 = vpop.f32.mrf.mxu1 }
 0x92b   : > { %v9944_v42 = vpop.f32.mrf.mxu1 }
 0x92c   : > { %v3576_v39 = vpack.c.bf16 %v9944_v42, %v9943_v34 }
 0x92d   : > { %v3234_v26 = vpop.f32.mrf.mxu1 }
 0x92e   : > { %v3575_v44 = vpack.c.bf16 %v3234_v26, %v3231_v2 }
 0x92f   : > { %v9947_v57 = vpop.f32.mrf.mxu1 }
 0x931   : > { %v3247_v31 = vpop.f32.mrf.mxu1 }
 0x933   : > { %v9948_v25 = vpop.f32.mrf.mxu1 }
 0x934   : > { %v3578_v56 = vpack.c.bf16 %v9948_v25, %v9947_v57 }
 0x935   : > { %v3250_v3 = vpop.f32.mrf.mxu1 }
 0x936   : > { %v3598_v40 = vsel %vm536_vm0, %v3578_v56, 0  ;;  %v3577_v43 = vpack.c.bf16 %v3250_v3, %v3247_v31  ;;  %10568 = vmatprep.subr.msk.bf16.mxu1 %vm536_vm0, %v3578_v56 }
 0x937   : > { %9992 = vmatpush3.bf16.msra.mxu1 %v3598_v40 }
 0x938   : > { %9993 = vmatprep.subr.bf16.mxu1 %v3577_v43 }
 0x93b   : > { %9994 = vmatpush3.bf16.msra.mxu1 %v3577_v43 }
 0x93c   : > { %9995 = vmatprep.subr.bf16.mxu1 %v3576_v39 }
 0x93f   : > { %9996 = vmatpush3.bf16.msra.mxu1 %v3576_v39 }
 0x940   : > { %9997 = vmatprep.subr.bf16.mxu1 %v3575_v44 }
 0x943   : > { %9998 = vmatpush3.bf16.msra.mxu1 %v3575_v44 }
 0x944   : > { %9999 = vmatprep.subr.bf16.mxu1 %v3574_v38 }
 0x947   : > { %10000 = vmatpush3.bf16.msra.mxu1 %v3574_v38 }
 0x948   : > { %10001 = vmatprep.subr.bf16.mxu1 %v3573_v18 }
 0x94b   : > { %10002 = vmatpush3.bf16.msra.mxu1 %v3573_v18 }
 0x9d0   : > { %v12503_v57 = vpop.f32.mrf.mxu0 }
 0x9d1   : > { %v3462_v31 = vsel %vm1195_vm5, %v12503_v57, -inf }
 0x9d2   : > { %3463 = vmax.xlane.f32.xlu1 %v3462_v31  ;;  %v12507_v40 = vpop.f32.mrf.mxu0 }
 0x9d3   : > { %v3459_v34 = vsel %vm1195_vm5, %v12507_v40, -inf }
 0x9d4   : > { %3460 = vmax.xlane.f32.xlu0 %v3459_v34  ;;  %v12511_v2 = vpop.f32.mrf.mxu0 }
 0x9d5   : > { %v3468_v4 = vsel %vm1195_vm5, %v12511_v2, -inf }
 0x9d6   : > { %3469 = vmax.xlane.f32.xlu1 %v3468_v4  ;;  %v12515_v63 = vpop.f32.mrf.mxu0 }
 0x9d7   : > { %v3465_v32 = vsel %vm1195_vm5, %v12515_v63, -inf }
 0x9d8   : > { %3466 = vmax.xlane.f32.xlu0 %v3465_v32  ;;  %v12519_v53 = vpop.f32.mrf.mxu0 }
 0x9d9   : > { %v3474_v42 = vsel %vm1195_vm5, %v12519_v53, -inf }
 0x9da   : > { %3475 = vmax.xlane.f32.xlu1 %v3474_v42  ;;  %v12523_v26 = vpop.f32.mrf.mxu0 }
 0x9db   : > { %v3471_v25 = vsel %vm1195_vm5, %v12523_v26, -inf }
 0x9dc   : > { %3472 = vmax.xlane.f32.xlu0 %v3471_v25  ;;  %v12527_v56 = vpop.f32.mrf.mxu0  ;;  %v1272_v25 = vsel %vm1195_vm5, %v11949_v55, 0.0  ;;  %v1275_v55 = vsel %vm1195_vm5, %v11956_v30, 0.0  ;;  %v2786_v30 = vsel %vm1195_vm5, %v12397_v36, 0.0  ;;  %v2035_v36 = vsel %vm1195_vm5, %v12191_v28, 0.0 }
 0x9dd   : > { %v3480_v3 = vsel %vm1195_vm5, %v12527_v56, -inf  ;;  %v2792_v28 = vsel %vm1195_vm5, %v12410_v13, 0.0  ;;  %v1293_v13 = vsel %vm1195_vm5, %v11981_v5, 0.0  ;;  %v2056_v5 = vsel %vm1229_vm6, %v12210_v7, 0.0 }
 0x9de   : > { %3481 = vmax.xlane.f32.xlu1 %v3480_v3  ;;  %v12531_v43 = vpop.f32.mrf.mxu0  ;;  %v1269_v3 = vsel %vm1195_vm5, %v11946_v47, 0.0  ;;  %v2032_v47 = vsel %vm1195_vm5, %v12175_v17, 0.0  ;;  %v2783_v17 = vsel %vm1195_vm5, %v12401_v8, 0.0  ;;  %v1290_v8 = vsel %vm1195_vm5, %v11976_v1, 0.0 }
 0x9df   : > { %v3477_v39 = vsel %vm1195_vm5, %v12531_v43, -inf  ;;  %v2789_v1 = vsel %vm1195_vm5, %v12413_v35, 0.0  ;;  %v2050_v35 = vsel %vm1195_vm5, %v12203_v23, 0.0  ;;  %v2053_v23 = vsel %vm1195_vm5, %v12213_v20, 0.0 }
 0x9e0   : > { %3478 = vmax.xlane.f32.xlu0 %v3477_v39  ;;  %v12535_v44 = vpop.f32.mrf.mxu0  ;;  %v2026_v39 = vsel %vm1195_vm5, %v12167_v52, 0.0  ;;  %v2029_v52 = vsel %vm1195_vm5, %v12179_v21, 0.0  ;;  %v1284_v21 = vsel %vm1195_vm5, %v11969_v12, 0.0  ;;  %v1287_v12 = vsel %vm1195_vm5, %v11973_v11, 0.0 }
 0x9e1   : > { %v3486_v38 = vsel %vm1195_vm5, %v12535_v44, -inf  ;;  %v2798_v11 = vsel %vm1195_vm5, %v12417_v19, 0.0  ;;  %v2047_v19 = vsel %vm1195_vm5, %v12206_v51, 0.0  ;;  %v2804_v51 = vsel %vm1195_vm5, %v12425_v54, 0.0 }
 0x9e2   : > { %3487 = vmax.xlane.f32.xlu1 %v3486_v38  ;;  %v12539_v18 = vpop.f32.mrf.mxu0  ;;  %v2023_v38 = vsel %vm1195_vm5, %v12170_v48, 0.0  ;;  %v2780_v48 = vsel %vm1195_vm5, %v12389_v16, 0.0  ;;  %v1281_v16 = vsel %vm1195_vm5, %v11966_v37, 0.0  ;;  %v2044_v37 = vsel %vm1195_vm5, %v12195_v24, 0.0 }
 0x9e3   : > { %v3483_v31 = vsel %vm1195_vm5, %v12539_v18, -inf  ;;  %v2795_v24 = vsel %vm1195_vm5, %v12420_v62, 0.0  ;;  %v1302_v62 = vsel %vm1229_vm6, %v11991_v15, 0.0  ;;  %v2801_v15 = vsel %vm1195_vm5, %v12428_v0, 0.0 }
 0x9e4   : > { %3484 = vmax.xlane.f32.xlu0 %v3483_v31  ;;  %v12543_v34 = vpop.f32.mrf.mxu0  ;;  %v1278_v31 = vsel %vm1195_vm5, %v11951_v58, 0.0  ;;  %v2777_v58 = vsel %vm1195_vm5, %v12392_v49, 0.0  ;;  %v2038_v49 = vsel %vm1195_vm5, %v12188_v6, 0.0  ;;  %v2041_v6 = vsel %vm1195_vm5, %v12198_v61, 0.0 }
 0x9e5   : > { %v3492_v4 = vsel %vm1229_vm6, %v12543_v34, -inf  ;;  %v1296_v61 = vsel %vm1195_vm5, %v11984_v10, 0.0  ;;  %v1299_v10 = vsel %vm1195_vm5, %v11988_v9, 0.0  ;;  %v2810_v9 = vsel %vm1229_vm6, %v12432_v22, 0.0 }
 0x9e6   : > { %3493 = vmax.xlane.f32.xlu1 %v3492_v4  ;;  %v12547_v32 = vpop.f32.mrf.mxu0  ;;  %v2807_v7 = vsel %vm1195_vm5, %v12435_v45, 0.0 }
 0x9e7   : > { %v3489_v42 = vsel %vm1195_vm5, %v12547_v32, -inf }
 0x9e8   : > { %3490 = vmax.xlane.f32.xlu0 %v3489_v42 }
 0x9ea   : > { %1273 = vadd.xlane.f32.xlu1 %v1272_v25 }
 0x9ec   : > { %1270 = vadd.xlane.f32.xlu0 %v1269_v3 }
 0x9ee   : > { %2027 = vadd.xlane.f32.xlu1 %v2026_v39 }
 0x9f0   : > { %2024 = vadd.xlane.f32.xlu0 %v2023_v38 }
 0x9f2   : > { %1279 = vadd.xlane.f32.xlu1 %v1278_v31 }
 0x9f4   : > { %1276 = vadd.xlane.f32.xlu0 %v1275_v55 }
 0x9f6   : > { %2033 = vadd.xlane.f32.xlu1 %v2032_v47 }
 0x9f8   : > { %2030 = vadd.xlane.f32.xlu0 %v2029_v52 }
 0x9fa   : > { %2781 = vadd.xlane.f32.xlu1 %v2780_v48 }
 0x9fc   : > { %2778 = vadd.xlane.f32.xlu0 %v2777_v58 }
 0x9fe   : > { %2787 = vadd.xlane.f32.xlu1 %v2786_v30 }
 0xa00   : > { %2784 = vadd.xlane.f32.xlu0 %v2783_v17 }
 0xa02   : > { %1285 = vadd.xlane.f32.xlu1 %v1284_v21 }
 0xa04   : > { %1282 = vadd.xlane.f32.xlu0 %v1281_v16 }
 0xa06   : > { %2039 = vadd.xlane.f32.xlu1 %v2038_v49 }
 0xa08   : > { %2036 = vadd.xlane.f32.xlu0 %v2035_v36 }
 0xa0a   : > { %1291 = vadd.xlane.f32.xlu1 %v1290_v8 }
 0xa0c   : > { %1288 = vadd.xlane.f32.xlu0 %v1287_v12 }
 0xa0e   : > { %2045 = vadd.xlane.f32.xlu1 %v2044_v37 }
 0xa10   : > { %2042 = vadd.xlane.f32.xlu0 %v2041_v6 }
 0xa12   : > { %2793 = vadd.xlane.f32.xlu1 %v2792_v28 }
 0xa14   : > { %2790 = vadd.xlane.f32.xlu0 %v2789_v1 }
 0xa16   : > { %2799 = vadd.xlane.f32.xlu1 %v2798_v11 }
 0xa18   : > { %2796 = vadd.xlane.f32.xlu0 %v2795_v24 }
 0xa1a   : > { %1297 = vadd.xlane.f32.xlu1 %v1296_v61 }
 0xa1c   : > { %1294 = vadd.xlane.f32.xlu0 %v1293_v13 }
 0xa1e   : > { %2051 = vadd.xlane.f32.xlu1 %v2050_v35 }
 0xa20   : > { %2048 = vadd.xlane.f32.xlu0 %v2047_v19 }
 0xa22   : > { %1303 = vadd.xlane.f32.xlu1 %v1302_v62 }
 0xa24   : > { %1300 = vadd.xlane.f32.xlu0 %v1299_v10 }
 0xa26   : > { %2057 = vadd.xlane.f32.xlu1 %v2056_v5 }
 0xa28   : > { %2054 = vadd.xlane.f32.xlu0 %v2053_v23 }
 0xa2a   : > { %2805 = vadd.xlane.f32.xlu1 %v2804_v51 }
 0xa2c   : > { %2802 = vadd.xlane.f32.xlu0 %v2801_v15 }
 0xa2e   : > { %2811 = vadd.xlane.f32.xlu1 %v2810_v9 }
 0xa30   : > { %2808 = vadd.xlane.f32.xlu0 %v2807_v7 }
 0xa5b   : > { %v3464_v4 = vpop.xlane.xlu1 %3463 }
 0xa5c   : > { %v3496_v20 = vsub.f32 %v12503_v57, %v3464_v4 }
 0xa5d   : > { %v3461_v42 = vpop.xlane.xlu0 %3460 }
 0xa5e   : > { %v3509_v25 = vmul.f32 1.442695, %v3496_v20  ;;  %v3495_v54 = vsub.f32 %v12507_v40, %v3461_v42 }
 0xa5f   : > { %v3470_v3 = vpop.xlane.xlu1 %3469 }
 0xa60   : > { %10798 = vpow2.f32 %v3509_v25  ;;  %v3507_v39 = vmul.f32 1.442695, %v3495_v54  ;;  %v3498_v0 = vsub.f32 %v12511_v2, %v3470_v3 }
 0xa61   : > { %v3467_v38 = vpop.xlane.xlu0 %3466 }
 0xa62   : > { %10800 = vpow2.f32 %v3507_v39  ;;  %v3513_v22 = vmul.f32 1.442695, %v3498_v0  ;;  %v3497_v31 = vsub.f32 %v12515_v63, %v3467_v38 }
 0xa63   : > { %v3476_v55 = vpop.xlane.xlu1 %3475 }
 0xa64   : > { %10802 = vpow2.f32 %v3513_v22  ;;  %v3511_v45 = vmul.f32 1.442695, %v3497_v31  ;;  %v3500_v47 = vsub.f32 %v12519_v53, %v3476_v55 }
 0xa65   : > { %v3473_v57 = vpop.xlane.xlu0 %3472 }
 0xa66   : > { %10804 = vpow2.f32 %v3511_v45  ;;  %v3517_v52 = vmul.f32 1.442695, %v3500_v47  ;;  %v3499_v40 = vsub.f32 %v12523_v26, %v3473_v57 }
 0xa67   : > { %v3482_v48 = vpop.xlane.xlu1 %3481 }
 0xa68   : > { %10806 = vpow2.f32 %v3517_v52  ;;  %v3515_v58 = vmul.f32 1.442695, %v3499_v40  ;;  %v3502_v2 = vsub.f32 %v12527_v56, %v3482_v48 }
 0xa69   : > { %v3479_v30 = vpop.xlane.xlu0 %3478 }
 0xa6a   : > { %10808 = vpow2.f32 %v3515_v58  ;;  %v3521_v17 = vmul.f32 1.442695, %v3502_v2  ;;  %v3501_v63 = vsub.f32 %v12531_v43, %v3479_v30 }
 0xa6b   : > { %v3488_v21 = vpop.xlane.xlu1 %3487 }
 0xa6c   : > { %10810 = vpow2.f32 %v3521_v17  ;;  %v3519_v16 = vmul.f32 1.442695, %v3501_v63  ;;  %v3504_v53 = vsub.f32 %v12535_v44, %v3488_v21 }
 0xa6d   : > { %v10799_v49 = vpop.eup %10798  ;;  %v3485_v36 = vpop.xlane.xlu0 %3484 }
 0xa6e   : > { %10812 = vpow2.f32 %v3519_v16  ;;  %v3525_v8 = vmul.f32 1.442695, %v3504_v53  ;;  %v3503_v26 = vsub.f32 %v12539_v18, %v3485_v36  ;;  %v3534_v12 = vsel %vm1195_vm5, %v10799_v49, 0.0 }
 0xa6f   : > { %v10801_v37 = vpop.eup %10800  ;;  %3535 = vadd.xlane.f32.xlu1 %v3534_v12  ;;  %v3494_v56 = vpop.xlane.xlu1 %3493 }
 0xa70   : > { %10814 = vpow2.f32 %v3525_v8  ;;  %v3523_v6 = vmul.f32 1.442695, %v3503_v26  ;;  %v3506_v43 = vsub.f32 %v12543_v34, %v3494_v56  ;;  %v3531_v28 = vsel %vm1195_vm5, %v10801_v37, 0.0 }
 0xa71   : > { %v10803_v1 = vpop.eup %10802  ;;  %v3491_v11 = vpop.xlane.xlu0 %3490  ;;  %3532 = vadd.xlane.f32.xlu0 %v3531_v28  ;;  %v3567_v44 = vpack.c.bf16 %v10799_v49, %v10801_v37 }
 0xa72   : > { %10816 = vpow2.f32 %v3523_v6  ;;  %v3529_v24 = vmul.f32 1.442695, %v3506_v43  ;;  %v3505_v61 = vsub.f32 %v12547_v32, %v3491_v11  ;;  %v3540_v18 = vsel %vm1195_vm5, %v10803_v1, 0.0 }
 0xa73   : > { %v10805_v13 = vpop.eup %10804  ;;  %10003 = vmatprep.mubr.msk.bf16.mxu1 %vm1195_vm5, %v3567_v44  ;;  %3541 = vadd.xlane.f32.xlu1 %v3540_v18  ;;  %v1274_v45 = vpop.xlane.xlu1 %1273 }
 0xa74   : > { %v3568_v35 = vpack.c.bf16 %v10803_v1, %v10805_v13  ;;  %10818 = vpow2.f32 %v3529_v24  ;;  %v3527_v19 = vmul.f32 1.442695, %v3505_v61  ;;  %v3537_v34 = vsel %vm1195_vm5, %v10805_v13, 0.0 }
 0xa75   : > { %v10807_v62 = vpop.eup %10806  ;;  %3538 = vadd.xlane.f32.xlu0 %v3537_v34  ;;  %v1271_v55 = vpop.xlane.xlu0 %1270 }
 0xa76   : > { %10820 = vpow2.f32 %v3527_v19  ;;  %10004 = vmatmul.mubr.msk.bf16.vlgmr.msra.gmra.mxu1 %vm1195_vm5, %v3568_v35  ;;  %v3546_v10 = vsel %vm1195_vm5, %v10807_v62, 0.0 }
 0xa77   : > { %v10809_v5 = vpop.eup %10808  ;;  %3547 = vadd.xlane.f32.xlu1 %v3546_v10  ;;  %v2028_v57 = vpop.xlane.xlu1 %2027  ;;  %10822 = vrcp.f32 %v1274_v45 }
 0xa78   : > { %v3543_v32 = vsel %vm1195_vm5, %v10809_v5, 0.0  ;;  %v3569_v23 = vpack.c.bf16 %v10807_v62, %v10809_v5  ;;  %10824 = vrcp.f32 %v1271_v55 }
 0xa79   : > { %v10811_v51 = vpop.eup %10810  ;;  %3544 = vadd.xlane.f32.xlu0 %v3543_v32  ;;  %v2025_v47 = vpop.xlane.xlu0 %2024  ;;  %10826 = vrcp.f32 %v2028_v57 }
 0xa7a   : > { %10007 = vmatprep.mubr.msk.bf16.mxu1 %vm1195_vm5, %v3569_v23  ;;  %v3552_v15 = vsel %vm1195_vm5, %v10811_v51, 0.0  ;;  %10828 = vrcp.f32 %v2025_v47 }
 0xa7b   : > { %v10813_v9 = vpop.eup %10812  ;;  %3553 = vadd.xlane.f32.xlu1 %v3552_v15  ;;  %v1280_v40 = vpop.xlane.xlu1 %1279 }
 0xa7c   : > { %v3549_v7 = vsel %vm1195_vm5, %v10813_v9, 0.0  ;;  %v3570_v4 = vpack.c.bf16 %v10811_v51, %v10813_v9  ;;  %10830 = vrcp.f32 %v1280_v40 }
 0xa7d   : > { %v10815_v20 = vpop.eup %10814  ;;  %3550 = vadd.xlane.f32.xlu0 %v3549_v7  ;;  %v1277_v52 = vpop.xlane.xlu0 %1276 }
 0xa7e   : > { %10008 = vmatmul.mubr.msk.bf16.gmra.mxu1 %vm1195_vm5, %v3570_v4  ;;  %v3558_v42 = vsel %vm1195_vm5, %v10815_v20, 0.0  ;;  %10832 = vrcp.f32 %v1277_v52 }
 0xa7f   : > { %v10817_v25 = vpop.eup %10816  ;;  %3559 = vadd.xlane.f32.xlu1 %v3558_v42  ;;  %v2034_v58 = vpop.xlane.xlu1 %2033 }
 0xa80   : > { %v3555_v54 = vsel %vm1195_vm5, %v10817_v25, 0.0  ;;  %v3571_v3 = vpack.c.bf16 %v10815_v20, %v10817_v25  ;;  %10834 = vrcp.f32 %v2034_v58 }
 0xa81   : > { %v10819_v39 = vpop.eup %10818  ;;  %3556 = vadd.xlane.f32.xlu0 %v3555_v54  ;;  %v2031_v48 = vpop.xlane.xlu0 %2030 }
 0xa82   : > { %10011 = vmatprep.mubr.msk.bf16.mxu1 %vm1195_vm5, %v3571_v3  ;;  %v3564_v0 = vsel %vm1229_vm6, %v10819_v39, 0.0  ;;  %10836 = vrcp.f32 %v2031_v48 }
 0xa83   : > { %v10821_v38 = vpop.eup %10820  ;;  %3565 = vadd.xlane.f32.xlu1 %v3564_v0  ;;  %v2782_v30 = vpop.xlane.xlu1 %2781 }
 0xa84   : > { %v3561_v22 = vsel %vm1195_vm5, %v10821_v38, 0.0  ;;  %v3572_v31 = vpack.c.bf16 %v10819_v39, %v10821_v38  ;;  %10838 = vrcp.f32 %v2782_v30  ;;  %v10823_v5 = vpop.eup %10822 }
 0xa85   : > { %3562 = vadd.xlane.f32.xlu0 %v3561_v22  ;;  %v2779_v2 = vpop.xlane.xlu0 %2778  ;;  %v10825_v32 = vpop.eup %10824 }
 0xa86   : > { %10012 = vmatmul.mubr.msk.bf16.gmra.mxu1 %vm1195_vm5, %v3572_v31  ;;  %10840 = vrcp.f32 %v2779_v2  ;;  %v10827_v23 = vpop.eup %10826 }
 0xa87   : > { %v2788_v63 = vpop.xlane.xlu1 %2787  ;;  %v10829_v51 = vpop.eup %10828  ;;  %v2186_v30 = vmul.f32 %v10827_v23, %v12253_v33  ;;  %v14698_v23 = vld [vmem:[#allocation40_spill] sm:$0xff] }
 0xa88   : > { %10842 = vrcp.f32 %v2788_v63 }
 0xa89   : > { %v2785_v17 = vpop.xlane.xlu0 %2784  ;;  %v10831_v9 = vpop.eup %10830 }
 0xa8a   : > { %10844 = vrcp.f32 %v2785_v17 }
 0xa8b   : > { %v1286_v16 = vpop.xlane.xlu1 %1285  ;;  %v10833_v7 = vpop.eup %10832 }
 0xa8c   : > { %10846 = vrcp.f32 %v1286_v16  ;;  %v2185_v16 = vmul.f32 %v10829_v51, %v12249_v46 }
 0xa8d   : > { %v1283_v21 = vpop.xlane.xlu0 %1282  ;;  %v10835_v20 = vpop.eup %10834 }
 0xa8e   : > { %10848 = vrcp.f32 %v1283_v21 }
 0xa8f   : > { %v2040_v49 = vpop.xlane.xlu1 %2039  ;;  %v10837_v42 = vpop.eup %10836 }
 0xa90   : > { %10850 = vrcp.f32 %v2040_v49  ;;  %v2187_v21 = vmul.f32 %v10837_v42, %v12247_v59 }
 0xa91   : > { %v2037_v53 = vpop.xlane.xlu0 %2036  ;;  %v10839_v25 = vpop.eup %10838 }
 0xa92   : > { %10852 = vrcp.f32 %v2037_v53  ;;  %v1432_v53 = vmul.f32 %v10823_v5, %v12031_v29  ;;  %v14694_v29 = vld [vmem:[#allocation28_spill] sm:$0xff] }
 0xa93   : > { %v1292_v8 = vpop.xlane.xlu1 %1291  ;;  %v10841_v54 = vpop.eup %10840  ;;  %v14697_v5 = vld [vmem:[#allocation32_spill] sm:$0xff] }
 0xa94   : > { %10854 = vrcp.f32 %v1292_v8  ;;  %v2188_v8 = vmul.f32 %v10835_v20, %v12251_v50  ;;  %v14700_v20 = vld [vmem:[#allocation38_spill] sm:$0xff] }
 0xa95   : > { %v1289_v36 = vpop.xlane.xlu0 %1288  ;;  %v10843_v39 = vpop.eup %10842 }
 0xa96   : > { %10856 = vrcp.f32 %v1289_v36  ;;  %v1431_v36 = vmul.f32 %v10825_v32, %v12027_v27  ;;  %v2198_v27 = vadd.f32 %v2186_v30, %v1432_v53  ;;  %v14704_v30 = vld [vmem:[#allocation29_spill] sm:$0xff] }
 0xa97   : > { %v2046_v12 = vpop.xlane.xlu1 %2045  ;;  %v10845_v0 = vpop.eup %10844  ;;  %v14707_v53 = vld [vmem:[#allocation49_spill] sm:$0xff] }
 0xa98   : > { %10858 = vrcp.f32 %v2046_v12  ;;  %v2941_v59 = vmul.f32 %v10845_v0, %v12465_v60  ;;  %v14702_v0 = vld [vmem:[#allocation31_spill] sm:$0xff] }
 0xa99   : > { %v2043_v26 = vpop.xlane.xlu0 %2042  ;;  %v10847_v22 = vpop.eup %10846 }
 0xa9a   : > { %10860 = vrcp.f32 %v2043_v26  ;;  %v2940_v26 = vmul.f32 %v10839_v25, %v12471_v41  ;;  %v2197_v41 = vadd.f32 %v2185_v16, %v1431_v36  ;;  %v1436_v32 = vmul.f32 %v10847_v22, %v14697_v5  ;;  %v14701_v25 = vld [vmem:[#allocation39_spill] sm:$0xff]  ;;  %v14706_v16 = vld [vmem:[#allocation48_spill] sm:$0xff] }
 0xa9b   : > { %v2794_v56 = vpop.xlane.xlu1 %2793  ;;  %v10849_v31 = vpop.eup %10848 }
 0xa9c   : > { %10862 = vrcp.f32 %v2794_v56  ;;  %v14693_v56 = vld [vmem:[#allocation45_spill] sm:$0xff] }
 0xa9d   : > { %v2791_v37 = vpop.xlane.xlu0 %2790  ;;  %v10851_v55 = vpop.eup %10850  ;;  %v2939_v46 = vmul.f32 %v10841_v54, %v14693_v56 }
 0xa9e   : > { %10864 = vrcp.f32 %v2791_v37  ;;  %v1433_v37 = vmul.f32 %v10833_v7, %v12025_v14  ;;  %v2190_v51 = vmul.f32 %v10851_v55, %v14698_v23  ;;  %v14709_v23 = vld [vmem:[#allocation34_spill] sm:$0xff] }
 0xa9f   : > { %v2800_v43 = vpop.xlane.xlu1 %2799  ;;  %v10853_v45 = vpop.eup %10852 }
 0xaa0   : > { %10866 = vrcp.f32 %v2800_v43  ;;  %v1434_v43 = vmul.f32 %v10831_v9, %v14694_v29  ;;  %v2199_v50 = vadd.f32 %v2187_v21, %v1433_v37  ;;  %v2189_v42 = vmul.f32 %v10853_v45, %v14700_v20 }
 0xaa1   : > { %v2797_v6 = vpop.xlane.xlu0 %2796  ;;  %v10855_v57 = vpop.eup %10854 }
 0xaa2   : > { %10868 = vrcp.f32 %v2797_v6  ;;  %v2200_v14 = vadd.f32 %v2188_v8, %v1434_v43 }
 0xaa3   : > { %v1298_v1 = vpop.xlane.xlu1 %1297  ;;  %v12663_v52 = vpop.eup %10856 }
 0xaa4   : > { %10870 = vrcp.f32 %v1298_v1 }
 0xaa5   : > { %v1295_v28 = vpop.xlane.xlu0 %1294  ;;  %v10859_v48 = vpop.eup %10858 }
 0xaa6   : > { %10872 = vrcp.f32 %v1295_v28  ;;  %v2192_v54 = vmul.f32 %v10859_v48, %v14701_v25  ;;  %v12705_v48 = vld [vmem:[#allocation10] ss:$0 sm:$0xff]  ;;  %v14712_v25 = vld [vmem:[#allocation17_spill] sm:$0xff] }
 0xaa7   : > { %v2052_v44 = vpop.xlane.xlu1 %2051  ;;  %v10861_v58 = vpop.eup %10860 }
 0xaa8   : > { %10874 = vrcp.f32 %v2052_v44 }
 0xaa9   : > { %v2049_v11 = vpop.xlane.xlu0 %2048  ;;  %v10863_v2 = vpop.eup %10862 }
 0xaaa   : > { %10876 = vrcp.f32 %v2049_v11  ;;  %v12685_v11 = vadd.f32 %v2940_v26, %v2198_v27 }
 0xaab   : > { %v1304_v61 = vpop.xlane.xlu1 %1303  ;;  %v10865_v17 = vpop.eup %10864 }
 0xaac   : > { %10878 = vrcp.f32 %v1304_v61  ;;  %v2951_v61 = vadd.f32 %v2939_v46, %v2197_v41 }
 0xaad   : > { %v1301_v24 = vpop.xlane.xlu0 %1300  ;;  %v10867_v49 = vpop.eup %10866 }
 0xaae   : > { %v2946_v45 = vmul.f32 %v10867_v49, %v14707_v53 }
 0xaaf   : > { %v2058_v13 = vpop.xlane.xlu1 %2057  ;;  %v10869_v12 = vpop.eup %10868 }
 0xab1   : > { %v12653_v18 = vpop.xlane.xlu0 %2054  ;;  %v12677_v6 = vpop.eup %10870 }
 0xab3   : > { %v12657_v19 = vpop.xlane.xlu1 %2805  ;;  %v12680_v28 = vpop.eup %10872 }
 0xab5   : > { %v12655_v35 = vpop.xlane.xlu0 %2802  ;;  %v12683_v1 = vpop.eup %10874 }
 0xab7   : > { %v12661_v62 = vpop.xlane.xlu1 %2811  ;;  %v10877_v60 = vpop.eup %10876 }
 0xab9   : > { %v12659_v34 = vpop.xlane.xlu0 %2808 }
 0xaf8   : > { %v3536_v15 = vpop.xlane.xlu1 %3535 }
 0xafa   : > { %v3533_v10 = vpop.xlane.xlu0 %3532 }
 0xafc   : > { %v3542_v3 = vpop.xlane.xlu1 %3541 }
 0xafe   : > { %v3539_v4 = vpop.xlane.xlu0 %3538 }
 0xaff   : > { %10880 = vrcp.f32 %v3539_v4 }
 0xb00   : > { %v3548_v47 = vpop.xlane.xlu1 %3547  ;;  %10882 = vrcp.f32 %v1301_v24  ;;  %v2953_v24 = vadd.f32 %v2941_v59, %v2199_v50 }
 0xb01   : > { %10884 = vrcp.f32 %v3533_v10 }
 0xb02   : > { %v3545_v38 = vpop.xlane.xlu0 %3544  ;;  %10886 = vrcp.f32 %v2058_v13 }
 0xb03   : > { %10888 = vrcp.f32 %v3542_v3 }
 0xb04   : > { %10890 = vrcp.f32 %v12653_v18  ;;  %v3554_v63 = vpop.xlane.xlu1 %3553  ;;  %v14695_v18 = vld [vmem:[#allocation46_spill] sm:$0xff] }
 0xb05   : > { %10892 = vrcp.f32 %v3536_v15  ;;  %v2942_v13 = vmul.f32 %v10843_v39, %v14695_v18 }
 0xb06   : > { %v3551_v40 = vpop.xlane.xlu0 %3550  ;;  %10894 = vrcp.f32 %v12657_v19  ;;  %v12689_v19 = vpop.eup %10878 }
 0xb07   : > { %10896 = vrcp.f32 %v3551_v40  ;;  %v2954_v37 = vadd.f32 %v2942_v13, %v2200_v14 }
 0xb08   : > { %10898 = vrcp.f32 %v12659_v34  ;;  %v3560_v44 = vpop.xlane.xlu1 %3559  ;;  %v14696_v34 = vld [vmem:[#allocation30_spill] sm:$0xff] }
 0xb09   : > { %10900 = vrcp.f32 %v3545_v38  ;;  %v1435_v10 = vmul.f32 %v10849_v31, %v14696_v34  ;;  %v1438_v38 = vmul.f32 %v10855_v57, %v14702_v0  ;;  %v14703_v31 = vld [vmem:[#allocation50_spill] sm:$0xff]  ;;  %v2202_v57 = vadd.f32 %v2190_v51, %v1436_v32 }
 0xb0a   : > { %v3557_v33 = vpop.xlane.xlu0 %3556  ;;  %10902 = vrcp.f32 %v12655_v35  ;;  %v14699_v35 = vld [vmem:[#allocation37_spill] sm:$0xff]  ;;  %v2944_v22 = vmul.f32 %v10863_v2, %v14703_v31  ;;  %v1439_v51 = vmul.f32 %v12680_v28, %v14709_v23 }
 0xb0b   : > { %10904 = vrcp.f32 %v3554_v63  ;;  %v2191_v4 = vmul.f32 %v10861_v58, %v14699_v35  ;;  %v14705_v63 = vld [vmem:[#allocation47_spill] sm:$0xff]  ;;  %v2943_v58 = vmul.f32 %v10865_v17, %v14706_v16  ;;  %v2201_v46 = vadd.f32 %v2189_v42, %v1435_v10  ;;  %v14713_v31 = vld [vmem:[#allocation33_spill] sm:$0xff] }
 0xb0c   : > { %v10881_v15 = vpop.eup %10880  ;;  %10906 = vrcp.f32 %v12661_v62  ;;  %v1437_v62 = vmul.f32 %v12663_v52, %v14704_v30  ;;  %v2945_v21 = vmul.f32 %v10869_v12, %v14705_v63  ;;  %v3566_v2 = vpop.xlane.xlu1 %3565  ;;  %v2204_v52 = vadd.f32 %v2192_v54, %v1438_v38 }
 0xb0d   : > { %v10883_v3 = vpop.eup %10882  ;;  %10908 = vrcp.f32 %v3548_v47  ;;  %v12707_v43 = vadd.f32 %v2944_v22, %v2202_v57  ;;  %v14714_v22 = vld [vmem:[#allocation19_spill] sm:$0xff] }
 0xb0e   : > { %v3563_v9 = vpop.xlane.xlu0 %3562  ;;  %v10885_v40 = vpop.eup %10884  ;;  %v2203_v56 = vadd.f32 %v2191_v4, %v1437_v62  ;;  %v2958_v18 = vadd.f32 %v2946_v45, %v2204_v52  ;;  %v1441_v28 = vmul.f32 %v10883_v3, %v14713_v31  ;;  %v14716_v3 = vld [vmem:[#allocation35_spill] sm:$0xff] }
 0xb0f   : > { %v10887_v36 = vpop.eup %10886  ;;  %10910 = vrcp.f32 %v3563_v9  ;;  %v1442_v53 = vmul.f32 %v12689_v19, %v14716_v3  ;;  %v14717_v45 = vld [vmem:[#allocation43_spill] sm:$0xff]  ;;  %v14721_v19 = vld [vmem:[#allocation18_spill] sm:$0xff]  ;;  %v14727_v3 = vld [vmem:[#allocation24_spill] sm:$0xff] }
 0xb10   : > { %v10889_v26 = vpop.eup %10888  ;;  %10912 = vrcp.f32 %v3557_v33  ;;  %v2957_v41 = vadd.f32 %v2945_v21, %v2203_v56  ;;  %v14708_v33 = vld [vmem:[#allocation41_spill] sm:$0xff] }
 0xb11   : > { %v10891_v29 = vpop.eup %10890  ;;  %10914 = vrcp.f32 %v3566_v2 }
 0xb12   : > { %v10893_v49 = vpop.eup %10892  ;;  %10916 = vrcp.f32 %v3560_v44 }
 0xb13   : > { %v10895_v34 = vpop.eup %10894 }
 0xb14   : > { %v10897_v5 = vpop.eup %10896 }
 0xb15   : > { %v10899_v4 = vpop.eup %10898 }
 0xb36   : > { %v10005_v7 = vpop.f32.mrf.mxu1 }
 0xb37   : > { %v3695_v39 = vmul.f32 %v10881_v15, %v10005_v7  ;;  %v14710_v15 = vld [vmem:[#allocation42_spill] sm:$0xff]  ;;  %v14711_v7 = vld [vmem:[#allocation36_spill] sm:$0xff] }
 0xb38   : > { %v3634_v55 = vpop.f32.mrf.mxu1  ;;  %v2193_v9 = vmul.f32 %v10877_v60, %v14710_v15  ;;  %v12717_v35 = vmul.f32 %v12677_v6, %v14711_v7  ;;  %v14724_v15 = vld [vmem:[#allocation21_spill] sm:$0xff] }
 0xb39   : > { %v3707_v47 = vadd.f32 %v3695_v39, %v2953_v24  ;;  %v3693_v8 = vmul.f32 %v10885_v40, %v3634_v55  ;;  %v2955_v24 = vadd.f32 %v2943_v58, %v2201_v46  ;;  %v10901_v39 = vpop.eup %10900  ;;  %v14715_v40 = vld [vmem:[#allocation44_spill] sm:$0xff] }
 0xb3a   : > { %v10006_v59 = vpop.f32.mrf.mxu1  ;;  %v2194_v6 = vmul.f32 %v12683_v1, %v14715_v40  ;;  %v10903_v55 = vpop.eup %10902  ;;  %v2205_v58 = vadd.f32 %v2193_v9, %v1439_v51 }
 0xb3b   : > { %v3705_v12 = vadd.f32 %v3693_v8, %v2951_v61  ;;  %v3696_v17 = vmul.f32 %v10889_v26, %v10006_v59  ;;  %v3725_v27 = vadd.f32 %v12705_v48, %v3707_v47  ;;  %v2195_v61 = vmul.f32 %v10891_v29, %v14708_v33  ;;  %v10905_v63 = vpop.eup %10904  ;;  %v14718_v26 = vld [vmem:[#allocation16_spill] sm:$0xff] }
 0xb3c   : > { %v3637_v50 = vpop.f32.mrf.mxu1  ;;  %v2196_v47 = vmul.f32 %v10887_v36, %v14717_v45  ;;  %v10907_v8 = vpop.eup %10906 }
 0xb3d   : > { %v3708_v14 = vadd.f32 %v3696_v17, %v2954_v37  ;;  %v3694_v13 = vmul.f32 %v10893_v49, %v3637_v50  ;;  %v3723_v10 = vadd.f32 %v12705_v48, %v3705_v12  ;;  %v12726_v60 = vadd.f32 %v3725_v27, %v14714_v22  ;;  %v14719_v37 = vld [vmem:[#allocation51_spill] sm:$0xff]  ;;  %v10909_v56 = vpop.eup %10908  ;;  %v14720_v12 = vld [vmem:[#allocation52_spill] sm:$0xff] }
 0xb3e   : > { %v10009_v32 = vpop.f32.mrf.mxu1  ;;  %v2207_v16 = vadd.f32 %v2195_v61, %v1441_v28  ;;  %v2949_v59 = vmul.f32 %v10899_v4, %v14719_v37  ;;  %v2947_v17 = vmul.f32 %v10903_v55, %v14720_v12  ;;  %v2206_v22 = vadd.f32 %v2194_v6, %v12717_v35 }
 0xb3f   : > { %v3706_v20 = vadd.f32 %v3694_v13, %v12685_v11  ;;  %v3699_v42 = vmul.f32 %v10897_v5, %v10009_v32  ;;  %v12721_v54 = vadd.f32 %v3723_v10, %v14712_v25  ;;  %v3726_v0 = vadd.f32 %v12705_v48, %v3708_v14  ;;  %v14722_v10 = vld [vmem:[#allocation53_spill] sm:$0xff]  ;;  %v14723_v32 = vld [vmem:[#allocation54_spill] sm:$0xff] }
 0xb40   : > { %v3650_v38 = vpop.f32.mrf.mxu1  ;;  %v3753_v29 = vsel %vm701_vm3, %v12726_v60, 0.0  ;;  %v2208_v13 = vadd.f32 %v2196_v47, %v1442_v53  ;;  %v2950_v5 = vmul.f32 %v10907_v8, %v14722_v10  ;;  %v2948_v33 = vmul.f32 %v10895_v34, %v14723_v32  ;;  %v14725_v25 = vld [vmem:[#allocation25_spill] sm:$0xff] }
 0xb41   : > { %v3711_v44 = vadd.f32 %v3699_v42, %v2957_v41  ;;  %v3697_v30 = vmul.f32 %v10901_v39, %v3650_v38  ;;  %v3747_v11 = vsel %vm701_vm3, %v12721_v54, 0.0  ;;  %v3724_v62 = vadd.f32 %v12705_v48, %v3706_v20 }
 0xb42   : > { %v10010_v21 = vpop.f32.mrf.mxu1  ;;  %3748 = vadd.xlane.f32.xlu0 %v3747_v11  ;;  %v12745_v49 = vadd.f32 %v3726_v0, %v14721_v19  ;;  %v2961_v23 = vadd.f32 %v2949_v59, %v2207_v16  ;;  %v2959_v4 = vadd.f32 %v2947_v17, %v2205_v58  ;;  %v2962_v55 = vadd.f32 %v2950_v5, %v2208_v13 }
 0xb43   : > { %v3709_v1 = vadd.f32 %v3697_v30, %v2955_v24  ;;  %v3700_v57 = vmul.f32 %v10905_v63, %v10010_v21  ;;  %v12737_v2 = vadd.f32 %v3724_v62, %v14718_v26  ;;  %v3729_v46 = vadd.f32 %v12705_v48, %v3711_v44  ;;  %v10911_v24 = vpop.eup %10910  ;;  %v14726_v30 = vld [vmem:[#allocation20_spill] sm:$0xff] }
 0xb44   : > { %v3653_v52 = vpop.f32.mrf.mxu1  ;;  %v3756_v42 = vsel %vm701_vm3, %v12745_v49, 0.0  ;;  %v2960_v21 = vadd.f32 %v2948_v33, %v2206_v22 }
 0xb45   : > { %v3727_v36 = vadd.f32 %v12705_v48, %v3709_v1  ;;  %v3712_v27 = vadd.f32 %v3700_v57, %v2958_v18  ;;  %v3698_v50 = vmul.f32 %v10909_v56, %v3653_v52  ;;  %v3750_v41 = vsel %vm701_vm3, %v12737_v2, 0.0  ;;  %v10913_v18 = vpop.eup %10912  ;;  %v14728_v1 = vld [vmem:[#allocation23_spill] sm:$0xff] }
 0xb46   : > { %3751 = vadd.xlane.f32.xlu1 %v3750_v41  ;;  %v10013_v14 = vpop.f32.mrf.mxu1  ;;  %3754 = vadd.xlane.f32.xlu0 %v3753_v29  ;;  %v12760_v39 = vadd.f32 %v3729_v46, %v14725_v25  ;;  %v10915_v31 = vpop.eup %10914  ;;  %v14729_v46 = vld [vmem:[#allocation27_spill] sm:$0xff]  ;;  %v14730_v29 = vld [vmem:[#allocation22_spill] sm:$0xff] }
 0xb47   : > { %v3710_v61 = vadd.f32 %v3698_v50, %v12707_v43  ;;  %v3703_v51 = vmul.f32 %v10911_v24, %v10013_v14  ;;  %v12754_v9 = vadd.f32 %v3727_v36, %v14724_v15  ;;  %v3730_v7 = vadd.f32 %v12705_v48, %v3712_v27  ;;  %v10917_v62 = vpop.eup %10916  ;;  %v14731_v36 = vld [vmem:[#allocation26_spill] sm:$0xff] }
 0xb48   : > { %v3666_v20 = vpop.f32.mrf.mxu1  ;;  %v3765_v58 = vsel %vm701_vm3, %v12760_v39, 0.0 }
 0xb49   : > { %v3715_v0 = vadd.f32 %v3703_v51, %v2961_v23  ;;  %v3701_v34 = vmul.f32 %v10913_v18, %v3666_v20  ;;  %v3759_v43 = vsel %vm701_vm3, %v12754_v9, 0.0  ;;  %v3728_v38 = vadd.f32 %v12705_v48, %v3710_v61 }
 0xb4a   : > { %3757 = vadd.xlane.f32.xlu1 %v3756_v42  ;;  %v10014_v28 = vpop.f32.mrf.mxu1  ;;  %3760 = vadd.xlane.f32.xlu0 %v3759_v43  ;;  %v12771_v53 = vadd.f32 %v3730_v7, %v14727_v3 }
 0xb4b   : > { %v3713_v40 = vadd.f32 %v3701_v34, %v2959_v4  ;;  %v3704_v44 = vmul.f32 %v10915_v31, %v10014_v28  ;;  %v3740_v11 = vadd.f32 %v3728_v38, %v14726_v30  ;;  %v3733_v63 = vadd.f32 %v12705_v48, %v3715_v0 }
 0xb4c   : > { %v3669_v16 = vpop.f32.mrf.mxu1  ;;  %v3768_v26 = vsel %vm701_vm3, %v12771_v53, 0.0 }
 0xb4d   : > { %v3731_v45 = vadd.f32 %v12705_v48, %v3713_v40  ;;  %v3716_v47 = vadd.f32 %v3704_v44, %v2962_v55  ;;  %v3702_v35 = vmul.f32 %v10917_v62, %v3669_v16  ;;  %v3762_v6 = vsel %vm701_vm3, %v3740_v11, 0.0 }
 0xb4e   : > { %3763 = vadd.xlane.f32.xlu1 %v3762_v6  ;;  %3766 = vadd.xlane.f32.xlu0 %v3765_v58  ;;  %v12782_v52 = vadd.f32 %v3733_v63, %v14729_v46 }
 0xb4f   : > { %v3714_v8 = vadd.f32 %v3702_v35, %v2960_v21  ;;  %v3743_v57 = vadd.f32 %v3731_v45, %v14728_v1  ;;  %v3734_v37 = vadd.f32 %v12705_v48, %v3716_v47 }
 0xb50   : > { %v3777_v19 = vsel %vm701_vm3, %v12782_v52, 0.0 }
 0xb51   : > { %v3771_v59 = vsel %vm701_vm3, %v3743_v57, 0.0  ;;  %v3732_v56 = vadd.f32 %v12705_v48, %v3714_v8  ;;  %v12792_v27 = vadd.f32 %v3734_v37, %v14731_v36 }
 0xb52   : > { %3769 = vadd.xlane.f32.xlu1 %v3768_v26  ;;  %3772 = vadd.xlane.f32.xlu0 %v3771_v59 }
 0xb53   : > { %v12785_v12 = vadd.f32 %v3732_v56, %v14730_v29  ;;  %v3781_v48 = vsel %vm3780_vm7, %v12792_v27, 0.0 }
 0xb55   : > { %v3774_v17 = vsel %vm701_vm3, %v12785_v12, 0.0 }
 0xb56   : > { %3775 = vadd.xlane.f32.xlu1 %v3774_v17  ;;  %3778 = vadd.xlane.f32.xlu0 %v3777_v19  ;;  %v10686_v19 = vld [vmem:[#allocation7 + $0x8] ss:$0 sps:$4 sm:$0xff]  }
 0xb57   : > { %10569 = vmatprep.subr.msk.bf16.mxu1 %vm720_vm2, %v10686_v19  ;;  %v3985_v36 = vsel %vm720_vm2, %v10686_v19, 0 }
 0xb58   : > { %10016 = vmatpush3.bf16.msra.mxu1 %v3985_v36 }
 0xb5a   : > { %3782 = vadd.xlane.f32.xlu1 %v3781_v48  ;;  %v10688_v48 = vld [vmem:[%s14624_s9 + $0x28] sm:$0xff]  }
 0xb5b   : > { %10031 = vmatprep.subr.bf16.mxu0 %v10688_v48 }
 0xb5c   : > { %10032 = vmatpush3.bf16.msra.mxu0 %v10688_v48 }
 0xbcb   : > { %v3749_v50 = vpop.xlane.xlu0 %3748 }
 0xbcc   : > { %v3785_v41 = vmul.f32 0.041666668, %v3749_v50  ;;  %v10689_v50 = vld [vmem:[%s14624_s9 + $0x20] sm:$0xff]  }
 0xbcd   : > { %10033 = vmatprep.subr.bf16.mxu0 %v10689_v50 }
 0xbce   : > { %v12797_v24 = vsub.f32 %v12721_v54, %v3785_v41  ;;  %v10690_v41 = vld [vmem:[%s14624_s9 + $0x18] sm:$0xff]   ;;  %10034 = vmatpush3.bf16.msra.mxu0 %v10689_v50 }
 0xbcf   : > { %v3752_v14 = vpop.xlane.xlu1 %3751  ;;  %v3755_v13 = vpop.xlane.xlu0 %3754  ;;  %10035 = vmatprep.subr.bf16.mxu0 %v10690_v41 }
 0xbd0   : > { %v3786_v10 = vmul.f32 0.041666668, %v3752_v14  ;;  %v3787_v5 = vmul.f32 0.041666668, %v3755_v13  ;;  %v3809_v32 = vmul.f32 %v12797_v24, %v12797_v24 }
 0xbd2   : > { %v12802_v33 = vsub.f32 %v12737_v2, %v3786_v10  ;;  %v12805_v61 = vsub.f32 %v12726_v60, %v3787_v5  ;;  %v3821_v23 = vsel %vm701_vm3, %v3809_v32, 0.0  ;;  %10036 = vmatpush3.bf16.msra.mxu0 %v10690_v41 }
 0xbd3   : > { %v3758_v51 = vpop.xlane.xlu1 %3757  ;;  %3822 = vadd.xlane.f32.xlu0 %v3821_v23  ;;  %v3761_v15 = vpop.xlane.xlu0 %3760 }
 0xbd4   : > { %v3788_v54 = vmul.f32 0.041666668, %v3758_v51  ;;  %v3789_v18 = vmul.f32 0.041666668, %v3761_v15  ;;  %v3810_v7 = vmul.f32 %v12802_v33, %v12802_v33  ;;  %v3811_v4 = vmul.f32 %v12805_v61, %v12805_v61 }
 0xbd6   : > { %v12813_v20 = vsub.f32 %v12745_v49, %v3788_v54  ;;  %v12816_v2 = vsub.f32 %v12754_v9, %v3789_v18  ;;  %v3824_v60 = vsel %vm701_vm3, %v3810_v7, 0.0  ;;  %v3827_v42 = vsel %vm701_vm3, %v3811_v4, 0.0 }
 0xbd7   : > { %v3764_v25 = vpop.xlane.xlu1 %3763  ;;  %3825 = vadd.xlane.f32.xlu1 %v3824_v60  ;;  %3828 = vadd.xlane.f32.xlu0 %v3827_v42  ;;  %v3767_v0 = vpop.xlane.xlu0 %3766 }
 0xbd8   : > { %v3790_v34 = vmul.f32 0.041666668, %v3764_v25  ;;  %v3791_v43 = vmul.f32 0.041666668, %v3767_v0  ;;  %v3812_v38 = vmul.f32 %v12813_v20, %v12813_v20  ;;  %v3813_v49 = vmul.f32 %v12816_v2, %v12816_v2 }
 0xbda   : > { %v12824_v31 = vsub.f32 %v3740_v11, %v3790_v34  ;;  %v12827_v9 = vsub.f32 %v12760_v39, %v3791_v43  ;;  %v3830_v28 = vsel %vm701_vm3, %v3812_v38, 0.0  ;;  %v3833_v22 = vsel %vm701_vm3, %v3813_v49, 0.0 }
 0xbdb   : > { %v3770_v40 = vpop.xlane.xlu1 %3769  ;;  %3831 = vadd.xlane.f32.xlu1 %v3830_v28  ;;  %3834 = vadd.xlane.f32.xlu0 %v3833_v22  ;;  %v3773_v55 = vpop.xlane.xlu0 %3772 }
 0xbdc   : > { %v3792_v44 = vmul.f32 0.041666668, %v3770_v40  ;;  %v3793_v30 = vmul.f32 0.041666668, %v3773_v55  ;;  %v3814_v62 = vmul.f32 %v12824_v31, %v12824_v31  ;;  %v3815_v11 = vmul.f32 %v12827_v9, %v12827_v9 }
 0xbde   : > { %v12836_v63 = vsub.f32 %v12771_v53, %v3792_v44  ;;  %v12838_v39 = vsub.f32 %v3743_v57, %v3793_v30  ;;  %v3836_v21 = vsel %vm701_vm3, %v3814_v62, 0.0  ;;  %v3839_v16 = vsel %vm701_vm3, %v3815_v11, 0.0  ;;  %v12877_v62 = vld [vmem:[#allocation10 + $0x1] ss:$0 sm:$0xff] }
 0xbdf   : > { %3837 = vadd.xlane.f32.xlu1 %v3836_v21  ;;  %v3776_v58 = vpop.xlane.xlu1 %3775  ;;  %3840 = vadd.xlane.f32.xlu0 %v3839_v16  ;;  %v3779_v3 = vpop.xlane.xlu0 %3778 }
 0xbe0   : > { %v3794_v45 = vmul.f32 0.041666668, %v3776_v58  ;;  %v3795_v47 = vmul.f32 0.041666668, %v3779_v3  ;;  %v3816_v35 = vmul.f32 %v12836_v63, %v12836_v63  ;;  %v3817_v6 = vmul.f32 %v12838_v39, %v12838_v39 }
 0xbe2   : > { %v12847_v53 = vsub.f32 %v12785_v12, %v3794_v45  ;;  %v12850_v8 = vsub.f32 %v12782_v52, %v3795_v47  ;;  %v3842_v1 = vsel %vm701_vm3, %v3816_v35, 0.0  ;;  %v3845_v57 = vsel %vm701_vm3, %v3817_v6, 0.0 }
 0xbe3   : > { %3843 = vadd.xlane.f32.xlu1 %v3842_v1  ;;  %v3783_v26 = vpop.xlane.xlu1 %3782  ;;  %3846 = vadd.xlane.f32.xlu0 %v3845_v57  ;;  %v8672_v57 = vld [vmem:[#allocation10 + $0x2] ss:$0 sm:$0xff] }
 0xbe4   : > { %v3796_v37 = vmul.f32 0.041666668, %v3783_v26  ;;  %v3818_v59 = vmul.f32 %v12847_v53, %v12847_v53  ;;  %v3819_v56 = vmul.f32 %v12850_v8, %v12850_v8 }
 0xbe6   : > { %v12859_v46 = vsub.f32 %v12792_v27, %v3796_v37  ;;  %v3848_v52 = vsel %vm701_vm3, %v3818_v59, 0.0  ;;  %v3851_v29 = vsel %vm701_vm3, %v3819_v56, 0.0  ;;  %v10687_v27 = vld [vmem:[#allocation7] sm:$0xff]  }
 0xbe7   : > { %3849 = vadd.xlane.f32.xlu1 %v3848_v52  ;;  %3852 = vadd.xlane.f32.xlu0 %v3851_v29 }
 0xbe8   : > { %v3820_v12 = vmul.f32 %v12859_v46, %v12859_v46  ;;  %10017 = vmatprep.subr.bf16.mxu1 %v10687_v27 }
 0xbe9   : > { %10018 = vmatpush3.bf16.msra.mxu1 %v10687_v27 }
 0xbea   : > { %v3854_v17 = vsel %vm3780_vm7, %v3820_v12, 0.0 }
 0xbeb   : > { %3855 = vadd.xlane.f32.xlu1 %v3854_v17 }
 0xc5c   : > { %v3823_v14 = vpop.xlane.xlu0 %3822 }
 0xc5d   : > { %v3857_v13 = vmul.f32 0.041666668, %v3823_v14 }
 0xc5f   : > { %v3869_v10 = vadd.f32 1e-05, %v3857_v13 }
 0xc60   : > { %v3826_v5 = vpop.xlane.xlu1 %3825  ;;  %v3829_v32 = vpop.xlane.xlu0 %3828 }
 0xc61   : > { %10918 = vrsqrt.f32 %v3869_v10  ;;  %v3858_v23 = vmul.f32 0.041666668, %v3826_v5  ;;  %v3859_v51 = vmul.f32 0.041666668, %v3829_v32 }
 0xc63   : > { %v3870_v15 = vadd.f32 1e-05, %v3858_v23  ;;  %v3871_v54 = vadd.f32 1e-05, %v3859_v51 }
 0xc64   : > { %v3832_v18 = vpop.xlane.xlu1 %3831  ;;  %v3835_v7 = vpop.xlane.xlu0 %3834 }
 0xc65   : > { %10920 = vrsqrt.f32 %v3870_v15  ;;  %v3860_v4 = vmul.f32 0.041666668, %v3832_v18  ;;  %v3861_v60 = vmul.f32 0.041666668, %v3835_v7 }
 0xc66   : > { %10922 = vrsqrt.f32 %v3871_v54 }
 0xc67   : > { %v3872_v42 = vadd.f32 1e-05, %v3860_v4  ;;  %v3873_v25 = vadd.f32 1e-05, %v3861_v60 }
 0xc68   : > { %v3838_v0 = vpop.xlane.xlu1 %3837  ;;  %v3841_v34 = vpop.xlane.xlu0 %3840 }
 0xc69   : > { %10924 = vrsqrt.f32 %v3872_v42  ;;  %v3862_v43 = vmul.f32 0.041666668, %v3838_v0  ;;  %v3863_v38 = vmul.f32 0.041666668, %v3841_v34 }
 0xc6a   : > { %10926 = vrsqrt.f32 %v3873_v25 }
 0xc6b   : > { %v3874_v49 = vadd.f32 1e-05, %v3862_v43  ;;  %v3875_v28 = vadd.f32 1e-05, %v3863_v38 }
 0xc6c   : > { %v3844_v22 = vpop.xlane.xlu1 %3843  ;;  %v3847_v40 = vpop.xlane.xlu0 %3846 }
 0xc6d   : > { %10928 = vrsqrt.f32 %v3874_v49  ;;  %v3864_v55 = vmul.f32 0.041666668, %v3844_v22  ;;  %v3865_v44 = vmul.f32 0.041666668, %v3847_v40 }
 0xc6e   : > { %v10919_v30 = vpop.eup %10918  ;;  %10930 = vrsqrt.f32 %v3875_v28 }
 0xc6f   : > { %v3876_v11 = vadd.f32 1e-05, %v3864_v55  ;;  %v3877_v21 = vadd.f32 1e-05, %v3865_v44  ;;  %v3893_v16 = vmul.f32 %v10919_v30, %v12797_v24 }
 0xc70   : > { %v3850_v58 = vpop.xlane.xlu1 %3849  ;;  %v3853_v3 = vpop.xlane.xlu0 %3852 }
 0xc71   : > { %10932 = vrsqrt.f32 %v3876_v11  ;;  %v3866_v45 = vmul.f32 0.041666668, %v3850_v58  ;;  %v3867_v47 = vmul.f32 0.041666668, %v3853_v3  ;;  %v3911_v6 = vmul.f32 %v12877_v62, %v3893_v16  ;;  %v10691_v16 = vld [vmem:[%s14624_s9 + $0x10] sm:$0xff]   ;;  %v10693_v58 = vld [vmem:[%s14624_s9] sm:$0xff]  }
 0xc72   : > { %v10921_v35 = vpop.eup %10920  ;;  %10934 = vrsqrt.f32 %v3877_v21  ;;  %10037 = vmatprep.subr.bf16.mxu0 %v10691_v16 }
 0xc73   : > { %v10923_v1 = vpop.eup %10922  ;;  %v3878_v26 = vadd.f32 1e-05, %v3866_v45  ;;  %v3879_v37 = vadd.f32 1e-05, %v3867_v47  ;;  %v3894_v59 = vmul.f32 %v10921_v35, %v12802_v33  ;;  %v12884_v17 = vadd.f32 %v8672_v57, %v3911_v6  ;;  %10038 = vmatpush3.bf16.msra.mxu0 %v10691_v16  ;;  %v8673_v47 = vld [vmem:[#allocation9] ss:$0 sm:$0xff] }
 0xc74   : > { %v3895_v56 = vmul.f32 %v10923_v1, %v12805_v61  ;;  %v3856_v52 = vpop.xlane.xlu1 %3855 }
 0xc75   : > { %10936 = vrsqrt.f32 %v3878_v26  ;;  %v3868_v24 = vmul.f32 0.041666668, %v3856_v52  ;;  %v3912_v29 = vmul.f32 %v12877_v62, %v3894_v59 }
 0xc76   : > { %v10925_v12 = vpop.eup %10924  ;;  %10938 = vrsqrt.f32 %v3879_v37  ;;  %v3913_v36 = vmul.f32 %v12877_v62, %v3895_v56 }
 0xc77   : > { %v10927_v19 = vpop.eup %10926  ;;  %v3896_v27 = vmul.f32 %v10925_v12, %v12813_v20  ;;  %v3880_v48 = vadd.f32 1e-05, %v3868_v24  ;;  %v12888_v50 = vadd.f32 %v8672_v57, %v3912_v29 }
 0xc78   : > { %v3897_v33 = vmul.f32 %v10927_v19, %v12816_v2  ;;  %v12894_v10 = vadd.f32 %v8672_v57, %v3913_v36 }
 0xc79   : > { %v3914_v61 = vmul.f32 %v12877_v62, %v3896_v27  ;;  %10940 = vrsqrt.f32 %v3880_v48  ;;  %v3941_v41 = vpack.c.bf16 %v12888_v50, %v12884_v17 }
 0xc7a   : > { %v10929_v14 = vpop.eup %10928  ;;  %v3915_v32 = vmul.f32 %v12877_v62, %v3897_v33 }
 0xc7b   : > { %v10931_v13 = vpop.eup %10930  ;;  %v12896_v5 = vadd.f32 %v8672_v57, %v3914_v61  ;;  %10019 = vmatprep.mubr.msk.bf16.mxu1 %vm701_vm3, %v3941_v41  ;;  %v3898_v20 = vmul.f32 %v10929_v14, %v12824_v31 }
 0xc7c   : > { %v3899_v2 = vmul.f32 %v10931_v13, %v12827_v9  ;;  %v12907_v7 = vadd.f32 %v8672_v57, %v3915_v32 }
 0xc7d   : > { %v3942_v23 = vpack.c.bf16 %v12896_v5, %v12894_v10  ;;  %v3916_v51 = vmul.f32 %v12877_v62, %v3898_v20 }
 0xc7e   : > { %v10933_v15 = vpop.eup %10932  ;;  %v3917_v31 = vmul.f32 %v12877_v62, %v3899_v2 }
 0xc7f   : > { %v10935_v54 = vpop.eup %10934  ;;  %v3900_v18 = vmul.f32 %v10933_v15, %v12836_v63  ;;  %10020 = vmatmul.mubr.msk.bf16.vlgmr.msra.gmra.mxu1 %vm701_vm3, %v3942_v23  ;;  %v12909_v4 = vadd.f32 %v8672_v57, %v3916_v51 }
 0xc80   : > { %v3901_v60 = vmul.f32 %v10935_v54, %v12838_v39  ;;  %v12917_v63 = vadd.f32 %v8672_v57, %v3917_v31 }
 0xc81   : > { %v3943_v9 = vpack.c.bf16 %v12909_v4, %v12907_v7  ;;  %v3918_v42 = vmul.f32 %v12877_v62, %v3900_v18 }
 0xc82   : > { %v10937_v25 = vpop.eup %10936  ;;  %v3919_v38 = vmul.f32 %v12877_v62, %v3901_v60 }
 0xc83   : > { %v10939_v0 = vpop.eup %10938  ;;  %10023 = vmatprep.mubr.msk.bf16.mxu1 %vm701_vm3, %v3943_v9  ;;  %v12919_v34 = vadd.f32 %v8672_v57, %v3918_v42  ;;  %v3902_v43 = vmul.f32 %v10937_v25, %v12847_v53 }
 0xc84   : > { %v3903_v49 = vmul.f32 %v10939_v0, %v12850_v8  ;;  %v12929_v55 = vadd.f32 %v8672_v57, %v3919_v38 }
 0xc85   : > { %v3944_v39 = vpack.c.bf16 %v12919_v34, %v12917_v63  ;;  %v3920_v28 = vmul.f32 %v12877_v62, %v3902_v43 }
 0xc86   : > { %v10941_v22 = vpop.eup %10940  ;;  %v3921_v53 = vmul.f32 %v12877_v62, %v3903_v49 }
 0xc87   : > { %v3904_v40 = vmul.f32 %v10941_v22, %v12859_v46  ;;  %10024 = vmatmul.mubr.msk.bf16.gmra.mxu1 %vm701_vm3, %v3944_v39  ;;  %v12931_v44 = vadd.f32 %v8672_v57, %v3920_v28  ;;  %v8682_v22 = vld [vmem:[#allocation10 + $0x3] ss:$0 sm:$0xff] }
 0xc88   : > { %v12938_v11 = vadd.f32 %v8672_v57, %v3921_v53 }
 0xc89   : > { %v3945_v30 = vpack.c.bf16 %v12931_v44, %v12929_v55  ;;  %v3922_v8 = vmul.f32 %v12877_v62, %v3904_v40  ;;  %v10692_v62 = vld [vmem:[%s14624_s9 + $0x8] sm:$0xff]  }
 0xc8a   : > { %10039 = vmatprep.subr.bf16.mxu0 %v10692_v62 }
 0xc8b   : > { %10027 = vmatprep.mubr.msk.bf16.mxu1 %vm701_vm3, %v3945_v30  ;;  %v12940_v21 = vadd.f32 %v8672_v57, %v3922_v8  ;;  %10040 = vmatpush3.bf16.msra.mxu0 %v10692_v62 }
 0xc8c   : > { %10041 = vmatprep.subr.bf16.mxu0 %v10693_v58 }
 0xc8d   : > { %v3946_v46 = vpack.c.bf16 %v12940_v21, %v12938_v11 }
 0xc8f   : > { %10028 = vmatmul.mubr.msk.bf16.gmra.mxu1 %vm701_vm3, %v3946_v46  ;;  %10042 = vmatpush3.bf16.msra.mxu0 %v10693_v58 }
 0xd3f   : > { %v10021_v3 = vpop.f32.mrf.mxu1 }
 0xd40   : > { %v4030_v57 = vadd.f32 %v10021_v3, %v8673_v47 }
 0xd41   : > { %v4021_v45 = vpop.f32.mrf.mxu1 }
 0xd42   : > { %v4022_v6 = vadd.f32 %v8673_v47, %v4021_v45  ;;  %v4070_v29 = vmax.f32 %v4030_v57, 0.0 }
 0xd43   : > { %v10022_v35 = vpop.f32.mrf.mxu1 }
 0xd44   : > { %v4033_v1 = vadd.f32 %v10022_v35, %v8673_v47  ;;  %v4068_v52 = vmax.f32 %v4022_v6, 0.0 }
 0xd45   : > { %v4024_v26 = vpop.f32.mrf.mxu1 }
 0xd46   : > { %v4025_v37 = vadd.f32 %v8673_v47, %v4024_v26  ;;  %v4071_v59 = vmax.f32 %v4033_v1, 0.0 }
 0xd47   : > { %v10025_v56 = vpop.f32.mrf.mxu1 }
 0xd48   : > { %v4069_v24 = vmax.f32 %v4025_v37, 0.0  ;;  %v4081_v36 = vpack.c.bf16 %v4071_v59, %v4070_v29  ;;  %v4046_v61 = vadd.f32 %v10025_v56, %v8673_v47 }
 0xd49   : > { %v4037_v12 = vpop.f32.mrf.mxu1 }
 0xd4a   : > { %v4080_v19 = vpack.c.bf16 %v4069_v24, %v4068_v52  ;;  %v4038_v48 = vadd.f32 %v8673_v47, %v4037_v12  ;;  %v4074_v23 = vmax.f32 %v4046_v61, 0.0 }
 0xd4b   : > { %v10026_v27 = vpop.f32.mrf.mxu1 }
 0xd4c   : > { %v4049_v33 = vadd.f32 %v10026_v27, %v8673_v47  ;;  %10043 = vmatprep.mubr.msk.bf16.mxu0 %vm4140_vm8, %v4080_v19  ;;  %v4072_v32 = vmax.f32 %v4038_v48, 0.0 }
 0xd4d   : > { %v4040_v41 = vpop.f32.mrf.mxu1  ;;  %10044 = vmatmul.mubr.msk.bf16.vlgmr.msra.gmra.mxu0 %vm4140_vm8, %v4081_v36 }
 0xd4e   : > { %v4041_v14 = vadd.f32 %v8673_v47, %v4040_v41  ;;  %v4075_v13 = vmax.f32 %v4049_v33, 0.0 }
 0xd4f   : > { %v10029_v20 = vpop.f32.mrf.mxu1 }
 0xd50   : > { %v4073_v2 = vmax.f32 %v4041_v14, 0.0  ;;  %v4083_v54 = vpack.c.bf16 %v4075_v13, %v4074_v23  ;;  %v4062_v9 = vadd.f32 %v10029_v20, %v8673_v47 }
 0xd51   : > { %v4053_v51 = vpop.f32.mrf.mxu1 }
 0xd52   : > { %v4082_v15 = vpack.c.bf16 %v4073_v2, %v4072_v32  ;;  %v4054_v31 = vadd.f32 %v8673_v47, %v4053_v51  ;;  %v4078_v49 = vmax.f32 %v4062_v9, 0.0 }
 0xd53   : > { %v10030_v18 = vpop.f32.mrf.mxu1 }
 0xd54   : > { %v4065_v60 = vadd.f32 %v10030_v18, %v8673_v47  ;;  %10047 = vmatprep.mubr.msk.bf16.mxu0 %vm4140_vm8, %v4082_v15  ;;  %v4076_v43 = vmax.f32 %v4054_v31, 0.0 }
 0xd55   : > { %v4056_v42 = vpop.f32.mrf.mxu1  ;;  %10048 = vmatmul.mubr.msk.bf16.gmra.mxu0 %vm4140_vm8, %v4083_v54 }
 0xd56   : > { %v4057_v25 = vadd.f32 %v8673_v47, %v4056_v42  ;;  %v4079_v0 = vmax.f32 %v4065_v60, 0.0 }
 0xd58   : > { %v4077_v38 = vmax.f32 %v4057_v25, 0.0  ;;  %v4085_v28 = vpack.c.bf16 %v4079_v0, %v4078_v49 }
 0xd5a   : > { %v4084_v39 = vpack.c.bf16 %v4077_v38, %v4076_v43 }
 0xd5c   : > { %10051 = vmatprep.mubr.msk.bf16.mxu0 %vm4140_vm8, %v4084_v39 }
 0xd5d   : > { %10052 = vmatmul.mubr.msk.bf16.gmra.mxu0 %vm4140_vm8, %v4085_v28 }
 0xe0d   : > { %v10045_v40 = vpop.f32.mrf.mxu0 }
 0xe0e   : > { %v4202_v53 = vadd.f32 %v10045_v40, %v8682_v22 }
 0xe0f   : > { %v4193_v30 = vpop.f32.mrf.mxu0 }
 0xe10   : > { %v4194_v8 = vadd.f32 %v8682_v22, %v4193_v30  ;;  %v12962_v62 = vadd.f32 %v4202_v53, %v12894_v10 }
 0xe11   : > { %v10046_v46 = vpop.f32.mrf.mxu0 }
 0xe12   : > { %v4240_v16 = vadd.f32 %v4194_v8, %v12884_v17  ;;  %v4205_v3 = vadd.f32 %v10046_v46, %v8682_v22  ;;  %v4258_v57 = vsel %vm701_vm3, %v12962_v62, 0.0 }
 0xe13   : > { %v4196_v58 = vpop.f32.mrf.mxu0 }
 0xe14   : > { %v4197_v45 = vadd.f32 %v8682_v22, %v4196_v58  ;;  %v4252_v47 = vsel %vm701_vm3, %v4240_v16, 0.0  ;;  %v4243_v26 = vadd.f32 %v4205_v3, %v12896_v5 }
 0xe15   : > { %4253 = vadd.xlane.f32.xlu0 %v4252_v47  ;;  %v10049_v35 = vpop.f32.mrf.mxu0 }
 0xe16   : > { %v4241_v6 = vadd.f32 %v4197_v45, %v12888_v50  ;;  %v4218_v37 = vadd.f32 %v10049_v35, %v8682_v22  ;;  %v4261_v12 = vsel %vm701_vm3, %v4243_v26, 0.0 }
 0xe17   : > { %v4209_v1 = vpop.f32.mrf.mxu0 }
 0xe18   : > { %v4210_v17 = vadd.f32 %v8682_v22, %v4209_v1  ;;  %v4255_v10 = vsel %vm701_vm3, %v4241_v6, 0.0  ;;  %v12972_v29 = vadd.f32 %v4218_v37, %v12917_v63 }
 0xe19   : > { %4256 = vadd.xlane.f32.xlu1 %v4255_v10  ;;  %4259 = vadd.xlane.f32.xlu0 %v4258_v57  ;;  %v10050_v59 = vpop.f32.mrf.mxu0 }
 0xe1a   : > { %v4244_v56 = vadd.f32 %v4210_v17, %v12907_v7  ;;  %v4221_v52 = vadd.f32 %v10050_v59, %v8682_v22  ;;  %v4270_v63 = vsel %vm701_vm3, %v12972_v29, 0.0 }
 0xe1b   : > { %v4212_v24 = vpop.f32.mrf.mxu0 }
 0xe1c   : > { %v4213_v50 = vadd.f32 %v8682_v22, %v4212_v24  ;;  %v4264_v19 = vsel %vm701_vm3, %v4244_v56, 0.0  ;;  %v12978_v27 = vadd.f32 %v4221_v52, %v12919_v34 }
 0xe1d   : > { %4262 = vadd.xlane.f32.xlu1 %v4261_v12  ;;  %4265 = vadd.xlane.f32.xlu0 %v4264_v19  ;;  %v10053_v5 = vpop.f32.mrf.mxu0 }
 0xe1e   : > { %v4245_v36 = vadd.f32 %v4213_v50, %v12909_v4  ;;  %v4234_v7 = vadd.f32 %v10053_v5, %v8682_v22  ;;  %v4273_v4 = vsel %vm701_vm3, %v12978_v27, 0.0 }
 0xe1f   : > { %v4225_v48 = vpop.f32.mrf.mxu0 }
 0xe20   : > { %v4226_v33 = vadd.f32 %v8682_v22, %v4225_v48  ;;  %v4267_v61 = vsel %vm701_vm3, %v4245_v36, 0.0  ;;  %v12987_v34 = vadd.f32 %v4234_v7, %v12938_v11 }
 0xe21   : > { %4268 = vadd.xlane.f32.xlu1 %v4267_v61  ;;  %4271 = vadd.xlane.f32.xlu0 %v4270_v63  ;;  %v10054_v41 = vpop.f32.mrf.mxu0 }
 0xe22   : > { %v4248_v14 = vadd.f32 %v4226_v33, %v12929_v55  ;;  %v4237_v20 = vadd.f32 %v10054_v41, %v8682_v22  ;;  %v4282_v15 = vsel %vm701_vm3, %v12987_v34, 0.0 }
 0xe23   : > { %v4228_v13 = vpop.f32.mrf.mxu0 }
 0xe24   : > { %v4229_v32 = vadd.f32 %v8682_v22, %v4228_v13  ;;  %v4276_v2 = vsel %vm701_vm3, %v4248_v14, 0.0  ;;  %v12992_v51 = vadd.f32 %v4237_v20, %v12940_v21 }
 0xe25   : > { %4274 = vadd.xlane.f32.xlu1 %v4273_v4  ;;  %4277 = vadd.xlane.f32.xlu0 %v4276_v2 }
 0xe26   : > { %v4249_v23 = vadd.f32 %v4229_v32, %v12931_v44  ;;  %v4285_v11 = vsel %vm3780_vm7, %v12992_v51, 0.0 }
 0xe28   : > { %v4279_v55 = vsel %vm701_vm3, %v4249_v23, 0.0 }
 0xe29   : > { %4280 = vadd.xlane.f32.xlu1 %v4279_v55  ;;  %4283 = vadd.xlane.f32.xlu0 %v4282_v15  ;;  %v10694_v55 = vld [vmem:[%s14619_s4 + $0x38] ss:$0 sps:$4 sm:$0xff]  }
 0xe2a   : > { %10571 = vmatprep.subr.msk.bf16.mxu0 %vm720_vm2, %v10694_v55  ;;  %v4599_v15 = vsel %vm720_vm2, %v10694_v55, 0 }
 0xe2b   : > { %10072 = vmatpush3.bf16.msra.mxu0 %v4599_v15 }
 0xe2d   : > { %4286 = vadd.xlane.f32.xlu1 %v4285_v11 }
 0xe9e   : > { %v4254_v54 = vpop.xlane.xlu0 %4253 }
 0xe9f   : > { %v4288_v18 = vmul.f32 0.041666668, %v4254_v54  ;;  %v10695_v54 = vld [vmem:[%s14619_s4 + $0x30] sm:$0xff]  }
 0xea0   : > { %10073 = vmatprep.subr.bf16.mxu0 %v10695_v54 }
 0xea1   : > { %v12999_v31 = vsub.f32 %v4240_v16, %v4288_v18  ;;  %v10697_v18 = vld [vmem:[%s14618_s3 + $0x30] sm:$0xff]   ;;  %10074 = vmatpush3.bf16.msra.mxu0 %v10695_v54 }
 0xea2   : > { %v4257_v60 = vpop.xlane.xlu1 %4256  ;;  %v4260_v44 = vpop.xlane.xlu0 %4259 }
 0xea3   : > { %v4289_v9 = vmul.f32 0.041666668, %v4257_v60  ;;  %v4290_v21 = vmul.f32 0.041666668, %v4260_v44  ;;  %v4312_v42 = vmul.f32 %v12999_v31, %v12999_v31  ;;  %v13080_v60 = vld [vmem:[#allocation6 + $0x38] ss:$0 sps:$4 sm:$0xff]  }
 0xea5   : > { %v13003_v25 = vsub.f32 %v4241_v6, %v4289_v9  ;;  %v13006_v0 = vsub.f32 %v12962_v62, %v4290_v21  ;;  %v4324_v43 = vsel %vm701_vm3, %v4312_v42, 0.0 }
 0xea6   : > { %v4263_v38 = vpop.xlane.xlu1 %4262  ;;  %4325 = vadd.xlane.f32.xlu0 %v4324_v43  ;;  %v4266_v49 = vpop.xlane.xlu0 %4265 }
 0xea7   : > { %v4291_v39 = vmul.f32 0.041666668, %v4263_v38  ;;  %v4292_v28 = vmul.f32 0.041666668, %v4266_v49  ;;  %v4313_v22 = vmul.f32 %v13003_v25, %v13003_v25  ;;  %v4314_v40 = vmul.f32 %v13006_v0, %v13006_v0 }
 0xea9   : > { %v13013_v53 = vsub.f32 %v4243_v26, %v4291_v39  ;;  %v13015_v30 = vsub.f32 %v4244_v56, %v4292_v28  ;;  %v4327_v8 = vsel %vm701_vm3, %v4313_v22, 0.0  ;;  %v4330_v46 = vsel %vm701_vm3, %v4314_v40, 0.0 }
 0xeaa   : > { %v4269_v16 = vpop.xlane.xlu1 %4268  ;;  %4328 = vadd.xlane.f32.xlu1 %v4327_v8  ;;  %4331 = vadd.xlane.f32.xlu0 %v4330_v46  ;;  %v4272_v62 = vpop.xlane.xlu0 %4271 }
 0xeab   : > { %v4293_v58 = vmul.f32 0.041666668, %v4269_v16  ;;  %v4294_v3 = vmul.f32 0.041666668, %v4272_v62  ;;  %v4315_v45 = vmul.f32 %v13013_v53, %v13013_v53  ;;  %v4316_v47 = vmul.f32 %v13015_v30, %v13015_v30 }
 0xead   : > { %v13023_v35 = vsub.f32 %v4245_v36, %v4293_v58  ;;  %v13026_v6 = vsub.f32 %v12972_v29, %v4294_v3  ;;  %v4333_v1 = vsel %vm701_vm3, %v4315_v45, 0.0  ;;  %v4336_v57 = vsel %vm701_vm3, %v4316_v47, 0.0 }
 0xeae   : > { %v4275_v26 = vpop.xlane.xlu1 %4274  ;;  %4334 = vadd.xlane.f32.xlu1 %v4333_v1  ;;  %4337 = vadd.xlane.f32.xlu0 %v4336_v57  ;;  %v4278_v37 = vpop.xlane.xlu0 %4277 }
 0xeaf   : > { %v4295_v17 = vmul.f32 0.041666668, %v4275_v26  ;;  %v4296_v10 = vmul.f32 0.041666668, %v4278_v37  ;;  %v4317_v59 = vmul.f32 %v13023_v35, %v13023_v35  ;;  %v4318_v56 = vmul.f32 %v13026_v6, %v13026_v6 }
 0xeb1   : > { %v13035_v52 = vsub.f32 %v12978_v27, %v4295_v17  ;;  %v13037_v24 = vsub.f32 %v4248_v14, %v4296_v10  ;;  %v4339_v29 = vsel %vm701_vm3, %v4317_v59, 0.0  ;;  %v4342_v50 = vsel %vm701_vm3, %v4318_v56, 0.0  ;;  %v13084_v56 = vld [vmem:[#allocation10 + $0x4] ss:$0 sm:$0xff] }
 0xeb2   : > { %4340 = vadd.xlane.f32.xlu1 %v4339_v29  ;;  %v4281_v12 = vpop.xlane.xlu1 %4280  ;;  %4343 = vadd.xlane.f32.xlu0 %v4342_v50  ;;  %v4284_v19 = vpop.xlane.xlu0 %4283 }
 0xeb3   : > { %v4297_v5 = vmul.f32 0.041666668, %v4281_v12  ;;  %v4298_v36 = vmul.f32 0.041666668, %v4284_v19  ;;  %v4319_v48 = vmul.f32 %v13035_v52, %v13035_v52  ;;  %v4320_v7 = vmul.f32 %v13037_v24, %v13037_v24 }
 0xeb5   : > { %v13045_v27 = vsub.f32 %v4249_v23, %v4297_v5  ;;  %v13048_v33 = vsub.f32 %v12987_v34, %v4298_v36  ;;  %v4345_v61 = vsel %vm701_vm3, %v4319_v48, 0.0  ;;  %v4348_v63 = vsel %vm701_vm3, %v4320_v7, 0.0 }
 0xeb6   : > { %4346 = vadd.xlane.f32.xlu1 %v4345_v61  ;;  %v4287_v41 = vpop.xlane.xlu1 %4286  ;;  %4349 = vadd.xlane.f32.xlu0 %v4348_v63 }
 0xeb7   : > { %v4299_v14 = vmul.f32 0.041666668, %v4287_v41  ;;  %v4321_v13 = vmul.f32 %v13045_v27, %v13045_v27  ;;  %v4322_v4 = vmul.f32 %v13048_v33, %v13048_v33  ;;  %v13088_v41 = vld [vmem:[#allocation10 + $0x5] ss:$0 sm:$0xff] }
 0xeb9   : > { %v13057_v20 = vsub.f32 %v12992_v51, %v4299_v14  ;;  %v4351_v34 = vsel %vm701_vm3, %v4321_v13, 0.0  ;;  %v4354_v32 = vsel %vm701_vm3, %v4322_v4, 0.0  ;;  %v10696_v51 = vld [vmem:[%s14618_s3 + $0x38] ss:$0 sps:$4 sm:$0xff]  }
 0xeba   : > { %4352 = vadd.xlane.f32.xlu1 %v4351_v34  ;;  %4355 = vadd.xlane.f32.xlu0 %v4354_v32  ;;  %v4502_v11 = vsel %vm720_vm2, %v10696_v51, 0 }
 0xebb   : > { %v4323_v2 = vmul.f32 %v13057_v20, %v13057_v20  ;;  %10570 = vmatprep.subr.msk.bf16.mxu1 %vm720_vm2, %v10696_v51 }
 0xebc   : > { %10056 = vmatpush3.bf16.msra.mxu1 %v4502_v11 }
 0xebd   : > { %v4357_v23 = vsel %vm3780_vm7, %v4323_v2, 0.0  ;;  %10057 = vmatprep.subr.bf16.mxu1 %v10697_v18 }
 0xebe   : > { %4358 = vadd.xlane.f32.xlu1 %v4357_v23 }
 0xec0   : > { %10058 = vmatpush3.bf16.msra.mxu1 %v10697_v18 }
 0xec1   : > { %10572 = vmatprep.subr.msk.bf16.mxu1 %vm720_vm2, %v13080_v60 }
 0xf2f   : > { %v4326_v44 = vpop.xlane.xlu0 %4325 }
 0xf30   : > { %v4360_v9 = vmul.f32 0.041666668, %v4326_v44 }
 0xf32   : > { %v4372_v21 = vadd.f32 1e-05, %v4360_v9 }
 0xf33   : > { %v4329_v42 = vpop.xlane.xlu1 %4328  ;;  %v4332_v43 = vpop.xlane.xlu0 %4331 }
 0xf34   : > { %10942 = vrsqrt.f32 %v4372_v21  ;;  %v4361_v38 = vmul.f32 0.041666668, %v4329_v42  ;;  %v4362_v49 = vmul.f32 0.041666668, %v4332_v43 }
 0xf36   : > { %v4373_v39 = vadd.f32 1e-05, %v4361_v38  ;;  %v4374_v28 = vadd.f32 1e-05, %v4362_v49 }
 0xf37   : > { %v4335_v22 = vpop.xlane.xlu1 %4334  ;;  %v4338_v40 = vpop.xlane.xlu0 %4337 }
 0xf38   : > { %10944 = vrsqrt.f32 %v4373_v39  ;;  %v4363_v8 = vmul.f32 0.041666668, %v4335_v22  ;;  %v4364_v46 = vmul.f32 0.041666668, %v4338_v40  ;;  %v10699_v22 = vld [vmem:[#allocation6 + $0x30] sm:$0xff]  }
 0xf39   : > { %10946 = vrsqrt.f32 %v4374_v28  ;;  %v4696_v28 = vsel %vm720_vm2, %v13080_v60, 0 }
 0xf3a   : > { %v4375_v16 = vadd.f32 1e-05, %v4363_v8  ;;  %v4376_v62 = vadd.f32 1e-05, %v4364_v46 }
 0xf3b   : > { %v4341_v58 = vpop.xlane.xlu1 %4340  ;;  %v4344_v3 = vpop.xlane.xlu0 %4343 }
 0xf3c   : > { %10948 = vrsqrt.f32 %v4375_v16  ;;  %v4365_v45 = vmul.f32 0.041666668, %v4341_v58  ;;  %v4366_v47 = vmul.f32 0.041666668, %v4344_v3 }
 0xf3d   : > { %10950 = vrsqrt.f32 %v4376_v62 }
 0xf3e   : > { %v4377_v1 = vadd.f32 1e-05, %v4365_v45  ;;  %v4378_v57 = vadd.f32 1e-05, %v4366_v47 }
 0xf3f   : > { %v4347_v26 = vpop.xlane.xlu1 %4346  ;;  %v4350_v37 = vpop.xlane.xlu0 %4349 }
 0xf40   : > { %10952 = vrsqrt.f32 %v4377_v1  ;;  %v4367_v17 = vmul.f32 0.041666668, %v4347_v26  ;;  %v4368_v10 = vmul.f32 0.041666668, %v4350_v37 }
 0xf41   : > { %v10943_v59 = vpop.eup %10942  ;;  %10954 = vrsqrt.f32 %v4378_v57 }
 0xf42   : > { %v4396_v29 = vmul.f32 %v10943_v59, %v12999_v31  ;;  %v4379_v50 = vadd.f32 1e-05, %v4367_v17  ;;  %v4380_v12 = vadd.f32 1e-05, %v4368_v10 }
 0xf43   : > { %v4353_v19 = vpop.xlane.xlu1 %4352  ;;  %v4356_v5 = vpop.xlane.xlu0 %4355 }
 0xf44   : > { %10956 = vrsqrt.f32 %v4379_v50  ;;  %v4369_v36 = vmul.f32 0.041666668, %v4353_v19  ;;  %v4370_v48 = vmul.f32 0.041666668, %v4356_v5  ;;  %v4414_v61 = vmul.f32 %v13084_v56, %v4396_v29 }
 0xf45   : > { %v10945_v7 = vpop.eup %10944  ;;  %10958 = vrsqrt.f32 %v4380_v12 }
 0xf46   : > { %v10947_v63 = vpop.eup %10946  ;;  %v4397_v14 = vmul.f32 %v10945_v7, %v13003_v25  ;;  %v4381_v13 = vadd.f32 1e-05, %v4369_v36  ;;  %v4382_v4 = vadd.f32 1e-05, %v4370_v48  ;;  %v13094_v55 = vadd.f32 %v13088_v41, %v4414_v61 }
 0xf47   : > { %v4398_v31 = vmul.f32 %v10947_v63, %v13006_v0  ;;  %v4359_v34 = vpop.xlane.xlu1 %4358 }
 0xf48   : > { %v4415_v32 = vmul.f32 %v13084_v56, %v4397_v14  ;;  %10960 = vrsqrt.f32 %v4381_v13  ;;  %v4371_v2 = vmul.f32 0.041666668, %v4359_v34  ;;  %14732 = vst [vmem:[#allocation45_spill] sm:$0xff] %v13094_v55 }
 0xf49   : > { %v10949_v23 = vpop.eup %10948  ;;  %10962 = vrsqrt.f32 %v4382_v4  ;;  %v4416_v25 = vmul.f32 %v13084_v56, %v4398_v31 }
 0xf4a   : > { %v10951_v51 = vpop.eup %10950  ;;  %v13097_v15 = vadd.f32 %v13088_v41, %v4415_v32  ;;  %v4399_v11 = vmul.f32 %v10949_v23, %v13013_v53  ;;  %v4383_v54 = vadd.f32 1e-05, %v4371_v2 }
 0xf4b   : > { %v4400_v0 = vmul.f32 %v10951_v51, %v13015_v30  ;;  %v13109_v43 = vadd.f32 %v13088_v41, %v4416_v25 }
 0xf4c   : > { %14733 = vst [vmem:[#allocation28_spill] sm:$0xff] %v13097_v15  ;;  %v13104_v18 = vpack.c.bf16 %v13097_v15, %v13094_v55  ;;  %v4417_v44 = vmul.f32 %v13084_v56, %v4399_v11  ;;  %10964 = vrsqrt.f32 %v4383_v54 }
 0xf4d   : > { %v10953_v9 = vpop.eup %10952  ;;  %v4418_v21 = vmul.f32 %v13084_v56, %v4400_v0  ;;  %14734 = vst [vmem:[#allocation46_spill] sm:$0xff] %v13109_v43 }
 0xf4e   : > { %v10955_v42 = vpop.eup %10954  ;;  %v13112_v38 = vadd.f32 %v13088_v41, %v4417_v44  ;;  %v4401_v53 = vmul.f32 %v10953_v9, %v13023_v35  ;;  %10059 = vmatprep.mubr.msk.bf16.mxu1 %vm701_vm3, %v13104_v18  ;;  %10075 = vmatprep.mubr.msk.bf16.mxu0 %vm701_vm3, %v13104_v18 }
 0xf4f   : > { %v4402_v30 = vmul.f32 %v10955_v42, %v13026_v6  ;;  %v13128_v35 = vadd.f32 %v13088_v41, %v4418_v21 }
 0xf50   : > { %14735 = vst [vmem:[#allocation30_spill] sm:$0xff] %v13112_v38  ;;  %v13122_v49 = vpack.c.bf16 %v13112_v38, %v13109_v43  ;;  %v4419_v39 = vmul.f32 %v13084_v56, %v4401_v53  ;;  %v10713_v43 = vld [vmem:[%s14619_s4 + $0x54] sm:$0xff]  }
 0xf51   : > { %v10957_v40 = vpop.eup %10956  ;;  %14736 = vst [vmem:[#allocation32_spill] sm:$0xff] %v13128_v35  ;;  %v4420_v6 = vmul.f32 %v13084_v56, %v4402_v30 }
 0xf52   : > { %v10959_v8 = vpop.eup %10958  ;;  %v13131_v46 = vadd.f32 %v13088_v41, %v4419_v39  ;;  %v4403_v16 = vmul.f32 %v10957_v40, %v13035_v52  ;;  %10060 = vmatmul.mubr.msk.bf16.vlgmr.msra.gmra.mxu1 %vm701_vm3, %v13122_v49  ;;  %10076 = vmatmul.mubr.msk.bf16.vlgmr.msra.gmra.mxu0 %vm701_vm3, %v13122_v49 }
 0xf53   : > { %v4404_v60 = vmul.f32 %v10959_v8, %v13037_v24  ;;  %10088 = vmatpush3.bf16.msra.mxu1 %v4696_v28  ;;  %v13147_v47 = vadd.f32 %v13088_v41, %v4420_v6 }
 0xf54   : > { %14737 = vst [vmem:[#allocation40_spill] sm:$0xff] %v13131_v46  ;;  %v13142_v62 = vpack.c.bf16 %v13131_v46, %v13128_v35  ;;  %v4421_v58 = vmul.f32 %v13084_v56, %v4403_v16  ;;  %10089 = vmatprep.subr.bf16.mxu1 %v10699_v22 }
 0xf55   : > { %v10961_v3 = vpop.eup %10960  ;;  %v4422_v45 = vmul.f32 %v13084_v56, %v4404_v60  ;;  %14738 = vst [vmem:[#allocation37_spill] sm:$0xff] %v13147_v47 }
 0xf56   : > { %v10963_v52 = vpop.eup %10962  ;;  %v13150_v1 = vadd.f32 %v13088_v41, %v4421_v58  ;;  %v4405_v24 = vmul.f32 %v10961_v3, %v13045_v27  ;;  %10063 = vmatprep.mubr.msk.bf16.mxu1 %vm701_vm3, %v13142_v62  ;;  %10079 = vmatprep.mubr.msk.bf16.mxu0 %vm701_vm3, %v13142_v62 }
 0xf57   : > { %v4406_v57 = vmul.f32 %v10963_v52, %v13048_v33  ;;  %10090 = vmatpush3.bf16.msra.mxu1 %v10699_v22  ;;  %v13164_v10 = vadd.f32 %v13088_v41, %v4422_v45 }
 0xf58   : > { %14739 = vst [vmem:[#allocation38_spill] sm:$0xff] %v13150_v1  ;;  %v13160_v26 = vpack.c.bf16 %v13150_v1, %v13147_v47  ;;  %v4423_v37 = vmul.f32 %v13084_v56, %v4405_v24 }
 0xf59   : > { %v10965_v17 = vpop.eup %10964  ;;  %14740 = vst [vmem:[#allocation39_spill] sm:$0xff] %v13164_v10  ;;  %v4424_v59 = vmul.f32 %v13084_v56, %v4406_v57 }
 0xf5a   : > { %v13167_v27 = vadd.f32 %v13088_v41, %v4423_v37  ;;  %v4407_v29 = vmul.f32 %v10965_v17, %v13057_v20  ;;  %10064 = vmatmul.mubr.msk.bf16.gmra.mxu1 %vm701_vm3, %v13160_v26  ;;  %10080 = vmatmul.mubr.msk.bf16.gmra.mxu0 %vm701_vm3, %v13160_v26 }
 0xf5b   : > { %v13181_v12 = vadd.f32 %v13088_v41, %v4424_v59 }
 0xf5c   : > { %14741 = vst [vmem:[#allocation31_spill] sm:$0xff] %v13167_v27  ;;  %v13177_v33 = vpack.c.bf16 %v13167_v27, %v13164_v10  ;;  %v4425_v50 = vmul.f32 %v13084_v56, %v4407_v29  ;;  %v13210_v56 = vld [vmem:[#allocation4 + $0x4] ss:$0 sm:$0xff] }
 0xf5d   : > { %14742 = vst [vmem:[#allocation50_spill] sm:$0xff] %v13181_v12 }
 0xf5e   : > { %v13184_v19 = vadd.f32 %v13088_v41, %v4425_v50  ;;  %10067 = vmatprep.mubr.msk.bf16.mxu1 %vm701_vm3, %v13177_v33  ;;  %10083 = vmatprep.mubr.msk.bf16.mxu0 %vm701_vm3, %v13177_v33 }
 0xf60   : > { %14743 = vst [vmem:[#allocation29_spill] sm:$0xff] %v13184_v19  ;;  %v13192_v20 = vpack.c.bf16 %v13184_v19, %v13181_v12  ;;  %v13604_v19 = vld [vmem:[%s14618_s3 + $0x50] ss:$0 sps:$4 sm:$0xff]  }
 0xf62   : > { %10068 = vmatmul.mubr.msk.bf16.gmra.mxu1 %vm701_vm3, %v13192_v20  ;;  %10084 = vmatmul.mubr.msk.bf16.gmra.mxu0 %vm701_vm3, %v13192_v20 }
 0xf63   : > { %10091 = vmatprep.mubr.msk.bf16.mxu1 %vm701_vm3, %v13104_v18 }
 0xf6a   : > { %10092 = vmatmul.mubr.msk.bf16.vlgmr.msra.gmra.mxu1 %vm701_vm3, %v13122_v49 }
 0xf6b   : > { %10095 = vmatprep.mubr.msk.bf16.mxu1 %vm701_vm3, %v13142_v62 }
 0xf72   : > { %10096 = vmatmul.mubr.msk.bf16.gmra.mxu1 %vm701_vm3, %v13160_v26 }
 0xf73   : > { %10099 = vmatprep.mubr.msk.bf16.mxu1 %vm701_vm3, %v13177_v33 }
 0xf7a   : > { %10100 = vmatmul.mubr.msk.bf16.gmra.mxu1 %vm701_vm3, %v13192_v20 }
0x1012   : > { %v10061_v5 = vpop.f32.mrf.mxu1  ;;  %v13212_v36 = vpop.f32.mrf.mxu0 }
0x1013   : > { %v13215_v48 = vadd.f32 %v10061_v5, %v13210_v56 }
0x1014   : > { %v4538_v7 = vpop.f32.mrf.mxu1  ;;  %v13217_v61 = vpop.f32.mrf.mxu0 }
0x1015   : > { %v4539_v63 = vadd.f32 %v13210_v56, %v4538_v7 }
0x1016   : > { %v10062_v41 = vpop.f32.mrf.mxu1  ;;  %v13220_v14 = vpop.f32.mrf.mxu0 }
0x1017   : > { %v13223_v13 = vadd.f32 %v10062_v41, %v13210_v56  ;;  %10127 = vmatprep.mubr.msk.f32.mxu0 %vm997_vm4, %v4539_v63 }
0x1018   : > { %v13226_v4 = vpop.f32.mrf.mxu1  ;;  %v13228_v31 = vpop.f32.mrf.mxu0 }
0x101a   : > { %v10065_v34 = vpop.f32.mrf.mxu1  ;;  %v10081_v32 = vpop.f32.mrf.mxu0 }
0x101b   : > { %v13231_v2 = vadd.f32 %v10065_v34, %v13210_v56 }
0x101c   : > { %v13233_v23 = vpop.f32.mrf.mxu1  ;;  %v4651_v51 = vpop.f32.mrf.mxu0 }
0x101e   : > { %v10066_v25 = vpop.f32.mrf.mxu1  ;;  %v10082_v11 = vpop.f32.mrf.mxu0 }
0x101f   : > { %v13236_v54 = vadd.f32 %v10066_v25, %v13210_v56 }
0x1020   : > { %v13238_v0 = vpop.f32.mrf.mxu1  ;;  %v4654_v44 = vpop.f32.mrf.mxu0 }
0x1022   : > { %v10069_v9 = vpop.f32.mrf.mxu1  ;;  %v10085_v21 = vpop.f32.mrf.mxu0 }
0x1023   : > { %v13241_v42 = vadd.f32 %v10069_v9, %v13210_v56 }
0x1024   : > { %v13243_v53 = vpop.f32.mrf.mxu1  ;;  %v4667_v30 = vpop.f32.mrf.mxu0 }
0x1026   : > { %v10070_v39 = vpop.f32.mrf.mxu1  ;;  %v10086_v28 = vpop.f32.mrf.mxu0 }
0x1027   : > { %v13246_v22 = vadd.f32 %v10070_v39, %v13210_v56  ;;  %10103 = vmatprep.subr.msk.mxu0 %vm997_vm4, %v10086_v28 }
0x1028   : > { %v13249_v40 = vpop.f32.mrf.mxu1  ;;  %10104 = vmatpush3.xpose.msk.msra.mxu0 %vm997_vm4, %v10086_v28  ;;  %v4670_v6 = vpop.f32.mrf.mxu0 }
0x1029   : > { %10105 = vmatprep.subr.msk.mxu0 %vm997_vm4, %v10085_v21 }
0x102a   : > { %v10093_v8 = vpop.f32.mrf.mxu1 }
0x102c   : > { %v4732_v16 = vpop.f32.mrf.mxu1  ;;  %10106 = vmatpush3.xpose.msk.msra.mxu0 %vm997_vm4, %v10085_v21 }
0x102d   : > { %10107 = vmatprep.subr.msk.mxu0 %vm997_vm4, %v4670_v6 }
0x102e   : > { %v10094_v60 = vpop.f32.mrf.mxu1 }
0x102f   : > { %v5091_v41 = vpack.c.bf16 %v10094_v60, %v10093_v8 }
0x1030   : > { %v4735_v58 = vpop.f32.mrf.mxu1  ;;  %10108 = vmatpush3.xpose.msk.msra.mxu0 %vm997_vm4, %v4670_v6 }
0x1031   : > { %10109 = vmatprep.subr.msk.mxu0 %vm997_vm4, %v4667_v30  ;;  %v5090_v34 = vpack.c.bf16 %v4735_v58, %v4732_v16 }
0x1032   : > { %v10097_v3 = vpop.f32.mrf.mxu1 }
0x1034   : > { %v4748_v45 = vpop.f32.mrf.mxu1  ;;  %10110 = vmatpush3.xpose.msk.msra.mxu0 %vm997_vm4, %v4667_v30 }
0x1035   : > { %10111 = vmatprep.subr.msk.mxu0 %vm997_vm4, %v10082_v11 }
0x1036   : > { %v10098_v52 = vpop.f32.mrf.mxu1 }
0x1037   : > { %v5093_v7 = vpack.c.bf16 %v10098_v52, %v10097_v3 }
0x1038   : > { %v4751_v24 = vpop.f32.mrf.mxu1  ;;  %10112 = vmatpush3.xpose.msk.msra.mxu0 %vm997_vm4, %v10082_v11 }
0x1039   : > { %10113 = vmatprep.subr.msk.mxu0 %vm997_vm4, %v10081_v32  ;;  %v5092_v63 = vpack.c.bf16 %v4751_v24, %v4748_v45 }
0x103a   : > { %v10101_v57 = vpop.f32.mrf.mxu1 }
0x103c   : > { %v4764_v37 = vpop.f32.mrf.mxu1  ;;  %10114 = vmatpush3.xpose.msk.msra.mxu0 %vm997_vm4, %v10081_v32  ;;  %v10701_v32 = vld [vmem:[%s14619_s4 + $0x3c] sm:$0xff]  }
0x103d   : > { %10115 = vmatprep.subr.msk.mxu0 %vm997_vm4, %v4654_v44 }
0x103e   : > { %v10102_v17 = vpop.f32.mrf.mxu1 }
0x103f   : > { %v5095_v59 = vpack.c.bf16 %v10102_v17, %v10101_v57 }
0x1040   : > { %v4767_v29 = vpop.f32.mrf.mxu1  ;;  %10116 = vmatpush3.xpose.msk.msra.mxu0 %vm997_vm4, %v4654_v44 }
0x1041   : > { %v5115_v50 = vsel %vm536_vm0, %v5095_v59, 0  ;;  %v5094_v5 = vpack.c.bf16 %v4767_v29, %v4764_v37  ;;  %10117 = vmatprep.subr.msk.mxu0 %vm997_vm4, %v4651_v51  ;;  %10573 = vmatprep.subr.msk.bf16.mxu1 %vm536_vm0, %v5095_v59 }
0x1042   : > { %10146 = vmatpush3.bf16.msra.mxu1 %v5115_v50  ;;  %v13382_v50 = vld [vmem:[%s14618_s3 + $0x44] ss:$0 sps:$4 sm:$0xff]  }
0x1043   : > { %10147 = vmatprep.subr.bf16.mxu1 %v5094_v5 }
0x1044   : > { %10118 = vmatpush3.xpose.msk.msra.mxu0 %vm997_vm4, %v4651_v51 }
0x1045   : > { %10119 = vmatprep.subr.msk.mxu0 %vm997_vm4, %v13220_v14 }
0x1046   : > { %10148 = vmatpush3.bf16.msra.mxu1 %v5094_v5 }
0x1047   : > { %10149 = vmatprep.subr.bf16.mxu1 %v5093_v7 }
0x1048   : > { %10120 = vmatpush3.xpose.msk.msra.mxu0 %vm997_vm4, %v13220_v14  ;;  %v10700_v14 = vld [vmem:[%s14619_s4 + $0x44] ss:$0 sps:$4 sm:$0xff]  }
0x1049   : > { %10121 = vmatprep.subr.msk.mxu0 %vm997_vm4, %v13212_v36 }
0x104a   : > { %10150 = vmatpush3.bf16.msra.mxu1 %v5093_v7 }
0x104b   : > { %10151 = vmatprep.subr.bf16.mxu1 %v5092_v63 }
0x104c   : > { %10122 = vmatpush3.xpose.msk.msra.mxu0 %vm997_vm4, %v13212_v36  ;;  %v4542_v36 = vadd.f32 %v13210_v56, %v13226_v4  ;;  %v4558_v4 = vadd.f32 %v13210_v56, %v13238_v0 }
0x104d   : > { %10123 = vmatprep.subr.msk.mxu0 %vm997_vm4, %v13228_v31 }
0x104e   : > { %10152 = vmatpush3.bf16.msra.mxu1 %v5092_v63 }
0x104f   : > { %10153 = vmatprep.subr.bf16.mxu1 %v5091_v41 }
0x1050   : > { %10124 = vmatpush3.xpose.msk.msra.mxu0 %vm997_vm4, %v13228_v31  ;;  %v5353_v31 = vsel %vm720_vm2, %v10700_v14, 0 }
0x1051   : > { %10125 = vmatprep.subr.msk.mxu0 %vm997_vm4, %v13217_v61 }
0x1052   : > { %10154 = vmatpush3.bf16.msra.mxu1 %v5091_v41 }
0x1053   : > { %10155 = vmatprep.subr.bf16.mxu1 %v5090_v34 }
0x1054   : > { %10126 = vmatpush3.xpose.msk.msra.mxu0 %vm997_vm4, %v13217_v61  ;;  %v4555_v61 = vadd.f32 %v13210_v56, %v13233_v23 }
0x1055   : > { %10575 = vmatprep.subr.msk.bf16.mxu0 %vm720_vm2, %v10700_v14 }
0x1056   : > { %10156 = vmatpush3.bf16.msra.mxu1 %v5090_v34 }
0x1057   : > { %10128 = vmatmul.mubr.msk.f32.vlgmr.msra.gmra.mxu0 %vm997_vm4, %v4542_v36  ;;  %10574 = vmatprep.subr.msk.bf16.mxu1 %vm720_vm2, %v13382_v50 }
0x1058   : > { %10130 = vmatprep.mubr.msk.f32.mxu0 %vm997_vm4, %v13215_v48  ;;  %10186 = vmatpush3.bf16.msra.mxu0 %v5353_v31  ;;  %v4571_v48 = vadd.f32 %v13210_v56, %v13243_v53 }
0x1059   : > { %10187 = vmatprep.subr.bf16.mxu0 %v10701_v32 }
0x105b   : > { %10131 = vmatmul.mubr.msk.f32.gmra.mxu0 %vm997_vm4, %v13223_v13  ;;  %v4574_v13 = vadd.f32 %v13210_v56, %v13249_v40 }
0x105c   : > { %10133 = vmatprep.mubr.msk.f32.mxu0 %vm997_vm4, %v4555_v61  ;;  %10188 = vmatpush3.bf16.msra.mxu0 %v10701_v32 }
0x105f   : > { %10134 = vmatmul.mubr.msk.f32.gmra.mxu0 %vm997_vm4, %v4558_v4 }
0x1060   : > { %10136 = vmatprep.mubr.msk.f32.mxu0 %vm997_vm4, %v13231_v2 }
0x1063   : > { %10137 = vmatmul.mubr.msk.f32.gmra.mxu0 %vm997_vm4, %v13236_v54 }
0x1064   : > { %10139 = vmatprep.mubr.msk.f32.mxu0 %vm997_vm4, %v4571_v48 }
0x1067   : > { %10140 = vmatmul.mubr.msk.f32.gmra.mxu0 %vm997_vm4, %v4574_v13 }
0x1068   : > { %10142 = vmatprep.mubr.msk.f32.mxu0 %vm997_vm4, %v13241_v42 }
0x106b   : > { %10143 = vmatmul.mubr.msk.f32.gmra.mxu0 %vm997_vm4, %v13246_v22 }
0x106c   : > { %10189 = vmatprep.mubr.msk.bf16.mxu0 %vm701_vm3, %v13104_v18 }
0x106f   : > { %10190 = vmatmul.mubr.msk.bf16.vlgmr.msra.gmra.mxu0 %vm701_vm3, %v13122_v49 }
0x1070   : > { %10193 = vmatprep.mubr.msk.bf16.mxu0 %vm701_vm3, %v13142_v62 }
0x1077   : > { %10194 = vmatmul.mubr.msk.bf16.gmra.mxu0 %vm701_vm3, %v13160_v26 }
0x1078   : > { %10197 = vmatprep.mubr.msk.bf16.mxu0 %vm701_vm3, %v13177_v33 }
0x107f   : > { %10198 = vmatmul.mubr.msk.bf16.gmra.mxu0 %vm701_vm3, %v13192_v20 }
0x1117   : > { %v13331_v56 = vpop.f32.mrf.mxu0 }
0x1118   : > { %v4979_v2 = vsel %vm1195_vm5, %v13331_v56, -inf }
0x1119   : > { %4980 = vmax.xlane.f32.xlu1 %v4979_v2  ;;  %v13335_v23 = vpop.f32.mrf.mxu0 }
0x111a   : > { %v4976_v51 = vsel %vm1195_vm5, %v13335_v23, -inf }
0x111b   : > { %4977 = vmax.xlane.f32.xlu0 %v4976_v51  ;;  %v13339_v25 = vpop.f32.mrf.mxu0 }
0x111c   : > { %v4985_v11 = vsel %vm1195_vm5, %v13339_v25, -inf }
0x111d   : > { %4986 = vmax.xlane.f32.xlu1 %v4985_v11  ;;  %v13343_v54 = vpop.f32.mrf.mxu0 }
0x111e   : > { %v4982_v0 = vsel %vm1195_vm5, %v13343_v54, -inf }
0x111f   : > { %4983 = vmax.xlane.f32.xlu0 %v4982_v0  ;;  %v13347_v44 = vpop.f32.mrf.mxu0 }
0x1120   : > { %v4991_v9 = vsel %vm1195_vm5, %v13347_v44, -inf }
0x1121   : > { %4992 = vmax.xlane.f32.xlu1 %v4991_v9  ;;  %v13351_v21 = vpop.f32.mrf.mxu0 }
0x1122   : > { %v4988_v42 = vsel %vm1195_vm5, %v13351_v21, -inf }
0x1123   : > { %4989 = vmax.xlane.f32.xlu0 %v4988_v42  ;;  %v13355_v53 = vpop.f32.mrf.mxu0 }
0x1124   : > { %v4997_v30 = vsel %vm1195_vm5, %v13355_v53, -inf }
0x1125   : > { %4998 = vmax.xlane.f32.xlu1 %v4997_v30  ;;  %v13359_v39 = vpop.f32.mrf.mxu0 }
0x1126   : > { %v4994_v28 = vsel %vm1195_vm5, %v13359_v39, -inf }
0x1127   : > { %4995 = vmax.xlane.f32.xlu0 %v4994_v28  ;;  %v13363_v22 = vpop.f32.mrf.mxu0 }
0x1128   : > { %v5003_v40 = vsel %vm1195_vm5, %v13363_v22, -inf }
0x1129   : > { %5004 = vmax.xlane.f32.xlu1 %v5003_v40  ;;  %v13367_v8 = vpop.f32.mrf.mxu0 }
0x112a   : > { %v5000_v6 = vsel %vm1195_vm5, %v13367_v8, -inf }
0x112b   : > { %5001 = vmax.xlane.f32.xlu0 %v5000_v6  ;;  %v13371_v16 = vpop.f32.mrf.mxu0 }
0x112c   : > { %v5009_v60 = vsel %vm1229_vm6, %v13371_v16, -inf }
0x112d   : > { %5010 = vmax.xlane.f32.xlu1 %v5009_v60  ;;  %v13375_v58 = vpop.f32.mrf.mxu0 }
0x112e   : > { %v5006_v3 = vsel %vm1195_vm5, %v13375_v58, -inf }
0x112f   : > { %v10191_v45 = vpop.f32.mrf.mxu0  ;;  %5007 = vmax.xlane.f32.xlu0 %v5006_v3 }
0x1131   : > { %v5389_v52 = vpop.f32.mrf.mxu0 }
0x1133   : > { %v10192_v24 = vpop.f32.mrf.mxu0 }
0x1135   : > { %v5392_v57 = vpop.f32.mrf.mxu0 }
0x1137   : > { %v10195_v37 = vpop.f32.mrf.mxu0 }
0x1139   : > { %v5405_v17 = vpop.f32.mrf.mxu0 }
0x113b   : > { %v10196_v59 = vpop.f32.mrf.mxu0 }
0x113d   : > { %v5408_v29 = vpop.f32.mrf.mxu0 }
0x113f   : > { %v10199_v5 = vpop.f32.mrf.mxu0 }
0x1141   : > { %v5421_v7 = vpop.f32.mrf.mxu0 }
0x1143   : > { %v10200_v63 = vpop.f32.mrf.mxu0 }
0x1144   : > { %10217 = vmatprep.subr.msk.mxu0 %vm997_vm4, %v10200_v63 }
0x1145   : > { %10218 = vmatpush3.xpose.msk.msra.mxu0 %vm997_vm4, %v10200_v63  ;;  %v5424_v41 = vpop.f32.mrf.mxu0 }
0x1146   : > { %10219 = vmatprep.subr.msk.mxu0 %vm997_vm4, %v10199_v5 }
0x1149   : > { %10220 = vmatpush3.xpose.msk.msra.mxu0 %vm997_vm4, %v10199_v5 }
0x114a   : > { %10221 = vmatprep.subr.msk.mxu0 %vm997_vm4, %v5424_v41 }
0x114d   : > { %10222 = vmatpush3.xpose.msk.msra.mxu0 %vm997_vm4, %v5424_v41  ;;  %v10703_v41 = vld [vmem:[%s14618_s3 + $0x3c] sm:$0xff]  }
0x114e   : > { %10223 = vmatprep.subr.msk.mxu0 %vm997_vm4, %v5421_v7 }
0x1151   : > { %10224 = vmatpush3.xpose.msk.msra.mxu0 %vm997_vm4, %v5421_v7 }
0x1152   : > { %10225 = vmatprep.subr.msk.mxu0 %vm997_vm4, %v10196_v59 }
0x1155   : > { %10226 = vmatpush3.xpose.msk.msra.mxu0 %vm997_vm4, %v10196_v59 }
0x1156   : > { %10227 = vmatprep.subr.msk.mxu0 %vm997_vm4, %v10195_v37 }
0x1159   : > { %10228 = vmatpush3.xpose.msk.msra.mxu0 %vm997_vm4, %v10195_v37 }
0x115a   : > { %10229 = vmatprep.subr.msk.mxu0 %vm997_vm4, %v5408_v29 }
0x115d   : > { %10230 = vmatpush3.xpose.msk.msra.mxu0 %vm997_vm4, %v5408_v29 }
0x115e   : > { %10231 = vmatprep.subr.msk.mxu0 %vm997_vm4, %v5405_v17 }
0x1161   : > { %10232 = vmatpush3.xpose.msk.msra.mxu0 %vm997_vm4, %v5405_v17 }
0x1162   : > { %10233 = vmatprep.subr.msk.mxu0 %vm997_vm4, %v10192_v24 }
0x1165   : > { %10234 = vmatpush3.xpose.msk.msra.mxu0 %vm997_vm4, %v10192_v24 }
0x1166   : > { %10235 = vmatprep.subr.msk.mxu0 %vm997_vm4, %v10191_v45 }
0x1169   : > { %10236 = vmatpush3.xpose.msk.msra.mxu0 %vm997_vm4, %v10191_v45 }
0x116a   : > { %10237 = vmatprep.subr.msk.mxu0 %vm997_vm4, %v5392_v57 }
0x116d   : > { %10238 = vmatpush3.xpose.msk.msra.mxu0 %vm997_vm4, %v5392_v57 }
0x116e   : > { %10239 = vmatprep.subr.msk.mxu0 %vm997_vm4, %v5389_v52 }
0x1171   : > { %10240 = vmatpush3.xpose.msk.msra.mxu0 %vm997_vm4, %v5389_v52 }
0x11a2   : > { %v4981_v34 = vpop.xlane.xlu1 %4980 }
0x11a3   : > { %v5013_v14 = vsub.f32 %v13331_v56, %v4981_v34 }
0x11a4   : > { %v4978_v36 = vpop.xlane.xlu0 %4977 }
0x11a5   : > { %v5026_v31 = vmul.f32 1.442695, %v5013_v14  ;;  %v5012_v32 = vsub.f32 %v13335_v23, %v4978_v36  ;;  %v10704_v36 = vld [vmem:[#allocation6 + $0x44] ss:$0 sps:$4 sm:$0xff]  }
0x11a6   : > { %v4987_v61 = vpop.xlane.xlu1 %4986 }
0x11a7   : > { %v5024_v4 = vmul.f32 1.442695, %v5012_v32  ;;  %v5015_v48 = vsub.f32 %v13339_v25, %v4987_v61  ;;  %10966 = vpow2.f32 %v5026_v31 }
0x11a8   : > { %v4984_v13 = vpop.xlane.xlu0 %4983 }
0x11a9   : > { %10968 = vpow2.f32 %v5024_v4  ;;  %v5030_v2 = vmul.f32 1.442695, %v5015_v48  ;;  %v5014_v51 = vsub.f32 %v13343_v54, %v4984_v13 }
0x11aa   : > { %v4993_v11 = vpop.xlane.xlu1 %4992 }
0x11ab   : > { %v5028_v0 = vmul.f32 1.442695, %v5014_v51  ;;  %v5017_v9 = vsub.f32 %v13347_v44, %v4993_v11  ;;  %10970 = vpow2.f32 %v5030_v2  ;;  %v5450_v11 = vsel %vm720_vm2, %v10704_v36, 0 }
0x11ac   : > { %v4990_v56 = vpop.xlane.xlu0 %4989 }
0x11ad   : > { %10972 = vpow2.f32 %v5028_v0  ;;  %v5034_v42 = vmul.f32 1.442695, %v5017_v9  ;;  %v5016_v23 = vsub.f32 %v13351_v21, %v4990_v56  ;;  %v10705_v0 = vld [vmem:[#allocation6 + $0x3c] sm:$0xff]  }
0x11ae   : > { %v4999_v30 = vpop.xlane.xlu1 %4998  ;;  %v10706_v9 = vld [vmem:[%s14619_s4 + $0x50] ss:$0 sps:$4 sm:$0xff]  }
0x11af   : > { %v5032_v28 = vmul.f32 1.442695, %v5016_v23  ;;  %v5019_v25 = vsub.f32 %v13355_v53, %v4999_v30  ;;  %10974 = vpow2.f32 %v5034_v42  ;;  %10579 = vmatprep.subr.msk.bf16.mxu0 %vm720_vm2, %v10706_v9 }
0x11b0   : > { %v4996_v40 = vpop.xlane.xlu0 %4995 }
0x11b1   : > { %10976 = vpow2.f32 %v5032_v28  ;;  %v5038_v6 = vmul.f32 1.442695, %v5019_v25  ;;  %v5018_v54 = vsub.f32 %v13359_v39, %v4996_v40 }
0x11b2   : > { %v5005_v60 = vpop.xlane.xlu1 %5004 }
0x11b3   : > { %v5036_v3 = vmul.f32 1.442695, %v5018_v54  ;;  %v5021_v44 = vsub.f32 %v13363_v22, %v5005_v60  ;;  %10978 = vpow2.f32 %v5038_v6 }
0x11b4   : > { %v5002_v45 = vpop.xlane.xlu0 %5001  ;;  %v13419_v52 = vpop.eup %10966 }
0x11b5   : > { %10980 = vpow2.f32 %v5036_v3  ;;  %v5042_v21 = vmul.f32 1.442695, %v5021_v44  ;;  %v5020_v24 = vsub.f32 %v13367_v8, %v5002_v45 }
0x11b6   : > { %v13422_v57 = vpop.eup %10968  ;;  %v5011_v53 = vpop.xlane.xlu1 %5010 }
0x11b7   : > { %v5040_v37 = vmul.f32 1.442695, %v5020_v24  ;;  %v5023_v17 = vsub.f32 %v13371_v16, %v5011_v53  ;;  %v5084_v39 = vpack.c.bf16 %v13419_v52, %v13422_v57  ;;  %10982 = vpow2.f32 %v5042_v21  ;;  %v8761_v21 = vld [vmem:[#allocation4 + $0x5] ss:$0 sm:$0xff] }
0x11b8   : > { %v5008_v59 = vpop.xlane.xlu0 %5007  ;;  %v13427_v22 = vpop.eup %10970  ;;  %v5256_v16 = vsel %vm720_vm2, %v13382_v50, 0 }
0x11b9   : > { %10984 = vpow2.f32 %v5040_v37  ;;  %v5046_v29 = vmul.f32 1.442695, %v5023_v17  ;;  %v5022_v5 = vsub.f32 %v13375_v58, %v5008_v59  ;;  %10157 = vmatprep.mubr.msk.bf16.mxu1 %vm1195_vm5, %v5084_v39  ;;  %v6107_v59 = vsel %vm720_vm2, %v10706_v9, 0 }
0x11ba   : > { %v13431_v8 = vpop.eup %10972 }
0x11bb   : > { %v5085_v7 = vpack.c.bf16 %v13427_v22, %v13431_v8  ;;  %v5044_v63 = vmul.f32 1.442695, %v5022_v5  ;;  %10986 = vpow2.f32 %v5046_v29  ;;  %v10707_v29 = vld [vmem:[%s14619_s4 + $0x48] sm:$0xff]  }
0x11bc   : > { %v13440_v34 = vpop.eup %10974 }
0x11bd   : > { %10988 = vpow2.f32 %v5044_v63  ;;  %10158 = vmatmul.mubr.msk.bf16.vlgmr.msra.gmra.mxu1 %vm1195_vm5, %v5085_v7 }
0x11be   : > { %v13443_v58 = vpop.eup %10976  ;;  %10170 = vmatpush3.bf16.msra.mxu1 %v5256_v16 }
0x11bf   : > { %v5086_v14 = vpack.c.bf16 %v13440_v34, %v13443_v58  ;;  %10171 = vmatprep.subr.bf16.mxu1 %v10703_v41 }
0x11c0   : > { %v13447_v31 = vpop.eup %10978 }
0x11c1   : > { %10161 = vmatprep.mubr.msk.bf16.mxu1 %vm1195_vm5, %v5086_v14 }
0x11c2   : > { %v13450_v50 = vpop.eup %10980  ;;  %10172 = vmatpush3.bf16.msra.mxu1 %v10703_v41 }
0x11c3   : > { %v5087_v32 = vpack.c.bf16 %v13447_v31, %v13450_v50  ;;  %10576 = vmatprep.subr.msk.bf16.mxu1 %vm720_vm2, %v10704_v36 }
0x11c4   : > { %v13455_v61 = vpop.eup %10982 }
0x11c5   : > { %10162 = vmatmul.mubr.msk.bf16.gmra.mxu1 %vm1195_vm5, %v5087_v32 }
0x11c6   : > { %v13458_v4 = vpop.eup %10984 }
0x11c7   : > { %v5088_v48 = vpack.c.bf16 %v13455_v61, %v13458_v4 }
0x11c8   : > { %v13462_v13 = vpop.eup %10986 }
0x11c9   : > { %10165 = vmatprep.mubr.msk.bf16.mxu1 %vm1195_vm5, %v5088_v48 }
0x11ca   : > { %v13465_v2 = vpop.eup %10988 }
0x11cb   : > { %v5089_v51 = vpack.c.bf16 %v13462_v13, %v13465_v2 }
0x11cd   : > { %10166 = vmatmul.mubr.msk.bf16.gmra.mxu1 %vm1195_vm5, %v5089_v51 }
0x11ce   : > { %10173 = vmatprep.mubr.msk.bf16.mxu1 %vm701_vm3, %v13104_v18 }
0x11d5   : > { %10174 = vmatmul.mubr.msk.bf16.vlgmr.msra.gmra.mxu1 %vm701_vm3, %v13122_v49 }
0x11d6   : > { %10177 = vmatprep.mubr.msk.bf16.mxu1 %vm701_vm3, %v13142_v62  ;;  %10202 = vmatpush3.bf16.msra.mxu1 %v5450_v11 }
0x11d7   : > { %10203 = vmatprep.subr.bf16.mxu1 %v10705_v0 }
0x11da   : > { %10204 = vmatpush3.bf16.msra.mxu1 %v10705_v0 }
0x11dd   : > { %10178 = vmatmul.mubr.msk.bf16.gmra.mxu1 %vm701_vm3, %v13160_v26 }
0x11de   : > { %10181 = vmatprep.mubr.msk.bf16.mxu1 %vm701_vm3, %v13177_v33 }
0x11e5   : > { %10182 = vmatmul.mubr.msk.bf16.gmra.mxu1 %vm701_vm3, %v13192_v20 }
0x11e6   : > { %10205 = vmatprep.mubr.msk.bf16.mxu1 %vm701_vm3, %v13104_v18 }
0x11ed   : > { %10206 = vmatmul.mubr.msk.bf16.vlgmr.msra.gmra.mxu1 %vm701_vm3, %v13122_v49 }
0x11ee   : > { %10209 = vmatprep.mubr.msk.bf16.mxu1 %vm701_vm3, %v13142_v62 }
0x11f5   : > { %10210 = vmatmul.mubr.msk.bf16.gmra.mxu1 %vm701_vm3, %v13160_v26 }
0x11f6   : > { %10213 = vmatprep.mubr.msk.bf16.mxu1 %vm701_vm3, %v13177_v33 }
0x11fd   : > { %10214 = vmatmul.mubr.msk.bf16.gmra.mxu1 %vm701_vm3, %v13192_v20 }
0x127d   : > { %v13499_v56 = vpop.f32.mrf.mxu1 }
0x127f   : > { %v13501_v42 = vpop.f32.mrf.mxu1 }
0x1281   : > { %v13503_v23 = vpop.f32.mrf.mxu1 }
0x1282   : > { %14744 = vst [vmem:[#allocation47_spill] sm:$0xff] %v13503_v23 }
0x1283   : > { %v13505_v30 = vpop.f32.mrf.mxu1 }
0x1285   : > { %v13507_v28 = vpop.f32.mrf.mxu1 }
0x1286   : > { %14745 = vst [vmem:[#allocation48_spill] sm:$0xff] %v13507_v28 }
0x1287   : > { %v13509_v25 = vpop.f32.mrf.mxu1 }
0x1288   : > { %14746 = vst [vmem:[#allocation49_spill] sm:$0xff] %v13509_v25 }
0x1289   : > { %v13511_v40 = vpop.f32.mrf.mxu1 }
0x128a   : > { %14747 = vst [vmem:[#allocation41_spill] sm:$0xff] %v13511_v40 }
0x128b   : > { %v13513_v6 = vpop.f32.mrf.mxu1 }
0x128c   : > { %14748 = vst [vmem:[#allocation34_spill] sm:$0xff] %v13513_v6 }
0x128d   : > { %v13515_v54 = vpop.f32.mrf.mxu1 }
0x128e   : > { %14749 = vst [vmem:[#allocation42_spill] sm:$0xff] %v13515_v54 }
0x128f   : > { %v13517_v60 = vpop.f32.mrf.mxu1 }
0x1290   : > { %14750 = vst [vmem:[#allocation36_spill] sm:$0xff] %v13517_v60 }
0x1291   : > { %v13519_v3 = vpop.f32.mrf.mxu1 }
0x1292   : > { %14751 = vst [vmem:[#allocation17_spill] sm:$0xff] %v13519_v3 }
0x1293   : > { %v13521_v44 = vpop.f32.mrf.mxu1 }
0x1294   : > { %14752 = vst [vmem:[#allocation33_spill] sm:$0xff] %v13521_v44 }
0x1295   : > { %v10175_v45 = vpop.f32.mrf.mxu1 }
0x1296   : > { %v5301_v5 = vadd.f32 %v10175_v45, %v8761_v21 }
0x1297   : > { %v5292_v24 = vpop.f32.mrf.mxu1 }
0x1298   : > { %v5293_v53 = vadd.f32 %v8761_v21, %v5292_v24 }
0x1299   : > { %v10176_v37 = vpop.f32.mrf.mxu1 }
0x129a   : > { %10241 = vmatprep.mubr.msk.f32.mxu0 %vm997_vm4, %v5293_v53  ;;  %v5304_v16 = vadd.f32 %v10176_v37, %v8761_v21 }
0x129b   : > { %v5295_v17 = vpop.f32.mrf.mxu1 }
0x129c   : > { %v5296_v39 = vadd.f32 %v8761_v21, %v5295_v17 }
0x129d   : > { %v10179_v7 = vpop.f32.mrf.mxu1 }
0x129e   : > { %10242 = vmatmul.mubr.msk.f32.vlgmr.msra.gmra.mxu0 %vm997_vm4, %v5296_v39  ;;  %v5317_v48 = vadd.f32 %v10179_v7, %v8761_v21 }
0x129f   : > { %v5308_v63 = vpop.f32.mrf.mxu1  ;;  %10244 = vmatprep.mubr.msk.f32.mxu0 %vm997_vm4, %v5301_v5  ;;  %10300 = vmatpush3.bf16.msra.mxu0 %v6107_v59 }
0x12a0   : > { %v5309_v41 = vadd.f32 %v8761_v21, %v5308_v63  ;;  %10301 = vmatprep.subr.bf16.mxu0 %v10707_v29 }
0x12a1   : > { %v10180_v14 = vpop.f32.mrf.mxu1 }
0x12a2   : > { %10245 = vmatmul.mubr.msk.f32.gmra.mxu0 %vm997_vm4, %v5304_v16  ;;  %v5320_v0 = vadd.f32 %v10180_v14, %v8761_v21 }
0x12a3   : > { %v5311_v36 = vpop.f32.mrf.mxu1  ;;  %10247 = vmatprep.mubr.msk.f32.mxu0 %vm997_vm4, %v5309_v41  ;;  %10302 = vmatpush3.bf16.msra.mxu0 %v10707_v29 }
0x12a4   : > { %v5312_v32 = vadd.f32 %v8761_v21, %v5311_v36 }
0x12a5   : > { %v10183_v51 = vpop.f32.mrf.mxu1 }
0x12a6   : > { %10248 = vmatmul.mubr.msk.f32.gmra.mxu0 %vm997_vm4, %v5312_v32  ;;  %v5333_v37 = vadd.f32 %v10183_v51, %v8761_v21 }
0x12a7   : > { %v5324_v11 = vpop.f32.mrf.mxu1  ;;  %10250 = vmatprep.mubr.msk.f32.mxu0 %vm997_vm4, %v5317_v48 }
0x12a8   : > { %v5325_v9 = vadd.f32 %v8761_v21, %v5324_v11 }
0x12a9   : > { %v10184_v45 = vpop.f32.mrf.mxu1 }
0x12aa   : > { %10251 = vmatmul.mubr.msk.f32.gmra.mxu0 %vm997_vm4, %v5320_v0  ;;  %v5336_v59 = vadd.f32 %v10184_v45, %v8761_v21 }
0x12ab   : > { %v5327_v24 = vpop.f32.mrf.mxu1  ;;  %10253 = vmatprep.mubr.msk.f32.mxu0 %vm997_vm4, %v5325_v9 }
0x12ac   : > { %v5328_v53 = vadd.f32 %v8761_v21, %v5327_v24 }
0x12ad   : > { %v10207_v17 = vpop.f32.mrf.mxu1 }
0x12ae   : > { %10254 = vmatmul.mubr.msk.f32.gmra.mxu0 %vm997_vm4, %v5328_v53 }
0x12af   : > { %v5486_v39 = vpop.f32.mrf.mxu1  ;;  %10256 = vmatprep.mubr.msk.f32.mxu0 %vm997_vm4, %v5333_v37 }
0x12b1   : > { %v10208_v29 = vpop.f32.mrf.mxu1 }
0x12b2   : > { %10257 = vmatmul.mubr.msk.f32.gmra.mxu0 %vm997_vm4, %v5336_v59  ;;  %v5845_v45 = vpack.c.bf16 %v10208_v29, %v10207_v17 }
0x12b3   : > { %v5489_v5 = vpop.f32.mrf.mxu1  ;;  %10303 = vmatprep.mubr.msk.bf16.mxu0 %vm701_vm3, %v13104_v18 }
0x12b4   : > { %v5844_v24 = vpack.c.bf16 %v5489_v5, %v5486_v39 }
0x12b5   : > { %v10211_v7 = vpop.f32.mrf.mxu1 }
0x12b6   : > { %10304 = vmatmul.mubr.msk.bf16.vlgmr.msra.gmra.mxu0 %vm701_vm3, %v13122_v49 }
0x12b7   : > { %v5502_v63 = vpop.f32.mrf.mxu1  ;;  %10307 = vmatprep.mubr.msk.bf16.mxu0 %vm701_vm3, %v13142_v62 }
0x12b9   : > { %v10212_v16 = vpop.f32.mrf.mxu1 }
0x12ba   : > { %v5847_v0 = vpack.c.bf16 %v10212_v16, %v10211_v7 }
0x12bb   : > { %v5505_v41 = vpop.f32.mrf.mxu1 }
0x12bc   : > { %v5846_v9 = vpack.c.bf16 %v5505_v41, %v5502_v63 }
0x12bd   : > { %v10215_v14 = vpop.f32.mrf.mxu1 }
0x12be   : > { %10308 = vmatmul.mubr.msk.bf16.gmra.mxu0 %vm701_vm3, %v13160_v26 }
0x12bf   : > { %v5518_v21 = vpop.f32.mrf.mxu1  ;;  %10311 = vmatprep.mubr.msk.bf16.mxu0 %vm701_vm3, %v13177_v33 }
0x12c1   : > { %v10216_v36 = vpop.f32.mrf.mxu1 }
0x12c2   : > { %v5849_v32 = vpack.c.bf16 %v10216_v36, %v10215_v14 }
0x12c3   : > { %v5521_v48 = vpop.f32.mrf.mxu1 }
0x12c4   : > { %v5869_v51 = vsel %vm536_vm0, %v5849_v32, 0  ;;  %v5848_v11 = vpack.c.bf16 %v5521_v48, %v5518_v21  ;;  %10577 = vmatprep.subr.msk.bf16.mxu1 %vm536_vm0, %v5849_v32 }
0x12c5   : > { %10260 = vmatpush3.bf16.msra.mxu1 %v5869_v51 }
0x12c6   : > { %10261 = vmatprep.subr.bf16.mxu1 %v5848_v11  ;;  %10312 = vmatmul.mubr.msk.bf16.gmra.mxu0 %vm701_vm3, %v13192_v20 }
0x12c9   : > { %10262 = vmatpush3.bf16.msra.mxu1 %v5848_v11 }
0x12ca   : > { %10263 = vmatprep.subr.bf16.mxu1 %v5847_v0 }
0x12cd   : > { %10264 = vmatpush3.bf16.msra.mxu1 %v5847_v0 }
0x12ce   : > { %10265 = vmatprep.subr.bf16.mxu1 %v5846_v9 }
0x12d1   : > { %10266 = vmatpush3.bf16.msra.mxu1 %v5846_v9 }
0x12d2   : > { %10267 = vmatprep.subr.bf16.mxu1 %v5845_v45 }
0x12d5   : > { %10268 = vmatpush3.bf16.msra.mxu1 %v5845_v45 }
0x12d6   : > { %10269 = vmatprep.subr.bf16.mxu1 %v5844_v24 }
0x12d9   : > { %10270 = vmatpush3.bf16.msra.mxu1 %v5844_v24 }
0x12da   : > { %10578 = vmatprep.subr.msk.bf16.mxu1 %vm720_vm2, %v13604_v19 }
0x135e   : > { %v13553_v53 = vpop.f32.mrf.mxu0 }
0x135f   : > { %v5733_v37 = vsel %vm1195_vm5, %v13553_v53, -inf }
0x1360   : > { %5734 = vmax.xlane.f32.xlu1 %v5733_v37  ;;  %v13557_v59 = vpop.f32.mrf.mxu0 }
0x1361   : > { %v5730_v7 = vsel %vm1195_vm5, %v13557_v59, -inf }
0x1362   : > { %5731 = vmax.xlane.f32.xlu0 %v5730_v7  ;;  %v13561_v63 = vpop.f32.mrf.mxu0 }
0x1363   : > { %v5739_v17 = vsel %vm1195_vm5, %v13561_v63, -inf }
0x1364   : > { %5740 = vmax.xlane.f32.xlu1 %v5739_v17  ;;  %v13565_v39 = vpop.f32.mrf.mxu0 }
0x1365   : > { %v5736_v29 = vsel %vm1195_vm5, %v13565_v39, -inf }
0x1366   : > { %5737 = vmax.xlane.f32.xlu0 %v5736_v29  ;;  %v13569_v5 = vpop.f32.mrf.mxu0 }
0x1367   : > { %v5745_v16 = vsel %vm1195_vm5, %v13569_v5, -inf }
0x1368   : > { %5746 = vmax.xlane.f32.xlu1 %v5745_v16  ;;  %v13573_v41 = vpop.f32.mrf.mxu0 }
0x1369   : > { %v5742_v14 = vsel %vm1195_vm5, %v13573_v41, -inf }
0x136a   : > { %5743 = vmax.xlane.f32.xlu0 %v5742_v14  ;;  %v13577_v21 = vpop.f32.mrf.mxu0 }
0x136b   : > { %v5751_v36 = vsel %vm1195_vm5, %v13577_v21, -inf }
0x136c   : > { %5752 = vmax.xlane.f32.xlu1 %v5751_v36  ;;  %v13581_v32 = vpop.f32.mrf.mxu0 }
0x136d   : > { %v5748_v48 = vsel %vm1195_vm5, %v13581_v32, -inf }
0x136e   : > { %5749 = vmax.xlane.f32.xlu0 %v5748_v48  ;;  %v13585_v51 = vpop.f32.mrf.mxu0 }
0x136f   : > { %v5757_v11 = vsel %vm1195_vm5, %v13585_v51, -inf }
0x1370   : > { %5758 = vmax.xlane.f32.xlu1 %v5757_v11  ;;  %v13589_v0 = vpop.f32.mrf.mxu0 }
0x1371   : > { %v5754_v9 = vsel %vm1195_vm5, %v13589_v0, -inf }
0x1372   : > { %5755 = vmax.xlane.f32.xlu0 %v5754_v9  ;;  %v13593_v45 = vpop.f32.mrf.mxu0 }
0x1373   : > { %v5763_v24 = vsel %vm1229_vm6, %v13593_v45, -inf }
0x1374   : > { %5764 = vmax.xlane.f32.xlu1 %v5763_v24  ;;  %v13597_v37 = vpop.f32.mrf.mxu0 }
0x1375   : > { %v5760_v7 = vsel %vm1195_vm5, %v13597_v37, -inf }
0x1376   : > { %v10305_v17 = vpop.f32.mrf.mxu0  ;;  %5761 = vmax.xlane.f32.xlu0 %v5760_v7 }
0x1378   : > { %v6143_v29 = vpop.f32.mrf.mxu0 }
0x137a   : > { %v10306_v16 = vpop.f32.mrf.mxu0 }
0x137c   : > { %v6146_v14 = vpop.f32.mrf.mxu0 }
0x137e   : > { %v10309_v36 = vpop.f32.mrf.mxu0 }
0x1380   : > { %v6159_v48 = vpop.f32.mrf.mxu0 }
0x1382   : > { %v10310_v11 = vpop.f32.mrf.mxu0 }
0x1384   : > { %v6162_v9 = vpop.f32.mrf.mxu0 }
0x1386   : > { %v10313_v24 = vpop.f32.mrf.mxu0 }
0x1388   : > { %v6175_v27 = vpop.f32.mrf.mxu0 }
0x138a   : > { %v10314_v12 = vpop.f32.mrf.mxu0 }
0x138b   : > { %10331 = vmatprep.subr.msk.mxu0 %vm997_vm4, %v10314_v12 }
0x138c   : > { %10332 = vmatpush3.xpose.msk.msra.mxu0 %vm997_vm4, %v10314_v12  ;;  %v6178_v7 = vpop.f32.mrf.mxu0 }
0x138d   : > { %10333 = vmatprep.subr.msk.mxu0 %vm997_vm4, %v10313_v24 }
0x1390   : > { %10334 = vmatpush3.xpose.msk.msra.mxu0 %vm997_vm4, %v10313_v24 }
0x1391   : > { %10335 = vmatprep.subr.msk.mxu0 %vm997_vm4, %v6178_v7 }
0x1394   : > { %10336 = vmatpush3.xpose.msk.msra.mxu0 %vm997_vm4, %v6178_v7 }
0x1395   : > { %10337 = vmatprep.subr.msk.mxu0 %vm997_vm4, %v6175_v27 }
0x1398   : > { %10338 = vmatpush3.xpose.msk.msra.mxu0 %vm997_vm4, %v6175_v27 }
0x1399   : > { %10339 = vmatprep.subr.msk.mxu0 %vm997_vm4, %v10310_v11 }
0x139c   : > { %10340 = vmatpush3.xpose.msk.msra.mxu0 %vm997_vm4, %v10310_v11 }
0x139d   : > { %10341 = vmatprep.subr.msk.mxu0 %vm997_vm4, %v10309_v36 }
0x13a0   : > { %10342 = vmatpush3.xpose.msk.msra.mxu0 %vm997_vm4, %v10309_v36 }
0x13a1   : > { %10343 = vmatprep.subr.msk.mxu0 %vm997_vm4, %v6162_v9 }
0x13a4   : > { %10344 = vmatpush3.xpose.msk.msra.mxu0 %vm997_vm4, %v6162_v9 }
0x13a5   : > { %10345 = vmatprep.subr.msk.mxu0 %vm997_vm4, %v6159_v48 }
0x13a8   : > { %10346 = vmatpush3.xpose.msk.msra.mxu0 %vm997_vm4, %v6159_v48 }
0x13a9   : > { %10347 = vmatprep.subr.msk.mxu0 %vm997_vm4, %v10306_v16 }
0x13ac   : > { %10348 = vmatpush3.xpose.msk.msra.mxu0 %vm997_vm4, %v10306_v16 }
0x13ad   : > { %10349 = vmatprep.subr.msk.mxu0 %vm997_vm4, %v10305_v17 }
0x13b0   : > { %10350 = vmatpush3.xpose.msk.msra.mxu0 %vm997_vm4, %v10305_v17 }
0x13b1   : > { %10351 = vmatprep.subr.msk.mxu0 %vm997_vm4, %v6146_v14 }
0x13b4   : > { %10352 = vmatpush3.xpose.msk.msra.mxu0 %vm997_vm4, %v6146_v14 }
0x13b5   : > { %10353 = vmatprep.subr.msk.mxu0 %vm997_vm4, %v6143_v29 }
0x13b8   : > { %10354 = vmatpush3.xpose.msk.msra.mxu0 %vm997_vm4, %v6143_v29 }
0x13e9   : > { %v5735_v27 = vpop.xlane.xlu1 %5734 }
0x13ea   : > { %v5767_v12 = vsub.f32 %v13553_v53, %v5735_v27 }
0x13eb   : > { %v5732_v36 = vpop.xlane.xlu0 %5731 }
0x13ec   : > { %v5780_v48 = vmul.f32 1.442695, %v5767_v12  ;;  %v5766_v11 = vsub.f32 %v13557_v59, %v5732_v36 }
0x13ed   : > { %v5741_v16 = vpop.xlane.xlu1 %5740 }
0x13ee   : > { %v5778_v9 = vmul.f32 1.442695, %v5766_v11  ;;  %v5769_v24 = vsub.f32 %v13561_v63, %v5741_v16  ;;  %10990 = vpow2.f32 %v5780_v48 }
0x13ef   : > { %v5738_v17 = vpop.xlane.xlu0 %5737 }
0x13f0   : > { %10992 = vpow2.f32 %v5778_v9  ;;  %v5784_v7 = vmul.f32 1.442695, %v5769_v24  ;;  %v5768_v14 = vsub.f32 %v13565_v39, %v5738_v17 }
0x13f1   : > { %v5747_v10 = vpop.xlane.xlu1 %5746 }
0x13f2   : > { %v5782_v1 = vmul.f32 1.442695, %v5768_v14  ;;  %v5771_v29 = vsub.f32 %v13569_v5, %v5747_v10  ;;  %10994 = vpow2.f32 %v5784_v7 }
0x13f3   : > { %v5744_v53 = vpop.xlane.xlu0 %5743 }
0x13f4   : > { %10996 = vpow2.f32 %v5782_v1  ;;  %v5788_v27 = vmul.f32 1.442695, %v5771_v29  ;;  %v5770_v59 = vsub.f32 %v13573_v41, %v5744_v53 }
0x13f5   : > { %v5753_v12 = vpop.xlane.xlu1 %5752 }
0x13f6   : > { %v5786_v36 = vmul.f32 1.442695, %v5770_v59  ;;  %v5773_v63 = vsub.f32 %v13577_v21, %v5753_v12  ;;  %10998 = vpow2.f32 %v5788_v27 }
0x13f7   : > { %v5750_v48 = vpop.xlane.xlu0 %5749 }
0x13f8   : > { %11000 = vpow2.f32 %v5786_v36  ;;  %v5792_v11 = vmul.f32 1.442695, %v5773_v63  ;;  %v5772_v39 = vsub.f32 %v13581_v32, %v5750_v48  ;;  %v10709_v36 = vld [vmem:[%s14618_s3 + $0x48] sm:$0xff]  }
0x13f9   : > { %v5759_v16 = vpop.xlane.xlu1 %5758 }
0x13fa   : > { %v5790_v9 = vmul.f32 1.442695, %v5772_v39  ;;  %v5775_v10 = vsub.f32 %v13585_v51, %v5759_v16  ;;  %11002 = vpow2.f32 %v5792_v11  ;;  %v10710_v11 = vld [vmem:[#allocation6 + $0x50] ss:$0 sps:$4 sm:$0xff]  }
0x13fb   : > { %v5756_v5 = vpop.xlane.xlu0 %5755  ;;  %v13641_v1 = vpop.eup %10990 }
0x13fc   : > { %11004 = vpow2.f32 %v5790_v9  ;;  %v5796_v41 = vmul.f32 1.442695, %v5775_v10  ;;  %v5774_v24 = vsub.f32 %v13589_v0, %v5756_v5 }
0x13fd   : > { %v13644_v17 = vpop.eup %10992  ;;  %v5765_v21 = vpop.xlane.xlu1 %5764 }
0x13fe   : > { %v5794_v7 = vmul.f32 1.442695, %v5774_v24  ;;  %v5777_v14 = vsub.f32 %v13593_v45, %v5765_v21  ;;  %v5838_v32 = vpack.c.bf16 %v13641_v1, %v13644_v17  ;;  %11006 = vpow2.f32 %v5796_v41 }
0x13ff   : > { %v5762_v29 = vpop.xlane.xlu0 %5761  ;;  %v13649_v51 = vpop.eup %10994  ;;  %v6010_v45 = vsel %vm720_vm2, %v13604_v19, 0 }
0x1400   : > { %11008 = vpow2.f32 %v5794_v7  ;;  %v5800_v53 = vmul.f32 1.442695, %v5777_v14  ;;  %v5776_v27 = vsub.f32 %v13597_v37, %v5762_v29  ;;  %10271 = vmatprep.mubr.msk.bf16.mxu1 %vm1195_vm5, %v5838_v32  ;;  %v6204_v7 = vsel %vm720_vm2, %v10710_v11, 0  ;;  %v10711_v14 = vld [vmem:[#allocation6 + $0x48] sm:$0xff]  }
0x1401   : > { %v13653_v0 = vpop.eup %10996  ;;  %v10712_v32 = vld [vmem:[%s14619_s4 + $0x5c] ss:$0 sps:$4 sm:$0xff]  }
0x1402   : > { %v5839_v59 = vpack.c.bf16 %v13649_v51, %v13653_v0  ;;  %v5798_v12 = vmul.f32 1.442695, %v5776_v27  ;;  %11010 = vpow2.f32 %v5800_v53  ;;  %10583 = vmatprep.subr.msk.bf16.mxu0 %vm720_vm2, %v10712_v32  ;;  %v6861_v3 = vsel %vm720_vm2, %v10712_v32, 0 }
0x1403   : > { %v13662_v63 = vpop.eup %10998 }
0x1404   : > { %11012 = vpow2.f32 %v5798_v12  ;;  %10272 = vmatmul.mubr.msk.bf16.vlgmr.msra.gmra.mxu1 %vm1195_vm5, %v5839_v59 }
0x1405   : > { %v13665_v37 = vpop.eup %11000  ;;  %10284 = vmatpush3.bf16.msra.mxu1 %v6010_v45 }
0x1406   : > { %v5840_v48 = vpack.c.bf16 %v13662_v63, %v13665_v37  ;;  %10285 = vmatprep.subr.bf16.mxu1 %v10709_v36 }
0x1407   : > { %v13669_v39 = vpop.eup %11002 }
0x1408   : > { %10275 = vmatprep.mubr.msk.bf16.mxu1 %vm1195_vm5, %v5840_v48 }
0x1409   : > { %v13672_v19 = vpop.eup %11004  ;;  %10286 = vmatpush3.bf16.msra.mxu1 %v10709_v36 }
0x140a   : > { %v5841_v16 = vpack.c.bf16 %v13669_v39, %v13672_v19  ;;  %10580 = vmatprep.subr.msk.bf16.mxu1 %vm720_vm2, %v10710_v11 }
0x140b   : > { %v13677_v9 = vpop.eup %11006 }
0x140c   : > { %10276 = vmatmul.mubr.msk.bf16.gmra.mxu1 %vm1195_vm5, %v5841_v16 }
0x140d   : > { %v13680_v10 = vpop.eup %11008 }
0x140e   : > { %v5842_v5 = vpack.c.bf16 %v13677_v9, %v13680_v10 }
0x140f   : > { %v13684_v41 = vpop.eup %11010 }
0x1410   : > { %10279 = vmatprep.mubr.msk.bf16.mxu1 %vm1195_vm5, %v5842_v5 }
0x1411   : > { %v13687_v24 = vpop.eup %11012 }
0x1412   : > { %v5843_v21 = vpack.c.bf16 %v13684_v41, %v13687_v24 }
0x1414   : > { %10280 = vmatmul.mubr.msk.bf16.gmra.mxu1 %vm1195_vm5, %v5843_v21 }
0x1415   : > { %10287 = vmatprep.mubr.msk.bf16.mxu1 %vm701_vm3, %v13104_v18 }
0x141c   : > { %10288 = vmatmul.mubr.msk.bf16.vlgmr.msra.gmra.mxu1 %vm701_vm3, %v13122_v49 }
0x141d   : > { %10291 = vmatprep.mubr.msk.bf16.mxu1 %vm701_vm3, %v13142_v62  ;;  %10316 = vmatpush3.bf16.msra.mxu1 %v6204_v7 }
0x141e   : > { %10317 = vmatprep.subr.bf16.mxu1 %v10711_v14 }
0x1421   : > { %10318 = vmatpush3.bf16.msra.mxu1 %v10711_v14  ;;  %v8822_v14 = vld [vmem:[#allocation4 + $0x6] ss:$0 sm:$0xff] }
0x1424   : > { %10292 = vmatmul.mubr.msk.bf16.gmra.mxu1 %vm701_vm3, %v13160_v26 }
0x1425   : > { %10295 = vmatprep.mubr.msk.bf16.mxu1 %vm701_vm3, %v13177_v33 }
0x142c   : > { %10296 = vmatmul.mubr.msk.bf16.gmra.mxu1 %vm701_vm3, %v13192_v20 }
0x142d   : > { %10319 = vmatprep.mubr.msk.bf16.mxu1 %vm701_vm3, %v13104_v18 }
0x1434   : > { %10320 = vmatmul.mubr.msk.bf16.vlgmr.msra.gmra.mxu1 %vm701_vm3, %v13122_v49 }
0x1435   : > { %10323 = vmatprep.mubr.msk.bf16.mxu1 %vm701_vm3, %v13142_v62 }
0x143c   : > { %10324 = vmatmul.mubr.msk.bf16.gmra.mxu1 %vm701_vm3, %v13160_v26 }
0x143d   : > { %10327 = vmatprep.mubr.msk.bf16.mxu1 %vm701_vm3, %v13177_v33 }
0x1444   : > { %10328 = vmatmul.mubr.msk.bf16.gmra.mxu1 %vm701_vm3, %v13192_v20 }
0x14c4   : > { %v13721_v29 = vpop.f32.mrf.mxu1 }
0x14c6   : > { %v13723_v53 = vpop.f32.mrf.mxu1 }
0x14c8   : > { %v13725_v27 = vpop.f32.mrf.mxu1 }
0x14ca   : > { %v13727_v59 = vpop.f32.mrf.mxu1 }
0x14cc   : > { %v13729_v12 = vpop.f32.mrf.mxu1 }
0x14cd   : > { %14753 = vst [vmem:[#allocation19_spill] sm:$0xff] %v13729_v12  ;;  %v13826_v12 = vld [vmem:[%s14618_s3 + $0x5c] ss:$0 sps:$4 sm:$0xff]  }
0x14ce   : > { %v13731_v45 = vpop.f32.mrf.mxu1 }
0x14cf   : > { %14754 = vst [vmem:[#allocation44_spill] sm:$0xff] %v13731_v45 }
0x14d0   : > { %v13733_v36 = vpop.f32.mrf.mxu1 }
0x14d1   : > { %14755 = vst [vmem:[#allocation35_spill] sm:$0xff] %v13733_v36 }
0x14d2   : > { %v13735_v48 = vpop.f32.mrf.mxu1 }
0x14d3   : > { %14756 = vst [vmem:[#allocation43_spill] sm:$0xff] %v13735_v48 }
0x14d4   : > { %v13737_v11 = vpop.f32.mrf.mxu1 }
0x14d5   : > { %14757 = vst [vmem:[#allocation16_spill] sm:$0xff] %v13737_v11 }
0x14d6   : > { %v13739_v16 = vpop.f32.mrf.mxu1 }
0x14d7   : > { %14758 = vst [vmem:[#allocation51_spill] sm:$0xff] %v13739_v16 }
0x14d8   : > { %v13741_v5 = vpop.f32.mrf.mxu1 }
0x14d9   : > { %14759 = vst [vmem:[#allocation52_spill] sm:$0xff] %v13741_v5 }
0x14da   : > { %v13743_v21 = vpop.f32.mrf.mxu1 }
0x14db   : > { %14760 = vst [vmem:[#allocation18_spill] sm:$0xff] %v13743_v21 }
0x14dc   : > { %v10289_v7 = vpop.f32.mrf.mxu1 }
0x14dd   : > { %v6055_v54 = vadd.f32 %v10289_v7, %v8822_v14 }
0x14de   : > { %v6046_v46 = vpop.f32.mrf.mxu1 }
0x14df   : > { %v6047_v47 = vadd.f32 %v8822_v14, %v6046_v46 }
0x14e0   : > { %v10290_v35 = vpop.f32.mrf.mxu1 }
0x14e1   : > { %10355 = vmatprep.mubr.msk.f32.mxu0 %vm997_vm4, %v6047_v47  ;;  %v6058_v46 = vadd.f32 %v10290_v35, %v8822_v14 }
0x14e2   : > { %v6049_v38 = vpop.f32.mrf.mxu1 }
0x14e3   : > { %v6050_v15 = vadd.f32 %v8822_v14, %v6049_v38 }
0x14e4   : > { %v10293_v55 = vpop.f32.mrf.mxu1 }
0x14e5   : > { %10356 = vmatmul.mubr.msk.f32.vlgmr.msra.gmra.mxu0 %vm997_vm4, %v6050_v15  ;;  %v6071_v44 = vadd.f32 %v10293_v55, %v8822_v14 }
0x14e6   : > { %v6062_v5 = vpop.f32.mrf.mxu1  ;;  %10358 = vmatprep.mubr.msk.f32.mxu0 %vm997_vm4, %v6055_v54  ;;  %10414 = vmatpush3.bf16.msra.mxu0 %v6861_v3 }
0x14e7   : > { %v6063_v21 = vadd.f32 %v8822_v14, %v6062_v5  ;;  %10415 = vmatprep.subr.bf16.mxu0 %v10713_v43 }
0x14e8   : > { %v10294_v47 = vpop.f32.mrf.mxu1 }
0x14e9   : > { %10359 = vmatmul.mubr.msk.f32.gmra.mxu0 %vm997_vm4, %v6058_v46  ;;  %v6074_v54 = vadd.f32 %v10294_v47, %v8822_v14 }
0x14ea   : > { %v6065_v38 = vpop.f32.mrf.mxu1  ;;  %10361 = vmatprep.mubr.msk.f32.mxu0 %vm997_vm4, %v6063_v21  ;;  %10416 = vmatpush3.bf16.msra.mxu0 %v10713_v43 }
0x14eb   : > { %v6066_v32 = vadd.f32 %v8822_v14, %v6065_v38 }
0x14ec   : > { %v10297_v7 = vpop.f32.mrf.mxu1 }
0x14ed   : > { %10362 = vmatmul.mubr.msk.f32.gmra.mxu0 %vm997_vm4, %v6066_v32  ;;  %v6087_v16 = vadd.f32 %v10297_v7, %v8822_v14 }
0x14ee   : > { %v6078_v15 = vpop.f32.mrf.mxu1  ;;  %10364 = vmatprep.mubr.msk.f32.mxu0 %vm997_vm4, %v6071_v44 }
0x14ef   : > { %v6079_v3 = vadd.f32 %v8822_v14, %v6078_v15 }
0x14f0   : > { %v10298_v35 = vpop.f32.mrf.mxu1 }
0x14f1   : > { %10365 = vmatmul.mubr.msk.f32.gmra.mxu0 %vm997_vm4, %v6074_v54  ;;  %v6090_v43 = vadd.f32 %v10298_v35, %v8822_v14 }
0x14f2   : > { %v6081_v5 = vpop.f32.mrf.mxu1  ;;  %10367 = vmatprep.mubr.msk.f32.mxu0 %vm997_vm4, %v6079_v3 }
0x14f3   : > { %v6082_v46 = vadd.f32 %v8822_v14, %v6081_v5 }
0x14f4   : > { %v10321_v21 = vpop.f32.mrf.mxu1 }
0x14f5   : > { %10368 = vmatmul.mubr.msk.f32.gmra.mxu0 %vm997_vm4, %v6082_v46 }
0x14f6   : > { %v6240_v55 = vpop.f32.mrf.mxu1  ;;  %10370 = vmatprep.mubr.msk.f32.mxu0 %vm997_vm4, %v6087_v16 }
0x14f8   : > { %v10322_v38 = vpop.f32.mrf.mxu1 }
0x14f9   : > { %10371 = vmatmul.mubr.msk.f32.gmra.mxu0 %vm997_vm4, %v6090_v43  ;;  %v6599_v11 = vpack.c.bf16 %v10322_v38, %v10321_v21 }
0x14fa   : > { %v6243_v44 = vpop.f32.mrf.mxu1  ;;  %10417 = vmatprep.mubr.msk.bf16.mxu0 %vm701_vm3, %v13104_v18 }
0x14fc   : > { %v10325_v47 = vpop.f32.mrf.mxu1 }
0x14fd   : > { %10418 = vmatmul.mubr.msk.bf16.vlgmr.msra.gmra.mxu0 %vm701_vm3, %v13122_v49 }
0x14fe   : > { %v6256_v32 = vpop.f32.mrf.mxu1  ;;  %10421 = vmatprep.mubr.msk.bf16.mxu0 %vm701_vm3, %v13142_v62 }
0x1500   : > { %v10326_v7 = vpop.f32.mrf.mxu1 }
0x1501   : > { %v6601_v43 = vpack.c.bf16 %v10326_v7, %v10325_v47 }
0x1502   : > { %v6259_v15 = vpop.f32.mrf.mxu1 }
0x1503   : > { %v6600_v60 = vpack.c.bf16 %v6259_v15, %v6256_v32 }
0x1504   : > { %v10329_v54 = vpop.f32.mrf.mxu1 }
0x1505   : > { %10422 = vmatmul.mubr.msk.bf16.gmra.mxu0 %vm701_vm3, %v13160_v26 }
0x1506   : > { %v6272_v16 = vpop.f32.mrf.mxu1  ;;  %10425 = vmatprep.mubr.msk.bf16.mxu0 %vm701_vm3, %v13177_v33 }
0x1508   : > { %v10330_v14 = vpop.f32.mrf.mxu1 }
0x1509   : > { %v6603_v3 = vpack.c.bf16 %v10330_v14, %v10329_v54  ;;  %v6598_v54 = vpack.c.bf16 %v6243_v44, %v6240_v55 }
0x150a   : > { %v6275_v35 = vpop.f32.mrf.mxu1 }
0x150b   : > { %v6623_v5 = vsel %vm536_vm0, %v6603_v3, 0  ;;  %v6602_v46 = vpack.c.bf16 %v6275_v35, %v6272_v16  ;;  %10581 = vmatprep.subr.msk.bf16.mxu1 %vm536_vm0, %v6603_v3 }
0x150c   : > { %10374 = vmatpush3.bf16.msra.mxu1 %v6623_v5 }
0x150d   : > { %10375 = vmatprep.subr.bf16.mxu1 %v6602_v46  ;;  %10426 = vmatmul.mubr.msk.bf16.gmra.mxu0 %vm701_vm3, %v13192_v20 }
0x1510   : > { %10376 = vmatpush3.bf16.msra.mxu1 %v6602_v46 }
0x1511   : > { %10377 = vmatprep.subr.bf16.mxu1 %v6601_v43 }
0x1514   : > { %10378 = vmatpush3.bf16.msra.mxu1 %v6601_v43 }
0x1515   : > { %10379 = vmatprep.subr.bf16.mxu1 %v6600_v60 }
0x1518   : > { %10380 = vmatpush3.bf16.msra.mxu1 %v6600_v60 }
0x1519   : > { %10381 = vmatprep.subr.bf16.mxu1 %v6599_v11 }
0x151c   : > { %10382 = vmatpush3.bf16.msra.mxu1 %v6599_v11 }
0x151d   : > { %10383 = vmatprep.subr.bf16.mxu1 %v6598_v54 }
0x1520   : > { %10384 = vmatpush3.bf16.msra.mxu1 %v6598_v54 }
0x1521   : > { %10582 = vmatprep.subr.msk.bf16.mxu1 %vm720_vm2, %v13826_v12 }
0x15a5   : > { %v13775_v16 = vpop.f32.mrf.mxu0 }
0x15a6   : > { %v6487_v14 = vsel %vm1195_vm5, %v13775_v16, -inf }
0x15a7   : > { %6488 = vmax.xlane.f32.xlu1 %v6487_v14  ;;  %v13779_v3 = vpop.f32.mrf.mxu0 }
0x15a8   : > { %v6484_v47 = vsel %vm1195_vm5, %v13779_v3, -inf }
0x15a9   : > { %6485 = vmax.xlane.f32.xlu0 %v6484_v47  ;;  %v13783_v32 = vpop.f32.mrf.mxu0 }
0x15aa   : > { %v6493_v60 = vsel %vm1195_vm5, %v13783_v32, -inf }
0x15ab   : > { %6494 = vmax.xlane.f32.xlu1 %v6493_v60  ;;  %v13787_v11 = vpop.f32.mrf.mxu0 }
0x15ac   : > { %v6490_v21 = vsel %vm1195_vm5, %v13787_v11, -inf }
0x15ad   : > { %6491 = vmax.xlane.f32.xlu0 %v6490_v21  ;;  %v13791_v55 = vpop.f32.mrf.mxu0 }
0x15ae   : > { %v6499_v38 = vsel %vm1195_vm5, %v13791_v55, -inf }
0x15af   : > { %6500 = vmax.xlane.f32.xlu1 %v6499_v38  ;;  %v13795_v44 = vpop.f32.mrf.mxu0 }
0x15b0   : > { %v6496_v7 = vsel %vm1195_vm5, %v13795_v44, -inf }
0x15b1   : > { %6497 = vmax.xlane.f32.xlu0 %v6496_v7  ;;  %v13799_v15 = vpop.f32.mrf.mxu0 }
0x15b2   : > { %v6505_v35 = vsel %vm1195_vm5, %v13799_v15, -inf }
0x15b3   : > { %6506 = vmax.xlane.f32.xlu1 %v6505_v35  ;;  %v13803_v5 = vpop.f32.mrf.mxu0 }
0x15b4   : > { %v6502_v46 = vsel %vm1195_vm5, %v13803_v5, -inf }
0x15b5   : > { %6503 = vmax.xlane.f32.xlu0 %v6502_v46  ;;  %v13807_v43 = vpop.f32.mrf.mxu0 }
0x15b6   : > { %v6511_v54 = vsel %vm1195_vm5, %v13807_v43, -inf }
0x15b7   : > { %6512 = vmax.xlane.f32.xlu1 %v6511_v54  ;;  %v13811_v14 = vpop.f32.mrf.mxu0 }
0x15b8   : > { %v6508_v47 = vsel %vm1195_vm5, %v13811_v14, -inf }
0x15b9   : > { %6509 = vmax.xlane.f32.xlu0 %v6508_v47  ;;  %v13815_v60 = vpop.f32.mrf.mxu0 }
0x15ba   : > { %v6517_v21 = vsel %vm1229_vm6, %v13815_v60, -inf }
0x15bb   : > { %6518 = vmax.xlane.f32.xlu1 %v6517_v21  ;;  %v13819_v38 = vpop.f32.mrf.mxu0 }
0x15bc   : > { %v6514_v7 = vsel %vm1195_vm5, %v13819_v38, -inf }
0x15bd   : > { %v10419_v35 = vpop.f32.mrf.mxu0  ;;  %6515 = vmax.xlane.f32.xlu0 %v6514_v7 }
0x15bf   : > { %v6897_v46 = vpop.f32.mrf.mxu0 }
0x15c1   : > { %v10420_v54 = vpop.f32.mrf.mxu0 }
0x15c3   : > { %v6900_v28 = vpop.f32.mrf.mxu0 }
0x15c5   : > { %v10423_v40 = vpop.f32.mrf.mxu0 }
0x15c7   : > { %v6913_v36 = vpop.f32.mrf.mxu0 }
0x15c9   : > { %v10424_v45 = vpop.f32.mrf.mxu0 }
0x15cb   : > { %v6916_v47 = vpop.f32.mrf.mxu0 }
0x15cd   : > { %v10427_v21 = vpop.f32.mrf.mxu0 }
0x15cf   : > { %v6929_v48 = vpop.f32.mrf.mxu0 }
0x15d1   : > { %v10428_v6 = vpop.f32.mrf.mxu0 }
0x15d2   : > { %10445 = vmatprep.subr.msk.mxu0 %vm997_vm4, %v10428_v6 }
0x15d3   : > { %10446 = vmatpush3.xpose.msk.msra.mxu0 %vm997_vm4, %v10428_v6  ;;  %v6932_v7 = vpop.f32.mrf.mxu0 }
0x15d4   : > { %10447 = vmatprep.subr.msk.mxu0 %vm997_vm4, %v10427_v21 }
0x15d7   : > { %10448 = vmatpush3.xpose.msk.msra.mxu0 %vm997_vm4, %v10427_v21 }
0x15d8   : > { %10449 = vmatprep.subr.msk.mxu0 %vm997_vm4, %v6932_v7 }
0x15db   : > { %10450 = vmatpush3.xpose.msk.msra.mxu0 %vm997_vm4, %v6932_v7 }
0x15dc   : > { %10451 = vmatprep.subr.msk.mxu0 %vm997_vm4, %v6929_v48 }
0x15df   : > { %10452 = vmatpush3.xpose.msk.msra.mxu0 %vm997_vm4, %v6929_v48 }
0x15e0   : > { %10453 = vmatprep.subr.msk.mxu0 %vm997_vm4, %v10424_v45 }
0x15e3   : > { %10454 = vmatpush3.xpose.msk.msra.mxu0 %vm997_vm4, %v10424_v45 }
0x15e4   : > { %10455 = vmatprep.subr.msk.mxu0 %vm997_vm4, %v10423_v40 }
0x15e7   : > { %10456 = vmatpush3.xpose.msk.msra.mxu0 %vm997_vm4, %v10423_v40 }
0x15e8   : > { %10457 = vmatprep.subr.msk.mxu0 %vm997_vm4, %v6916_v47 }
0x15eb   : > { %10458 = vmatpush3.xpose.msk.msra.mxu0 %vm997_vm4, %v6916_v47 }
0x15ec   : > { %10459 = vmatprep.subr.msk.mxu0 %vm997_vm4, %v6913_v36 }
0x15ef   : > { %10460 = vmatpush3.xpose.msk.msra.mxu0 %vm997_vm4, %v6913_v36 }
0x15f0   : > { %10461 = vmatprep.subr.msk.mxu0 %vm997_vm4, %v10420_v54 }
0x15f3   : > { %10462 = vmatpush3.xpose.msk.msra.mxu0 %vm997_vm4, %v10420_v54 }
0x15f4   : > { %10463 = vmatprep.subr.msk.mxu0 %vm997_vm4, %v10419_v35 }
0x15f7   : > { %10464 = vmatpush3.xpose.msk.msra.mxu0 %vm997_vm4, %v10419_v35 }
0x15f8   : > { %10465 = vmatprep.subr.msk.mxu0 %vm997_vm4, %v6900_v28 }
0x15fb   : > { %10466 = vmatpush3.xpose.msk.msra.mxu0 %vm997_vm4, %v6900_v28 }
0x15fc   : > { %10467 = vmatprep.subr.msk.mxu0 %vm997_vm4, %v6897_v46 }
0x15ff   : > { %10468 = vmatpush3.xpose.msk.msra.mxu0 %vm997_vm4, %v6897_v46 }
0x1630   : > { %v6489_v40 = vpop.xlane.xlu1 %6488 }
0x1631   : > { %v6521_v6 = vsub.f32 %v13775_v16, %v6489_v40 }
0x1632   : > { %v6486_v45 = vpop.xlane.xlu0 %6485 }
0x1633   : > { %v6534_v36 = vmul.f32 1.442695, %v6521_v6  ;;  %v6520_v48 = vsub.f32 %v13779_v3, %v6486_v45 }
0x1634   : > { %v6495_v54 = vpop.xlane.xlu1 %6494 }
0x1635   : > { %v6532_v47 = vmul.f32 1.442695, %v6520_v48  ;;  %v6523_v21 = vsub.f32 %v13783_v32, %v6495_v54  ;;  %11014 = vpow2.f32 %v6534_v36 }
0x1636   : > { %v6492_v35 = vpop.xlane.xlu0 %6491 }
0x1637   : > { %11016 = vpow2.f32 %v6532_v47  ;;  %v6538_v7 = vmul.f32 1.442695, %v6523_v21  ;;  %v6522_v28 = vsub.f32 %v13787_v11, %v6492_v35 }
0x1638   : > { %v6501_v25 = vpop.xlane.xlu1 %6500 }
0x1639   : > { %v6536_v23 = vmul.f32 1.442695, %v6522_v28  ;;  %v6525_v46 = vsub.f32 %v13791_v55, %v6501_v25  ;;  %11018 = vpow2.f32 %v6538_v7 }
0x163a   : > { %v6498_v16 = vpop.xlane.xlu0 %6497 }
0x163b   : > { %11020 = vpow2.f32 %v6536_v23  ;;  %v6542_v40 = vmul.f32 1.442695, %v6525_v46  ;;  %v6524_v3 = vsub.f32 %v13795_v44, %v6498_v16 }
0x163c   : > { %v6507_v6 = vpop.xlane.xlu1 %6506 }
0x163d   : > { %v6540_v45 = vmul.f32 1.442695, %v6524_v3  ;;  %v6527_v32 = vsub.f32 %v13799_v15, %v6507_v6  ;;  %11022 = vpow2.f32 %v6542_v40 }
0x163e   : > { %v6504_v36 = vpop.xlane.xlu0 %6503 }
0x163f   : > { %11024 = vpow2.f32 %v6540_v45  ;;  %v6546_v48 = vmul.f32 1.442695, %v6527_v32  ;;  %v6526_v11 = vsub.f32 %v13803_v5, %v6504_v36  ;;  %v10715_v45 = vld [vmem:[%s14618_s3 + $0x54] sm:$0xff]  }
0x1640   : > { %v6513_v54 = vpop.xlane.xlu1 %6512 }
0x1641   : > { %v6544_v47 = vmul.f32 1.442695, %v6526_v11  ;;  %v6529_v25 = vsub.f32 %v13807_v43, %v6513_v54  ;;  %11026 = vpow2.f32 %v6546_v48  ;;  %v10716_v48 = vld [vmem:[#allocation6 + $0x5c] ss:$0 sps:$4 sm:$0xff]  }
0x1642   : > { %v6510_v55 = vpop.xlane.xlu0 %6509  ;;  %v13863_v23 = vpop.eup %11014 }
0x1643   : > { %11028 = vpow2.f32 %v6544_v47  ;;  %v6550_v44 = vmul.f32 1.442695, %v6529_v25  ;;  %v6528_v21 = vsub.f32 %v13811_v14, %v6510_v55 }
0x1644   : > { %v13866_v35 = vpop.eup %11016  ;;  %v6519_v15 = vpop.xlane.xlu1 %6518 }
0x1645   : > { %v6548_v7 = vmul.f32 1.442695, %v6528_v21  ;;  %v6531_v28 = vsub.f32 %v13815_v60, %v6519_v15  ;;  %v6592_v5 = vpack.c.bf16 %v13863_v23, %v13866_v35  ;;  %11030 = vpow2.f32 %v6550_v44 }
0x1646   : > { %v6516_v46 = vpop.xlane.xlu0 %6515  ;;  %v13871_v43 = vpop.eup %11018  ;;  %v6764_v60 = vsel %vm720_vm2, %v13826_v12, 0 }
0x1647   : > { %11032 = vpow2.f32 %v6548_v7  ;;  %v6554_v16 = vmul.f32 1.442695, %v6531_v28  ;;  %v6530_v40 = vsub.f32 %v13819_v38, %v6516_v46  ;;  %10385 = vmatprep.mubr.msk.bf16.mxu1 %vm1195_vm5, %v6592_v5  ;;  %v6958_v7 = vsel %vm720_vm2, %v10716_v48, 0  ;;  %v10717_v28 = vld [vmem:[#allocation6 + $0x54] sm:$0xff]  }
0x1648   : > { %v13875_v14 = vpop.eup %11020 }
0x1649   : > { %v6593_v3 = vpack.c.bf16 %v13871_v43, %v13875_v14  ;;  %v6552_v6 = vmul.f32 1.442695, %v6530_v40  ;;  %11034 = vpow2.f32 %v6554_v16 }
0x164a   : > { %v13884_v32 = vpop.eup %11022 }
0x164b   : > { %11036 = vpow2.f32 %v6552_v6  ;;  %10386 = vmatmul.mubr.msk.bf16.vlgmr.msra.gmra.mxu1 %vm1195_vm5, %v6593_v3 }
0x164c   : > { %v13887_v38 = vpop.eup %11024  ;;  %10398 = vmatpush3.bf16.msra.mxu1 %v6764_v60 }
0x164d   : > { %v6594_v36 = vpack.c.bf16 %v13884_v32, %v13887_v38  ;;  %10399 = vmatprep.subr.bf16.mxu1 %v10715_v45 }
0x164e   : > { %v13891_v11 = vpop.eup %11026 }
0x164f   : > { %10389 = vmatprep.mubr.msk.bf16.mxu1 %vm1195_vm5, %v6594_v36 }
0x1650   : > { %v13894_v12 = vpop.eup %11028  ;;  %10400 = vmatpush3.bf16.msra.mxu1 %v10715_v45  ;;  %v8883_v45 = vld [vmem:[#allocation4 + $0x7] ss:$0 sm:$0xff] }
0x1651   : > { %v6595_v54 = vpack.c.bf16 %v13891_v11, %v13894_v12  ;;  %10584 = vmatprep.subr.msk.bf16.mxu1 %vm720_vm2, %v10716_v48 }
0x1652   : > { %v13899_v47 = vpop.eup %11030 }
0x1653   : > { %10390 = vmatmul.mubr.msk.bf16.gmra.mxu1 %vm1195_vm5, %v6595_v54 }
0x1654   : > { %v13902_v25 = vpop.eup %11032 }
0x1655   : > { %v6596_v55 = vpack.c.bf16 %v13899_v47, %v13902_v25 }
0x1656   : > { %v13906_v44 = vpop.eup %11034 }
0x1657   : > { %10393 = vmatprep.mubr.msk.bf16.mxu1 %vm1195_vm5, %v6596_v55 }
0x1658   : > { %v13909_v21 = vpop.eup %11036 }
0x1659   : > { %v6597_v15 = vpack.c.bf16 %v13906_v44, %v13909_v21 }
0x165b   : > { %10394 = vmatmul.mubr.msk.bf16.gmra.mxu1 %vm1195_vm5, %v6597_v15 }
0x165c   : > { %10401 = vmatprep.mubr.msk.bf16.mxu1 %vm701_vm3, %v13104_v18 }
0x1663   : > { %10402 = vmatmul.mubr.msk.bf16.vlgmr.msra.gmra.mxu1 %vm701_vm3, %v13122_v49 }
0x1664   : > { %10405 = vmatprep.mubr.msk.bf16.mxu1 %vm701_vm3, %v13142_v62  ;;  %10430 = vmatpush3.bf16.msra.mxu1 %v6958_v7 }
0x1665   : > { %10431 = vmatprep.subr.bf16.mxu1 %v10717_v28 }
0x1668   : > { %10432 = vmatpush3.bf16.msra.mxu1 %v10717_v28 }
0x166b   : > { %10406 = vmatmul.mubr.msk.bf16.gmra.mxu1 %vm701_vm3, %v13160_v26 }
0x166c   : > { %10409 = vmatprep.mubr.msk.bf16.mxu1 %vm701_vm3, %v13177_v33 }
0x1673   : > { %10410 = vmatmul.mubr.msk.bf16.gmra.mxu1 %vm701_vm3, %v13192_v20 }
0x1674   : > { %10433 = vmatprep.mubr.msk.bf16.mxu1 %vm701_vm3, %v13104_v18 }
0x167b   : > { %10434 = vmatmul.mubr.msk.bf16.vlgmr.msra.gmra.mxu1 %vm701_vm3, %v13122_v49 }
0x167c   : > { %10437 = vmatprep.mubr.msk.bf16.mxu1 %vm701_vm3, %v13142_v62 }
0x1683   : > { %10438 = vmatmul.mubr.msk.bf16.gmra.mxu1 %vm701_vm3, %v13160_v26 }
0x1684   : > { %10441 = vmatprep.mubr.msk.bf16.mxu1 %vm701_vm3, %v13177_v33 }
0x168b   : > { %10442 = vmatmul.mubr.msk.bf16.gmra.mxu1 %vm701_vm3, %v13192_v20 }
0x170b   : > { %v13939_v5 = vpop.f32.mrf.mxu1 }
0x170d   : > { %v13941_v46 = vpop.f32.mrf.mxu1 }
0x170e   : > { %14761 = vst [vmem:[#allocation53_spill] sm:$0xff] %v13941_v46 }
0x170f   : > { %v13943_v18 = vpop.f32.mrf.mxu1 }
0x1710   : > { %14762 = vst [vmem:[#allocation54_spill] sm:$0xff] %v13943_v18 }
0x1711   : > { %v13945_v16 = vpop.f32.mrf.mxu1 }
0x1713   : > { %v13947_v49 = vpop.f32.mrf.mxu1 }
0x1714   : > { %14763 = vst [vmem:[#allocation21_spill] sm:$0xff] %v13947_v49 }
0x1715   : > { %v13949_v62 = vpop.f32.mrf.mxu1 }
0x1716   : > { %14764 = vst [vmem:[#allocation25_spill] sm:$0xff] %v13949_v62 }
0x1717   : > { %v13951_v40 = vpop.f32.mrf.mxu1 }
0x1718   : > { %14765 = vst [vmem:[#allocation20_spill] sm:$0xff] %v13951_v40 }
0x1719   : > { %v13953_v26 = vpop.f32.mrf.mxu1 }
0x171a   : > { %14766 = vst [vmem:[#allocation24_spill] sm:$0xff] %v13953_v26 }
0x171b   : > { %v13955_v33 = vpop.f32.mrf.mxu1 }
0x171c   : > { %14767 = vst [vmem:[#allocation23_spill] sm:$0xff] %v13955_v33 }
0x171d   : > { %v13957_v3 = vpop.f32.mrf.mxu1 }
0x171e   : > { %14768 = vst [vmem:[#allocation27_spill] sm:$0xff] %v13957_v3 }
0x171f   : > { %v13959_v20 = vpop.f32.mrf.mxu1 }
0x1720   : > { %14769 = vst [vmem:[#allocation22_spill] sm:$0xff] %v13959_v20 }
0x1721   : > { %v13961_v6 = vpop.f32.mrf.mxu1 }
0x1722   : > { %14770 = vst [vmem:[#allocation26_spill] sm:$0xff] %v13961_v6 }
0x1723   : > { %v10403_v60 = vpop.f32.mrf.mxu1 }
0x1724   : > { %v6809_v7 = vadd.f32 %v10403_v60, %v8883_v45 }
0x1725   : > { %v6800_v36 = vpop.f32.mrf.mxu1 }
0x1726   : > { %v6801_v48 = vadd.f32 %v8883_v45, %v6800_v36 }
0x1727   : > { %v10404_v54 = vpop.f32.mrf.mxu1 }
0x1728   : > { %10469 = vmatprep.mubr.msk.f32.mxu0 %vm997_vm4, %v6801_v48  ;;  %v6812_v3 = vadd.f32 %v10404_v54, %v8883_v45 }
0x1729   : > { %v6803_v55 = vpop.f32.mrf.mxu1 }
0x172a   : > { %v6804_v15 = vadd.f32 %v8883_v45, %v6803_v55 }
0x172b   : > { %v10407_v28 = vpop.f32.mrf.mxu1 }
0x172c   : > { %10470 = vmatmul.mubr.msk.f32.vlgmr.msra.gmra.mxu0 %vm997_vm4, %v6804_v15  ;;  %v6825_v62 = vadd.f32 %v10407_v28, %v8883_v45 }
0x172d   : > { %v6816_v33 = vpop.f32.mrf.mxu1  ;;  %10472 = vmatprep.mubr.msk.f32.mxu0 %vm997_vm4, %v6809_v7 }
0x172e   : > { %v6817_v20 = vadd.f32 %v8883_v45, %v6816_v33 }
0x172f   : > { %v10408_v40 = vpop.f32.mrf.mxu1 }
0x1730   : > { %10473 = vmatmul.mubr.msk.f32.gmra.mxu0 %vm997_vm4, %v6812_v3  ;;  %v6828_v55 = vadd.f32 %v10408_v40, %v8883_v45 }
0x1731   : > { %v6819_v6 = vpop.f32.mrf.mxu1  ;;  %10475 = vmatprep.mubr.msk.f32.mxu0 %vm997_vm4, %v6817_v20 }
0x1732   : > { %v6820_v36 = vadd.f32 %v8883_v45, %v6819_v6 }
0x1733   : > { %v10411_v48 = vpop.f32.mrf.mxu1 }
0x1734   : > { %10476 = vmatmul.mubr.msk.f32.gmra.mxu0 %vm997_vm4, %v6820_v36  ;;  %v6841_v54 = vadd.f32 %v10411_v48, %v8883_v45 }
0x1735   : > { %v6832_v60 = vpop.f32.mrf.mxu1  ;;  %10478 = vmatprep.mubr.msk.f32.mxu0 %vm997_vm4, %v6825_v62 }
0x1736   : > { %v6833_v15 = vadd.f32 %v8883_v45, %v6832_v60 }
0x1737   : > { %v10412_v49 = vpop.f32.mrf.mxu1 }
0x1738   : > { %10479 = vmatmul.mubr.msk.f32.gmra.mxu0 %vm997_vm4, %v6828_v55  ;;  %v6844_v6 = vadd.f32 %v10412_v49, %v8883_v45 }
0x1739   : > { %v6835_v33 = vpop.f32.mrf.mxu1  ;;  %10481 = vmatprep.mubr.msk.f32.mxu0 %vm997_vm4, %v6833_v15 }
0x173a   : > { %v6836_v3 = vadd.f32 %v8883_v45, %v6835_v33 }
0x173b   : > { %v10435_v7 = vpop.f32.mrf.mxu1 }
0x173c   : > { %10482 = vmatmul.mubr.msk.f32.gmra.mxu0 %vm997_vm4, %v6836_v3 }
0x173d   : > { %v6994_v20 = vpop.f32.mrf.mxu1  ;;  %10484 = vmatprep.mubr.msk.f32.mxu0 %vm997_vm4, %v6841_v54 }
0x173f   : > { %v10436_v28 = vpop.f32.mrf.mxu1 }
0x1740   : > { %10485 = vmatmul.mubr.msk.f32.gmra.mxu0 %vm997_vm4, %v6844_v6  ;;  %v7353_v54 = vpack.c.bf16 %v10436_v28, %v10435_v7 }
0x1741   : > { %v6997_v62 = vpop.f32.mrf.mxu1 }
0x1742   : > { %v7352_v6 = vpack.c.bf16 %v6997_v62, %v6994_v20 }
0x1743   : > { %v10439_v40 = vpop.f32.mrf.mxu1 }
0x1745   : > { %v7010_v36 = vpop.f32.mrf.mxu1 }
0x1747   : > { %v10440_v60 = vpop.f32.mrf.mxu1 }
0x1748   : > { %v7355_v49 = vpack.c.bf16 %v10440_v60, %v10439_v40 }
0x1749   : > { %v7013_v55 = vpop.f32.mrf.mxu1 }
0x174a   : > { %v7354_v45 = vpack.c.bf16 %v7013_v55, %v7010_v36 }
0x174b   : > { %v10443_v26 = vpop.f32.mrf.mxu1 }
0x174d   : > { %v7026_v18 = vpop.f32.mrf.mxu1 }
0x174f   : > { %v10444_v15 = vpop.f32.mrf.mxu1 }
0x1750   : > { %v7357_v33 = vpack.c.bf16 %v10444_v15, %v10443_v26 }
0x1751   : > { %v7029_v48 = vpop.f32.mrf.mxu1 }
0x1752   : > { %v7377_v46 = vsel %vm536_vm0, %v7357_v33, 0  ;;  %v7356_v3 = vpack.c.bf16 %v7029_v48, %v7026_v18  ;;  %10585 = vmatprep.subr.msk.bf16.mxu1 %vm536_vm0, %v7357_v33 }
0x1753   : > { %10488 = vmatpush3.bf16.msra.mxu1 %v7377_v46 }
0x1754   : > { %10489 = vmatprep.subr.bf16.mxu1 %v7356_v3 }
0x1757   : > { %10490 = vmatpush3.bf16.msra.mxu1 %v7356_v3 }
0x1758   : > { %10491 = vmatprep.subr.bf16.mxu1 %v7355_v49 }
0x175b   : > { %10492 = vmatpush3.bf16.msra.mxu1 %v7355_v49 }
0x175c   : > { %10493 = vmatprep.subr.bf16.mxu1 %v7354_v45 }
0x175f   : > { %10494 = vmatpush3.bf16.msra.mxu1 %v7354_v45 }
0x1760   : > { %10495 = vmatprep.subr.bf16.mxu1 %v7353_v54 }
0x1763   : > { %10496 = vmatpush3.bf16.msra.mxu1 %v7353_v54 }
0x1764   : > { %10497 = vmatprep.subr.bf16.mxu1 %v7352_v6 }
0x1767   : > { %10498 = vmatpush3.bf16.msra.mxu1 %v7352_v6 }
0x17ec   : > { %v13977_v26 = vpop.f32.mrf.mxu0 }
0x17ed   : > { %v7241_v18 = vsel %vm1195_vm5, %v13977_v26, -inf }
0x17ee   : > { %7242 = vmax.xlane.f32.xlu1 %v7241_v18  ;;  %v13981_v46 = vpop.f32.mrf.mxu0 }
0x17ef   : > { %v7238_v40 = vsel %vm1195_vm5, %v13981_v46, -inf }
0x17f0   : > { %7239 = vmax.xlane.f32.xlu0 %v7238_v40  ;;  %v13985_v36 = vpop.f32.mrf.mxu0 }
0x17f1   : > { %v7247_v7 = vsel %vm1195_vm5, %v13985_v36, -inf }
0x17f2   : > { %7248 = vmax.xlane.f32.xlu1 %v7247_v7  ;;  %v13989_v20 = vpop.f32.mrf.mxu0 }
0x17f3   : > { %v7244_v28 = vsel %vm1195_vm5, %v13989_v20, -inf }
0x17f4   : > { %7245 = vmax.xlane.f32.xlu0 %v7244_v28  ;;  %v13993_v62 = vpop.f32.mrf.mxu0 }
0x17f5   : > { %v7253_v60 = vsel %vm1195_vm5, %v13993_v62, -inf }
0x17f6   : > { %7254 = vmax.xlane.f32.xlu1 %v7253_v60  ;;  %v13997_v55 = vpop.f32.mrf.mxu0 }
0x17f7   : > { %v7250_v15 = vsel %vm1195_vm5, %v13997_v55, -inf }
0x17f8   : > { %7251 = vmax.xlane.f32.xlu0 %v7250_v15  ;;  %v14001_v33 = vpop.f32.mrf.mxu0  ;;  %v5051_v15 = vsel %vm1195_vm5, %v13419_v52, 0.0  ;;  %v5054_v52 = vsel %vm1195_vm5, %v13431_v8, 0.0  ;;  %v6565_v8 = vsel %vm1195_vm5, %v13871_v43, 0.0  ;;  %v5814_v43 = vsel %vm1195_vm5, %v13665_v37, 0.0 }
0x17f9   : > { %v7259_v48 = vsel %vm1195_vm5, %v14001_v33, -inf  ;;  %v6571_v37 = vsel %vm1195_vm5, %v13884_v32, 0.0  ;;  %v5072_v32 = vsel %vm1195_vm5, %v13458_v4, 0.0  ;;  %v5835_v4 = vsel %vm1229_vm6, %v13684_v41, 0.0 }
0x17fa   : > { %7260 = vmax.xlane.f32.xlu1 %v7259_v48  ;;  %v14005_v3 = vpop.f32.mrf.mxu0  ;;  %v5048_v48 = vsel %vm1195_vm5, %v13422_v57, 0.0  ;;  %v5811_v57 = vsel %vm1195_vm5, %v13649_v51, 0.0  ;;  %v6562_v51 = vsel %vm1195_vm5, %v13875_v14, 0.0  ;;  %v5069_v14 = vsel %vm1195_vm5, %v13447_v31, 0.0 }
0x17fb   : > { %v7256_v49 = vsel %vm1195_vm5, %v14005_v3, -inf  ;;  %v6568_v31 = vsel %vm1195_vm5, %v13887_v38, 0.0  ;;  %v5829_v38 = vsel %vm1195_vm5, %v13677_v9, 0.0  ;;  %v5832_v9 = vsel %vm1195_vm5, %v13687_v24, 0.0 }
0x17fc   : > { %7257 = vmax.xlane.f32.xlu0 %v7256_v49  ;;  %v14009_v45 = vpop.f32.mrf.mxu0  ;;  %v5805_v49 = vsel %vm1195_vm5, %v13641_v1, 0.0  ;;  %v5808_v1 = vsel %vm1195_vm5, %v13653_v0, 0.0  ;;  %v5063_v0 = vsel %vm1195_vm5, %v13440_v34, 0.0  ;;  %v5066_v34 = vsel %vm1195_vm5, %v13450_v50, 0.0 }
0x17fd   : > { %v7265_v54 = vsel %vm1195_vm5, %v14009_v45, -inf  ;;  %v6577_v50 = vsel %vm1195_vm5, %v13891_v11, 0.0  ;;  %v5826_v11 = vsel %vm1195_vm5, %v13680_v10, 0.0  ;;  %v6583_v10 = vsel %vm1195_vm5, %v13899_v47, 0.0 }
0x17fe   : > { %7266 = vmax.xlane.f32.xlu1 %v7265_v54  ;;  %v14013_v6 = vpop.f32.mrf.mxu0  ;;  %v5802_v54 = vsel %vm1195_vm5, %v13644_v17, 0.0  ;;  %v6559_v17 = vsel %vm1195_vm5, %v13863_v23, 0.0  ;;  %v5060_v23 = vsel %vm1195_vm5, %v13443_v58, 0.0  ;;  %v5823_v58 = vsel %vm1195_vm5, %v13669_v39, 0.0 }
0x17ff   : > { %v7262_v18 = vsel %vm1195_vm5, %v14013_v6, -inf  ;;  %v6574_v39 = vsel %vm1195_vm5, %v13894_v12, 0.0  ;;  %v5081_v12 = vsel %vm1229_vm6, %v13462_v13, 0.0  ;;  %v6580_v13 = vsel %vm1195_vm5, %v13902_v25, 0.0 }
0x1800   : > { %7263 = vmax.xlane.f32.xlu0 %v7262_v18  ;;  %v14017_v40 = vpop.f32.mrf.mxu0  ;;  %v5057_v18 = vsel %vm1195_vm5, %v13427_v22, 0.0  ;;  %v6556_v22 = vsel %vm1195_vm5, %v13866_v35, 0.0  ;;  %v5817_v35 = vsel %vm1195_vm5, %v13662_v63, 0.0  ;;  %v5820_v63 = vsel %vm1195_vm5, %v13672_v19, 0.0 }
0x1801   : > { %v7271_v7 = vsel %vm1229_vm6, %v14017_v40, -inf  ;;  %v5075_v19 = vsel %vm1195_vm5, %v13455_v61, 0.0  ;;  %v5078_v61 = vsel %vm1195_vm5, %v13465_v2, 0.0  ;;  %v6589_v2 = vsel %vm1229_vm6, %v13906_v44, 0.0 }
0x1802   : > { %7272 = vmax.xlane.f32.xlu1 %v7271_v7  ;;  %v14021_v28 = vpop.f32.mrf.mxu0  ;;  %v6586_v41 = vsel %vm1195_vm5, %v13909_v21, 0.0 }
0x1803   : > { %v7268_v60 = vsel %vm1195_vm5, %v14021_v28, -inf }
0x1804   : > { %7269 = vmax.xlane.f32.xlu0 %v7268_v60 }
0x1806   : > { %5052 = vadd.xlane.f32.xlu1 %v5051_v15 }
0x1808   : > { %5049 = vadd.xlane.f32.xlu0 %v5048_v48 }
0x180a   : > { %5806 = vadd.xlane.f32.xlu1 %v5805_v49 }
0x180c   : > { %5803 = vadd.xlane.f32.xlu0 %v5802_v54 }
0x180e   : > { %5058 = vadd.xlane.f32.xlu1 %v5057_v18 }
0x1810   : > { %5055 = vadd.xlane.f32.xlu0 %v5054_v52 }
0x1812   : > { %5812 = vadd.xlane.f32.xlu1 %v5811_v57 }
0x1814   : > { %5809 = vadd.xlane.f32.xlu0 %v5808_v1 }
0x1816   : > { %6560 = vadd.xlane.f32.xlu1 %v6559_v17 }
0x1818   : > { %6557 = vadd.xlane.f32.xlu0 %v6556_v22 }
0x181a   : > { %6566 = vadd.xlane.f32.xlu1 %v6565_v8 }
0x181c   : > { %6563 = vadd.xlane.f32.xlu0 %v6562_v51 }
0x181e   : > { %5064 = vadd.xlane.f32.xlu1 %v5063_v0 }
0x1820   : > { %5061 = vadd.xlane.f32.xlu0 %v5060_v23 }
0x1822   : > { %5818 = vadd.xlane.f32.xlu1 %v5817_v35 }
0x1824   : > { %5815 = vadd.xlane.f32.xlu0 %v5814_v43 }
0x1826   : > { %5070 = vadd.xlane.f32.xlu1 %v5069_v14 }
0x1828   : > { %5067 = vadd.xlane.f32.xlu0 %v5066_v34 }
0x182a   : > { %5824 = vadd.xlane.f32.xlu1 %v5823_v58 }
0x182c   : > { %5821 = vadd.xlane.f32.xlu0 %v5820_v63 }
0x182e   : > { %6572 = vadd.xlane.f32.xlu1 %v6571_v37 }
0x1830   : > { %6569 = vadd.xlane.f32.xlu0 %v6568_v31 }
0x1832   : > { %6578 = vadd.xlane.f32.xlu1 %v6577_v50 }
0x1834   : > { %6575 = vadd.xlane.f32.xlu0 %v6574_v39 }
0x1836   : > { %5076 = vadd.xlane.f32.xlu1 %v5075_v19 }
0x1838   : > { %5073 = vadd.xlane.f32.xlu0 %v5072_v32 }
0x183a   : > { %5830 = vadd.xlane.f32.xlu1 %v5829_v38 }
0x183c   : > { %5827 = vadd.xlane.f32.xlu0 %v5826_v11 }
0x183e   : > { %5082 = vadd.xlane.f32.xlu1 %v5081_v12 }
0x1840   : > { %5079 = vadd.xlane.f32.xlu0 %v5078_v61 }
0x1842   : > { %5836 = vadd.xlane.f32.xlu1 %v5835_v4 }
0x1844   : > { %5833 = vadd.xlane.f32.xlu0 %v5832_v9 }
0x1846   : > { %6584 = vadd.xlane.f32.xlu1 %v6583_v10 }
0x1848   : > { %6581 = vadd.xlane.f32.xlu0 %v6580_v13 }
0x184a   : > { %6590 = vadd.xlane.f32.xlu1 %v6589_v2 }
0x184c   : > { %6587 = vadd.xlane.f32.xlu0 %v6586_v41 }
0x1877   : > { %v7243_v7 = vpop.xlane.xlu1 %7242 }
0x1878   : > { %v7275_v24 = vsub.f32 %v13977_v26, %v7243_v7 }
0x1879   : > { %v7240_v60 = vpop.xlane.xlu0 %7239 }
0x187a   : > { %v7288_v15 = vmul.f32 1.442695, %v7275_v24  ;;  %v7274_v47 = vsub.f32 %v13981_v46, %v7240_v60 }
0x187b   : > { %v7249_v48 = vpop.xlane.xlu1 %7248 }
0x187c   : > { %11038 = vpow2.f32 %v7288_v15  ;;  %v7286_v49 = vmul.f32 1.442695, %v7274_v47  ;;  %v7277_v25 = vsub.f32 %v13985_v36, %v7249_v48 }
0x187d   : > { %v7246_v54 = vpop.xlane.xlu0 %7245 }
0x187e   : > { %11040 = vpow2.f32 %v7286_v49  ;;  %v7292_v44 = vmul.f32 1.442695, %v7277_v25  ;;  %v7276_v18 = vsub.f32 %v13989_v20, %v7246_v54 }
0x187f   : > { %v7255_v52 = vpop.xlane.xlu1 %7254 }
0x1880   : > { %11042 = vpow2.f32 %v7292_v44  ;;  %v7290_v21 = vmul.f32 1.442695, %v7276_v18  ;;  %v7279_v57 = vsub.f32 %v13993_v62, %v7255_v52 }
0x1881   : > { %v7252_v26 = vpop.xlane.xlu0 %7251 }
0x1882   : > { %11044 = vpow2.f32 %v7290_v21  ;;  %v7296_v1 = vmul.f32 1.442695, %v7279_v57  ;;  %v7278_v46 = vsub.f32 %v13997_v55, %v7252_v26 }
0x1883   : > { %v7261_v17 = vpop.xlane.xlu1 %7260 }
0x1884   : > { %11046 = vpow2.f32 %v7296_v1  ;;  %v7294_v22 = vmul.f32 1.442695, %v7278_v46  ;;  %v7281_v36 = vsub.f32 %v14001_v33, %v7261_v17 }
0x1885   : > { %v7258_v8 = vpop.xlane.xlu0 %7257 }
0x1886   : > { %11048 = vpow2.f32 %v7294_v22  ;;  %v7300_v51 = vmul.f32 1.442695, %v7281_v36  ;;  %v7280_v20 = vsub.f32 %v14005_v3, %v7258_v8 }
0x1887   : > { %v7267_v0 = vpop.xlane.xlu1 %7266 }
0x1888   : > { %11050 = vpow2.f32 %v7300_v51  ;;  %v7298_v23 = vmul.f32 1.442695, %v7280_v20  ;;  %v7283_v62 = vsub.f32 %v14009_v45, %v7267_v0 }
0x1889   : > { %v11039_v35 = vpop.eup %11038  ;;  %v7264_v43 = vpop.xlane.xlu0 %7263 }
0x188a   : > { %11052 = vpow2.f32 %v7298_v23  ;;  %v7304_v14 = vmul.f32 1.442695, %v7283_v62  ;;  %v7282_v55 = vsub.f32 %v14013_v6, %v7264_v43  ;;  %v7313_v34 = vsel %vm1195_vm5, %v11039_v35, 0.0 }
0x188b   : > { %v11041_v58 = vpop.eup %11040  ;;  %7314 = vadd.xlane.f32.xlu1 %v7313_v34  ;;  %v7273_v33 = vpop.xlane.xlu1 %7272 }
0x188c   : > { %11054 = vpow2.f32 %v7304_v14  ;;  %v7302_v63 = vmul.f32 1.442695, %v7282_v55  ;;  %v7285_v3 = vsub.f32 %v14017_v40, %v7273_v33  ;;  %v7310_v37 = vsel %vm1195_vm5, %v11041_v58, 0.0 }
0x188d   : > { %v11043_v31 = vpop.eup %11042  ;;  %v7270_v50 = vpop.xlane.xlu0 %7269  ;;  %7311 = vadd.xlane.f32.xlu0 %v7310_v37  ;;  %v7346_v45 = vpack.c.bf16 %v11039_v35, %v11041_v58 }
0x188e   : > { %11056 = vpow2.f32 %v7302_v63  ;;  %v7308_v39 = vmul.f32 1.442695, %v7285_v3  ;;  %v7284_v19 = vsub.f32 %v14021_v28, %v7270_v50  ;;  %v7319_v6 = vsel %vm1195_vm5, %v11043_v31, 0.0 }
0x188f   : > { %v11045_v32 = vpop.eup %11044  ;;  %10499 = vmatprep.mubr.msk.bf16.mxu1 %vm1195_vm5, %v7346_v45  ;;  %7320 = vadd.xlane.f32.xlu1 %v7319_v6  ;;  %v5053_v38 = vpop.xlane.xlu1 %5052 }
0x1890   : > { %v7347_v11 = vpack.c.bf16 %v11043_v31, %v11045_v32  ;;  %11058 = vpow2.f32 %v7308_v39  ;;  %v7306_v40 = vmul.f32 1.442695, %v7284_v19  ;;  %v7316_v12 = vsel %vm1195_vm5, %v11045_v32, 0.0 }
0x1891   : > { %v11047_v61 = vpop.eup %11046  ;;  %11060 = vrcp.f32 %v5053_v38  ;;  %v5050_v4 = vpop.xlane.xlu0 %5049  ;;  %7317 = vadd.xlane.f32.xlu0 %v7316_v12 }
0x1892   : > { %11062 = vpow2.f32 %v7306_v40  ;;  %10500 = vmatmul.mubr.msk.bf16.vlgmr.msra.gmra.mxu1 %vm1195_vm5, %v7347_v11  ;;  %v7325_v28 = vsel %vm1195_vm5, %v11047_v61, 0.0 }
0x1893   : > { %v11049_v9 = vpop.eup %11048  ;;  %11064 = vrcp.f32 %v5050_v4  ;;  %7326 = vadd.xlane.f32.xlu1 %v7325_v28  ;;  %v5807_v10 = vpop.xlane.xlu1 %5806 }
0x1894   : > { %11066 = vrcp.f32 %v5807_v10  ;;  %v7322_v13 = vsel %vm1195_vm5, %v11049_v9, 0.0  ;;  %v7348_v2 = vpack.c.bf16 %v11047_v61, %v11049_v9 }
0x1895   : > { %v11051_v41 = vpop.eup %11050  ;;  %v5804_v7 = vpop.xlane.xlu0 %5803  ;;  %7323 = vadd.xlane.f32.xlu0 %v7322_v13 }
0x1896   : > { %11068 = vrcp.f32 %v5804_v7  ;;  %10503 = vmatprep.mubr.msk.bf16.mxu1 %vm1195_vm5, %v7348_v2  ;;  %v7331_v24 = vsel %vm1195_vm5, %v11051_v41, 0.0 }
0x1897   : > { %v11053_v60 = vpop.eup %11052  ;;  %7332 = vadd.xlane.f32.xlu1 %v7331_v24  ;;  %v5059_v35 = vpop.xlane.xlu1 %5058 }
0x1898   : > { %v7328_v15 = vsel %vm1195_vm5, %v11053_v60, 0.0  ;;  %v7349_v47 = vpack.c.bf16 %v11051_v41, %v11053_v60  ;;  %11070 = vrcp.f32 %v5059_v35 }
0x1899   : > { %v11055_v48 = vpop.eup %11054  ;;  %7329 = vadd.xlane.f32.xlu0 %v7328_v15  ;;  %v5056_v62 = vpop.xlane.xlu0 %5055 }
0x189a   : > { %10504 = vmatmul.mubr.msk.bf16.gmra.mxu1 %vm1195_vm5, %v7349_v47  ;;  %v7337_v49 = vsel %vm1195_vm5, %v11055_v48, 0.0  ;;  %11072 = vrcp.f32 %v5056_v62 }
0x189b   : > { %v11057_v25 = vpop.eup %11056  ;;  %7338 = vadd.xlane.f32.xlu1 %v7337_v49  ;;  %v5813_v14 = vpop.xlane.xlu1 %5812 }
0x189c   : > { %v7334_v54 = vsel %vm1195_vm5, %v11057_v25, 0.0  ;;  %v7350_v44 = vpack.c.bf16 %v11055_v48, %v11057_v25  ;;  %11074 = vrcp.f32 %v5813_v14 }
0x189d   : > { %v11059_v18 = vpop.eup %11058  ;;  %7335 = vadd.xlane.f32.xlu0 %v7334_v54  ;;  %v5810_v43 = vpop.xlane.xlu0 %5809 }
0x189e   : > { %v11061_v52 = vpop.eup %11060  ;;  %10507 = vmatprep.mubr.msk.bf16.mxu1 %vm1195_vm5, %v7350_v44  ;;  %v7343_v21 = vsel %vm1229_vm6, %v11059_v18, 0.0  ;;  %11076 = vrcp.f32 %v5810_v43 }
0x189f   : > { %v11063_v57 = vpop.eup %11062  ;;  %7344 = vadd.xlane.f32.xlu1 %v7343_v21  ;;  %v5211_v22 = vmul.f32 %v11061_v52, %v13505_v30  ;;  %v6561_v34 = vpop.xlane.xlu1 %6560 }
0x18a0   : > { %v11065_v26 = vpop.eup %11064  ;;  %v7340_v1 = vsel %vm1195_vm5, %v11063_v57, 0.0  ;;  %v7351_v46 = vpack.c.bf16 %v11059_v18, %v11063_v57  ;;  %11078 = vrcp.f32 %v6561_v34 }
0x18a1   : > { %v11067_v17 = vpop.eup %11066  ;;  %7341 = vadd.xlane.f32.xlu0 %v7340_v1  ;;  %v5210_v51 = vmul.f32 %v11065_v26, %v13501_v42  ;;  %v6558_v55 = vpop.xlane.xlu0 %6557 }
0x18a2   : > { %10508 = vmatmul.mubr.msk.bf16.gmra.mxu1 %vm1195_vm5, %v7351_v46  ;;  %v5965_v36 = vmul.f32 %v11067_v17, %v13727_v59  ;;  %11080 = vrcp.f32 %v6558_v55 }
0x18a3   : > { %v11069_v8 = vpop.eup %11068  ;;  %v6567_v33 = vpop.xlane.xlu1 %6566 }
0x18a4   : > { %v5964_v20 = vmul.f32 %v11069_v8, %v13723_v53  ;;  %v14131_v0 = vadd.f32 %v5965_v36, %v5211_v22  ;;  %11082 = vrcp.f32 %v6567_v33 }
0x18a5   : > { %v6564_v58 = vpop.xlane.xlu0 %6563  ;;  %v11071_v7 = vpop.eup %11070 }
0x18a6   : > { %v14133_v23 = vadd.f32 %v5964_v20, %v5210_v51  ;;  %11084 = vrcp.f32 %v6564_v58 }
0x18a7   : > { %v5065_v63 = vpop.xlane.xlu1 %5064  ;;  %v11073_v24 = vpop.eup %11072 }
0x18a8   : > { %11086 = vrcp.f32 %v5065_v63  ;;  %v5212_v33 = vmul.f32 %v11073_v24, %v13499_v56  ;;  %v14771_v63 = vld [vmem:[#allocation53_spill] sm:$0xff] }
0x18a9   : > { %v5062_v30 = vpop.xlane.xlu0 %5061  ;;  %v11075_v15 = vpop.eup %11074 }
0x18aa   : > { %11088 = vrcp.f32 %v5062_v30  ;;  %v5967_v14 = vmul.f32 %v11075_v15, %v13725_v27  ;;  %v14780_v15 = vld [vmem:[#allocation41_spill] sm:$0xff] }
0x18ab   : > { %v5819_v3 = vpop.xlane.xlu1 %5818  ;;  %v11077_v47 = vpop.eup %11076 }
0x18ac   : > { %11090 = vrcp.f32 %v5819_v3  ;;  %v5966_v35 = vmul.f32 %v11077_v47, %v13721_v29 }
0x18ad   : > { %v5816_v59 = vpop.xlane.xlu0 %5815  ;;  %v11079_v48 = vpop.eup %11078 }
0x18ae   : > { %11092 = vrcp.f32 %v5816_v59  ;;  %v6719_v55 = vmul.f32 %v11079_v48, %v13945_v16  ;;  %v5978_v27 = vadd.f32 %v5966_v35, %v5212_v33  ;;  %v14781_v48 = vld [vmem:[#allocation24_spill] sm:$0xff] }
0x18af   : > { %v5071_v42 = vpop.xlane.xlu1 %5070  ;;  %v11081_v49 = vpop.eup %11080 }
0x18b0   : > { %11094 = vrcp.f32 %v5071_v42  ;;  %v6718_v59 = vmul.f32 %v11081_v49, %v14771_v63  ;;  %v14156_v56 = vadd.f32 %v6719_v55, %v14131_v0 }
0x18b1   : > { %v5068_v37 = vpop.xlane.xlu0 %5067  ;;  %v11083_v54 = vpop.eup %11082 }
0x18b2   : > { %11096 = vrcp.f32 %v5068_v37  ;;  %v14772_v37 = vld [vmem:[#allocation47_spill] sm:$0xff] }
0x18b3   : > { %v5825_v53 = vpop.xlane.xlu1 %5824  ;;  %v11085_v44 = vpop.eup %11084  ;;  %v5213_v29 = vmul.f32 %v11071_v7, %v14772_v37 }
0x18b4   : > { %11098 = vrcp.f32 %v5825_v53  ;;  %v6720_v30 = vmul.f32 %v11085_v44, %v13939_v5  ;;  %v14782_v44 = vld [vmem:[#allocation48_spill] sm:$0xff] }
0x18b5   : > { %v5822_v31 = vpop.xlane.xlu0 %5821  ;;  %v11087_v52 = vpop.eup %11086 }
0x18b6   : > { %11100 = vrcp.f32 %v5822_v31  ;;  %v5979_v31 = vadd.f32 %v5967_v14, %v5213_v29 }
0x18b7   : > { %v6573_v45 = vpop.xlane.xlu1 %6572  ;;  %v11089_v21 = vpop.eup %11088 }
0x18b8   : > { %11102 = vrcp.f32 %v6573_v45  ;;  %v6730_v45 = vadd.f32 %v6718_v59, %v14133_v23 }
0x18b9   : > { %v6570_v50 = vpop.xlane.xlu0 %6569  ;;  %v11091_v57 = vpop.eup %11090 }
0x18ba   : > { %11104 = vrcp.f32 %v6570_v50  ;;  %v6732_v50 = vadd.f32 %v6720_v30, %v5978_v27 }
0x18bb   : > { %v6579_v19 = vpop.xlane.xlu1 %6578  ;;  %v11093_v26 = vpop.eup %11092 }
0x18bc   : > { %11106 = vrcp.f32 %v6579_v19 }
0x18bd   : > { %v6576_v39 = vpop.xlane.xlu0 %6575  ;;  %v11095_v46 = vpop.eup %11094 }
0x18be   : > { %11108 = vrcp.f32 %v6576_v39  ;;  %v14773_v39 = vld [vmem:[#allocation54_spill] sm:$0xff]  ;;  %v5217_v47 = vmul.f32 %v11095_v46, %v14780_v15 }
0x18bf   : > { %v5077_v32 = vpop.xlane.xlu1 %5076  ;;  %v11097_v17 = vpop.eup %11096  ;;  %v6721_v19 = vmul.f32 %v11083_v54, %v14773_v39 }
0x18c0   : > { %11110 = vrcp.f32 %v5077_v32  ;;  %v14774_v32 = vld [vmem:[#allocation49_spill] sm:$0xff] }
0x18c1   : > { %v5074_v6 = vpop.xlane.xlu0 %5073  ;;  %v11099_v36 = vpop.eup %11098 }
0x18c2   : > { %11112 = vrcp.f32 %v5074_v6 }
0x18c3   : > { %v5831_v11 = vpop.xlane.xlu1 %5830  ;;  %v11101_v8 = vpop.eup %11100 }
0x18c4   : > { %11114 = vrcp.f32 %v5831_v11  ;;  %v14775_v11 = vld [vmem:[#allocation34_spill] sm:$0xff] }
0x18c5   : > { %v5828_v38 = vpop.xlane.xlu0 %5827  ;;  %v11103_v51 = vpop.eup %11102 }
0x18c6   : > { %11116 = vrcp.f32 %v5828_v38  ;;  %v5214_v38 = vmul.f32 %v11089_v21, %v14774_v32  ;;  %v6723_v49 = vmul.f32 %v11103_v51, %v14781_v48  ;;  %v14784_v21 = vld [vmem:[#allocation25_spill] sm:$0xff]  ;;  %v6733_v51 = vadd.f32 %v6721_v19, %v5979_v31  ;;  %v14791_v48 = vld [vmem:[#allocation42_spill] sm:$0xff] }
0x18c7   : > { %v5083_v12 = vpop.xlane.xlu1 %5082  ;;  %v11105_v20 = vpop.eup %11104 }
0x18c8   : > { %11118 = vrcp.f32 %v5083_v12  ;;  %v14776_v12 = vld [vmem:[#allocation43_spill] sm:$0xff] }
0x18c9   : > { %v5080_v40 = vpop.xlane.xlu0 %5079  ;;  %v11107_v43 = vpop.eup %11106 }
0x18cb   : > { %v5837_v4 = vpop.xlane.xlu1 %5836  ;;  %v11109_v34 = vpop.eup %11108 }
0x18cd   : > { %v5834_v61 = vpop.xlane.xlu0 %5833  ;;  %v14147_v3 = vpop.eup %11110 }
0x18cf   : > { %v6585_v9 = vpop.xlane.xlu1 %6584  ;;  %v14150_v42 = vpop.eup %11112 }
0x18d1   : > { %v14135_v28 = vpop.xlane.xlu0 %6581  ;;  %v14153_v16 = vpop.eup %11114 }
0x18d3   : > { %v14139_v13 = vpop.xlane.xlu1 %6590  ;;  %v11117_v5 = vpop.eup %11116 }
0x18d5   : > { %v14137_v10 = vpop.xlane.xlu0 %6587  ;;  %v14161_v6 = vpop.eup %11118 }
0x1914   : > { %v7315_v41 = vpop.xlane.xlu1 %7314 }
0x1916   : > { %v7312_v2 = vpop.xlane.xlu0 %7311 }
0x1918   : > { %v7321_v25 = vpop.xlane.xlu1 %7320 }
0x191a   : > { %v7318_v60 = vpop.xlane.xlu0 %7317 }
0x191b   : > { %11120 = vrcp.f32 %v7318_v60 }
0x191c   : > { %v7327_v1 = vpop.xlane.xlu1 %7326  ;;  %11122 = vrcp.f32 %v5080_v40  ;;  %v5215_v40 = vmul.f32 %v11087_v52, %v14775_v11 }
0x191d   : > { %11124 = vrcp.f32 %v7312_v2  ;;  %v14778_v2 = vld [vmem:[#allocation44_spill] sm:$0xff] }
0x191e   : > { %v7324_v18 = vpop.xlane.xlu0 %7323  ;;  %11126 = vrcp.f32 %v5837_v4  ;;  %v5968_v23 = vmul.f32 %v11093_v26, %v14778_v2 }
0x191f   : > { %11128 = vrcp.f32 %v7321_v25 }
0x1920   : > { %11130 = vrcp.f32 %v5834_v61  ;;  %v7333_v62 = vpop.xlane.xlu1 %7332  ;;  %v5969_v61 = vmul.f32 %v11091_v57, %v14776_v12  ;;  %v6722_v57 = vmul.f32 %v11105_v20, %v14784_v21  ;;  %v5980_v30 = vadd.f32 %v5968_v23, %v5214_v38  ;;  %v14787_v12 = vld [vmem:[#allocation36_spill] sm:$0xff] }
0x1921   : > { %11132 = vrcp.f32 %v7315_v41  ;;  %v14779_v41 = vld [vmem:[#allocation35_spill] sm:$0xff] }
0x1922   : > { %v7330_v22 = vpop.xlane.xlu0 %7329  ;;  %11134 = vrcp.f32 %v6585_v9  ;;  %v14777_v9 = vld [vmem:[#allocation19_spill] sm:$0xff]  ;;  %v5971_v7 = vmul.f32 %v11099_v36, %v14779_v41  ;;  %v5981_v35 = vadd.f32 %v5969_v61, %v5215_v40  ;;  %v5218_v61 = vmul.f32 %v14150_v42, %v14787_v12  ;;  %v14790_v41 = vld [vmem:[#allocation45_spill] sm:$0xff] }
0x1923   : > { %11136 = vrcp.f32 %v7330_v22  ;;  %v14785_v22 = vld [vmem:[#allocation20_spill] sm:$0xff]  ;;  %v14176_v36 = vld [vmem:[#allocation10 + $0x6] ss:$0 sm:$0xff] }
0x1924   : > { %11138 = vrcp.f32 %v14137_v10  ;;  %v7339_v53 = vpop.xlane.xlu1 %7338  ;;  %v5970_v10 = vmul.f32 %v11101_v8, %v14777_v9  ;;  %v6725_v8 = vmul.f32 %v11107_v43, %v14785_v22  ;;  %v14178_v59 = vadd.f32 %v6723_v49, %v5981_v35  ;;  %v14792_v49 = vld [vmem:[#allocation46_spill] sm:$0xff] }
0x1925   : > { %11140 = vrcp.f32 %v7324_v18  ;;  %v5216_v18 = vmul.f32 %v11097_v17, %v14782_v44  ;;  %v5983_v17 = vadd.f32 %v5971_v7, %v5217_v47 }
0x1926   : > { %v7336_v58 = vpop.xlane.xlu0 %7335  ;;  %11142 = vrcp.f32 %v14135_v28 }
0x1927   : > { %11144 = vrcp.f32 %v7333_v62  ;;  %v5982_v33 = vadd.f32 %v5970_v10, %v5216_v18  ;;  %v6737_v39 = vadd.f32 %v6725_v8, %v5983_v17  ;;  %v14795_v8 = vld [vmem:[#allocation52_spill] sm:$0xff] }
0x1928   : > { %v11121_v0 = vpop.eup %11120  ;;  %11146 = vrcp.f32 %v14139_v13  ;;  %v14783_v13 = vld [vmem:[#allocation21_spill] sm:$0xff]  ;;  %v7345_v14 = vpop.xlane.xlu1 %7344 }
0x1929   : > { %v11123_v24 = vpop.eup %11122  ;;  %11148 = vrcp.f32 %v7327_v1  ;;  %v6724_v52 = vmul.f32 %v11109_v34, %v14783_v13 }
0x192a   : > { %v7342_v4 = vpop.xlane.xlu0 %7341  ;;  %v11125_v25 = vpop.eup %11124  ;;  %v5220_v42 = vmul.f32 %v11123_v24, %v14791_v48  ;;  %v14794_v24 = vld [vmem:[#allocation17_spill] sm:$0xff] }
0x192b   : > { %v11127_v26 = vpop.eup %11126  ;;  %11150 = vrcp.f32 %v7342_v4  ;;  %v6736_v27 = vadd.f32 %v6724_v52, %v5982_v33  ;;  %v5221_v22 = vmul.f32 %v14161_v6, %v14794_v24  ;;  %v14799_v6 = vld [vmem:[#allocation30_spill] sm:$0xff] }
0x192c   : > { %v11129_v46 = vpop.eup %11128  ;;  %11152 = vrcp.f32 %v7336_v58  ;;  %v14786_v58 = vld [vmem:[#allocation16_spill] sm:$0xff]  ;;  %v14805_v24 = vld [vmem:[#allocation38_spill] sm:$0xff] }
0x192d   : > { %v11131_v63 = vpop.eup %11130  ;;  %11154 = vrcp.f32 %v7345_v14 }
0x192e   : > { %v11133_v43 = vpop.eup %11132  ;;  %11156 = vrcp.f32 %v7339_v53 }
0x192f   : > { %v11135_v32 = vpop.eup %11134 }
0x1930   : > { %v11137_v11 = vpop.eup %11136 }
0x1931   : > { %v11139_v10 = vpop.eup %11138 }
0x1952   : > { %v10501_v28 = vpop.f32.mrf.mxu1 }
0x1953   : > { %v7474_v60 = vmul.f32 %v11121_v0, %v10501_v28  ;;  %v14788_v0 = vld [vmem:[#allocation51_spill] sm:$0xff]  ;;  %v14789_v28 = vld [vmem:[#allocation33_spill] sm:$0xff] }
0x1954   : > { %v7413_v54 = vpop.f32.mrf.mxu1  ;;  %v5972_v4 = vmul.f32 %v11117_v5, %v14788_v0  ;;  %v14188_v9 = vmul.f32 %v14147_v3, %v14789_v28  ;;  %v14802_v0 = vld [vmem:[#allocation32_spill] sm:$0xff] }
0x1955   : > { %v7486_v1 = vadd.f32 %v7474_v60, %v6732_v50  ;;  %v7472_v62 = vmul.f32 %v11125_v25, %v7413_v54  ;;  %v6734_v50 = vadd.f32 %v6722_v57, %v5980_v30  ;;  %v11141_v60 = vpop.eup %11140  ;;  %v14793_v25 = vld [vmem:[#allocation18_spill] sm:$0xff] }
0x1956   : > { %v10502_v55 = vpop.f32.mrf.mxu1  ;;  %v5973_v3 = vmul.f32 %v14153_v16, %v14793_v25  ;;  %v11143_v54 = vpop.eup %11142  ;;  %v5984_v57 = vadd.f32 %v5972_v4, %v5218_v61 }
0x1957   : > { %v7484_v34 = vadd.f32 %v7472_v62, %v6730_v45  ;;  %v7475_v20 = vmul.f32 %v11129_v46, %v10502_v55  ;;  %v7504_v37 = vadd.f32 %v14176_v36, %v7486_v1  ;;  %v5974_v45 = vmul.f32 %v11131_v63, %v14786_v58  ;;  %v11145_v13 = vpop.eup %11144  ;;  %v14796_v46 = vld [vmem:[#allocation28_spill] sm:$0xff] }
0x1958   : > { %v7416_v29 = vpop.f32.mrf.mxu1  ;;  %v5975_v1 = vmul.f32 %v11127_v26, %v14795_v8  ;;  %v11147_v62 = vpop.eup %11146 }
0x1959   : > { %v7502_v31 = vadd.f32 %v14176_v36, %v7484_v34  ;;  %v7487_v19 = vadd.f32 %v7475_v20, %v6733_v51  ;;  %v7473_v38 = vmul.f32 %v11133_v43, %v7416_v29  ;;  %v14197_v5 = vadd.f32 %v7504_v37, %v14792_v49  ;;  %v14797_v51 = vld [vmem:[#allocation23_spill] sm:$0xff]  ;;  %v11149_v33 = vpop.eup %11148 }
0x195a   : > { %v10505_v40 = vpop.f32.mrf.mxu1  ;;  %v5986_v21 = vadd.f32 %v5974_v45, %v5220_v42  ;;  %v6728_v55 = vmul.f32 %v11139_v10, %v14797_v51  ;;  %v14798_v34 = vld [vmem:[#allocation27_spill] sm:$0xff]  ;;  %v5985_v49 = vadd.f32 %v5973_v3, %v14188_v9 }
0x195b   : > { %v7485_v2 = vadd.f32 %v7473_v38, %v14156_v56  ;;  %v7478_v23 = vmul.f32 %v11137_v11, %v10505_v40  ;;  %v14192_v7 = vadd.f32 %v7502_v31, %v14790_v41  ;;  %v7505_v15 = vadd.f32 %v14176_v36, %v7487_v19  ;;  %v14800_v38 = vld [vmem:[#allocation22_spill] sm:$0xff]  ;;  %v14803_v41 = vld [vmem:[#allocation37_spill] sm:$0xff] }
0x195c   : > { %v7429_v47 = vpop.f32.mrf.mxu1  ;;  %v7532_v63 = vsel %vm701_vm3, %v14197_v5, 0.0  ;;  %v6726_v20 = vmul.f32 %v11143_v54, %v14798_v34  ;;  %v5987_v19 = vadd.f32 %v5975_v1, %v5221_v22  ;;  %v6729_v11 = vmul.f32 %v11147_v62, %v14800_v38  ;;  %v14801_v40 = vld [vmem:[#allocation26_spill] sm:$0xff] }
0x195d   : > { %v7503_v53 = vadd.f32 %v14176_v36, %v7485_v2  ;;  %v7490_v56 = vadd.f32 %v7478_v23, %v6736_v27  ;;  %v7476_v44 = vmul.f32 %v11141_v60, %v7429_v47  ;;  %v7526_v18 = vsel %vm701_vm3, %v14192_v7, 0.0 }
0x195e   : > { %v10506_v52 = vpop.f32.mrf.mxu1  ;;  %7527 = vadd.xlane.f32.xlu0 %v7526_v18  ;;  %v14216_v43 = vadd.f32 %v7505_v15, %v14799_v6  ;;  %v6727_v58 = vmul.f32 %v11135_v32, %v14801_v40  ;;  %v6740_v12 = vadd.f32 %v6728_v55, %v5986_v21  ;;  %v6738_v10 = vadd.f32 %v6726_v20, %v5984_v57 }
0x195f   : > { %v7488_v16 = vadd.f32 %v7476_v44, %v6734_v50  ;;  %v7479_v35 = vmul.f32 %v11145_v13, %v10506_v52  ;;  %v14208_v14 = vadd.f32 %v7503_v53, %v14796_v46  ;;  %v7508_v30 = vadd.f32 %v14176_v36, %v7490_v56  ;;  %v11151_v50 = vpop.eup %11150  ;;  %v14804_v56 = vld [vmem:[#allocation40_spill] sm:$0xff] }
0x1960   : > { %v7432_v17 = vpop.f32.mrf.mxu1  ;;  %v7535_v23 = vsel %vm701_vm3, %v14216_v43, 0.0  ;;  %v6741_v54 = vadd.f32 %v6729_v11, %v5987_v19  ;;  %v6739_v52 = vadd.f32 %v6727_v58, %v5985_v49 }
0x1961   : > { %v7506_v26 = vadd.f32 %v14176_v36, %v7488_v16  ;;  %v7491_v37 = vadd.f32 %v7479_v35, %v6737_v39  ;;  %v7477_v29 = vmul.f32 %v11149_v33, %v7432_v17  ;;  %v7529_v27 = vsel %vm701_vm3, %v14208_v14, 0.0  ;;  %v11153_v39 = vpop.eup %11152  ;;  %v14806_v16 = vld [vmem:[#allocation39_spill] sm:$0xff] }
0x1962   : > { %7530 = vadd.xlane.f32.xlu1 %v7529_v27  ;;  %v10509_v31 = vpop.f32.mrf.mxu1  ;;  %7533 = vadd.xlane.f32.xlu0 %v7532_v63  ;;  %v14231_v60 = vadd.f32 %v7508_v30, %v14803_v41  ;;  %v11155_v48 = vpop.eup %11154  ;;  %v14807_v30 = vld [vmem:[#allocation50_spill] sm:$0xff]  ;;  %v14808_v63 = vld [vmem:[#allocation31_spill] sm:$0xff] }
0x1963   : > { %v7489_v45 = vadd.f32 %v7477_v29, %v14178_v59  ;;  %v7482_v61 = vmul.f32 %v11151_v50, %v10509_v31  ;;  %v14225_v4 = vadd.f32 %v7506_v26, %v14802_v0  ;;  %v7509_v28 = vadd.f32 %v14176_v36, %v7491_v37  ;;  %v11157_v18 = vpop.eup %11156  ;;  %v14809_v26 = vld [vmem:[#allocation29_spill] sm:$0xff] }
0x1964   : > { %v7445_v2 = vpop.f32.mrf.mxu1  ;;  %v7544_v57 = vsel %vm701_vm3, %v14231_v60, 0.0 }
0x1965   : > { %v7507_v32 = vadd.f32 %v14176_v36, %v7489_v45  ;;  %v7494_v15 = vadd.f32 %v7482_v61, %v6740_v12  ;;  %v7480_v59 = vmul.f32 %v11153_v39, %v7445_v2  ;;  %v7538_v47 = vsel %vm701_vm3, %v14225_v4, 0.0 }
0x1966   : > { %7536 = vadd.xlane.f32.xlu1 %v7535_v23  ;;  %v10510_v42 = vpop.f32.mrf.mxu1  ;;  %7539 = vadd.xlane.f32.xlu0 %v7538_v47  ;;  %v14242_v22 = vadd.f32 %v7509_v28, %v14805_v24 }
0x1967   : > { %v7492_v25 = vadd.f32 %v7480_v59, %v6738_v10  ;;  %v7483_v53 = vmul.f32 %v11155_v48, %v10510_v42  ;;  %v7519_v44 = vadd.f32 %v7507_v32, %v14804_v56  ;;  %v7512_v13 = vadd.f32 %v14176_v36, %v7494_v15 }
0x1968   : > { %v7448_v21 = vpop.f32.mrf.mxu1  ;;  %v7547_v46 = vsel %vm701_vm3, %v14242_v22, 0.0 }
0x1969   : > { %v7510_v8 = vadd.f32 %v14176_v36, %v7492_v25  ;;  %v7495_v1 = vadd.f32 %v7483_v53, %v6741_v54  ;;  %v7481_v9 = vmul.f32 %v11157_v18, %v7448_v21  ;;  %v7541_v3 = vsel %vm701_vm3, %v7519_v44, 0.0 }
0x196a   : > { %7542 = vadd.xlane.f32.xlu1 %v7541_v3  ;;  %7545 = vadd.xlane.f32.xlu0 %v7544_v57  ;;  %v14253_v17 = vadd.f32 %v7512_v13, %v14807_v30 }
0x196b   : > { %v7493_v62 = vadd.f32 %v7481_v9, %v6739_v52  ;;  %v7522_v35 = vadd.f32 %v7510_v8, %v14806_v16  ;;  %v7513_v51 = vadd.f32 %v14176_v36, %v7495_v1 }
0x196c   : > { %v7556_v6 = vsel %vm701_vm3, %v14253_v17, 0.0 }
0x196d   : > { %v7511_v55 = vadd.f32 %v14176_v36, %v7493_v62  ;;  %v7550_v33 = vsel %vm701_vm3, %v7522_v35, 0.0  ;;  %v14260_v37 = vadd.f32 %v7513_v51, %v14809_v26 }
0x196e   : > { %7548 = vadd.xlane.f32.xlu1 %v7547_v46  ;;  %7551 = vadd.xlane.f32.xlu0 %v7550_v33 }
0x196f   : > { %v7523_v34 = vadd.f32 %v7511_v55, %v14808_v63  ;;  %v7559_v36 = vsel %vm3780_vm7, %v14260_v37, 0.0 }
0x1971   : > { %v7553_v20 = vsel %vm701_vm3, %v7523_v34, 0.0 }
0x1972   : > { %7554 = vadd.xlane.f32.xlu1 %v7553_v20  ;;  %7557 = vadd.xlane.f32.xlu0 %v7556_v6  ;;  %v10718_v6 = vld [vmem:[#allocation7 + $0x14] ss:$0 sps:$4 sm:$0xff]  }
0x1973   : > { %10586 = vmatprep.subr.msk.bf16.mxu1 %vm720_vm2, %v10718_v6  ;;  %v7764_v26 = vsel %vm720_vm2, %v10718_v6, 0 }
0x1974   : > { %10512 = vmatpush3.bf16.msra.mxu1 %v7764_v26 }
0x1976   : > { %7560 = vadd.xlane.f32.xlu1 %v7559_v36  ;;  %v10720_v36 = vld [vmem:[%s14624_s9 + $0x58] sm:$0xff]  }
0x1977   : > { %10527 = vmatprep.subr.bf16.mxu0 %v10720_v36 }
0x1978   : > { %10528 = vmatpush3.bf16.msra.mxu0 %v10720_v36 }
0x19e7   : > { %v7528_v29 = vpop.xlane.xlu0 %7527 }
0x19e8   : > { %v7562_v27 = vmul.f32 0.041666668, %v7528_v29  ;;  %v10721_v29 = vld [vmem:[%s14624_s9 + $0x50] sm:$0xff]  }
0x19e9   : > { %10529 = vmatprep.subr.bf16.mxu0 %v10721_v29 }
0x19ea   : > { %v14265_v50 = vsub.f32 %v14192_v7, %v7562_v27  ;;  %v10722_v27 = vld [vmem:[%s14624_s9 + $0x48] sm:$0xff]   ;;  %10530 = vmatpush3.bf16.msra.mxu0 %v10721_v29 }
0x19eb   : > { %v7531_v31 = vpop.xlane.xlu1 %7530  ;;  %v7534_v19 = vpop.xlane.xlu0 %7533  ;;  %10531 = vmatprep.subr.bf16.mxu0 %v10722_v27 }
0x19ec   : > { %v7563_v38 = vmul.f32 0.041666668, %v7531_v31  ;;  %v7564_v11 = vmul.f32 0.041666668, %v7534_v19  ;;  %v7586_v40 = vmul.f32 %v14265_v50, %v14265_v50 }
0x19ee   : > { %v14270_v58 = vsub.f32 %v14208_v14, %v7563_v38  ;;  %v14273_v45 = vsub.f32 %v14197_v5, %v7564_v11  ;;  %v7598_v12 = vsel %vm701_vm3, %v7586_v40, 0.0  ;;  %10532 = vmatpush3.bf16.msra.mxu0 %v10722_v27 }
0x19ef   : > { %v7537_v61 = vpop.xlane.xlu1 %7536  ;;  %7599 = vadd.xlane.f32.xlu0 %v7598_v12  ;;  %v7540_v0 = vpop.xlane.xlu0 %7539 }
0x19f0   : > { %v7565_v7 = vmul.f32 0.041666668, %v7537_v61  ;;  %v7566_v39 = vmul.f32 0.041666668, %v7540_v0  ;;  %v7587_v28 = vmul.f32 %v14270_v58, %v14270_v58  ;;  %v7588_v10 = vmul.f32 %v14273_v45, %v14273_v45 }
0x19f2   : > { %v14281_v2 = vsub.f32 %v14216_v43, %v7565_v7  ;;  %v14284_v14 = vsub.f32 %v14225_v4, %v7566_v39  ;;  %v7601_v5 = vsel %vm701_vm3, %v7587_v28, 0.0  ;;  %v7604_v23 = vsel %vm701_vm3, %v7588_v10, 0.0 }
0x19f3   : > { %v7543_v41 = vpop.xlane.xlu1 %7542  ;;  %7602 = vadd.xlane.f32.xlu1 %v7601_v5  ;;  %7605 = vadd.xlane.f32.xlu0 %v7604_v23  ;;  %v7546_v32 = vpop.xlane.xlu0 %7545 }
0x19f4   : > { %v7567_v15 = vmul.f32 0.041666668, %v7543_v41  ;;  %v7568_v59 = vmul.f32 0.041666668, %v7546_v32  ;;  %v7589_v47 = vmul.f32 %v14281_v2, %v14281_v2  ;;  %v7590_v43 = vmul.f32 %v14284_v14, %v14284_v14 }
0x19f6   : > { %v14292_v48 = vsub.f32 %v7519_v44, %v7567_v15  ;;  %v14295_v4 = vsub.f32 %v14231_v60, %v7568_v59  ;;  %v7607_v42 = vsel %vm701_vm3, %v7589_v47, 0.0  ;;  %v7610_v49 = vsel %vm701_vm3, %v7590_v43, 0.0 }
0x19f7   : > { %v7549_v25 = vpop.xlane.xlu1 %7548  ;;  %7608 = vadd.xlane.f32.xlu1 %v7607_v42  ;;  %7611 = vadd.xlane.f32.xlu0 %v7610_v49  ;;  %v7552_v54 = vpop.xlane.xlu0 %7551 }
0x19f8   : > { %v7569_v53 = vmul.f32 0.041666668, %v7549_v25  ;;  %v7570_v56 = vmul.f32 0.041666668, %v7552_v54  ;;  %v7591_v18 = vmul.f32 %v14292_v48, %v14292_v48  ;;  %v7592_v44 = vmul.f32 %v14295_v4, %v14295_v4 }
0x19fa   : > { %v14304_v13 = vsub.f32 %v14242_v22, %v7569_v53  ;;  %v14306_v60 = vsub.f32 %v7522_v35, %v7570_v56  ;;  %v7613_v52 = vsel %vm701_vm3, %v7591_v18, 0.0  ;;  %v7616_v21 = vsel %vm701_vm3, %v7592_v44, 0.0  ;;  %v14344_v18 = vld [vmem:[#allocation10 + $0x7] ss:$0 sm:$0xff] }
0x19fb   : > { %7614 = vadd.xlane.f32.xlu1 %v7613_v52  ;;  %v7555_v57 = vpop.xlane.xlu1 %7554  ;;  %7617 = vadd.xlane.f32.xlu0 %v7616_v21  ;;  %v7558_v24 = vpop.xlane.xlu0 %7557 }
0x19fc   : > { %v7571_v8 = vmul.f32 0.041666668, %v7555_v57  ;;  %v7572_v1 = vmul.f32 0.041666668, %v7558_v24  ;;  %v7593_v9 = vmul.f32 %v14304_v13, %v14304_v13  ;;  %v7594_v3 = vmul.f32 %v14306_v60, %v14306_v60 }
0x19fe   : > { %v14314_v22 = vsub.f32 %v7523_v34, %v7571_v8  ;;  %v14317_v62 = vsub.f32 %v14253_v17, %v7572_v1  ;;  %v7619_v16 = vsel %vm701_vm3, %v7593_v9, 0.0  ;;  %v7622_v35 = vsel %vm701_vm3, %v7594_v3, 0.0 }
0x19ff   : > { %7620 = vadd.xlane.f32.xlu1 %v7619_v16  ;;  %v7561_v46 = vpop.xlane.xlu1 %7560  ;;  %7623 = vadd.xlane.f32.xlu0 %v7622_v35  ;;  %v8943_v35 = vld [vmem:[#allocation10 + $0x8] ss:$0 sm:$0xff] }
0x1a00   : > { %v7573_v51 = vmul.f32 0.041666668, %v7561_v46  ;;  %v7595_v55 = vmul.f32 %v14314_v22, %v14314_v22  ;;  %v7596_v33 = vmul.f32 %v14317_v62, %v14317_v62 }
0x1a02   : > { %v14326_v30 = vsub.f32 %v14260_v37, %v7573_v51  ;;  %v7625_v17 = vsel %vm701_vm3, %v7595_v55, 0.0  ;;  %v7628_v63 = vsel %vm701_vm3, %v7596_v33, 0.0  ;;  %v10719_v37 = vld [vmem:[#allocation7 + $0xc] sm:$0xff]  }
0x1a03   : > { %7626 = vadd.xlane.f32.xlu1 %v7625_v17  ;;  %7629 = vadd.xlane.f32.xlu0 %v7628_v63 }
0x1a04   : > { %v7597_v34 = vmul.f32 %v14326_v30, %v14326_v30  ;;  %10513 = vmatprep.subr.bf16.mxu1 %v10719_v37 }
0x1a05   : > { %10514 = vmatpush3.bf16.msra.mxu1 %v10719_v37 }
0x1a06   : > { %v7631_v20 = vsel %vm3780_vm7, %v7597_v34, 0.0 }
0x1a07   : > { %7632 = vadd.xlane.f32.xlu1 %v7631_v20 }
0x1a78   : > { %v7600_v31 = vpop.xlane.xlu0 %7599 }
0x1a79   : > { %v7634_v19 = vmul.f32 0.041666668, %v7600_v31 }
0x1a7b   : > { %v7646_v38 = vadd.f32 1e-05, %v7634_v19 }
0x1a7c   : > { %v7603_v11 = vpop.xlane.xlu1 %7602  ;;  %v7606_v40 = vpop.xlane.xlu0 %7605 }
0x1a7d   : > { %11158 = vrsqrt.f32 %v7646_v38  ;;  %v7635_v12 = vmul.f32 0.041666668, %v7603_v11  ;;  %v7636_v61 = vmul.f32 0.041666668, %v7606_v40 }
0x1a7f   : > { %v7647_v0 = vadd.f32 1e-05, %v7635_v12  ;;  %v7648_v7 = vadd.f32 1e-05, %v7636_v61 }
0x1a80   : > { %v7609_v39 = vpop.xlane.xlu1 %7608  ;;  %v7612_v28 = vpop.xlane.xlu0 %7611 }
0x1a81   : > { %11160 = vrsqrt.f32 %v7647_v0  ;;  %v7637_v10 = vmul.f32 0.041666668, %v7609_v39  ;;  %v7638_v5 = vmul.f32 0.041666668, %v7612_v28 }
0x1a82   : > { %11162 = vrsqrt.f32 %v7648_v7 }
0x1a83   : > { %v7649_v23 = vadd.f32 1e-05, %v7637_v10  ;;  %v7650_v41 = vadd.f32 1e-05, %v7638_v5 }
0x1a84   : > { %v7615_v32 = vpop.xlane.xlu1 %7614  ;;  %v7618_v15 = vpop.xlane.xlu0 %7617 }
0x1a85   : > { %11164 = vrsqrt.f32 %v7649_v23  ;;  %v7639_v59 = vmul.f32 0.041666668, %v7615_v32  ;;  %v7640_v47 = vmul.f32 0.041666668, %v7618_v15 }
0x1a86   : > { %11166 = vrsqrt.f32 %v7650_v41 }
0x1a87   : > { %v7651_v43 = vadd.f32 1e-05, %v7639_v59  ;;  %v7652_v42 = vadd.f32 1e-05, %v7640_v47 }
0x1a88   : > { %v7621_v49 = vpop.xlane.xlu1 %7620  ;;  %v7624_v25 = vpop.xlane.xlu0 %7623 }
0x1a89   : > { %11168 = vrsqrt.f32 %v7651_v43  ;;  %v7641_v54 = vmul.f32 0.041666668, %v7621_v49  ;;  %v7642_v53 = vmul.f32 0.041666668, %v7624_v25 }
0x1a8a   : > { %v11159_v56 = vpop.eup %11158  ;;  %11170 = vrsqrt.f32 %v7652_v42 }
0x1a8b   : > { %v7653_v44 = vadd.f32 1e-05, %v7641_v54  ;;  %v7654_v52 = vadd.f32 1e-05, %v7642_v53  ;;  %v7670_v21 = vmul.f32 %v11159_v56, %v14265_v50 }
0x1a8c   : > { %v7627_v57 = vpop.xlane.xlu1 %7626  ;;  %v7630_v24 = vpop.xlane.xlu0 %7629 }
0x1a8d   : > { %11172 = vrsqrt.f32 %v7653_v44  ;;  %v7643_v8 = vmul.f32 0.041666668, %v7627_v57  ;;  %v7644_v1 = vmul.f32 0.041666668, %v7630_v24  ;;  %v7688_v3 = vmul.f32 %v14344_v18, %v7670_v21  ;;  %v10723_v21 = vld [vmem:[%s14624_s9 + $0x40] sm:$0xff]   ;;  %v10725_v57 = vld [vmem:[%s14624_s9 + $0x30] sm:$0xff]  }
0x1a8e   : > { %v11161_v9 = vpop.eup %11160  ;;  %11174 = vrsqrt.f32 %v7654_v52  ;;  %10533 = vmatprep.subr.bf16.mxu0 %v10723_v21 }
0x1a8f   : > { %v11163_v16 = vpop.eup %11162  ;;  %v7655_v46 = vadd.f32 1e-05, %v7643_v8  ;;  %v7656_v51 = vadd.f32 1e-05, %v7644_v1  ;;  %v7671_v55 = vmul.f32 %v11161_v9, %v14270_v58  ;;  %v14351_v20 = vadd.f32 %v8943_v35, %v7688_v3  ;;  %10534 = vmatpush3.bf16.msra.mxu0 %v10723_v21  ;;  %v8944_v1 = vld [vmem:[#allocation9 + $0x1] ss:$0 sm:$0xff] }
0x1a90   : > { %v7672_v33 = vmul.f32 %v11163_v16, %v14273_v45  ;;  %v7633_v17 = vpop.xlane.xlu1 %7632 }
0x1a91   : > { %11176 = vrsqrt.f32 %v7655_v46  ;;  %v7645_v50 = vmul.f32 0.041666668, %v7633_v17  ;;  %v7689_v63 = vmul.f32 %v14344_v18, %v7671_v55 }
0x1a92   : > { %v11165_v34 = vpop.eup %11164  ;;  %11178 = vrsqrt.f32 %v7656_v51  ;;  %v7690_v26 = vmul.f32 %v14344_v18, %v7672_v33 }
0x1a93   : > { %v11167_v6 = vpop.eup %11166  ;;  %v7673_v37 = vmul.f32 %v11165_v34, %v14281_v2  ;;  %v7657_v36 = vadd.f32 1e-05, %v7645_v50  ;;  %v14355_v29 = vadd.f32 %v8943_v35, %v7689_v63 }
0x1a94   : > { %v7674_v58 = vmul.f32 %v11167_v6, %v14284_v14  ;;  %v14361_v38 = vadd.f32 %v8943_v35, %v7690_v26 }
0x1a95   : > { %v7691_v45 = vmul.f32 %v14344_v18, %v7673_v37  ;;  %11180 = vrsqrt.f32 %v7657_v36  ;;  %v7718_v27 = vpack.c.bf16 %v14355_v29, %v14351_v20 }
0x1a96   : > { %v11169_v31 = vpop.eup %11168  ;;  %v7692_v40 = vmul.f32 %v14344_v18, %v7674_v58 }
0x1a97   : > { %v11171_v19 = vpop.eup %11170  ;;  %v14363_v11 = vadd.f32 %v8943_v35, %v7691_v45  ;;  %10515 = vmatprep.mubr.msk.bf16.mxu1 %vm701_vm3, %v7718_v27  ;;  %v7675_v2 = vmul.f32 %v11169_v31, %v14292_v48 }
0x1a98   : > { %v7676_v14 = vmul.f32 %v11171_v19, %v14295_v4  ;;  %v14374_v28 = vadd.f32 %v8943_v35, %v7692_v40 }
0x1a99   : > { %v7719_v12 = vpack.c.bf16 %v14363_v11, %v14361_v38  ;;  %v7693_v61 = vmul.f32 %v14344_v18, %v7675_v2 }
0x1a9a   : > { %v11173_v0 = vpop.eup %11172  ;;  %v7694_v48 = vmul.f32 %v14344_v18, %v7676_v14 }
0x1a9b   : > { %v11175_v7 = vpop.eup %11174  ;;  %v7677_v39 = vmul.f32 %v11173_v0, %v14304_v13  ;;  %10516 = vmatmul.mubr.msk.bf16.vlgmr.msra.gmra.mxu1 %vm701_vm3, %v7719_v12  ;;  %v14376_v10 = vadd.f32 %v8943_v35, %v7693_v61 }
0x1a9c   : > { %v7678_v5 = vmul.f32 %v11175_v7, %v14306_v60  ;;  %v14384_v13 = vadd.f32 %v8943_v35, %v7694_v48 }
0x1a9d   : > { %v7720_v4 = vpack.c.bf16 %v14376_v10, %v14374_v28  ;;  %v7695_v23 = vmul.f32 %v14344_v18, %v7677_v39 }
0x1a9e   : > { %v11177_v41 = vpop.eup %11176  ;;  %v7696_v47 = vmul.f32 %v14344_v18, %v7678_v5 }
0x1a9f   : > { %v11179_v32 = vpop.eup %11178  ;;  %10519 = vmatprep.mubr.msk.bf16.mxu1 %vm701_vm3, %v7720_v4  ;;  %v14386_v15 = vadd.f32 %v8943_v35, %v7695_v23  ;;  %v7679_v59 = vmul.f32 %v11177_v41, %v14314_v22 }
0x1aa0   : > { %v7680_v43 = vmul.f32 %v11179_v32, %v14317_v62  ;;  %v14396_v54 = vadd.f32 %v8943_v35, %v7696_v47 }
0x1aa1   : > { %v7721_v60 = vpack.c.bf16 %v14386_v15, %v14384_v13  ;;  %v7697_v42 = vmul.f32 %v14344_v18, %v7679_v59 }
0x1aa2   : > { %v11181_v49 = vpop.eup %11180  ;;  %v7698_v22 = vmul.f32 %v14344_v18, %v7680_v43 }
0x1aa3   : > { %v7681_v25 = vmul.f32 %v11181_v49, %v14326_v30  ;;  %10520 = vmatmul.mubr.msk.bf16.gmra.mxu1 %vm701_vm3, %v7721_v60  ;;  %v14398_v53 = vadd.f32 %v8943_v35, %v7697_v42  ;;  %v8965_v49 = vld [vmem:[#allocation10 + $0x9] ss:$0 sm:$0xff] }
0x1aa4   : > { %v14405_v44 = vadd.f32 %v8943_v35, %v7698_v22 }
0x1aa5   : > { %v7722_v56 = vpack.c.bf16 %v14398_v53, %v14396_v54  ;;  %v7699_v62 = vmul.f32 %v14344_v18, %v7681_v25  ;;  %v10724_v18 = vld [vmem:[%s14624_s9 + $0x38] sm:$0xff]  }
0x1aa6   : > { %10535 = vmatprep.subr.bf16.mxu0 %v10724_v18 }
0x1aa7   : > { %10523 = vmatprep.mubr.msk.bf16.mxu1 %vm701_vm3, %v7722_v56  ;;  %v14407_v52 = vadd.f32 %v8943_v35, %v7699_v62  ;;  %10536 = vmatpush3.bf16.msra.mxu0 %v10724_v18 }
0x1aa8   : > { %10537 = vmatprep.subr.bf16.mxu0 %v10725_v57 }
0x1aa9   : > { %v7723_v30 = vpack.c.bf16 %v14407_v52, %v14405_v44 }
0x1aab   : > { %10524 = vmatmul.mubr.msk.bf16.gmra.mxu1 %vm701_vm3, %v7723_v30  ;;  %10538 = vmatpush3.bf16.msra.mxu0 %v10725_v57 }
0x1b5b   : > { %v10517_v24 = vpop.f32.mrf.mxu1 }
0x1b5c   : > { %v7809_v35 = vadd.f32 %v10517_v24, %v8944_v1 }
0x1b5d   : > { %v7800_v8 = vpop.f32.mrf.mxu1 }
0x1b5e   : > { %v7801_v3 = vadd.f32 %v8944_v1, %v7800_v8  ;;  %v7849_v63 = vmax.f32 %v7809_v35, 0.0 }
0x1b5f   : > { %v10518_v9 = vpop.f32.mrf.mxu1 }
0x1b60   : > { %v7812_v16 = vadd.f32 %v10518_v9, %v8944_v1  ;;  %v7847_v17 = vmax.f32 %v7801_v3, 0.0 }
0x1b61   : > { %v7803_v46 = vpop.f32.mrf.mxu1 }
0x1b62   : > { %v7804_v51 = vadd.f32 %v8944_v1, %v7803_v46  ;;  %v7850_v55 = vmax.f32 %v7812_v16, 0.0 }
0x1b63   : > { %v10521_v33 = vpop.f32.mrf.mxu1 }
0x1b64   : > { %v7848_v50 = vmax.f32 %v7804_v51, 0.0  ;;  %v7860_v26 = vpack.c.bf16 %v7850_v55, %v7849_v63  ;;  %v7825_v45 = vadd.f32 %v10521_v33, %v8944_v1 }
0x1b65   : > { %v7816_v34 = vpop.f32.mrf.mxu1 }
0x1b66   : > { %v7859_v6 = vpack.c.bf16 %v7848_v50, %v7847_v17  ;;  %v7817_v36 = vadd.f32 %v8944_v1, %v7816_v34  ;;  %v7853_v12 = vmax.f32 %v7825_v45, 0.0 }
0x1b67   : > { %v10522_v37 = vpop.f32.mrf.mxu1 }
0x1b68   : > { %v7828_v58 = vadd.f32 %v10522_v37, %v8944_v1  ;;  %10539 = vmatprep.mubr.msk.bf16.mxu0 %vm4140_vm8, %v7859_v6  ;;  %v7851_v40 = vmax.f32 %v7817_v36, 0.0 }
0x1b69   : > { %v7819_v27 = vpop.f32.mrf.mxu1  ;;  %10540 = vmatmul.mubr.msk.bf16.vlgmr.msra.gmra.mxu0 %vm4140_vm8, %v7860_v26 }
0x1b6a   : > { %v7820_v31 = vadd.f32 %v8944_v1, %v7819_v27  ;;  %v7854_v19 = vmax.f32 %v7828_v58, 0.0 }
0x1b6b   : > { %v10525_v2 = vpop.f32.mrf.mxu1 }
0x1b6c   : > { %v7852_v14 = vmax.f32 %v7820_v31, 0.0  ;;  %v7862_v7 = vpack.c.bf16 %v7854_v19, %v7853_v12  ;;  %v7841_v4 = vadd.f32 %v10525_v2, %v8944_v1 }
0x1b6d   : > { %v7832_v61 = vpop.f32.mrf.mxu1 }
0x1b6e   : > { %v7861_v0 = vpack.c.bf16 %v7852_v14, %v7851_v40  ;;  %v7833_v48 = vadd.f32 %v8944_v1, %v7832_v61  ;;  %v7857_v43 = vmax.f32 %v7841_v4, 0.0 }
0x1b6f   : > { %v10526_v39 = vpop.f32.mrf.mxu1 }
0x1b70   : > { %v7844_v5 = vadd.f32 %v10526_v39, %v8944_v1  ;;  %10543 = vmatprep.mubr.msk.bf16.mxu0 %vm4140_vm8, %v7861_v0  ;;  %v7855_v59 = vmax.f32 %v7833_v48, 0.0 }
0x1b71   : > { %v7835_v23 = vpop.f32.mrf.mxu1  ;;  %10544 = vmatmul.mubr.msk.bf16.gmra.mxu0 %vm4140_vm8, %v7862_v7 }
0x1b72   : > { %v7836_v41 = vadd.f32 %v8944_v1, %v7835_v23  ;;  %v7858_v32 = vmax.f32 %v7844_v5, 0.0 }
0x1b74   : > { %v7856_v47 = vmax.f32 %v7836_v41, 0.0  ;;  %v7864_v42 = vpack.c.bf16 %v7858_v32, %v7857_v43 }
0x1b76   : > { %v7863_v60 = vpack.c.bf16 %v7856_v47, %v7855_v59 }
0x1b78   : > { %10547 = vmatprep.mubr.msk.bf16.mxu0 %vm4140_vm8, %v7863_v60 }
0x1b79   : > { %10548 = vmatmul.mubr.msk.bf16.gmra.mxu0 %vm4140_vm8, %v7864_v42 }
0x1c29   : > { %v10541_v25 = vpop.f32.mrf.mxu0 }
0x1c2a   : > { %v7981_v22 = vadd.f32 %v10541_v25, %v8965_v49 }
0x1c2b   : > { %v7972_v56 = vpop.f32.mrf.mxu0 }
0x1c2c   : > { %v8021_v62 = vadd.f32 %v7981_v22, %v14361_v38  ;;  %v7973_v30 = vadd.f32 %v8965_v49, %v7972_v56 }
0x1c2d   : > { %v10542_v21 = vpop.f32.mrf.mxu0 }
0x1c2e   : > { %v14429_v18 = vadd.f32 %v7973_v30, %v14351_v20  ;;  %v7984_v57 = vadd.f32 %v10542_v21, %v8965_v49  ;;  %v8037_v24 = vsel %vm701_vm3, %v8021_v62, 0.0 }
0x1c2f   : > { %8038 = vadd.xlane.f32.xlu0 %v8037_v24  ;;  %v7975_v8 = vpop.f32.mrf.mxu0 }
0x1c30   : > { %v8022_v1 = vadd.f32 %v7984_v57, %v14363_v11  ;;  %v7976_v9 = vadd.f32 %v8965_v49, %v7975_v8  ;;  %v8031_v46 = vsel %vm701_vm3, %v14429_v18, 0.0 }
0x1c31   : > { %v10545_v3 = vpop.f32.mrf.mxu0 }
0x1c32   : > { %v14434_v16 = vadd.f32 %v7976_v9, %v14355_v29  ;;  %v7997_v35 = vadd.f32 %v10545_v3, %v8965_v49  ;;  %v8040_v38 = vsel %vm701_vm3, %v8022_v1, 0.0 }
0x1c33   : > { %8041 = vadd.xlane.f32.xlu1 %v8040_v38  ;;  %8032 = vadd.xlane.f32.xlu0 %v8031_v46  ;;  %v7988_v20 = vpop.f32.mrf.mxu0 }
0x1c34   : > { %v8025_v51 = vadd.f32 %v7997_v35, %v14384_v13  ;;  %v7989_v55 = vadd.f32 %v8965_v49, %v7988_v20  ;;  %v8034_v29 = vsel %vm701_vm3, %v14434_v16, 0.0 }
0x1c35   : > { %v10546_v33 = vpop.f32.mrf.mxu0 }
0x1c36   : > { %v14441_v11 = vadd.f32 %v7989_v55, %v14374_v28  ;;  %v8000_v17 = vadd.f32 %v10546_v33, %v8965_v49  ;;  %v8049_v50 = vsel %vm701_vm3, %v8025_v51, 0.0 }
0x1c37   : > { %8035 = vadd.xlane.f32.xlu1 %v8034_v29  ;;  %8050 = vadd.xlane.f32.xlu0 %v8049_v50  ;;  %v7991_v63 = vpop.f32.mrf.mxu0 }
0x1c38   : > { %v8026_v34 = vadd.f32 %v8000_v17, %v14386_v15  ;;  %v7992_v6 = vadd.f32 %v8965_v49, %v7991_v63  ;;  %v8043_v28 = vsel %vm701_vm3, %v14441_v11, 0.0 }
0x1c39   : > { %v10549_v26 = vpop.f32.mrf.mxu0 }
0x1c3a   : > { %v14448_v13 = vadd.f32 %v7992_v6, %v14376_v10  ;;  %v8052_v37 = vsel %vm701_vm3, %v8026_v34, 0.0  ;;  %v8013_v58 = vadd.f32 %v10549_v26, %v8965_v49 }
0x1c3b   : > { %8053 = vadd.xlane.f32.xlu1 %v8052_v37  ;;  %8044 = vadd.xlane.f32.xlu0 %v8043_v28  ;;  %v8004_v36 = vpop.f32.mrf.mxu0 }
0x1c3c   : > { %v8005_v45 = vadd.f32 %v8965_v49, %v8004_v36  ;;  %v8046_v15 = vsel %vm701_vm3, %v14448_v13, 0.0  ;;  %v14459_v19 = vadd.f32 %v8013_v58, %v14405_v44 }
0x1c3d   : > { %v10550_v27 = vpop.f32.mrf.mxu0 }
0x1c3e   : > { %v14454_v31 = vadd.f32 %v8005_v45, %v14396_v54  ;;  %v8016_v2 = vadd.f32 %v10550_v27, %v8965_v49  ;;  %v8061_v0 = vsel %vm701_vm3, %v14459_v19, 0.0 }
0x1c3f   : > { %8047 = vadd.xlane.f32.xlu1 %v8046_v15  ;;  %v8007_v10 = vpop.f32.mrf.mxu0 }
0x1c40   : > { %v8008_v40 = vadd.f32 %v8965_v49, %v8007_v10  ;;  %v8055_v14 = vsel %vm701_vm3, %v14454_v31, 0.0  ;;  %v14467_v54 = vadd.f32 %v8016_v2, %v14407_v52 }
0x1c41   : > { %8056 = vadd.xlane.f32.xlu0 %v8055_v14 }
0x1c42   : > { %v14464_v12 = vadd.f32 %v8008_v40, %v14398_v53  ;;  %v8064_v44 = vsel %vm3780_vm7, %v14467_v54, 0.0 }
0x1c44   : > { %v8058_v61 = vsel %vm701_vm3, %v14464_v12, 0.0 }
0x1c45   : > { %8059 = vadd.xlane.f32.xlu1 %v8058_v61  ;;  %8062 = vadd.xlane.f32.xlu0 %v8061_v0 }
0x1c49   : > { %8065 = vadd.xlane.f32.xlu1 %v8064_v44 }
0x1cb8   : > { %v8039_v7 = vpop.xlane.xlu0 %8038 }
0x1cb9   : > { %v8069_v39 = vmul.f32 0.041666668, %v8039_v7 }
0x1cbb   : > { %v14475_v48 = vsub.f32 %v8021_v62, %v8069_v39 }
0x1cbc   : > { %v8042_v53 = vpop.xlane.xlu1 %8041  ;;  %v8033_v5 = vpop.xlane.xlu0 %8032 }
0x1cbd   : > { %v8070_v52 = vmul.f32 0.041666668, %v8042_v53  ;;  %v8067_v4 = vmul.f32 0.041666668, %v8033_v5  ;;  %v8093_v23 = vmul.f32 %v14475_v48, %v14475_v48 }
0x1cbf   : > { %v14479_v41 = vsub.f32 %v8022_v1, %v8070_v52  ;;  %v14482_v32 = vsub.f32 %v14429_v18, %v8067_v4  ;;  %v8109_v59 = vsel %vm701_vm3, %v8093_v23, 0.0 }
0x1cc0   : > { %v8036_v47 = vpop.xlane.xlu1 %8035  ;;  %8110 = vadd.xlane.f32.xlu0 %v8109_v59  ;;  %v8051_v43 = vpop.xlane.xlu0 %8050 }
0x1cc1   : > { %v8068_v60 = vmul.f32 0.041666668, %v8036_v47  ;;  %v8073_v42 = vmul.f32 0.041666668, %v8051_v43  ;;  %v8094_v49 = vmul.f32 %v14479_v41, %v14479_v41  ;;  %v8091_v25 = vmul.f32 %v14482_v32, %v14482_v32 }
0x1cc3   : > { %v14490_v22 = vsub.f32 %v14434_v16, %v8068_v60  ;;  %v14492_v56 = vsub.f32 %v8025_v51, %v8073_v42  ;;  %v8112_v62 = vsel %vm701_vm3, %v8094_v49, 0.0  ;;  %v8103_v30 = vsel %vm701_vm3, %v8091_v25, 0.0 }
0x1cc4   : > { %v8054_v21 = vpop.xlane.xlu1 %8053  ;;  %8113 = vadd.xlane.f32.xlu1 %v8112_v62  ;;  %8104 = vadd.xlane.f32.xlu0 %v8103_v30  ;;  %v8045_v18 = vpop.xlane.xlu0 %8044 }
0x1cc5   : > { %v8074_v57 = vmul.f32 0.041666668, %v8054_v21  ;;  %v8071_v24 = vmul.f32 0.041666668, %v8045_v18  ;;  %v8092_v8 = vmul.f32 %v14490_v22, %v14490_v22  ;;  %v8097_v1 = vmul.f32 %v14492_v56, %v14492_v56 }
0x1cc7   : > { %v14500_v9 = vsub.f32 %v8026_v34, %v8074_v57  ;;  %v14503_v3 = vsub.f32 %v14441_v11, %v8071_v24  ;;  %v8106_v16 = vsel %vm701_vm3, %v8092_v8, 0.0  ;;  %v8121_v35 = vsel %vm701_vm3, %v8097_v1, 0.0  ;;  %v14543_v8 = vld [vmem:[#allocation10 + $0xa] ss:$0 sm:$0xff] }
0x1cc8   : > { %v8048_v38 = vpop.xlane.xlu1 %8047  ;;  %8107 = vadd.xlane.f32.xlu1 %v8106_v16  ;;  %8122 = vadd.xlane.f32.xlu0 %v8121_v35 }
0x1cc9   : > { %v8072_v46 = vmul.f32 0.041666668, %v8048_v38  ;;  %v8098_v20 = vmul.f32 %v14500_v9, %v14500_v9  ;;  %v8095_v51 = vmul.f32 %v14503_v3, %v14503_v3 }
0x1cca   : > { %v8057_v55 = vpop.xlane.xlu0 %8056 }
0x1ccb   : > { %v14512_v33 = vsub.f32 %v14448_v13, %v8072_v46  ;;  %v8075_v11 = vmul.f32 0.041666668, %v8057_v55  ;;  %v8124_v17 = vsel %vm701_vm3, %v8098_v20, 0.0  ;;  %v8115_v29 = vsel %vm701_vm3, %v8095_v51, 0.0  ;;  %v14547_v46 = vld [vmem:[#allocation10 + $0xb] ss:$0 sm:$0xff] }
0x1ccc   : > { %8125 = vadd.xlane.f32.xlu1 %v8124_v17  ;;  %8116 = vadd.xlane.f32.xlu0 %v8115_v29 }
0x1ccd   : > { %v14517_v50 = vsub.f32 %v14454_v31, %v8075_v11  ;;  %v8096_v63 = vmul.f32 %v14512_v33, %v14512_v33 }
0x1cce   : > { %v8060_v34 = vpop.xlane.xlu1 %8059  ;;  %v8063_v6 = vpop.xlane.xlu0 %8062 }
0x1ccf   : > { %v8076_v26 = vmul.f32 0.041666668, %v8060_v34  ;;  %v8077_v37 = vmul.f32 0.041666668, %v8063_v6  ;;  %v8118_v13 = vsel %vm701_vm3, %v8096_v63, 0.0  ;;  %v8099_v28 = vmul.f32 %v14517_v50, %v14517_v50 }
0x1cd0   : > { %8119 = vadd.xlane.f32.xlu1 %v8118_v13 }
0x1cd1   : > { %v14525_v36 = vsub.f32 %v14464_v12, %v8076_v26  ;;  %v14528_v58 = vsub.f32 %v14459_v19, %v8077_v37  ;;  %v8127_v45 = vsel %vm701_vm3, %v8099_v28, 0.0 }
0x1cd2   : > { %v8066_v27 = vpop.xlane.xlu1 %8065  ;;  %8128 = vadd.xlane.f32.xlu0 %v8127_v45 }
0x1cd3   : > { %v8078_v31 = vmul.f32 0.041666668, %v8066_v27  ;;  %v8100_v15 = vmul.f32 %v14525_v36, %v14525_v36  ;;  %v8101_v10 = vmul.f32 %v14528_v58, %v14528_v58 }
0x1cd5   : > { %v14536_v2 = vsub.f32 %v14467_v54, %v8078_v31  ;;  %v8130_v40 = vsel %vm701_vm3, %v8100_v15, 0.0  ;;  %v8133_v14 = vsel %vm701_vm3, %v8101_v10, 0.0 }
0x1cd6   : > { %8131 = vadd.xlane.f32.xlu1 %v8130_v40  ;;  %8134 = vadd.xlane.f32.xlu0 %v8133_v14 }
0x1cd7   : > { %v8102_v19 = vmul.f32 %v14536_v2, %v14536_v2 }
0x1cd9   : > { %v8136_v12 = vsel %vm3780_vm7, %v8102_v19, 0.0 }
0x1cda   : > { %8137 = vadd.xlane.f32.xlu1 %v8136_v12 }
0x1d49   : > { %v8111_v61 = vpop.xlane.xlu0 %8110 }
0x1d4a   : > { %v8141_v0 = vmul.f32 0.041666668, %v8111_v61 }
0x1d4c   : > { %v8153_v44 = vadd.f32 1e-05, %v8141_v0 }
0x1d4d   : > { %v8114_v7 = vpop.xlane.xlu1 %8113  ;;  %v8105_v39 = vpop.xlane.xlu0 %8104 }
0x1d4e   : > { %11182 = vrsqrt.f32 %v8153_v44  ;;  %v8142_v54 = vmul.f32 0.041666668, %v8114_v7  ;;  %v8139_v53 = vmul.f32 0.041666668, %v8105_v39 }
0x1d50   : > { %v8154_v5 = vadd.f32 1e-05, %v8142_v54  ;;  %v8151_v52 = vadd.f32 1e-05, %v8139_v53 }
0x1d51   : > { %v8108_v4 = vpop.xlane.xlu1 %8107  ;;  %v8123_v23 = vpop.xlane.xlu0 %8122 }
0x1d52   : > { %11184 = vrsqrt.f32 %v8154_v5  ;;  %v8140_v59 = vmul.f32 0.041666668, %v8108_v4  ;;  %v8145_v47 = vmul.f32 0.041666668, %v8123_v23 }
0x1d53   : > { %11186 = vrsqrt.f32 %v8151_v52 }
0x1d54   : > { %v8152_v43 = vadd.f32 1e-05, %v8140_v59  ;;  %v8157_v60 = vadd.f32 1e-05, %v8145_v47 }
0x1d55   : > { %v8126_v42 = vpop.xlane.xlu1 %8125  ;;  %v8117_v49 = vpop.xlane.xlu0 %8116 }
0x1d56   : > { %11188 = vrsqrt.f32 %v8152_v43  ;;  %v8146_v25 = vmul.f32 0.041666668, %v8126_v42  ;;  %v8143_v62 = vmul.f32 0.041666668, %v8117_v49 }
0x1d57   : > { %11190 = vrsqrt.f32 %v8157_v60 }
0x1d58   : > { %v8158_v30 = vadd.f32 1e-05, %v8146_v25  ;;  %v8155_v21 = vadd.f32 1e-05, %v8143_v62 }
0x1d59   : > { %v8120_v18 = vpop.xlane.xlu1 %8119 }
0x1d5a   : > { %11192 = vrsqrt.f32 %v8158_v30  ;;  %v8144_v57 = vmul.f32 0.041666668, %v8120_v18 }
0x1d5b   : > { %v11183_v24 = vpop.eup %11182  ;;  %11194 = vrsqrt.f32 %v8155_v21  ;;  %v8129_v1 = vpop.xlane.xlu0 %8128 }
0x1d5c   : > { %v8177_v16 = vmul.f32 %v11183_v24, %v14475_v48  ;;  %v8156_v35 = vadd.f32 1e-05, %v8144_v57  ;;  %v8147_v38 = vmul.f32 0.041666668, %v8129_v1 }
0x1d5e   : > { %v8195_v20 = vmul.f32 %v14543_v8, %v8177_v16  ;;  %11196 = vrsqrt.f32 %v8156_v35  ;;  %v8159_v51 = vadd.f32 1e-05, %v8147_v38 }
0x1d5f   : > { %v11185_v55 = vpop.eup %11184  ;;  %v8132_v11 = vpop.xlane.xlu1 %8131 }
0x1d60   : > { %v8135_v17 = vpop.xlane.xlu0 %8134  ;;  %v11187_v29 = vpop.eup %11186  ;;  %v8213_v63 = vadd.f32 %v14547_v46, %v8195_v20  ;;  %v8178_v34 = vmul.f32 %v11185_v55, %v14479_v41  ;;  %11198 = vrsqrt.f32 %v8159_v51  ;;  %v8148_v6 = vmul.f32 0.041666668, %v8132_v11 }
0x1d61   : > { %v8175_v48 = vmul.f32 %v11187_v29, %v14482_v32  ;;  %v8149_v26 = vmul.f32 0.041666668, %v8135_v17 }
0x1d62   : > { %v8996_v37 = vpack.c.bf16 %v8213_v63, %v8213_v63  ;;  %v8196_v13 = vmul.f32 %v14543_v8, %v8178_v34  ;;  %v8160_v28 = vadd.f32 1e-05, %v8148_v6 }
0x1d63   : > { %v11189_v45 = vpop.eup %11188  ;;  %v8193_v27 = vmul.f32 %v14543_v8, %v8175_v48  ;;  %v8161_v41 = vadd.f32 1e-05, %v8149_v26  ;;  %v8138_v31 = vpop.xlane.xlu1 %8137 }
0x1d64   : > { %v11191_v15 = vpop.eup %11190  ;;  %8274 = vst.msk [vmem:[%s14555_s20 + $0x8] sm:$0xf] %vm8271_vm9, %v8996_v37  ;;  %v8214_v10 = vadd.f32 %v14547_v46, %v8196_v13  ;;  %v8176_v40 = vmul.f32 %v11189_v45, %v14490_v22  ;;  %11200 = vrsqrt.f32 %v8160_v28  ;;  %v8150_v32 = vmul.f32 0.041666668, %v8138_v31 }
0x1d65   : > { %v8211_v14 = vadd.f32 %v14547_v46, %v8193_v27  ;;  %v8181_v19 = vmul.f32 %v11191_v15, %v14492_v56  ;;  %11202 = vrsqrt.f32 %v8161_v41 }
0x1d66   : > { %v8997_v12 = vpack.c.bf16 %v8214_v10, %v8214_v10  ;;  %v8194_v61 = vmul.f32 %v14543_v8, %v8176_v40  ;;  %v8162_v0 = vadd.f32 1e-05, %v8150_v32 }
0x1d67   : > { %v11193_v44 = vpop.eup %11192  ;;  %v8994_v7 = vpack.c.bf16 %v8211_v14, %v8211_v14  ;;  %v8199_v39 = vmul.f32 %v14543_v8, %v8181_v19 }
0x1d68   : > { %v11195_v54 = vpop.eup %11194  ;;  %8275 = vst.msk [vmem:[%s14555_s20 + $0xc] sm:$0xf] %vm8271_vm9, %v8997_v12  ;;  %v8212_v22 = vadd.f32 %v14547_v46, %v8194_v61  ;;  %v8182_v53 = vmul.f32 %v11193_v44, %v14500_v9  ;;  %11204 = vrsqrt.f32 %v8162_v0 }
0x1d69   : > { %8272 = vst.msk [vmem:[%s14555_s20] sm:$0xf] %vm8271_vm9, %v8994_v7  ;;  %v8217_v56 = vadd.f32 %v14547_v46, %v8199_v39  ;;  %v8179_v5 = vmul.f32 %v11195_v54, %v14503_v3 }
0x1d6a   : > { %v8995_v52 = vpack.c.bf16 %v8212_v22, %v8212_v22  ;;  %v8200_v4 = vmul.f32 %v14543_v8, %v8182_v53 }
0x1d6b   : > { %v11197_v23 = vpop.eup %11196  ;;  %v9000_v59 = vpack.c.bf16 %v8217_v56, %v8217_v56  ;;  %v8197_v47 = vmul.f32 %v14543_v8, %v8179_v5 }
0x1d6c   : > { %8273 = vst.msk [vmem:[%s14555_s20 + $0x4] sm:$0xf] %vm8271_vm9, %v8995_v52  ;;  %v8218_v9 = vadd.f32 %v14547_v46, %v8200_v4  ;;  %v8180_v43 = vmul.f32 %v11197_v23, %v14512_v33 }
0x1d6d   : > { %v11199_v60 = vpop.eup %11198  ;;  %8278 = vst.msk [vmem:[%s14555_s20 + $0x18] sm:$0xf] %vm8271_vm9, %v9000_v59  ;;  %v8215_v3 = vadd.f32 %v14547_v46, %v8197_v47 }
0x1d6e   : > { %v9001_v42 = vpack.c.bf16 %v8218_v9, %v8218_v9  ;;  %v8198_v49 = vmul.f32 %v14543_v8, %v8180_v43  ;;  %v8183_v25 = vmul.f32 %v11199_v60, %v14517_v50 }
0x1d6f   : > { %v8998_v62 = vpack.c.bf16 %v8215_v3, %v8215_v3 }
0x1d70   : > { %8279 = vst.msk [vmem:[%s14555_s20 + $0x1c] sm:$0xf] %vm8271_vm9, %v9001_v42  ;;  %v8216_v30 = vadd.f32 %v14547_v46, %v8198_v49  ;;  %v8201_v21 = vmul.f32 %v14543_v8, %v8183_v25 }
0x1d71   : > { %v11201_v33 = vpop.eup %11200  ;;  %8276 = vst.msk [vmem:[%s14555_s20 + $0x10] sm:$0xf] %vm8271_vm9, %v8998_v62 }
0x1d72   : > { %v11203_v18 = vpop.eup %11202  ;;  %v8999_v57 = vpack.c.bf16 %v8216_v30, %v8216_v30  ;;  %v8219_v24 = vadd.f32 %v14547_v46, %v8201_v21  ;;  %v8184_v1 = vmul.f32 %v11201_v33, %v14525_v36 }
0x1d73   : > { %v8185_v50 = vmul.f32 %v11203_v18, %v14528_v58 }
0x1d74   : > { %8277 = vst.msk [vmem:[%s14555_s20 + $0x14] sm:$0xf] %vm8271_vm9, %v8999_v57  ;;  %v9002_v16 = vpack.c.bf16 %v8219_v24, %v8219_v24  ;;  %v8202_v35 = vmul.f32 %v14543_v8, %v8184_v1 }
0x1d75   : > { %v11205_v38 = vpop.eup %11204  ;;  %v8203_v20 = vmul.f32 %v14543_v8, %v8185_v50 }
0x1d76   : > { %8280 = vst.msk [vmem:[%s14555_s20 + $0x20] sm:$0xf] %vm8271_vm9, %v9002_v16  ;;  %v8220_v51 = vadd.f32 %v14547_v46, %v8202_v35  ;;  %v8186_v55 = vmul.f32 %v11205_v38, %v14536_v2 }
0x1d77   : > { %v8221_v36 = vadd.f32 %v14547_v46, %v8203_v20 }
0x1d78   : > { %v9003_v11 = vpack.c.bf16 %v8220_v51, %v8220_v51  ;;  %v8204_v58 = vmul.f32 %v14543_v8, %v8186_v55 }
0x1d79   : > { %v9004_v17 = vpack.c.bf16 %v8221_v36, %v8221_v36 }
0x1d7a   : > { %8281 = vst.msk [vmem:[%s14555_s20 + $0x24] sm:$0xf] %vm8271_vm9, %v9003_v11  ;;  %v8222_v29 = vadd.f32 %v14547_v46, %v8204_v58 }
0x1d7b   : > { %8282 = vst.msk [vmem:[%s14555_s20 + $0x28] sm:$0xf] %vm8271_vm9, %v9004_v17 }
0x1d7c   : > { %v9005_v63 = vpack.c.bf16 %v8222_v29, %v8222_v29 }
0x1d7e   : > { %8284 = vst.msk [vmem:[%s14555_s20 + $0x2c] sm:$0x1] %vm8283_vm10, %v9005_v63 }
0x1d7f PF: > { %s25_s17 = sadd.s32 1, %s11384_s17  }
0x1d80   : > { %p22_p2 = scmp.ge.s32.totalorder %s25_s17, 4  }
0x1d82   :  { %24 = sbr.rel (!%p22_p2) target bundleno = 4 (0x4), region = 161 }
0x1d87   :  { %8306 = vsyncpa [#allocation3], 1 }
0x1d88   :  { %8308 = vsyncpa [#allocation3 + $0x1], 1 }
0x1d89   :  { %8309 = vsyncpa [#allocation5], 1 }
0x1d8a   :  { %8310 = vsyncpa [#allocation8], 1 }
0x1d8b   :  { %8311 = vsyncpa [#allocation11], 1 }

</bundles_post_ra>
